<compile_context>
chip_gen: v7x
topology: tpu7x:2x2x1
jax: 0.10.0
libtpu: 0.0.40
codegen_flags: <defaults>
</compile_context>

<pallas_src>
import functools
import math

import jax
import jax.numpy as jnp
from jax.experimental import pallas as pl
from jax.experimental.pallas import tpu as pltpu

EPS_BN = 1e-5


# ------------------------------------------------------------------
# helpers
# ------------------------------------------------------------------
def _div_tile(n, target, mult):
    """Largest divisor of n that is <= target and a multiple of `mult`.
    Falls back to n itself (single full tile) if none exists."""
    # TODO(synk): add a pad-to-multiple path for awkward (e.g. prime) N.
    if n <= target:
        return n
    d = target - target % mult
    while d >= mult:
        if n % d == 0:
            return d
        d -= mult
    return n


# ------------------------------------------------------------------
# Pallas kernel 1: fused kNN (pairwise distances + iterative top-k in VMEM)
#   no (B,N,N) HBM materialization, no XLA sort.
# ------------------------------------------------------------------
def _knn_kernel(p_ref, qt_ref, o_ref, *, k):
    d = jnp.dot(p_ref[0], qt_ref[0], preferred_element_type=jnp.float32)  # (tr, N)
    n = d.shape[-1]
    bi = jax.lax.broadcasted_iota(jnp.int32, d.shape, 1).astype(jnp.float32)
    big = jnp.float32(n)
    cols = []
    for _ in range(k):                      # static k, unrolled
        dmin = jnp.min(d, axis=-1, keepdims=True)                   # (tr, 1)
        sel = jnp.min(jnp.where(d == dmin, bi, big),
                      axis=-1, keepdims=True)                       # smallest idx at min
        cols.append(sel)
        d = jnp.where(bi == sel, jnp.inf, d)                        # mask it out
    o_ref[0] = jnp.concatenate(cols, axis=-1).astype(jnp.int32)


def knn_idx(x, k, row_tile=256):
    """x: (B,N,C) -> (B,N,k) int32 indices of k nearest neighbours (incl. self)."""
    x = x.astype(jnp.float32)
    B, N, C = x.shape
    sq = jnp.sum(x * x, axis=-1, keepdims=True)
    ones = jnp.ones_like(sq)
    P = jnp.concatenate([-2.0 * x, sq, ones], axis=-1)                      # (B,N,C+2)
    QT = jnp.transpose(jnp.concatenate([x, ones, sq], axis=-1), (0, 2, 1))  # (B,C+2,N)
    C2 = C + 2
    tr = _div_tile(N, row_tile, 8)
    # TODO(synk): for very large N, tile the column axis too and merge running
    # top-k accumulators across column tiles instead of holding (C2,N) whole.
    return pl.pallas_call(
        functools.partial(_knn_kernel, k=k),
        out_shape=jax.ShapeDtypeStruct((B, N, k), jnp.int32),
        grid=(B, N // tr),
        in_specs=[pl.BlockSpec((1, tr, C2), lambda b, i: (b, i, 0)),
                  pl.BlockSpec((1, C2, N), lambda b, i: (b, 0, 0))],
        out_specs=pl.BlockSpec((1, tr, k), lambda b, i: (b, i, 0)),
        compiler_params=pltpu.CompilerParams(
            dimension_semantics=("parallel", "parallel")),
    )(P, QT)


def gather_kmajor(x, idx):
    """x: (B,N,C), idx: (B,N,k) -> (B,k,N,C) with out[b,m,i] = x[b, idx[b,i,m]]."""
    # TODO(synk): move this gather in-kernel (jnp.take on a VMEM-resident (N,C)
    # block) once dynamic sublane gather is robust; for now it stays in XLA.
    idx_t = jnp.transpose(idx, (0, 2, 1))                 # (B,k,N)
    return jax.vmap(lambda xb, ib: xb[ib])(x, idx_t)


# ------------------------------------------------------------------
# Pallas kernel 2: fused EdgeConv block
#   per-point term + batched per-neighbor conv(s) + ReLU + max/mean over k,
#   all in VMEM.  Output is lane-dense [max || mean].
# ------------------------------------------------------------------
def _edge_block_kernel(*refs, k, two_layer, with_mean):
    if two_layer:
        x_ref, nbr_ref, wa_ref, wd_ref, b1_ref, w2_ref, b2_ref, o_ref = refs
    else:
        x_ref, nbr_ref, wa_ref, wd_ref, b1_ref, o_ref = refs
        w2_ref = b2_ref = None

    x = x_ref[0]                       # (tn, C) bf16
    tn, C = x.shape
    wa = wa_ref[...]
    wd = wd_ref[...]
    b1 = b1_ref[...]

    # per-point half of the edge conv:  x_i @ (Wb - Wa)' + shift  (BN folded)
    t = jnp.dot(x, wd, preferred_element_type=jnp.float32) + b1     # (tn, c1)

    # one big MXU matmul over all k neighbours at once
    nb = nbr_ref[0].reshape(k * tn, C)                              # (k*tn, C) bf16
    y = jnp.dot(nb, wa, preferred_element_type=jnp.float32)         # (k*tn, c1)
    c1 = y.shape[-1]
    y = y.reshape(k, tn, c1) + t[None]
    y = jnp.maximum(y, 0.0)
    if two_layer:
        w2 = w2_ref[...]
        b2 = b2_ref[...]
        c2 = w2.shape[-1]
        y = jnp.dot(y.reshape(k * tn, c1).astype(jnp.bfloat16), w2,
                    preferred_element_type=jnp.float32)
        y = y.reshape(k, tn, c2) + b2
        y = jnp.maximum(y, 0.0)

    ymax = jnp.max(y, axis=0)                                       # (tn, c_last)
    if with_mean:
        out = jnp.concatenate([ymax, jnp.sum(y, axis=0) * (1.0 / k)], axis=-1)
    else:
        out = ymax
    o_ref[0] = out.astype(o_ref.dtype)


def edge_block(p, x, nbrs, *, with_mean, row_tile=256):
    """x: (B,N,C) bf16 point features; nbrs: (B,k,N,C) bf16 gathered neighbors.
    Returns (B,N,2*Cout) = [max_k || mean_k] (or (B,N,Cout) if with_mean=False)."""
    B, N, C = x.shape
    k = nbrs.shape[1]
    c1 = p["wa"].shape[1]
    two = "w2" in p
    c_last = p["w2"].shape[1] if two else c1
    width = (2 * c_last) if with_mean else c_last
    # per-step working set (k*tn*C bf16 neighbours + f32 temps) is ~2-6 MB at
    # tn=256, k=30 -> fits every gen's scoped VMEM; v6e can go to 512.
    tn = _div_tile(N, row_tile, 8)

    in_specs = [
        pl.BlockSpec((1, tn, C), lambda b, i: (b, i, 0)),
        pl.BlockSpec((1, k, tn, C), lambda b, i: (b, 0, i, 0)),
        pl.BlockSpec((C, c1), lambda b, i: (0, 0)),
        pl.BlockSpec((C, c1), lambda b, i: (0, 0)),
        pl.BlockSpec((1, c1), lambda b, i: (0, 0)),
    ]
    args = [x, nbrs, p["wa"], p["wd"], p["b1"]]
    if two:
        in_specs += [pl.BlockSpec((c1, c_last), lambda b, i: (0, 0)),
                     pl.BlockSpec((1, c_last), lambda b, i: (0, 0))]
        args += [p["w2"], p["b2"]]

    return pl.pallas_call(
        functools.partial(_edge_block_kernel, k=k, two_layer=two,
                          with_mean=with_mean),
        out_shape=jax.ShapeDtypeStruct((B, N, width), jnp.bfloat16),
        grid=(B, N // tn),
        in_specs=in_specs,
        out_specs=pl.BlockSpec((1, tn, width), lambda b, i: (b, i, 0)),
        compiler_params=pltpu.CompilerParams(
            dimension_semantics=("parallel", "parallel")),
    )(*args)


# ------------------------------------------------------------------
# Pallas kernel 3: fused pointwise MLP (1x1 conv chain + folded BN + ReLU)
# ------------------------------------------------------------------
def _conv_mlp_kernel(*refs, relus):
    x_ref = refs[0]
    o_ref = refs[-1]
    h = x_ref[...]
    if h.dtype != jnp.bfloat16:
        h = h.astype(jnp.bfloat16)
    n_layers = len(relus)
    for li in range(n_layers):
        w_ref = refs[1 + 2 * li]
        b_ref = refs[2 + 2 * li]
        h = jnp.dot(h, w_ref[...], preferred_element_type=jnp.float32) + b_ref[...]
        if relus[li]:
            h = jnp.maximum(h, 0.0)
        if li + 1 < n_layers:
            h = h.astype(jnp.bfloat16)
    o_ref[...] = h.astype(o_ref.dtype)


def conv_mlp(x, layers, relus=None, out_dtype=jnp.bfloat16, row_tile=1024):
    """x: (..., Cin); layers: list of dicts {w:(Ci,Co) bf16, b:(1,Co) f32}."""
    lead = x.shape[:-1]
    cin = x.shape[-1]
    M = math.prod(lead)
    x2 = x.reshape(M, cin)
    if relus is None:
        relus = (True,) * len(layers)
    cout = layers[-1]["w"].shape[1]
    tm = _div_tile(M, row_tile, 8)

    in_specs = [pl.BlockSpec((tm, cin), lambda i: (i, 0))]
    args = [x2]
    for lay in layers:
        ci, co = lay["w"].shape
        in_specs.append(pl.BlockSpec((ci, co), lambda i: (0, 0)))
        in_specs.append(pl.BlockSpec((1, co), lambda i: (0, 0)))
        args += [lay["w"], lay["b"]]

    out = pl.pallas_call(
        functools.partial(_conv_mlp_kernel, relus=tuple(relus)),
        out_shape=jax.ShapeDtypeStruct((M, cout), out_dtype),
        grid=(M // tm,),
        in_specs=in_specs,
        out_specs=pl.BlockSpec((tm, cout), lambda i: (i, 0)),
        compiler_params=pltpu.CompilerParams(dimension_semantics=("parallel",)),
    )(*args)
    return out.reshape(lead + (cout,))


# ------------------------------------------------------------------
# Pallas kernel 4: conv + ReLU fused with global max over N
#   (transform path: activation never written to HBM)
# ------------------------------------------------------------------
def _conv_max_kernel(x_ref, w_ref, b_ref, m_ref):
    @pl.when(pl.program_id(1) == 0)
    def _init():
        m_ref[...] = jnp.full(m_ref.shape, -jnp.inf, m_ref.dtype)
    h = jnp.dot(x_ref[0], w_ref[...], preferred_element_type=jnp.float32) + b_ref[...]
    h = jnp.maximum(h, 0.0)
    m_ref[0] = jnp.maximum(m_ref[0], jnp.max(h, axis=0, keepdims=True))


def conv_max(x, layer, row_tile=512):
    """x: (B,N,Cin) bf16 -> (B,Cout) = max_N relu(x @ w + b); no HBM intermediate."""
    B, N, C = x.shape
    cout = layer["w"].shape[1]
    tn = _div_tile(N, row_tile, 8)
    out = pl.pallas_call(
        _conv_max_kernel,
        out_shape=jax.ShapeDtypeStruct((B, 1, cout), jnp.float32),
        grid=(B, N // tn),
        in_specs=[pl.BlockSpec((1, tn, C), lambda b, i: (b, i, 0)),
                  pl.BlockSpec((C, cout), lambda b, i: (0, 0)),
                  pl.BlockSpec((1, cout), lambda b, i: (0, 0))],
        out_specs=pl.BlockSpec((1, 1, cout), lambda b, i: (b, 0, 0)),
        compiler_params=pltpu.CompilerParams(
            dimension_semantics=("parallel", "arbitrary")),
    )(x, layer["w"], layer["b"])
    return out[:, 0, :]


# ------------------------------------------------------------------
# Pallas kernel 5: 192->1024 mlp, split-weight matmuls on out1/out2/out3,
#   emitting out4 tiles AND a running global-max accumulator.
# ------------------------------------------------------------------
def _mlp_max_kernel(x1_ref, x2_ref, x3_ref, w_ref, b_ref, o_ref, m_ref):
    @pl.when(pl.program_id(1) == 0)
    def _init():
        m_ref[...] = jnp.full(m_ref.shape, -jnp.inf, m_ref.dtype)
    c = x1_ref.shape[-1]
    h = (jnp.dot(x1_ref[0], w_ref[pl.ds(0, c), :], preferred_element_type=jnp.float32)
         + jnp.dot(x2_ref[0], w_ref[pl.ds(c, c), :], preferred_element_type=jnp.float32)
         + jnp.dot(x3_ref[0], w_ref[pl.ds(2 * c, c), :], preferred_element_type=jnp.float32)
         + b_ref[...])
    h = jnp.maximum(h, 0.0)
    o_ref[0] = h.astype(o_ref.dtype)
    m_ref[0] = jnp.maximum(m_ref[0], jnp.max(h, axis=0, keepdims=True))


def mlp_with_max(layer, out1, out2, out3, row_tile=512):
    B, N, c = out1.shape
    cout = layer["w"].shape[1]
    tn = _div_tile(N, row_tile, 8)
    feat_spec = pl.BlockSpec((1, tn, c), lambda b, i: (b, i, 0))
    out4, gmax = pl.pallas_call(
        _mlp_max_kernel,
        out_shape=(jax.ShapeDtypeStruct((B, N, cout), jnp.bfloat16),
                   jax.ShapeDtypeStruct((B, 1, cout), jnp.float32)),
        grid=(B, N // tn),
        in_specs=[feat_spec, feat_spec, feat_spec,
                  pl.BlockSpec(layer["w"].shape, lambda b, i: (0, 0)),
                  pl.BlockSpec(layer["b"].shape, lambda b, i: (0, 0))],
        out_specs=(pl.BlockSpec((1, tn, cout), lambda b, i: (b, i, 0)),
                   pl.BlockSpec((1, 1, cout), lambda b, i: (b, 0, 0))),
        compiler_params=pltpu.CompilerParams(
            dimension_semantics=("parallel", "arbitrary")),
    )(out1, out2, out3, layer["w"], layer["b"])
    return out4, gmax[:, 0, :]


# ------------------------------------------------------------------
# Pallas kernel 6: fused classifier (fc1 split row-wise + per-batch global
#   bias, fc2, fc3-padded-to-128), no (B,N,2752) concat / (B,N,1152) broadcast.
# ------------------------------------------------------------------
def _classifier_kernel(m1_ref, o1_ref, m2_ref, o2_ref, m3_ref, o3_ref, o4_ref,
                       bias_ref, w1_ref, w2_ref, b2_ref, w3_ref, b3_ref, out_ref):
    h = bias_ref[0]                                   # (1, 256): glob@W1_glob + b1
    off = 0
    for r in (m1_ref, o1_ref, m2_ref, o2_ref, m3_ref, o3_ref, o4_ref):
        x = r[0]
        ci = x.shape[-1]
        h = h + jnp.dot(x, w1_ref[pl.ds(off, ci), :],
                        preferred_element_type=jnp.float32)
        off += ci
    h = jnp.maximum(h, 0.0)                           # fc1 + ReLU (dropout = id)
    h = jnp.dot(h.astype(jnp.bfloat16), w2_ref[...],
                preferred_element_type=jnp.float32) + b2_ref[...]
    h = jnp.maximum(h, 0.0)                           # fc2 + ReLU
    h = jnp.dot(h.astype(jnp.bfloat16), w3_ref[...],
                preferred_element_type=jnp.float32) + b3_ref[...]
    out_ref[0] = h                                    # fc3 (padded, lane-dense)


def classifier_fused(params, mm1, out1, mm2, out2, mm3, out3, out4, bias,
                     row_tile=512):
    B, N, _ = mm1.shape
    w1 = params["fc1"]["w_local"]
    w2, b2 = params["fc2"]["w"], params["fc2"]["b"]
    w3, b3 = params["fc3"]["w"], params["fc3"]["b"]
    cpad = w3.shape[-1]
    tn = _div_tile(N, row_tile, 8)

    def spec3(arr):
        c = arr.shape[-1]
        return pl.BlockSpec((1, tn, c), lambda b, i: (b, i, 0))

    feats = (mm1, out1, mm2, out2, mm3, out3, out4)
    in_specs = [spec3(a) for a in feats]
    in_specs += [pl.BlockSpec((1, 1, bias.shape[-1]), lambda b, i: (b, 0, 0)),
                 pl.BlockSpec(w1.shape, lambda b, i: (0, 0)),
                 pl.BlockSpec(w2.shape, lambda b, i: (0, 0)),
                 pl.BlockSpec(b2.shape, lambda b, i: (0, 0)),
                 pl.BlockSpec(w3.shape, lambda b, i: (0, 0)),
                 pl.BlockSpec(b3.shape, lambda b, i: (0, 0))]

    return pl.pallas_call(
        _classifier_kernel,
        out_shape=jax.ShapeDtypeStruct((B, N, cpad), jnp.float32),
        grid=(B, N // tn),
        in_specs=in_specs,
        out_specs=pl.BlockSpec((1, tn, cpad), lambda b, i: (b, i, 0)),
        compiler_params=pltpu.CompilerParams(
            dimension_semantics=("parallel", "parallel")),
    )(*feats, bias, w1, w2, b2, w3, b3)


# ------------------------------------------------------------------
# tiny XLA-side layers (launch overhead would dominate a Pallas call)
# ------------------------------------------------------------------
def dense(p, x, relu=True):
    y = jnp.dot(x.astype(jnp.float32), p["w"]) + p["b"]
    return jnp.maximum(y, 0.0) if relu else y


# ------------------------------------------------------------------
# deterministic parameter initialization (BN scale folded into weights)
# ------------------------------------------------------------------
def _bn_affine(kg, kb, cout):
    gamma = 1.0 + 0.1 * jax.random.normal(kg, (cout,), jnp.float32)
    beta = 0.1 * jax.random.normal(kb, (cout,), jnp.float32)
    scale = gamma / jnp.sqrt(1.0 + EPS_BN)   # inference BN: running mean=0, var=1
    return scale, beta


def init_conv(key, cin, cout, bn=True, dtype=jnp.bfloat16):
    kw, kg, kb = jax.random.split(key, 3)
    w = jax.random.normal(kw, (cin, cout), jnp.float32) * (2.0 / cin) ** 0.5
    if bn:
        scale, shift = _bn_affine(kg, kb, cout)
    else:
        scale = jnp.ones((cout,), jnp.float32)
        shift = 0.1 * jax.random.normal(kb, (cout,), jnp.float32)
    return dict(w=(w * scale[None, :]).astype(dtype), b=shift.reshape(1, cout))


def init_dense(key, cin, cout, bn=True):
    p = init_conv(key, cin, cout, bn, dtype=jnp.float32)
    return dict(w=p["w"], b=p["b"].reshape(cout))


def init_edge(key, cin, cout, cout2=None):
    # First conv acts on edge feature [x_j - x_i, x_i]; with W = [Wa; Wb]:
    #   y = x_j @ (Wa*s) + x_i @ ((Wb - Wa)*s) + beta     (BN scale s folded)
    k1, k2, kg, kb, k3 = jax.random.split(key, 5)
    fan = (2.0 / (2 * cin)) ** 0.5
    wa = jax.random.normal(k1, (cin, cout), jnp.float32) * fan
    wb = jax.random.normal(k2, (cin, cout), jnp.float32) * fan
    scale, shift = _bn_affine(kg, kb, cout)
    p = dict(wa=(wa * scale[None, :]).astype(jnp.bfloat16),
             wd=((wb - wa) * scale[None, :]).astype(jnp.bfloat16),
             b1=shift.reshape(1, cout))
    if cout2 is not None:
        c2 = init_conv(k3, cout, cout2)
        p["w2"] = c2["w"]
        p["b2"] = c2["b"]
    return p


def init_fc1(key, cglob, clocal, cout):
    kw, kg, kb = jax.random.split(key, 3)
    cin = cglob + clocal
    w = jax.random.normal(kw, (cin, cout), jnp.float32) * (2.0 / cin) ** 0.5
    scale, shift = _bn_affine(kg, kb, cout)
    w = w * scale[None, :]
    return dict(w_glob=w[:cglob],                       # f32, used per-batch in XLA
                w_local=w[cglob:].astype(jnp.bfloat16),  # per-point part (in-kernel)
                b=shift.reshape(1, cout))


def init_fc3_padded(key, cin, cout, pad_to=128):
    kw, kb = jax.random.split(key, 2)
    w = jax.random.normal(kw, (cin, cout), jnp.float32) * (2.0 / cin) ** 0.5
    b = 0.1 * jax.random.normal(kb, (cout,), jnp.float32)
    wp = jnp.zeros((cin, pad_to), jnp.float32).at[:, :cout].set(w)
    bp = jnp.zeros((pad_to,), jnp.float32).at[:cout].set(b)
    return dict(w=wp.astype(jnp.bfloat16), b=bp.reshape(1, pad_to))


def init_params(key, num_parts=50, num_classes=16):
    keys = jax.random.split(key, 16)
    p = {}
    # transform_net (reconstructed: standard DGCNN spatial-transform head)
    p["tconv"] = init_edge(keys[0], 3, 64, 128)     # tconv1(6->64)+tconv2(64->128)
    p["tconv3"] = init_conv(keys[1], 128, 1024)
    p["tfc1"] = init_dense(keys[2], 1024, 512)
    p["tfc2"] = init_dense(keys[3], 512, 256)
    p["tfc3"] = dict(w=jnp.zeros((256, 9), jnp.float32),
                     b=jnp.eye(3, dtype=jnp.float32).reshape(9))
    # edge conv blocks
    p["ec1"] = init_edge(keys[4], 3, 64, 64)        # edgeconv1_1(6->64)+1_2(64->64)
    p["ec1_3"] = init_conv(keys[5], 128, 64)
    p["ec2"] = init_edge(keys[6], 64, 64)
    p["ec2_2"] = init_conv(keys[7], 128, 64)
    p["ec3"] = init_edge(keys[8], 64, 64)
    p["ec3_2"] = init_conv(keys[9], 128, 64)
    p["mlp"] = init_conv(keys[10], 192, 1024)
    p["onehot"] = init_dense(keys[11], num_classes, 128)
    # classifier: fc1 in = 1152 (global) + 1600 (per-point) = 2752
    p["fc1"] = init_fc1(keys[12], 1024 + 128, 128 + 64 + 128 + 64 + 128 + 64 + 1024, 256)
    p["fc2"] = init_conv(keys[13], 256, 256)
    p["fc3"] = init_fc3_padded(keys[14], 256, num_parts, pad_to=128)
    return p


# ------------------------------------------------------------------
# full forward pass
# ------------------------------------------------------------------
def dgcnn_seg_forward(params, pc, one_hot_labels, k, num_parts):
    B, N, _ = pc.shape
    pc = pc.astype(jnp.float32)

    # ---- transform_net ----
    idx = knn_idx(pc, k)
    pcb = pc.astype(jnp.bfloat16)
    tfeat = edge_block(params["tconv"], pcb, gather_kmajor(pcb, idx),
                       with_mean=False)                     # (B,N,128), max over k
    tglob = conv_max(tfeat, params["tconv3"])               # (B,1024), fused global max
    tg = dense(params["tfc1"], tglob)
    tg = dense(params["tfc2"], tg)
    t9 = dense(params["tfc3"], tg, relu=False)              # identity transform at init
    transform = t9.reshape(B, 3, 3)
    x = jnp.einsum("bnc,bcd->bnd", pc, transform)           # tiny -> XLA

    # ---- EdgeConv block 1 ----
    idx = knn_idx(x, k)
    xb = x.astype(jnp.bfloat16)
    mm1 = edge_block(params["ec1"], xb, gather_kmajor(xb, idx),
                     with_mean=True)                        # (B,N,128) = [max1||mean1]
    out1 = conv_mlp(mm1, [params["ec1_3"]])                 # (B,N,64)

    # ---- EdgeConv block 2 ----
    idx = knn_idx(out1, k)
    mm2 = edge_block(params["ec2"], out1, gather_kmajor(out1, idx),
                     with_mean=True)
    out2 = conv_mlp(mm2, [params["ec2_2"]])

    # ---- EdgeConv block 3 ----
    idx = knn_idx(out2, k)
    mm3 = edge_block(params["ec3"], out2, gather_kmajor(out2, idx),
                     with_mean=True)
    out3 = conv_mlp(mm3, [params["ec3_2"]])

    # ---- 192->1024 mlp fused with global max over N ----
    out4, gmax = mlp_with_max(params["mlp"], out1, out2, out3)   # (B,N,1024), (B,1024)

    # ---- global feature -> per-batch fc1 bias (replaces broadcast + concat) ----
    oh = dense(params["onehot"], one_hot_labels)            # (B,128)
    glob = jnp.concatenate([gmax, oh], axis=-1)             # (B,1152) f32
    fc1_bias = glob @ params["fc1"]["w_glob"] + params["fc1"]["b"]   # (B,256)
    fc1_bias = fc1_bias[:, None, :]                         # (B,1,256)

    # ---- classifier (Dropout2d p=0.4 is identity at inference) ----
    scores = classifier_fused(params, mm1, out1, mm2, out2, mm3, out3, out4,
                              fc1_bias)                     # (B,N,128) lane-dense
    scores = scores[:, :, :num_parts]                       # un-pad 128 -> num_parts
    return jnp.transpose(scores, (0, 2, 1))                 # (B,num_parts,N)


# ------------------------------------------------------------------
if __name__ == "__main__":
    B, N, K_KNN = 2, 16, 8
    NUM_PARTS, NUM_CLASSES = 50, 16

    key = jax.random.PRNGKey(0)
    k_pc, k_lbl, k_par = jax.random.split(key, 3)
    pc = jax.random.normal(k_pc, (B, N, 3), jnp.float32)          # data_dict['pc']
    labels = jax.random.randint(k_lbl, (B,), 0, NUM_CLASSES)
    one_hot_labels = jax.nn.one_hot(labels, NUM_CLASSES, dtype=jnp.float32)

    params = init_params(k_par, NUM_PARTS, NUM_CLASSES)

    fwd = jax.jit(functools.partial(dgcnn_seg_forward, k=K_KNN,
                                    num_parts=NUM_PARTS))
    scores = fwd(params, pc, one_hot_labels)
    jax.block_until_ready(scores)
    assert scores.shape == (B, NUM_PARTS, N)
    print("KERNEL_OK")
</pallas_src>

<mosaic_0001>
module attributes {stable_mosaic.version = 11 : i64} {
  func.func @_knn_kernel(%arg0: i32, %arg1: i32, %arg2: memref<1x16x5xf32, #tpu.memory_space<vmem>>, %arg3: memref<1x5x16xf32, #tpu.memory_space<vmem>>, %arg4: memref<1x16x8xi32, #tpu.memory_space<vmem>>) attributes {dimension_semantics = [#tpu.dimension_semantics<parallel>, #tpu.dimension_semantics<parallel>], iteration_bounds = array<i64: 2, 1>, scalar_prefetch = 0 : i64, scratch_operands = 0 : i64, tpu.core_type = #tpu.core_type<tc>, window_params = [{transform_indices = @transform_0, window_bounds = array<i64: 1, 16, 5>}, {transform_indices = @transform_1, window_bounds = array<i64: 1, 5, 16>}, {transform_indices = @transform_2, window_bounds = array<i64: 1, 16, 8>}]} {
    %c0 = arith.constant 0 : index
    %c0_0 = arith.constant 0 : index
    %c0_1 = arith.constant 0 : index
    %0 = vector.load %arg2[%c0, %c0_0, %c0_1] : memref<1x16x5xf32, #tpu.memory_space<vmem>>, vector<1x16x5xf32>
    %1 = vector.shape_cast %0 : vector<1x16x5xf32> to vector<16x5xf32>
    %c0_2 = arith.constant 0 : index
    %c0_3 = arith.constant 0 : index
    %c0_4 = arith.constant 0 : index
    %2 = vector.load %arg3[%c0_2, %c0_3, %c0_4] : memref<1x5x16xf32, #tpu.memory_space<vmem>>, vector<1x5x16xf32>
    %3 = vector.shape_cast %2 : vector<1x5x16xf32> to vector<5x16xf32>
    %cst = arith.constant dense<0.000000e+00> : vector<16x16xf32>
    %4 = tpu.matmul %1, %3, %cst {dimension_numbers = #tpu.dot_dimension_numbers<[1], [0], [0], [1], [0, 0, 1, 1], [], []>} : vector<16x5xf32>, vector<5x16xf32>, vector<16x16xf32> -> vector<16x16xf32>
    %5 = tpu.iota {dimensions = array<i32: 1>} : vector<16x16xi32>
    %6 = arith.sitofp %5 : vector<16x16xi32> to vector<16x16xf32>
    %cst_5 = arith.constant dense<0x7F800000> : vector<16xf32>
    %7 = vector.multi_reduction <minimumf>, %4, %cst_5 [1] : vector<16x16xf32> to vector<16xf32>
    %8 = vector.shape_cast %7 : vector<16xf32> to vector<16x1xf32>
    %9 = vector.broadcast %8 : vector<16x1xf32> to vector<16x16xf32>
    %10 = arith.cmpf oeq, %4, %9 : vector<16x16xf32>
    %cst_6 = arith.constant 1.600000e+01 : f32
    %11 = vector.broadcast %cst_6 : f32 to vector<16x16xf32>
    %12 = arith.select %10, %6, %11 : vector<16x16xi1>, vector<16x16xf32>
    %cst_7 = arith.constant dense<0x7F800000> : vector<16xf32>
    %13 = vector.multi_reduction <minimumf>, %12, %cst_7 [1] : vector<16x16xf32> to vector<16xf32>
    %14 = vector.shape_cast %13 : vector<16xf32> to vector<16x1xf32>
    %15 = vector.broadcast %14 : vector<16x1xf32> to vector<16x16xf32>
    %16 = arith.cmpf oeq, %6, %15 : vector<16x16xf32>
    %cst_8 = arith.constant 0x7F800000 : f32
    %17 = vector.broadcast %cst_8 : f32 to vector<16x16xf32>
    %18 = arith.select %16, %17, %4 : vector<16x16xi1>, vector<16x16xf32>
    %cst_9 = arith.constant dense<0x7F800000> : vector<16xf32>
    %19 = vector.multi_reduction <minimumf>, %18, %cst_9 [1] : vector<16x16xf32> to vector<16xf32>
    %20 = vector.shape_cast %19 : vector<16xf32> to vector<16x1xf32>
    %21 = vector.broadcast %20 : vector<16x1xf32> to vector<16x16xf32>
    %22 = arith.cmpf oeq, %18, %21 : vector<16x16xf32>
    %cst_10 = arith.constant 1.600000e+01 : f32
    %23 = vector.broadcast %cst_10 : f32 to vector<16x16xf32>
    %24 = arith.select %22, %6, %23 : vector<16x16xi1>, vector<16x16xf32>
    %cst_11 = arith.constant dense<0x7F800000> : vector<16xf32>
    %25 = vector.multi_reduction <minimumf>, %24, %cst_11 [1] : vector<16x16xf32> to vector<16xf32>
    %26 = vector.shape_cast %25 : vector<16xf32> to vector<16x1xf32>
    %27 = vector.broadcast %26 : vector<16x1xf32> to vector<16x16xf32>
    %28 = arith.cmpf oeq, %6, %27 : vector<16x16xf32>
    %cst_12 = arith.constant 0x7F800000 : f32
    %29 = vector.broadcast %cst_12 : f32 to vector<16x16xf32>
    %30 = arith.select %28, %29, %18 : vector<16x16xi1>, vector<16x16xf32>
    %cst_13 = arith.constant dense<0x7F800000> : vector<16xf32>
    %31 = vector.multi_reduction <minimumf>, %30, %cst_13 [1] : vector<16x16xf32> to vector<16xf32>
    %32 = vector.shape_cast %31 : vector<16xf32> to vector<16x1xf32>
    %33 = vector.broadcast %32 : vector<16x1xf32> to vector<16x16xf32>
    %34 = arith.cmpf oeq, %30, %33 : vector<16x16xf32>
    %cst_14 = arith.constant 1.600000e+01 : f32
    %35 = vector.broadcast %cst_14 : f32 to vector<16x16xf32>
    %36 = arith.select %34, %6, %35 : vector<16x16xi1>, vector<16x16xf32>
    %cst_15 = arith.constant dense<0x7F800000> : vector<16xf32>
    %37 = vector.multi_reduction <minimumf>, %36, %cst_15 [1] : vector<16x16xf32> to vector<16xf32>
    %38 = vector.shape_cast %37 : vector<16xf32> to vector<16x1xf32>
    %39 = vector.broadcast %38 : vector<16x1xf32> to vector<16x16xf32>
    %40 = arith.cmpf oeq, %6, %39 : vector<16x16xf32>
    %cst_16 = arith.constant 0x7F800000 : f32
    %41 = vector.broadcast %cst_16 : f32 to vector<16x16xf32>
    %42 = arith.select %40, %41, %30 : vector<16x16xi1>, vector<16x16xf32>
    %cst_17 = arith.constant dense<0x7F800000> : vector<16xf32>
    %43 = vector.multi_reduction <minimumf>, %42, %cst_17 [1] : vector<16x16xf32> to vector<16xf32>
    %44 = vector.shape_cast %43 : vector<16xf32> to vector<16x1xf32>
    %45 = vector.broadcast %44 : vector<16x1xf32> to vector<16x16xf32>
    %46 = arith.cmpf oeq, %42, %45 : vector<16x16xf32>
    %cst_18 = arith.constant 1.600000e+01 : f32
    %47 = vector.broadcast %cst_18 : f32 to vector<16x16xf32>
    %48 = arith.select %46, %6, %47 : vector<16x16xi1>, vector<16x16xf32>
    %cst_19 = arith.constant dense<0x7F800000> : vector<16xf32>
    %49 = vector.multi_reduction <minimumf>, %48, %cst_19 [1] : vector<16x16xf32> to vector<16xf32>
    %50 = vector.shape_cast %49 : vector<16xf32> to vector<16x1xf32>
    %51 = vector.broadcast %50 : vector<16x1xf32> to vector<16x16xf32>
    %52 = arith.cmpf oeq, %6, %51 : vector<16x16xf32>
    %cst_20 = arith.constant 0x7F800000 : f32
    %53 = vector.broadcast %cst_20 : f32 to vector<16x16xf32>
    %54 = arith.select %52, %53, %42 : vector<16x16xi1>, vector<16x16xf32>
    %cst_21 = arith.constant dense<0x7F800000> : vector<16xf32>
    %55 = vector.multi_reduction <minimumf>, %54, %cst_21 [1] : vector<16x16xf32> to vector<16xf32>
    %56 = vector.shape_cast %55 : vector<16xf32> to vector<16x1xf32>
    %57 = vector.broadcast %56 : vector<16x1xf32> to vector<16x16xf32>
    %58 = arith.cmpf oeq, %54, %57 : vector<16x16xf32>
    %cst_22 = arith.constant 1.600000e+01 : f32
    %59 = vector.broadcast %cst_22 : f32 to vector<16x16xf32>
    %60 = arith.select %58, %6, %59 : vector<16x16xi1>, vector<16x16xf32>
    %cst_23 = arith.constant dense<0x7F800000> : vector<16xf32>
    %61 = vector.multi_reduction <minimumf>, %60, %cst_23 [1] : vector<16x16xf32> to vector<16xf32>
    %62 = vector.shape_cast %61 : vector<16xf32> to vector<16x1xf32>
    %63 = vector.broadcast %62 : vector<16x1xf32> to vector<16x16xf32>
    %64 = arith.cmpf oeq, %6, %63 : vector<16x16xf32>
    %cst_24 = arith.constant 0x7F800000 : f32
    %65 = vector.broadcast %cst_24 : f32 to vector<16x16xf32>
    %66 = arith.select %64, %65, %54 : vector<16x16xi1>, vector<16x16xf32>
    %cst_25 = arith.constant dense<0x7F800000> : vector<16xf32>
    %67 = vector.multi_reduction <minimumf>, %66, %cst_25 [1] : vector<16x16xf32> to vector<16xf32>
    %68 = vector.shape_cast %67 : vector<16xf32> to vector<16x1xf32>
    %69 = vector.broadcast %68 : vector<16x1xf32> to vector<16x16xf32>
    %70 = arith.cmpf oeq, %66, %69 : vector<16x16xf32>
    %cst_26 = arith.constant 1.600000e+01 : f32
    %71 = vector.broadcast %cst_26 : f32 to vector<16x16xf32>
    %72 = arith.select %70, %6, %71 : vector<16x16xi1>, vector<16x16xf32>
    %cst_27 = arith.constant dense<0x7F800000> : vector<16xf32>
    %73 = vector.multi_reduction <minimumf>, %72, %cst_27 [1] : vector<16x16xf32> to vector<16xf32>
    %74 = vector.shape_cast %73 : vector<16xf32> to vector<16x1xf32>
    %75 = vector.broadcast %74 : vector<16x1xf32> to vector<16x16xf32>
    %76 = arith.cmpf oeq, %6, %75 : vector<16x16xf32>
    %cst_28 = arith.constant 0x7F800000 : f32
    %77 = vector.broadcast %cst_28 : f32 to vector<16x16xf32>
    %78 = arith.select %76, %77, %66 : vector<16x16xi1>, vector<16x16xf32>
    %cst_29 = arith.constant dense<0x7F800000> : vector<16xf32>
    %79 = vector.multi_reduction <minimumf>, %78, %cst_29 [1] : vector<16x16xf32> to vector<16xf32>
    %80 = vector.shape_cast %79 : vector<16xf32> to vector<16x1xf32>
    %81 = vector.broadcast %80 : vector<16x1xf32> to vector<16x16xf32>
    %82 = arith.cmpf oeq, %78, %81 : vector<16x16xf32>
    %cst_30 = arith.constant 1.600000e+01 : f32
    %83 = vector.broadcast %cst_30 : f32 to vector<16x16xf32>
    %84 = arith.select %82, %6, %83 : vector<16x16xi1>, vector<16x16xf32>
    %cst_31 = arith.constant dense<0x7F800000> : vector<16xf32>
    %85 = vector.multi_reduction <minimumf>, %84, %cst_31 [1] : vector<16x16xf32> to vector<16xf32>
    %86 = vector.shape_cast %85 : vector<16xf32> to vector<16x1xf32>
    %87 = vector.broadcast %86 : vector<16x1xf32> to vector<16x16xf32>
    %88 = arith.cmpf oeq, %6, %87 : vector<16x16xf32>
    %cst_32 = arith.constant 0x7F800000 : f32
    %89 = vector.broadcast %cst_32 : f32 to vector<16x16xf32>
    %90 = arith.select %88, %89, %78 : vector<16x16xi1>, vector<16x16xf32>
    %cst_33 = arith.constant dense<0x7F800000> : vector<16xf32>
    %91 = vector.multi_reduction <minimumf>, %90, %cst_33 [1] : vector<16x16xf32> to vector<16xf32>
    %92 = vector.shape_cast %91 : vector<16xf32> to vector<16x1xf32>
    %93 = vector.broadcast %92 : vector<16x1xf32> to vector<16x16xf32>
    %94 = arith.cmpf oeq, %90, %93 : vector<16x16xf32>
    %cst_34 = arith.constant 1.600000e+01 : f32
    %95 = vector.broadcast %cst_34 : f32 to vector<16x16xf32>
    %96 = arith.select %94, %6, %95 : vector<16x16xi1>, vector<16x16xf32>
    %cst_35 = arith.constant dense<0x7F800000> : vector<16xf32>
    %97 = vector.multi_reduction <minimumf>, %96, %cst_35 [1] : vector<16x16xf32> to vector<16xf32>
    %98 = vector.shape_cast %97 : vector<16xf32> to vector<16x1xf32>
    %99 = tpu.concatenate %14, %26, %38, %50, %62, %74, %86, %98 in 1 : vector<16x1xf32>, vector<16x1xf32>, vector<16x1xf32>, vector<16x1xf32>, vector<16x1xf32>, vector<16x1xf32>, vector<16x1xf32>, vector<16x1xf32> -> vector<16x8xf32>
    %100 = arith.fptosi %99 : vector<16x8xf32> to vector<16x8xi32>
    %c0_36 = arith.constant 0 : index
    %c0_37 = arith.constant 0 : index
    %c0_38 = arith.constant 0 : index
    %101 = vector.load %arg4[%c0_36, %c0_37, %c0_38] : memref<1x16x8xi32, #tpu.memory_space<vmem>>, vector<1x16x8xi32>
    %102 = vector.shape_cast %101 : vector<1x16x8xi32> to vector<16x8xi32>
    %103 = vector.shape_cast %100 : vector<16x8xi32> to vector<1x16x8xi32>
    tpu.vector_store %arg4[%c0_36, %c0_37, %c0_38], %103 {strides = array<i32>} : memref<1x16x8xi32, #tpu.memory_space<vmem>>, vector<1x16x8xi32>,
    return
  }
  func.func @transform_0(%arg0: i32, %arg1: i32) -> (i32, i32, i32) {
    %c0_i32 = arith.constant 0 : i32
    %c0_i32_0 = arith.constant 0 : i32
    return %arg0, %arg1, %c0_i32 : i32, i32, i32
  }
  func.func @transform_1(%arg0: i32, %arg1: i32) -> (i32, i32, i32) {
    %c0_i32 = arith.constant 0 : i32
    %c0_i32_0 = arith.constant 0 : i32
    %c0_i32_1 = arith.constant 0 : i32
    return %arg0, %c0_i32, %c0_i32_0 : i32, i32, i32
  }
  func.func @transform_2(%arg0: i32, %arg1: i32) -> (i32, i32, i32) {
    %c0_i32 = arith.constant 0 : i32
    %c0_i32_0 = arith.constant 0 : i32
    return %arg0, %arg1, %c0_i32 : i32, i32, i32
  }
}

module attributes {stable_mosaic.version = 11 : i64} {
  func.func @_edge_block_kernel(%arg0: i32, %arg1: i32, %arg2: memref<1x16x3xbf16, #tpu.memory_space<vmem>>, %arg3: memref<1x8x16x3xbf16, #tpu.memory_space<vmem>>, %arg4: memref<3x64xbf16, #tpu.memory_space<vmem>>, %arg5: memref<3x64xbf16, #tpu.memory_space<vmem>>, %arg6: memref<1x64xf32, #tpu.memory_space<vmem>>, %arg7: memref<64x128xbf16, #tpu.memory_space<vmem>>, %arg8: memref<1x128xf32, #tpu.memory_space<vmem>>, %arg9: memref<1x16x128xbf16, #tpu.memory_space<vmem>>) attributes {dimension_semantics = [#tpu.dimension_semantics<parallel>, #tpu.dimension_semantics<parallel>], iteration_bounds = array<i64: 2, 1>, scalar_prefetch = 0 : i64, scratch_operands = 0 : i64, tpu.core_type = #tpu.core_type<tc>, window_params = [{transform_indices = @transform_0, window_bounds = array<i64: 1, 16, 3>}, {transform_indices = @transform_1, window_bounds = array<i64: 1, 8, 16, 3>}, {pipeline_mode = #tpu.pipeline_mode<synchronous>, transform_indices = @transform_2, window_bounds = array<i64: 3, 64>}, {pipeline_mode = #tpu.pipeline_mode<synchronous>, transform_indices = @transform_3, window_bounds = array<i64: 3, 64>}, {pipeline_mode = #tpu.pipeline_mode<synchronous>, transform_indices = @transform_4, window_bounds = array<i64: 1, 64>}, {pipeline_mode = #tpu.pipeline_mode<synchronous>, transform_indices = @transform_5, window_bounds = array<i64: 64, 128>}, {pipeline_mode = #tpu.pipeline_mode<synchronous>, transform_indices = @transform_6, window_bounds = array<i64: 1, 128>}, {transform_indices = @transform_7, window_bounds = array<i64: 1, 16, 128>}]} {
    %c0 = arith.constant 0 : index
    %c0_0 = arith.constant 0 : index
    %c0_1 = arith.constant 0 : index
    %0 = vector.load %arg2[%c0, %c0_0, %c0_1] : memref<1x16x3xbf16, #tpu.memory_space<vmem>>, vector<1x16x3xbf16>
    %1 = vector.shape_cast %0 : vector<1x16x3xbf16> to vector<16x3xbf16>
    %c0_2 = arith.constant 0 : index
    %c0_3 = arith.constant 0 : index
    %2 = vector.load %arg4[%c0_2, %c0_3] : memref<3x64xbf16, #tpu.memory_space<vmem>>, vector<3x64xbf16>
    %c0_4 = arith.constant 0 : index
    %c0_5 = arith.constant 0 : index
    %3 = vector.load %arg5[%c0_4, %c0_5] : memref<3x64xbf16, #tpu.memory_space<vmem>>, vector<3x64xbf16>
    %c0_6 = arith.constant 0 : index
    %c0_7 = arith.constant 0 : index
    %4 = vector.load %arg6[%c0_6, %c0_7] : memref<1x64xf32, #tpu.memory_space<vmem>>, vector<1x64xf32>
    %cst = arith.constant dense<0.000000e+00> : vector<16x64xf32>
    %5 = tpu.matmul %1, %3, %cst {dimension_numbers = #tpu.dot_dimension_numbers<[1], [0], [0], [1], [0, 0, 1, 1], [], []>} : vector<16x3xbf16>, vector<3x64xbf16>, vector<16x64xf32> -> vector<16x64xf32>
    %6 = vector.broadcast %4 : vector<1x64xf32> to vector<16x64xf32>
    %7 = arith.addf %5, %6 : vector<16x64xf32>
    %c0_8 = arith.constant 0 : index
    %c0_9 = arith.constant 0 : index
    %c0_10 = arith.constant 0 : index
    %c0_11 = arith.constant 0 : index
    %8 = vector.load %arg3[%c0_8, %c0_9, %c0_10, %c0_11] : memref<1x8x16x3xbf16, #tpu.memory_space<vmem>>, vector<1x8x16x3xbf16>
    %9 = vector.shape_cast %8 : vector<1x8x16x3xbf16> to vector<8x16x3xbf16>
    %10 = vector.shape_cast %9 : vector<8x16x3xbf16> to vector<128x3xbf16>
    %cst_12 = arith.constant dense<0.000000e+00> : vector<128x64xf32>
    %11 = tpu.matmul %10, %2, %cst_12 {dimension_numbers = #tpu.dot_dimension_numbers<[1], [0], [0], [1], [0, 0, 1, 1], [], []>} : vector<128x3xbf16>, vector<3x64xbf16>, vector<128x64xf32> -> vector<128x64xf32>
    %12 = vector.shape_cast %11 : vector<128x64xf32> to vector<8x16x64xf32>
    %13 = vector.shape_cast %7 : vector<16x64xf32> to vector<1x16x64xf32>
    %14 = vector.broadcast %13 : vector<1x16x64xf32> to vector<8x16x64xf32>
    %15 = arith.addf %12, %14 : vector<8x16x64xf32>
    %cst_13 = arith.constant 0.000000e+00 : f32
    %16 = vector.broadcast %cst_13 : f32 to vector<8x16x64xf32>
    %17 = arith.maximumf %15, %16 : vector<8x16x64xf32>
    %c0_14 = arith.constant 0 : index
    %c0_15 = arith.constant 0 : index
    %18 = vector.load %arg7[%c0_14, %c0_15] : memref<64x128xbf16, #tpu.memory_space<vmem>>, vector<64x128xbf16>
    %c0_16 = arith.constant 0 : index
    %c0_17 = arith.constant 0 : index
    %19 = vector.load %arg8[%c0_16, %c0_17] : memref<1x128xf32, #tpu.memory_space<vmem>>, vector<1x128xf32>
    %20 = vector.shape_cast %17 : vector<8x16x64xf32> to vector<128x64xf32>
    %21 = arith.truncf %20 : vector<128x64xf32> to vector<128x64xbf16>
    %cst_18 = arith.constant dense<0.000000e+00> : vector<128x128xf32>
    %22 = tpu.matmul %21, %18, %cst_18 {dimension_numbers = #tpu.dot_dimension_numbers<[1], [0], [0], [1], [0, 0, 1, 1], [], []>} : vector<128x64xbf16>, vector<64x128xbf16>, vector<128x128xf32> -> vector<128x128xf32>
    %23 = vector.shape_cast %22 : vector<128x128xf32> to vector<8x16x128xf32>
    %24 = vector.shape_cast %19 : vector<1x128xf32> to vector<1x1x128xf32>
    %25 = vector.broadcast %24 : vector<1x1x128xf32> to vector<8x16x128xf32>
    %26 = arith.addf %23, %25 : vector<8x16x128xf32>
    %cst_19 = arith.constant 0.000000e+00 : f32
    %27 = vector.broadcast %cst_19 : f32 to vector<8x16x128xf32>
    %28 = arith.maximumf %26, %27 : vector<8x16x128xf32>
    %cst_20 = arith.constant dense<0xFF800000> : vector<16x128xf32>
    %29 = vector.multi_reduction <maximumf>, %28, %cst_20 [0] : vector<8x16x128xf32> to vector<16x128xf32>
    %30 = arith.truncf %29 : vector<16x128xf32> to vector<16x128xbf16>
    %c0_21 = arith.constant 0 : index
    %c0_22 = arith.constant 0 : index
    %c0_23 = arith.constant 0 : index
    %31 = vector.load %arg9[%c0_21, %c0_22, %c0_23] : memref<1x16x128xbf16, #tpu.memory_space<vmem>>, vector<1x16x128xbf16>
    %32 = vector.shape_cast %31 : vector<1x16x128xbf16> to vector<16x128xbf16>
    %33 = vector.shape_cast %30 : vector<16x128xbf16> to vector<1x16x128xbf16>
    tpu.vector_store %arg9[%c0_21, %c0_22, %c0_23], %33 {strides = array<i32>} : memref<1x16x128xbf16, #tpu.memory_space<vmem>>, vector<1x16x128xbf16>,
    return
  }
  func.func @transform_0(%arg0: i32, %arg1: i32) -> (i32, i32, i32) {
    %c0_i32 = arith.constant 0 : i32
    %c0_i32_0 = arith.constant 0 : i32
    return %arg0, %arg1, %c0_i32 : i32, i32, i32
  }
  func.func @transform_1(%arg0: i32, %arg1: i32) -> (i32, i32, i32, i32) {
    %c0_i32 = arith.constant 0 : i32
    %c0_i32_0 = arith.constant 0 : i32
    %c0_i32_1 = arith.constant 0 : i32
    return %arg0, %c0_i32, %arg1, %c0_i32_0 : i32, i32, i32, i32
  }
  func.func @transform_2(%arg0: i32, %arg1: i32) -> (i32, i32) {
    %c0_i32 = arith.constant 0 : i32
    %c0_i32_0 = arith.constant 0 : i32
    %c0_i32_1 = arith.constant 0 : i32
    return %c0_i32, %c0_i32_0 : i32, i32
  }
  func.func @transform_3(%arg0: i32, %arg1: i32) -> (i32, i32) {
    %c0_i32 = arith.constant 0 : i32
    %c0_i32_0 = arith.constant 0 : i32
    %c0_i32_1 = arith.constant 0 : i32
    return %c0_i32, %c0_i32_0 : i32, i32
  }
  func.func @transform_4(%arg0: i32, %arg1: i32) -> (i32, i32) {
    %c0_i32 = arith.constant 0 : i32
    %c0_i32_0 = arith.constant 0 : i32
    %c0_i32_1 = arith.constant 0 : i32
    return %c0_i32, %c0_i32_0 : i32, i32
  }
  func.func @transform_5(%arg0: i32, %arg1: i32) -> (i32, i32) {
    %c0_i32 = arith.constant 0 : i32
    %c0_i32_0 = arith.constant 0 : i32
    %c0_i32_1 = arith.constant 0 : i32
    return %c0_i32, %c0_i32_0 : i32, i32
  }
  func.func @transform_6(%arg0: i32, %arg1: i32) -> (i32, i32) {
    %c0_i32 = arith.constant 0 : i32
    %c0_i32_0 = arith.constant 0 : i32
    %c0_i32_1 = arith.constant 0 : i32
    return %c0_i32, %c0_i32_0 : i32, i32
  }
  func.func @transform_7(%arg0: i32, %arg1: i32) -> (i32, i32, i32) {
    %c0_i32 = arith.constant 0 : i32
    %c0_i32_0 = arith.constant 0 : i32
    return %arg0, %arg1, %c0_i32 : i32, i32, i32
  }
}

module attributes {stable_mosaic.version = 11 : i64} {
  func.func @_conv_max_kernel(%arg0: i32, %arg1: i32, %arg2: memref<1x16x128xbf16, #tpu.memory_space<vmem>>, %arg3: memref<128x1024xbf16, #tpu.memory_space<vmem>>, %arg4: memref<1x1024xf32, #tpu.memory_space<vmem>>, %arg5: memref<1x1x1024xf32, #tpu.memory_space<vmem>>) attributes {dimension_semantics = [#tpu.dimension_semantics<parallel>, #tpu.dimension_semantics<arbitrary>], iteration_bounds = array<i64: 2, 1>, scalar_prefetch = 0 : i64, scratch_operands = 0 : i64, tpu.core_type = #tpu.core_type<tc>, window_params = [{transform_indices = @transform_0, window_bounds = array<i64: 1, 16, 128>}, {pipeline_mode = #tpu.pipeline_mode<synchronous>, transform_indices = @transform_1, window_bounds = array<i64: 128, 1024>}, {pipeline_mode = #tpu.pipeline_mode<synchronous>, transform_indices = @transform_2, window_bounds = array<i64: 1, 1024>}, {transform_indices = @transform_3, window_bounds = array<i64: 1, 1, 1024>}]} {
    %c0_i32 = arith.constant 0 : i32
    %0 = arith.cmpi eq, %arg1, %c0_i32 : i32
    %1 = arith.extui %0 : i1 to i32
    %c0_i32_0 = arith.constant 0 : i32
    %2 = arith.cmpi ne, %1, %c0_i32_0 : i32
    scf.if %2 {
      %cst_15 = arith.constant 0xFF800000 : f32
      %20 = vector.broadcast %cst_15 : f32 to vector<1x1x1024xf32>
      %c0_16 = arith.constant 0 : index
      %c0_17 = arith.constant 0 : index
      %c0_18 = arith.constant 0 : index
      %21 = vector.load %arg5[%c0_16, %c0_17, %c0_18] : memref<1x1x1024xf32, #tpu.memory_space<vmem>>, vector<1x1x1024xf32>
      tpu.vector_store %arg5[%c0_16, %c0_17, %c0_18], %20 {strides = array<i32>} : memref<1x1x1024xf32, #tpu.memory_space<vmem>>, vector<1x1x1024xf32>,
    } else {
    }
    %c0 = arith.constant 0 : index
    %c0_1 = arith.constant 0 : index
    %c0_2 = arith.constant 0 : index
    %3 = vector.load %arg2[%c0, %c0_1, %c0_2] : memref<1x16x128xbf16, #tpu.memory_space<vmem>>, vector<1x16x128xbf16>
    %4 = vector.shape_cast %3 : vector<1x16x128xbf16> to vector<16x128xbf16>
    %c0_3 = arith.constant 0 : index
    %c0_4 = arith.constant 0 : index
    %5 = vector.load %arg3[%c0_3, %c0_4] : memref<128x1024xbf16, #tpu.memory_space<vmem>>, vector<128x1024xbf16>
    %cst = arith.constant dense<0.000000e+00> : vector<16x1024xf32>
    %6 = tpu.matmul %4, %5, %cst {dimension_numbers = #tpu.dot_dimension_numbers<[1], [0], [0], [1], [0, 0, 1, 1], [], []>} : vector<16x128xbf16>, vector<128x1024xbf16>, vector<16x1024xf32> -> vector<16x1024xf32>
    %c0_5 = arith.constant 0 : index
    %c0_6 = arith.constant 0 : index
    %7 = vector.load %arg4[%c0_5, %c0_6] : memref<1x1024xf32, #tpu.memory_space<vmem>>, vector<1x1024xf32>
    %8 = vector.broadcast %7 : vector<1x1024xf32> to vector<16x1024xf32>
    %9 = arith.addf %6, %8 : vector<16x1024xf32>
    %cst_7 = arith.constant 0.000000e+00 : f32
    %10 = vector.broadcast %cst_7 : f32 to vector<16x1024xf32>
    %11 = arith.maximumf %9, %10 : vector<16x1024xf32>
    %c0_8 = arith.constant 0 : index
    %c0_9 = arith.constant 0 : index
    %c0_10 = arith.constant 0 : index
    %12 = vector.load %arg5[%c0_8, %c0_9, %c0_10] : memref<1x1x1024xf32, #tpu.memory_space<vmem>>, vector<1x1x1024xf32>
    %13 = vector.shape_cast %12 : vector<1x1x1024xf32> to vector<1x1024xf32>
    %cst_11 = arith.constant dense<0xFF800000> : vector<1024xf32>
    %14 = vector.multi_reduction <maximumf>, %11, %cst_11 [0] : vector<16x1024xf32> to vector<1024xf32>
    %15 = vector.shape_cast %14 : vector<1024xf32> to vector<1x1024xf32>
    %16 = arith.maximumf %13, %15 : vector<1x1024xf32>
    %c0_12 = arith.constant 0 : index
    %c0_13 = arith.constant 0 : index
    %c0_14 = arith.constant 0 : index
    %17 = vector.load %arg5[%c0_12, %c0_13, %c0_14] : memref<1x1x1024xf32, #tpu.memory_space<vmem>>, vector<1x1x1024xf32>
    %18 = vector.shape_cast %17 : vector<1x1x1024xf32> to vector<1x1024xf32>
    %19 = vector.shape_cast %16 : vector<1x1024xf32> to vector<1x1x1024xf32>
    tpu.vector_store %arg5[%c0_12, %c0_13, %c0_14], %19 {strides = array<i32>} : memref<1x1x1024xf32, #tpu.memory_space<vmem>>, vector<1x1x1024xf32>,
    return
  }
  func.func @transform_0(%arg0: i32, %arg1: i32) -> (i32, i32, i32) {
    %c0_i32 = arith.constant 0 : i32
    %c0_i32_0 = arith.constant 0 : i32
    return %arg0, %arg1, %c0_i32 : i32, i32, i32
  }
  func.func @transform_1(%arg0: i32, %arg1: i32) -> (i32, i32) {
    %c0_i32 = arith.constant 0 : i32
    %c0_i32_0 = arith.constant 0 : i32
    %c0_i32_1 = arith.constant 0 : i32
    return %c0_i32, %c0_i32_0 : i32, i32
  }
  func.func @transform_2(%arg0: i32, %arg1: i32) -> (i32, i32) {
    %c0_i32 = arith.constant 0 : i32
    %c0_i32_0 = arith.constant 0 : i32
    %c0_i32_1 = arith.constant 0 : i32
    return %c0_i32, %c0_i32_0 : i32, i32
  }
  func.func @transform_3(%arg0: i32, %arg1: i32) -> (i32, i32, i32) {
    %c0_i32 = arith.constant 0 : i32
    %c0_i32_0 = arith.constant 0 : i32
    %c0_i32_1 = arith.constant 0 : i32
    return %arg0, %c0_i32, %c0_i32_0 : i32, i32, i32
  }
}

module attributes {stable_mosaic.version = 11 : i64} {
  func.func @_edge_block_kernel(%arg0: i32, %arg1: i32, %arg2: memref<1x16x3xbf16, #tpu.memory_space<vmem>>, %arg3: memref<1x8x16x3xbf16, #tpu.memory_space<vmem>>, %arg4: memref<3x64xbf16, #tpu.memory_space<vmem>>, %arg5: memref<3x64xbf16, #tpu.memory_space<vmem>>, %arg6: memref<1x64xf32, #tpu.memory_space<vmem>>, %arg7: memref<64x64xbf16, #tpu.memory_space<vmem>>, %arg8: memref<1x64xf32, #tpu.memory_space<vmem>>, %arg9: memref<1x16x128xbf16, #tpu.memory_space<vmem>>) attributes {dimension_semantics = [#tpu.dimension_semantics<parallel>, #tpu.dimension_semantics<parallel>], iteration_bounds = array<i64: 2, 1>, scalar_prefetch = 0 : i64, scratch_operands = 0 : i64, tpu.core_type = #tpu.core_type<tc>, window_params = [{transform_indices = @transform_0, window_bounds = array<i64: 1, 16, 3>}, {transform_indices = @transform_1, window_bounds = array<i64: 1, 8, 16, 3>}, {pipeline_mode = #tpu.pipeline_mode<synchronous>, transform_indices = @transform_2, window_bounds = array<i64: 3, 64>}, {pipeline_mode = #tpu.pipeline_mode<synchronous>, transform_indices = @transform_3, window_bounds = array<i64: 3, 64>}, {pipeline_mode = #tpu.pipeline_mode<synchronous>, transform_indices = @transform_4, window_bounds = array<i64: 1, 64>}, {pipeline_mode = #tpu.pipeline_mode<synchronous>, transform_indices = @transform_5, window_bounds = array<i64: 64, 64>}, {pipeline_mode = #tpu.pipeline_mode<synchronous>, transform_indices = @transform_6, window_bounds = array<i64: 1, 64>}, {transform_indices = @transform_7, window_bounds = array<i64: 1, 16, 128>}]} {
    %c0 = arith.constant 0 : index
    %c0_0 = arith.constant 0 : index
    %c0_1 = arith.constant 0 : index
    %0 = vector.load %arg2[%c0, %c0_0, %c0_1] : memref<1x16x3xbf16, #tpu.memory_space<vmem>>, vector<1x16x3xbf16>
    %1 = vector.shape_cast %0 : vector<1x16x3xbf16> to vector<16x3xbf16>
    %c0_2 = arith.constant 0 : index
    %c0_3 = arith.constant 0 : index
    %2 = vector.load %arg4[%c0_2, %c0_3] : memref<3x64xbf16, #tpu.memory_space<vmem>>, vector<3x64xbf16>
    %c0_4 = arith.constant 0 : index
    %c0_5 = arith.constant 0 : index
    %3 = vector.load %arg5[%c0_4, %c0_5] : memref<3x64xbf16, #tpu.memory_space<vmem>>, vector<3x64xbf16>
    %c0_6 = arith.constant 0 : index
    %c0_7 = arith.constant 0 : index
    %4 = vector.load %arg6[%c0_6, %c0_7] : memref<1x64xf32, #tpu.memory_space<vmem>>, vector<1x64xf32>
    %cst = arith.constant dense<0.000000e+00> : vector<16x64xf32>
    %5 = tpu.matmul %1, %3, %cst {dimension_numbers = #tpu.dot_dimension_numbers<[1], [0], [0], [1], [0, 0, 1, 1], [], []>} : vector<16x3xbf16>, vector<3x64xbf16>, vector<16x64xf32> -> vector<16x64xf32>
    %6 = vector.broadcast %4 : vector<1x64xf32> to vector<16x64xf32>
    %7 = arith.addf %5, %6 : vector<16x64xf32>
    %c0_8 = arith.constant 0 : index
    %c0_9 = arith.constant 0 : index
    %c0_10 = arith.constant 0 : index
    %c0_11 = arith.constant 0 : index
    %8 = vector.load %arg3[%c0_8, %c0_9, %c0_10, %c0_11] : memref<1x8x16x3xbf16, #tpu.memory_space<vmem>>, vector<1x8x16x3xbf16>
    %9 = vector.shape_cast %8 : vector<1x8x16x3xbf16> to vector<8x16x3xbf16>
    %10 = vector.shape_cast %9 : vector<8x16x3xbf16> to vector<128x3xbf16>
    %cst_12 = arith.constant dense<0.000000e+00> : vector<128x64xf32>
    %11 = tpu.matmul %10, %2, %cst_12 {dimension_numbers = #tpu.dot_dimension_numbers<[1], [0], [0], [1], [0, 0, 1, 1], [], []>} : vector<128x3xbf16>, vector<3x64xbf16>, vector<128x64xf32> -> vector<128x64xf32>
    %12 = vector.shape_cast %11 : vector<128x64xf32> to vector<8x16x64xf32>
    %13 = vector.shape_cast %7 : vector<16x64xf32> to vector<1x16x64xf32>
    %14 = vector.broadcast %13 : vector<1x16x64xf32> to vector<8x16x64xf32>
    %15 = arith.addf %12, %14 : vector<8x16x64xf32>
    %cst_13 = arith.constant 0.000000e+00 : f32
    %16 = vector.broadcast %cst_13 : f32 to vector<8x16x64xf32>
    %17 = arith.maximumf %15, %16 : vector<8x16x64xf32>
    %c0_14 = arith.constant 0 : index
    %c0_15 = arith.constant 0 : index
    %18 = vector.load %arg7[%c0_14, %c0_15] : memref<64x64xbf16, #tpu.memory_space<vmem>>, vector<64x64xbf16>
    %c0_16 = arith.constant 0 : index
    %c0_17 = arith.constant 0 : index
    %19 = vector.load %arg8[%c0_16, %c0_17] : memref<1x64xf32, #tpu.memory_space<vmem>>, vector<1x64xf32>
    %20 = vector.shape_cast %17 : vector<8x16x64xf32> to vector<128x64xf32>
    %21 = arith.truncf %20 : vector<128x64xf32> to vector<128x64xbf16>
    %cst_18 = arith.constant dense<0.000000e+00> : vector<128x64xf32>
    %22 = tpu.matmul %21, %18, %cst_18 {dimension_numbers = #tpu.dot_dimension_numbers<[1], [0], [0], [1], [0, 0, 1, 1], [], []>} : vector<128x64xbf16>, vector<64x64xbf16>, vector<128x64xf32> -> vector<128x64xf32>
    %23 = vector.shape_cast %22 : vector<128x64xf32> to vector<8x16x64xf32>
    %24 = vector.shape_cast %19 : vector<1x64xf32> to vector<1x1x64xf32>
    %25 = vector.broadcast %24 : vector<1x1x64xf32> to vector<8x16x64xf32>
    %26 = arith.addf %23, %25 : vector<8x16x64xf32>
    %cst_19 = arith.constant 0.000000e+00 : f32
    %27 = vector.broadcast %cst_19 : f32 to vector<8x16x64xf32>
    %28 = arith.maximumf %26, %27 : vector<8x16x64xf32>
    %cst_20 = arith.constant dense<0xFF800000> : vector<16x64xf32>
    %29 = vector.multi_reduction <maximumf>, %28, %cst_20 [0] : vector<8x16x64xf32> to vector<16x64xf32>
    %cst_21 = arith.constant dense<0.000000e+00> : vector<16x64xf32>
    %30 = vector.multi_reduction <add>, %28, %cst_21 [0] : vector<8x16x64xf32> to vector<16x64xf32>
    %cst_22 = arith.constant 1.250000e-01 : f32
    %31 = vector.broadcast %cst_22 : f32 to vector<16x64xf32>
    %32 = arith.mulf %30, %31 : vector<16x64xf32>
    %33 = tpu.concatenate %29, %32 in 1 : vector<16x64xf32>, vector<16x64xf32> -> vector<16x128xf32>
    %34 = arith.truncf %33 : vector<16x128xf32> to vector<16x128xbf16>
    %c0_23 = arith.constant 0 : index
    %c0_24 = arith.constant 0 : index
    %c0_25 = arith.constant 0 : index
    %35 = vector.load %arg9[%c0_23, %c0_24, %c0_25] : memref<1x16x128xbf16, #tpu.memory_space<vmem>>, vector<1x16x128xbf16>
    %36 = vector.shape_cast %35 : vector<1x16x128xbf16> to vector<16x128xbf16>
    %37 = vector.shape_cast %34 : vector<16x128xbf16> to vector<1x16x128xbf16>
    tpu.vector_store %arg9[%c0_23, %c0_24, %c0_25], %37 {strides = array<i32>} : memref<1x16x128xbf16, #tpu.memory_space<vmem>>, vector<1x16x128xbf16>,
    return
  }
  func.func @transform_0(%arg0: i32, %arg1: i32) -> (i32, i32, i32) {
    %c0_i32 = arith.constant 0 : i32
    %c0_i32_0 = arith.constant 0 : i32
    return %arg0, %arg1, %c0_i32 : i32, i32, i32
  }
  func.func @transform_1(%arg0: i32, %arg1: i32) -> (i32, i32, i32, i32) {
    %c0_i32 = arith.constant 0 : i32
    %c0_i32_0 = arith.constant 0 : i32
    %c0_i32_1 = arith.constant 0 : i32
    return %arg0, %c0_i32, %arg1, %c0_i32_0 : i32, i32, i32, i32
  }
  func.func @transform_2(%arg0: i32, %arg1: i32) -> (i32, i32) {
    %c0_i32 = arith.constant 0 : i32
    %c0_i32_0 = arith.constant 0 : i32
    %c0_i32_1 = arith.constant 0 : i32
    return %c0_i32, %c0_i32_0 : i32, i32
  }
  func.func @transform_3(%arg0: i32, %arg1: i32) -> (i32, i32) {
    %c0_i32 = arith.constant 0 : i32
    %c0_i32_0 = arith.constant 0 : i32
    %c0_i32_1 = arith.constant 0 : i32
    return %c0_i32, %c0_i32_0 : i32, i32
  }
  func.func @transform_4(%arg0: i32, %arg1: i32) -> (i32, i32) {
    %c0_i32 = arith.constant 0 : i32
    %c0_i32_0 = arith.constant 0 : i32
    %c0_i32_1 = arith.constant 0 : i32
    return %c0_i32, %c0_i32_0 : i32, i32
  }
  func.func @transform_5(%arg0: i32, %arg1: i32) -> (i32, i32) {
    %c0_i32 = arith.constant 0 : i32
    %c0_i32_0 = arith.constant 0 : i32
    %c0_i32_1 = arith.constant 0 : i32
    return %c0_i32, %c0_i32_0 : i32, i32
  }
  func.func @transform_6(%arg0: i32, %arg1: i32) -> (i32, i32) {
    %c0_i32 = arith.constant 0 : i32
    %c0_i32_0 = arith.constant 0 : i32
    %c0_i32_1 = arith.constant 0 : i32
    return %c0_i32, %c0_i32_0 : i32, i32
  }
  func.func @transform_7(%arg0: i32, %arg1: i32) -> (i32, i32, i32) {
    %c0_i32 = arith.constant 0 : i32
    %c0_i32_0 = arith.constant 0 : i32
    return %arg0, %arg1, %c0_i32 : i32, i32, i32
  }
}

module attributes {stable_mosaic.version = 11 : i64} {
  func.func @_conv_mlp_kernel(%arg0: i32, %arg1: memref<32x128xbf16, #tpu.memory_space<vmem>>, %arg2: memref<128x64xbf16, #tpu.memory_space<vmem>>, %arg3: memref<1x64xf32, #tpu.memory_space<vmem>>, %arg4: memref<32x64xbf16, #tpu.memory_space<vmem>>) attributes {dimension_semantics = [#tpu.dimension_semantics<parallel>], iteration_bounds = array<i64: 1>, scalar_prefetch = 0 : i64, scratch_operands = 0 : i64, tpu.core_type = #tpu.core_type<tc>, window_params = [{transform_indices = @transform_0, window_bounds = array<i64: 32, 128>}, {pipeline_mode = #tpu.pipeline_mode<synchronous>, transform_indices = @transform_1, window_bounds = array<i64: 128, 64>}, {pipeline_mode = #tpu.pipeline_mode<synchronous>, transform_indices = @transform_2, window_bounds = array<i64: 1, 64>}, {transform_indices = @transform_3, window_bounds = array<i64: 32, 64>}]} {
    %c0 = arith.constant 0 : index
    %c0_0 = arith.constant 0 : index
    %0 = vector.load %arg1[%c0, %c0_0] : memref<32x128xbf16, #tpu.memory_space<vmem>>, vector<32x128xbf16>
    %c0_1 = arith.constant 0 : index
    %c0_2 = arith.constant 0 : index
    %1 = vector.load %arg2[%c0_1, %c0_2] : memref<128x64xbf16, #tpu.memory_space<vmem>>, vector<128x64xbf16>
    %cst = arith.constant dense<0.000000e+00> : vector<32x64xf32>
    %2 = tpu.matmul %0, %1, %cst {dimension_numbers = #tpu.dot_dimension_numbers<[1], [0], [0], [1], [0, 0, 1, 1], [], []>} : vector<32x128xbf16>, vector<128x64xbf16>, vector<32x64xf32> -> vector<32x64xf32>
    %c0_3 = arith.constant 0 : index
    %c0_4 = arith.constant 0 : index
    %3 = vector.load %arg3[%c0_3, %c0_4] : memref<1x64xf32, #tpu.memory_space<vmem>>, vector<1x64xf32>
    %4 = vector.broadcast %3 : vector<1x64xf32> to vector<32x64xf32>
    %5 = arith.addf %2, %4 : vector<32x64xf32>
    %cst_5 = arith.constant 0.000000e+00 : f32
    %6 = vector.broadcast %cst_5 : f32 to vector<32x64xf32>
    %7 = arith.maximumf %5, %6 : vector<32x64xf32>
    %8 = arith.truncf %7 : vector<32x64xf32> to vector<32x64xbf16>
    %c0_6 = arith.constant 0 : index
    %c0_7 = arith.constant 0 : index
    %9 = vector.load %arg4[%c0_6, %c0_7] : memref<32x64xbf16, #tpu.memory_space<vmem>>, vector<32x64xbf16>
    tpu.vector_store %arg4[%c0_6, %c0_7], %8 {strides = array<i32>} : memref<32x64xbf16, #tpu.memory_space<vmem>>, vector<32x64xbf16>,
    return
  }
  func.func @transform_0(%arg0: i32) -> (i32, i32) {
    %c0_i32 = arith.constant 0 : i32
    %c0_i32_0 = arith.constant 0 : i32
    return %arg0, %c0_i32 : i32, i32
  }
  func.func @transform_1(%arg0: i32) -> (i32, i32) {
    %c0_i32 = arith.constant 0 : i32
    %c0_i32_0 = arith.constant 0 : i32
    %c0_i32_1 = arith.constant 0 : i32
    return %c0_i32, %c0_i32_0 : i32, i32
  }
  func.func @transform_2(%arg0: i32) -> (i32, i32) {
    %c0_i32 = arith.constant 0 : i32
    %c0_i32_0 = arith.constant 0 : i32
    %c0_i32_1 = arith.constant 0 : i32
    return %c0_i32, %c0_i32_0 : i32, i32
  }
  func.func @transform_3(%arg0: i32) -> (i32, i32) {
    %c0_i32 = arith.constant 0 : i32
    %c0_i32_0 = arith.constant 0 : i32
    return %arg0, %c0_i32 : i32, i32
  }
}

module attributes {stable_mosaic.version = 11 : i64} {
  func.func @_knn_kernel(%arg0: i32, %arg1: i32, %arg2: memref<1x16x66xf32, #tpu.memory_space<vmem>>, %arg3: memref<1x66x16xf32, #tpu.memory_space<vmem>>, %arg4: memref<1x16x8xi32, #tpu.memory_space<vmem>>) attributes {dimension_semantics = [#tpu.dimension_semantics<parallel>, #tpu.dimension_semantics<parallel>], iteration_bounds = array<i64: 2, 1>, scalar_prefetch = 0 : i64, scratch_operands = 0 : i64, tpu.core_type = #tpu.core_type<tc>, window_params = [{transform_indices = @transform_0, window_bounds = array<i64: 1, 16, 66>}, {transform_indices = @transform_1, window_bounds = array<i64: 1, 66, 16>}, {transform_indices = @transform_2, window_bounds = array<i64: 1, 16, 8>}]} {
    %c0 = arith.constant 0 : index
    %c0_0 = arith.constant 0 : index
    %c0_1 = arith.constant 0 : index
    %0 = vector.load %arg2[%c0, %c0_0, %c0_1] : memref<1x16x66xf32, #tpu.memory_space<vmem>>, vector<1x16x66xf32>
    %1 = vector.shape_cast %0 : vector<1x16x66xf32> to vector<16x66xf32>
    %c0_2 = arith.constant 0 : index
    %c0_3 = arith.constant 0 : index
    %c0_4 = arith.constant 0 : index
    %2 = vector.load %arg3[%c0_2, %c0_3, %c0_4] : memref<1x66x16xf32, #tpu.memory_space<vmem>>, vector<1x66x16xf32>
    %3 = vector.shape_cast %2 : vector<1x66x16xf32> to vector<66x16xf32>
    %cst = arith.constant dense<0.000000e+00> : vector<16x16xf32>
    %4 = tpu.matmul %1, %3, %cst {dimension_numbers = #tpu.dot_dimension_numbers<[1], [0], [0], [1], [0, 0, 1, 1], [], []>} : vector<16x66xf32>, vector<66x16xf32>, vector<16x16xf32> -> vector<16x16xf32>
    %5 = tpu.iota {dimensions = array<i32: 1>} : vector<16x16xi32>
    %6 = arith.sitofp %5 : vector<16x16xi32> to vector<16x16xf32>
    %cst_5 = arith.constant dense<0x7F800000> : vector<16xf32>
    %7 = vector.multi_reduction <minimumf>, %4, %cst_5 [1] : vector<16x16xf32> to vector<16xf32>
    %8 = vector.shape_cast %7 : vector<16xf32> to vector<16x1xf32>
    %9 = vector.broadcast %8 : vector<16x1xf32> to vector<16x16xf32>
    %10 = arith.cmpf oeq, %4, %9 : vector<16x16xf32>
    %cst_6 = arith.constant 1.600000e+01 : f32
    %11 = vector.broadcast %cst_6 : f32 to vector<16x16xf32>
    %12 = arith.select %10, %6, %11 : vector<16x16xi1>, vector<16x16xf32>
    %cst_7 = arith.constant dense<0x7F800000> : vector<16xf32>
    %13 = vector.multi_reduction <minimumf>, %12, %cst_7 [1] : vector<16x16xf32> to vector<16xf32>
    %14 = vector.shape_cast %13 : vector<16xf32> to vector<16x1xf32>
    %15 = vector.broadcast %14 : vector<16x1xf32> to vector<16x16xf32>
    %16 = arith.cmpf oeq, %6, %15 : vector<16x16xf32>
    %cst_8 = arith.constant 0x7F800000 : f32
    %17 = vector.broadcast %cst_8 : f32 to vector<16x16xf32>
    %18 = arith.select %16, %17, %4 : vector<16x16xi1>, vector<16x16xf32>
    %cst_9 = arith.constant dense<0x7F800000> : vector<16xf32>
    %19 = vector.multi_reduction <minimumf>, %18, %cst_9 [1] : vector<16x16xf32> to vector<16xf32>
    %20 = vector.shape_cast %19 : vector<16xf32> to vector<16x1xf32>
    %21 = vector.broadcast %20 : vector<16x1xf32> to vector<16x16xf32>
    %22 = arith.cmpf oeq, %18, %21 : vector<16x16xf32>
    %cst_10 = arith.constant 1.600000e+01 : f32
    %23 = vector.broadcast %cst_10 : f32 to vector<16x16xf32>
    %24 = arith.select %22, %6, %23 : vector<16x16xi1>, vector<16x16xf32>
    %cst_11 = arith.constant dense<0x7F800000> : vector<16xf32>
    %25 = vector.multi_reduction <minimumf>, %24, %cst_11 [1] : vector<16x16xf32> to vector<16xf32>
    %26 = vector.shape_cast %25 : vector<16xf32> to vector<16x1xf32>
    %27 = vector.broadcast %26 : vector<16x1xf32> to vector<16x16xf32>
    %28 = arith.cmpf oeq, %6, %27 : vector<16x16xf32>
    %cst_12 = arith.constant 0x7F800000 : f32
    %29 = vector.broadcast %cst_12 : f32 to vector<16x16xf32>
    %30 = arith.select %28, %29, %18 : vector<16x16xi1>, vector<16x16xf32>
    %cst_13 = arith.constant dense<0x7F800000> : vector<16xf32>
    %31 = vector.multi_reduction <minimumf>, %30, %cst_13 [1] : vector<16x16xf32> to vector<16xf32>
    %32 = vector.shape_cast %31 : vector<16xf32> to vector<16x1xf32>
    %33 = vector.broadcast %32 : vector<16x1xf32> to vector<16x16xf32>
    %34 = arith.cmpf oeq, %30, %33 : vector<16x16xf32>
    %cst_14 = arith.constant 1.600000e+01 : f32
    %35 = vector.broadcast %cst_14 : f32 to vector<16x16xf32>
    %36 = arith.select %34, %6, %35 : vector<16x16xi1>, vector<16x16xf32>
    %cst_15 = arith.constant dense<0x7F800000> : vector<16xf32>
    %37 = vector.multi_reduction <minimumf>, %36, %cst_15 [1] : vector<16x16xf32> to vector<16xf32>
    %38 = vector.shape_cast %37 : vector<16xf32> to vector<16x1xf32>
    %39 = vector.broadcast %38 : vector<16x1xf32> to vector<16x16xf32>
    %40 = arith.cmpf oeq, %6, %39 : vector<16x16xf32>
    %cst_16 = arith.constant 0x7F800000 : f32
    %41 = vector.broadcast %cst_16 : f32 to vector<16x16xf32>
    %42 = arith.select %40, %41, %30 : vector<16x16xi1>, vector<16x16xf32>
    %cst_17 = arith.constant dense<0x7F800000> : vector<16xf32>
    %43 = vector.multi_reduction <minimumf>, %42, %cst_17 [1] : vector<16x16xf32> to vector<16xf32>
    %44 = vector.shape_cast %43 : vector<16xf32> to vector<16x1xf32>
    %45 = vector.broadcast %44 : vector<16x1xf32> to vector<16x16xf32>
    %46 = arith.cmpf oeq, %42, %45 : vector<16x16xf32>
    %cst_18 = arith.constant 1.600000e+01 : f32
    %47 = vector.broadcast %cst_18 : f32 to vector<16x16xf32>
    %48 = arith.select %46, %6, %47 : vector<16x16xi1>, vector<16x16xf32>
    %cst_19 = arith.constant dense<0x7F800000> : vector<16xf32>
    %49 = vector.multi_reduction <minimumf>, %48, %cst_19 [1] : vector<16x16xf32> to vector<16xf32>
    %50 = vector.shape_cast %49 : vector<16xf32> to vector<16x1xf32>
    %51 = vector.broadcast %50 : vector<16x1xf32> to vector<16x16xf32>
    %52 = arith.cmpf oeq, %6, %51 : vector<16x16xf32>
    %cst_20 = arith.constant 0x7F800000 : f32
    %53 = vector.broadcast %cst_20 : f32 to vector<16x16xf32>
    %54 = arith.select %52, %53, %42 : vector<16x16xi1>, vector<16x16xf32>
    %cst_21 = arith.constant dense<0x7F800000> : vector<16xf32>
    %55 = vector.multi_reduction <minimumf>, %54, %cst_21 [1] : vector<16x16xf32> to vector<16xf32>
    %56 = vector.shape_cast %55 : vector<16xf32> to vector<16x1xf32>
    %57 = vector.broadcast %56 : vector<16x1xf32> to vector<16x16xf32>
    %58 = arith.cmpf oeq, %54, %57 : vector<16x16xf32>
    %cst_22 = arith.constant 1.600000e+01 : f32
    %59 = vector.broadcast %cst_22 : f32 to vector<16x16xf32>
    %60 = arith.select %58, %6, %59 : vector<16x16xi1>, vector<16x16xf32>
    %cst_23 = arith.constant dense<0x7F800000> : vector<16xf32>
    %61 = vector.multi_reduction <minimumf>, %60, %cst_23 [1] : vector<16x16xf32> to vector<16xf32>
    %62 = vector.shape_cast %61 : vector<16xf32> to vector<16x1xf32>
    %63 = vector.broadcast %62 : vector<16x1xf32> to vector<16x16xf32>
    %64 = arith.cmpf oeq, %6, %63 : vector<16x16xf32>
    %cst_24 = arith.constant 0x7F800000 : f32
    %65 = vector.broadcast %cst_24 : f32 to vector<16x16xf32>
    %66 = arith.select %64, %65, %54 : vector<16x16xi1>, vector<16x16xf32>
    %cst_25 = arith.constant dense<0x7F800000> : vector<16xf32>
    %67 = vector.multi_reduction <minimumf>, %66, %cst_25 [1] : vector<16x16xf32> to vector<16xf32>
    %68 = vector.shape_cast %67 : vector<16xf32> to vector<16x1xf32>
    %69 = vector.broadcast %68 : vector<16x1xf32> to vector<16x16xf32>
    %70 = arith.cmpf oeq, %66, %69 : vector<16x16xf32>
    %cst_26 = arith.constant 1.600000e+01 : f32
    %71 = vector.broadcast %cst_26 : f32 to vector<16x16xf32>
    %72 = arith.select %70, %6, %71 : vector<16x16xi1>, vector<16x16xf32>
    %cst_27 = arith.constant dense<0x7F800000> : vector<16xf32>
    %73 = vector.multi_reduction <minimumf>, %72, %cst_27 [1] : vector<16x16xf32> to vector<16xf32>
    %74 = vector.shape_cast %73 : vector<16xf32> to vector<16x1xf32>
    %75 = vector.broadcast %74 : vector<16x1xf32> to vector<16x16xf32>
    %76 = arith.cmpf oeq, %6, %75 : vector<16x16xf32>
    %cst_28 = arith.constant 0x7F800000 : f32
    %77 = vector.broadcast %cst_28 : f32 to vector<16x16xf32>
    %78 = arith.select %76, %77, %66 : vector<16x16xi1>, vector<16x16xf32>
    %cst_29 = arith.constant dense<0x7F800000> : vector<16xf32>
    %79 = vector.multi_reduction <minimumf>, %78, %cst_29 [1] : vector<16x16xf32> to vector<16xf32>
    %80 = vector.shape_cast %79 : vector<16xf32> to vector<16x1xf32>
    %81 = vector.broadcast %80 : vector<16x1xf32> to vector<16x16xf32>
    %82 = arith.cmpf oeq, %78, %81 : vector<16x16xf32>
    %cst_30 = arith.constant 1.600000e+01 : f32
    %83 = vector.broadcast %cst_30 : f32 to vector<16x16xf32>
    %84 = arith.select %82, %6, %83 : vector<16x16xi1>, vector<16x16xf32>
    %cst_31 = arith.constant dense<0x7F800000> : vector<16xf32>
    %85 = vector.multi_reduction <minimumf>, %84, %cst_31 [1] : vector<16x16xf32> to vector<16xf32>
    %86 = vector.shape_cast %85 : vector<16xf32> to vector<16x1xf32>
    %87 = vector.broadcast %86 : vector<16x1xf32> to vector<16x16xf32>
    %88 = arith.cmpf oeq, %6, %87 : vector<16x16xf32>
    %cst_32 = arith.constant 0x7F800000 : f32
    %89 = vector.broadcast %cst_32 : f32 to vector<16x16xf32>
    %90 = arith.select %88, %89, %78 : vector<16x16xi1>, vector<16x16xf32>
    %cst_33 = arith.constant dense<0x7F800000> : vector<16xf32>
    %91 = vector.multi_reduction <minimumf>, %90, %cst_33 [1] : vector<16x16xf32> to vector<16xf32>
    %92 = vector.shape_cast %91 : vector<16xf32> to vector<16x1xf32>
    %93 = vector.broadcast %92 : vector<16x1xf32> to vector<16x16xf32>
    %94 = arith.cmpf oeq, %90, %93 : vector<16x16xf32>
    %cst_34 = arith.constant 1.600000e+01 : f32
    %95 = vector.broadcast %cst_34 : f32 to vector<16x16xf32>
    %96 = arith.select %94, %6, %95 : vector<16x16xi1>, vector<16x16xf32>
    %cst_35 = arith.constant dense<0x7F800000> : vector<16xf32>
    %97 = vector.multi_reduction <minimumf>, %96, %cst_35 [1] : vector<16x16xf32> to vector<16xf32>
    %98 = vector.shape_cast %97 : vector<16xf32> to vector<16x1xf32>
    %99 = tpu.concatenate %14, %26, %38, %50, %62, %74, %86, %98 in 1 : vector<16x1xf32>, vector<16x1xf32>, vector<16x1xf32>, vector<16x1xf32>, vector<16x1xf32>, vector<16x1xf32>, vector<16x1xf32>, vector<16x1xf32> -> vector<16x8xf32>
    %100 = arith.fptosi %99 : vector<16x8xf32> to vector<16x8xi32>
    %c0_36 = arith.constant 0 : index
    %c0_37 = arith.constant 0 : index
    %c0_38 = arith.constant 0 : index
    %101 = vector.load %arg4[%c0_36, %c0_37, %c0_38] : memref<1x16x8xi32, #tpu.memory_space<vmem>>, vector<1x16x8xi32>
    %102 = vector.shape_cast %101 : vector<1x16x8xi32> to vector<16x8xi32>
    %103 = vector.shape_cast %100 : vector<16x8xi32> to vector<1x16x8xi32>
    tpu.vector_store %arg4[%c0_36, %c0_37, %c0_38], %103 {strides = array<i32>} : memref<1x16x8xi32, #tpu.memory_space<vmem>>, vector<1x16x8xi32>,
    return
  }
  func.func @transform_0(%arg0: i32, %arg1: i32) -> (i32, i32, i32) {
    %c0_i32 = arith.constant 0 : i32
    %c0_i32_0 = arith.constant 0 : i32
    return %arg0, %arg1, %c0_i32 : i32, i32, i32
  }
  func.func @transform_1(%arg0: i32, %arg1: i32) -> (i32, i32, i32) {
    %c0_i32 = arith.constant 0 : i32
    %c0_i32_0 = arith.constant 0 : i32
    %c0_i32_1 = arith.constant 0 : i32
    return %arg0, %c0_i32, %c0_i32_0 : i32, i32, i32
  }
  func.func @transform_2(%arg0: i32, %arg1: i32) -> (i32, i32, i32) {
    %c0_i32 = arith.constant 0 : i32
    %c0_i32_0 = arith.constant 0 : i32
    return %arg0, %arg1, %c0_i32 : i32, i32, i32
  }
}

module attributes {stable_mosaic.version = 11 : i64} {
  func.func @_edge_block_kernel(%arg0: i32, %arg1: i32, %arg2: memref<1x16x64xbf16, #tpu.memory_space<vmem>>, %arg3: memref<1x8x16x64xbf16, #tpu.memory_space<vmem>>, %arg4: memref<64x64xbf16, #tpu.memory_space<vmem>>, %arg5: memref<64x64xbf16, #tpu.memory_space<vmem>>, %arg6: memref<1x64xf32, #tpu.memory_space<vmem>>, %arg7: memref<1x16x128xbf16, #tpu.memory_space<vmem>>) attributes {dimension_semantics = [#tpu.dimension_semantics<parallel>, #tpu.dimension_semantics<parallel>], iteration_bounds = array<i64: 2, 1>, scalar_prefetch = 0 : i64, scratch_operands = 0 : i64, tpu.core_type = #tpu.core_type<tc>, window_params = [{transform_indices = @transform_0, window_bounds = array<i64: 1, 16, 64>}, {transform_indices = @transform_1, window_bounds = array<i64: 1, 8, 16, 64>}, {pipeline_mode = #tpu.pipeline_mode<synchronous>, transform_indices = @transform_2, window_bounds = array<i64: 64, 64>}, {pipeline_mode = #tpu.pipeline_mode<synchronous>, transform_indices = @transform_3, window_bounds = array<i64: 64, 64>}, {pipeline_mode = #tpu.pipeline_mode<synchronous>, transform_indices = @transform_4, window_bounds = array<i64: 1, 64>}, {transform_indices = @transform_5, window_bounds = array<i64: 1, 16, 128>}]} {
    %c0 = arith.constant 0 : index
    %c0_0 = arith.constant 0 : index
    %c0_1 = arith.constant 0 : index
    %0 = vector.load %arg2[%c0, %c0_0, %c0_1] : memref<1x16x64xbf16, #tpu.memory_space<vmem>>, vector<1x16x64xbf16>
    %1 = vector.shape_cast %0 : vector<1x16x64xbf16> to vector<16x64xbf16>
    %c0_2 = arith.constant 0 : index
    %c0_3 = arith.constant 0 : index
    %2 = vector.load %arg4[%c0_2, %c0_3] : memref<64x64xbf16, #tpu.memory_space<vmem>>, vector<64x64xbf16>
    %c0_4 = arith.constant 0 : index
    %c0_5 = arith.constant 0 : index
    %3 = vector.load %arg5[%c0_4, %c0_5] : memref<64x64xbf16, #tpu.memory_space<vmem>>, vector<64x64xbf16>
    %c0_6 = arith.constant 0 : index
    %c0_7 = arith.constant 0 : index
    %4 = vector.load %arg6[%c0_6, %c0_7] : memref<1x64xf32, #tpu.memory_space<vmem>>, vector<1x64xf32>
    %cst = arith.constant dense<0.000000e+00> : vector<16x64xf32>
    %5 = tpu.matmul %1, %3, %cst {dimension_numbers = #tpu.dot_dimension_numbers<[1], [0], [0], [1], [0, 0, 1, 1], [], []>} : vector<16x64xbf16>, vector<64x64xbf16>, vector<16x64xf32> -> vector<16x64xf32>
    %6 = vector.broadcast %4 : vector<1x64xf32> to vector<16x64xf32>
    %7 = arith.addf %5, %6 : vector<16x64xf32>
    %c0_8 = arith.constant 0 : index
    %c0_9 = arith.constant 0 : index
    %c0_10 = arith.constant 0 : index
    %c0_11 = arith.constant 0 : index
    %8 = vector.load %arg3[%c0_8, %c0_9, %c0_10, %c0_11] : memref<1x8x16x64xbf16, #tpu.memory_space<vmem>>, vector<1x8x16x64xbf16>
    %9 = vector.shape_cast %8 : vector<1x8x16x64xbf16> to vector<8x16x64xbf16>
    %10 = vector.shape_cast %9 : vector<8x16x64xbf16> to vector<128x64xbf16>
    %cst_12 = arith.constant dense<0.000000e+00> : vector<128x64xf32>
    %11 = tpu.matmul %10, %2, %cst_12 {dimension_numbers = #tpu.dot_dimension_numbers<[1], [0], [0], [1], [0, 0, 1, 1], [], []>} : vector<128x64xbf16>, vector<64x64xbf16>, vector<128x64xf32> -> vector<128x64xf32>
    %12 = vector.shape_cast %11 : vector<128x64xf32> to vector<8x16x64xf32>
    %13 = vector.shape_cast %7 : vector<16x64xf32> to vector<1x16x64xf32>
    %14 = vector.broadcast %13 : vector<1x16x64xf32> to vector<8x16x64xf32>
    %15 = arith.addf %12, %14 : vector<8x16x64xf32>
    %cst_13 = arith.constant 0.000000e+00 : f32
    %16 = vector.broadcast %cst_13 : f32 to vector<8x16x64xf32>
    %17 = arith.maximumf %15, %16 : vector<8x16x64xf32>
    %cst_14 = arith.constant dense<0xFF800000> : vector<16x64xf32>
    %18 = vector.multi_reduction <maximumf>, %17, %cst_14 [0] : vector<8x16x64xf32> to vector<16x64xf32>
    %cst_15 = arith.constant dense<0.000000e+00> : vector<16x64xf32>
    %19 = vector.multi_reduction <add>, %17, %cst_15 [0] : vector<8x16x64xf32> to vector<16x64xf32>
    %cst_16 = arith.constant 1.250000e-01 : f32
    %20 = vector.broadcast %cst_16 : f32 to vector<16x64xf32>
    %21 = arith.mulf %19, %20 : vector<16x64xf32>
    %22 = tpu.concatenate %18, %21 in 1 : vector<16x64xf32>, vector<16x64xf32> -> vector<16x128xf32>
    %23 = arith.truncf %22 : vector<16x128xf32> to vector<16x128xbf16>
    %c0_17 = arith.constant 0 : index
    %c0_18 = arith.constant 0 : index
    %c0_19 = arith.constant 0 : index
    %24 = vector.load %arg7[%c0_17, %c0_18, %c0_19] : memref<1x16x128xbf16, #tpu.memory_space<vmem>>, vector<1x16x128xbf16>
    %25 = vector.shape_cast %24 : vector<1x16x128xbf16> to vector<16x128xbf16>
    %26 = vector.shape_cast %23 : vector<16x128xbf16> to vector<1x16x128xbf16>
    tpu.vector_store %arg7[%c0_17, %c0_18, %c0_19], %26 {strides = array<i32>} : memref<1x16x128xbf16, #tpu.memory_space<vmem>>, vector<1x16x128xbf16>,
    return
  }
  func.func @transform_0(%arg0: i32, %arg1: i32) -> (i32, i32, i32) {
    %c0_i32 = arith.constant 0 : i32
    %c0_i32_0 = arith.constant 0 : i32
    return %arg0, %arg1, %c0_i32 : i32, i32, i32
  }
  func.func @transform_1(%arg0: i32, %arg1: i32) -> (i32, i32, i32, i32) {
    %c0_i32 = arith.constant 0 : i32
    %c0_i32_0 = arith.constant 0 : i32
    %c0_i32_1 = arith.constant 0 : i32
    return %arg0, %c0_i32, %arg1, %c0_i32_0 : i32, i32, i32, i32
  }
  func.func @transform_2(%arg0: i32, %arg1: i32) -> (i32, i32) {
    %c0_i32 = arith.constant 0 : i32
    %c0_i32_0 = arith.constant 0 : i32
    %c0_i32_1 = arith.constant 0 : i32
    return %c0_i32, %c0_i32_0 : i32, i32
  }
  func.func @transform_3(%arg0: i32, %arg1: i32) -> (i32, i32) {
    %c0_i32 = arith.constant 0 : i32
    %c0_i32_0 = arith.constant 0 : i32
    %c0_i32_1 = arith.constant 0 : i32
    return %c0_i32, %c0_i32_0 : i32, i32
  }
  func.func @transform_4(%arg0: i32, %arg1: i32) -> (i32, i32) {
    %c0_i32 = arith.constant 0 : i32
    %c0_i32_0 = arith.constant 0 : i32
    %c0_i32_1 = arith.constant 0 : i32
    return %c0_i32, %c0_i32_0 : i32, i32
  }
  func.func @transform_5(%arg0: i32, %arg1: i32) -> (i32, i32, i32) {
    %c0_i32 = arith.constant 0 : i32
    %c0_i32_0 = arith.constant 0 : i32
    return %arg0, %arg1, %c0_i32 : i32, i32, i32
  }
}

module attributes {stable_mosaic.version = 11 : i64} {
  func.func @_mlp_max_kernel(%arg0: i32, %arg1: i32, %arg2: memref<1x16x64xbf16, #tpu.memory_space<vmem>>, %arg3: memref<1x16x64xbf16, #tpu.memory_space<vmem>>, %arg4: memref<1x16x64xbf16, #tpu.memory_space<vmem>>, %arg5: memref<192x1024xbf16, #tpu.memory_space<vmem>>, %arg6: memref<1x1024xf32, #tpu.memory_space<vmem>>, %arg7: memref<1x16x1024xbf16, #tpu.memory_space<vmem>>, %arg8: memref<1x1x1024xf32, #tpu.memory_space<vmem>>) attributes {dimension_semantics = [#tpu.dimension_semantics<parallel>, #tpu.dimension_semantics<arbitrary>], iteration_bounds = array<i64: 2, 1>, scalar_prefetch = 0 : i64, scratch_operands = 0 : i64, tpu.core_type = #tpu.core_type<tc>, window_params = [{transform_indices = @transform_0, window_bounds = array<i64: 1, 16, 64>}, {transform_indices = @transform_1, window_bounds = array<i64: 1, 16, 64>}, {transform_indices = @transform_2, window_bounds = array<i64: 1, 16, 64>}, {pipeline_mode = #tpu.pipeline_mode<synchronous>, transform_indices = @transform_3, window_bounds = array<i64: 192, 1024>}, {pipeline_mode = #tpu.pipeline_mode<synchronous>, transform_indices = @transform_4, window_bounds = array<i64: 1, 1024>}, {transform_indices = @transform_5, window_bounds = array<i64: 1, 16, 1024>}, {transform_indices = @transform_6, window_bounds = array<i64: 1, 1, 1024>}]} {
    %c0_i32 = arith.constant 0 : i32
    %0 = arith.cmpi eq, %arg1, %c0_i32 : i32
    %1 = arith.extui %0 : i1 to i32
    %c0_i32_0 = arith.constant 0 : i32
    %2 = arith.cmpi ne, %1, %c0_i32_0 : i32
    scf.if %2 {
      %cst_28 = arith.constant 0xFF800000 : f32
      %34 = vector.broadcast %cst_28 : f32 to vector<1x1x1024xf32>
      %c0_29 = arith.constant 0 : index
      %c0_30 = arith.constant 0 : index
      %c0_31 = arith.constant 0 : index
      %35 = vector.load %arg8[%c0_29, %c0_30, %c0_31] : memref<1x1x1024xf32, #tpu.memory_space<vmem>>, vector<1x1x1024xf32>
      tpu.vector_store %arg8[%c0_29, %c0_30, %c0_31], %34 {strides = array<i32>} : memref<1x1x1024xf32, #tpu.memory_space<vmem>>, vector<1x1x1024xf32>,
    } else {
    }
    %c0 = arith.constant 0 : index
    %c0_1 = arith.constant 0 : index
    %c0_2 = arith.constant 0 : index
    %3 = vector.load %arg2[%c0, %c0_1, %c0_2] : memref<1x16x64xbf16, #tpu.memory_space<vmem>>, vector<1x16x64xbf16>
    %4 = vector.shape_cast %3 : vector<1x16x64xbf16> to vector<16x64xbf16>
    %c0_3 = arith.constant 0 : index
    %c0_4 = arith.constant 0 : index
    %5 = vector.load %arg5[%c0_3, %c0_4] : memref<192x1024xbf16, #tpu.memory_space<vmem>>, vector<64x1024xbf16>
    %cst = arith.constant dense<0.000000e+00> : vector<16x1024xf32>
    %6 = tpu.matmul %4, %5, %cst {dimension_numbers = #tpu.dot_dimension_numbers<[1], [0], [0], [1], [0, 0, 1, 1], [], []>} : vector<16x64xbf16>, vector<64x1024xbf16>, vector<16x1024xf32> -> vector<16x1024xf32>
    %c0_5 = arith.constant 0 : index
    %c0_6 = arith.constant 0 : index
    %c0_7 = arith.constant 0 : index
    %7 = vector.load %arg3[%c0_5, %c0_6, %c0_7] : memref<1x16x64xbf16, #tpu.memory_space<vmem>>, vector<1x16x64xbf16>
    %8 = vector.shape_cast %7 : vector<1x16x64xbf16> to vector<16x64xbf16>
    %c64 = arith.constant 64 : index
    %c0_8 = arith.constant 0 : index
    %9 = vector.load %arg5[%c64, %c0_8] : memref<192x1024xbf16, #tpu.memory_space<vmem>>, vector<64x1024xbf16>
    %cst_9 = arith.constant dense<0.000000e+00> : vector<16x1024xf32>
    %10 = tpu.matmul %8, %9, %cst_9 {dimension_numbers = #tpu.dot_dimension_numbers<[1], [0], [0], [1], [0, 0, 1, 1], [], []>} : vector<16x64xbf16>, vector<64x1024xbf16>, vector<16x1024xf32> -> vector<16x1024xf32>
    %11 = arith.addf %6, %10 : vector<16x1024xf32>
    %c0_10 = arith.constant 0 : index
    %c0_11 = arith.constant 0 : index
    %c0_12 = arith.constant 0 : index
    %12 = vector.load %arg4[%c0_10, %c0_11, %c0_12] : memref<1x16x64xbf16, #tpu.memory_space<vmem>>, vector<1x16x64xbf16>
    %13 = vector.shape_cast %12 : vector<1x16x64xbf16> to vector<16x64xbf16>
    %c128 = arith.constant 128 : index
    %c0_13 = arith.constant 0 : index
    %14 = vector.load %arg5[%c128, %c0_13] : memref<192x1024xbf16, #tpu.memory_space<vmem>>, vector<64x1024xbf16>
    %cst_14 = arith.constant dense<0.000000e+00> : vector<16x1024xf32>
    %15 = tpu.matmul %13, %14, %cst_14 {dimension_numbers = #tpu.dot_dimension_numbers<[1], [0], [0], [1], [0, 0, 1, 1], [], []>} : vector<16x64xbf16>, vector<64x1024xbf16>, vector<16x1024xf32> -> vector<16x1024xf32>
    %16 = arith.addf %11, %15 : vector<16x1024xf32>
    %c0_15 = arith.constant 0 : index
    %c0_16 = arith.constant 0 : index
    %17 = vector.load %arg6[%c0_15, %c0_16] : memref<1x1024xf32, #tpu.memory_space<vmem>>, vector<1x1024xf32>
    %18 = vector.broadcast %17 : vector<1x1024xf32> to vector<16x1024xf32>
    %19 = arith.addf %16, %18 : vector<16x1024xf32>
    %cst_17 = arith.constant 0.000000e+00 : f32
    %20 = vector.broadcast %cst_17 : f32 to vector<16x1024xf32>
    %21 = arith.maximumf %19, %20 : vector<16x1024xf32>
    %22 = arith.truncf %21 : vector<16x1024xf32> to vector<16x1024xbf16>
    %c0_18 = arith.constant 0 : index
    %c0_19 = arith.constant 0 : index
    %c0_20 = arith.constant 0 : index
    %23 = vector.load %arg7[%c0_18, %c0_19, %c0_20] : memref<1x16x1024xbf16, #tpu.memory_space<vmem>>, vector<1x16x1024xbf16>
    %24 = vector.shape_cast %23 : vector<1x16x1024xbf16> to vector<16x1024xbf16>
    %25 = vector.shape_cast %22 : vector<16x1024xbf16> to vector<1x16x1024xbf16>
    tpu.vector_store %arg7[%c0_18, %c0_19, %c0_20], %25 {strides = array<i32>} : memref<1x16x1024xbf16, #tpu.memory_space<vmem>>, vector<1x16x1024xbf16>,
    %c0_21 = arith.constant 0 : index
    %c0_22 = arith.constant 0 : index
    %c0_23 = arith.constant 0 : index
    %26 = vector.load %arg8[%c0_21, %c0_22, %c0_23] : memref<1x1x1024xf32, #tpu.memory_space<vmem>>, vector<1x1x1024xf32>
    %27 = vector.shape_cast %26 : vector<1x1x1024xf32> to vector<1x1024xf32>
    %cst_24 = arith.constant dense<0xFF800000> : vector<1024xf32>
    %28 = vector.multi_reduction <maximumf>, %21, %cst_24 [0] : vector<16x1024xf32> to vector<1024xf32>
    %29 = vector.shape_cast %28 : vector<1024xf32> to vector<1x1024xf32>
    %30 = arith.maximumf %27, %29 : vector<1x1024xf32>
    %c0_25 = arith.constant 0 : index
    %c0_26 = arith.constant 0 : index
    %c0_27 = arith.constant 0 : index
    %31 = vector.load %arg8[%c0_25, %c0_26, %c0_27] : memref<1x1x1024xf32, #tpu.memory_space<vmem>>, vector<1x1x1024xf32>
    %32 = vector.shape_cast %31 : vector<1x1x1024xf32> to vector<1x1024xf32>
    %33 = vector.shape_cast %30 : vector<1x1024xf32> to vector<1x1x1024xf32>
    tpu.vector_store %arg8[%c0_25, %c0_26, %c0_27], %33 {strides = array<i32>} : memref<1x1x1024xf32, #tpu.memory_space<vmem>>, vector<1x1x1024xf32>,
    return
  }
  func.func @transform_0(%arg0: i32, %arg1: i32) -> (i32, i32, i32) {
    %c0_i32 = arith.constant 0 : i32
    %c0_i32_0 = arith.constant 0 : i32
    return %arg0, %arg1, %c0_i32 : i32, i32, i32
  }
  func.func @transform_1(%arg0: i32, %arg1: i32) -> (i32, i32, i32) {
    %c0_i32 = arith.constant 0 : i32
    %c0_i32_0 = arith.constant 0 : i32
    return %arg0, %arg1, %c0_i32 : i32, i32, i32
  }
  func.func @transform_2(%arg0: i32, %arg1: i32) -> (i32, i32, i32) {
    %c0_i32 = arith.constant 0 : i32
    %c0_i32_0 = arith.constant 0 : i32
    return %arg0, %arg1, %c0_i32 : i32, i32, i32
  }
  func.func @transform_3(%arg0: i32, %arg1: i32) -> (i32, i32) {
    %c0_i32 = arith.constant 0 : i32
    %c0_i32_0 = arith.constant 0 : i32
    %c0_i32_1 = arith.constant 0 : i32
    return %c0_i32, %c0_i32_0 : i32, i32
  }
  func.func @transform_4(%arg0: i32, %arg1: i32) -> (i32, i32) {
    %c0_i32 = arith.constant 0 : i32
    %c0_i32_0 = arith.constant 0 : i32
    %c0_i32_1 = arith.constant 0 : i32
    return %c0_i32, %c0_i32_0 : i32, i32
  }
  func.func @transform_5(%arg0: i32, %arg1: i32) -> (i32, i32, i32) {
    %c0_i32 = arith.constant 0 : i32
    %c0_i32_0 = arith.constant 0 : i32
    return %arg0, %arg1, %c0_i32 : i32, i32, i32
  }
  func.func @transform_6(%arg0: i32, %arg1: i32) -> (i32, i32, i32) {
    %c0_i32 = arith.constant 0 : i32
    %c0_i32_0 = arith.constant 0 : i32
    %c0_i32_1 = arith.constant 0 : i32
    return %arg0, %c0_i32, %c0_i32_0 : i32, i32, i32
  }
}

module attributes {stable_mosaic.version = 11 : i64} {
  func.func @_classifier_kernel(%arg0: i32, %arg1: i32, %arg2: memref<1x16x128xbf16, #tpu.memory_space<vmem>>, %arg3: memref<1x16x64xbf16, #tpu.memory_space<vmem>>, %arg4: memref<1x16x128xbf16, #tpu.memory_space<vmem>>, %arg5: memref<1x16x64xbf16, #tpu.memory_space<vmem>>, %arg6: memref<1x16x128xbf16, #tpu.memory_space<vmem>>, %arg7: memref<1x16x64xbf16, #tpu.memory_space<vmem>>, %arg8: memref<1x16x1024xbf16, #tpu.memory_space<vmem>>, %arg9: memref<1x1x256xf32, #tpu.memory_space<vmem>>, %arg10: memref<1600x256xbf16, #tpu.memory_space<vmem>>, %arg11: memref<256x256xbf16, #tpu.memory_space<vmem>>, %arg12: memref<1x256xf32, #tpu.memory_space<vmem>>, %arg13: memref<256x128xbf16, #tpu.memory_space<vmem>>, %arg14: memref<1x128xf32, #tpu.memory_space<vmem>>, %arg15: memref<1x16x128xf32, #tpu.memory_space<vmem>>) attributes {dimension_semantics = [#tpu.dimension_semantics<parallel>, #tpu.dimension_semantics<parallel>], iteration_bounds = array<i64: 2, 1>, scalar_prefetch = 0 : i64, scratch_operands = 0 : i64, tpu.core_type = #tpu.core_type<tc>, window_params = [{transform_indices = @transform_0, window_bounds = array<i64: 1, 16, 128>}, {transform_indices = @transform_1, window_bounds = array<i64: 1, 16, 64>}, {transform_indices = @transform_2, window_bounds = array<i64: 1, 16, 128>}, {transform_indices = @transform_3, window_bounds = array<i64: 1, 16, 64>}, {transform_indices = @transform_4, window_bounds = array<i64: 1, 16, 128>}, {transform_indices = @transform_5, window_bounds = array<i64: 1, 16, 64>}, {transform_indices = @transform_6, window_bounds = array<i64: 1, 16, 1024>}, {transform_indices = @transform_7, window_bounds = array<i64: 1, 1, 256>}, {pipeline_mode = #tpu.pipeline_mode<synchronous>, transform_indices = @transform_8, window_bounds = array<i64: 1600, 256>}, {pipeline_mode = #tpu.pipeline_mode<synchronous>, transform_indices = @transform_9, window_bounds = array<i64: 256, 256>}, {pipeline_mode = #tpu.pipeline_mode<synchronous>, transform_indices = @transform_10, window_bounds = array<i64: 1, 256>}, {pipeline_mode = #tpu.pipeline_mode<synchronous>, transform_indices = @transform_11, window_bounds = array<i64: 256, 128>}, {pipeline_mode = #tpu.pipeline_mode<synchronous>, transform_indices = @transform_12, window_bounds = array<i64: 1, 128>}, {transform_indices = @transform_13, window_bounds = array<i64: 1, 16, 128>}]} {
    %c0 = arith.constant 0 : index
    %c0_0 = arith.constant 0 : index
    %c0_1 = arith.constant 0 : index
    %0 = vector.load %arg9[%c0, %c0_0, %c0_1] : memref<1x1x256xf32, #tpu.memory_space<vmem>>, vector<1x1x256xf32>
    %1 = vector.shape_cast %0 : vector<1x1x256xf32> to vector<1x256xf32>
    %c0_2 = arith.constant 0 : index
    %c0_3 = arith.constant 0 : index
    %c0_4 = arith.constant 0 : index
    %2 = vector.load %arg2[%c0_2, %c0_3, %c0_4] : memref<1x16x128xbf16, #tpu.memory_space<vmem>>, vector<1x16x128xbf16>
    %3 = vector.shape_cast %2 : vector<1x16x128xbf16> to vector<16x128xbf16>
    %c0_5 = arith.constant 0 : index
    %c0_6 = arith.constant 0 : index
    %4 = vector.load %arg10[%c0_5, %c0_6] : memref<1600x256xbf16, #tpu.memory_space<vmem>>, vector<128x256xbf16>
    %cst = arith.constant dense<0.000000e+00> : vector<16x256xf32>
    %5 = tpu.matmul %3, %4, %cst {dimension_numbers = #tpu.dot_dimension_numbers<[1], [0], [0], [1], [0, 0, 1, 1], [], []>} : vector<16x128xbf16>, vector<128x256xbf16>, vector<16x256xf32> -> vector<16x256xf32>
    %6 = vector.broadcast %1 : vector<1x256xf32> to vector<16x256xf32>
    %7 = arith.addf %6, %5 : vector<16x256xf32>
    %c0_7 = arith.constant 0 : index
    %c0_8 = arith.constant 0 : index
    %c0_9 = arith.constant 0 : index
    %8 = vector.load %arg3[%c0_7, %c0_8, %c0_9] : memref<1x16x64xbf16, #tpu.memory_space<vmem>>, vector<1x16x64xbf16>
    %9 = vector.shape_cast %8 : vector<1x16x64xbf16> to vector<16x64xbf16>
    %c128 = arith.constant 128 : index
    %c0_10 = arith.constant 0 : index
    %10 = vector.load %arg10[%c128, %c0_10] : memref<1600x256xbf16, #tpu.memory_space<vmem>>, vector<64x256xbf16>
    %cst_11 = arith.constant dense<0.000000e+00> : vector<16x256xf32>
    %11 = tpu.matmul %9, %10, %cst_11 {dimension_numbers = #tpu.dot_dimension_numbers<[1], [0], [0], [1], [0, 0, 1, 1], [], []>} : vector<16x64xbf16>, vector<64x256xbf16>, vector<16x256xf32> -> vector<16x256xf32>
    %12 = arith.addf %7, %11 : vector<16x256xf32>
    %c0_12 = arith.constant 0 : index
    %c0_13 = arith.constant 0 : index
    %c0_14 = arith.constant 0 : index
    %13 = vector.load %arg4[%c0_12, %c0_13, %c0_14] : memref<1x16x128xbf16, #tpu.memory_space<vmem>>, vector<1x16x128xbf16>
    %14 = vector.shape_cast %13 : vector<1x16x128xbf16> to vector<16x128xbf16>
    %c192 = arith.constant 192 : index
    %c0_15 = arith.constant 0 : index
    %15 = vector.load %arg10[%c192, %c0_15] : memref<1600x256xbf16, #tpu.memory_space<vmem>>, vector<128x256xbf16>
    %cst_16 = arith.constant dense<0.000000e+00> : vector<16x256xf32>
    %16 = tpu.matmul %14, %15, %cst_16 {dimension_numbers = #tpu.dot_dimension_numbers<[1], [0], [0], [1], [0, 0, 1, 1], [], []>} : vector<16x128xbf16>, vector<128x256xbf16>, vector<16x256xf32> -> vector<16x256xf32>
    %17 = arith.addf %12, %16 : vector<16x256xf32>
    %c0_17 = arith.constant 0 : index
    %c0_18 = arith.constant 0 : index
    %c0_19 = arith.constant 0 : index
    %18 = vector.load %arg5[%c0_17, %c0_18, %c0_19] : memref<1x16x64xbf16, #tpu.memory_space<vmem>>, vector<1x16x64xbf16>
    %19 = vector.shape_cast %18 : vector<1x16x64xbf16> to vector<16x64xbf16>
    %c320 = arith.constant 320 : index
    %c0_20 = arith.constant 0 : index
    %20 = vector.load %arg10[%c320, %c0_20] : memref<1600x256xbf16, #tpu.memory_space<vmem>>, vector<64x256xbf16>
    %cst_21 = arith.constant dense<0.000000e+00> : vector<16x256xf32>
    %21 = tpu.matmul %19, %20, %cst_21 {dimension_numbers = #tpu.dot_dimension_numbers<[1], [0], [0], [1], [0, 0, 1, 1], [], []>} : vector<16x64xbf16>, vector<64x256xbf16>, vector<16x256xf32> -> vector<16x256xf32>
    %22 = arith.addf %17, %21 : vector<16x256xf32>
    %c0_22 = arith.constant 0 : index
    %c0_23 = arith.constant 0 : index
    %c0_24 = arith.constant 0 : index
    %23 = vector.load %arg6[%c0_22, %c0_23, %c0_24] : memref<1x16x128xbf16, #tpu.memory_space<vmem>>, vector<1x16x128xbf16>
    %24 = vector.shape_cast %23 : vector<1x16x128xbf16> to vector<16x128xbf16>
    %c384 = arith.constant 384 : index
    %c0_25 = arith.constant 0 : index
    %25 = vector.load %arg10[%c384, %c0_25] : memref<1600x256xbf16, #tpu.memory_space<vmem>>, vector<128x256xbf16>
    %cst_26 = arith.constant dense<0.000000e+00> : vector<16x256xf32>
    %26 = tpu.matmul %24, %25, %cst_26 {dimension_numbers = #tpu.dot_dimension_numbers<[1], [0], [0], [1], [0, 0, 1, 1], [], []>} : vector<16x128xbf16>, vector<128x256xbf16>, vector<16x256xf32> -> vector<16x256xf32>
    %27 = arith.addf %22, %26 : vector<16x256xf32>
    %c0_27 = arith.constant 0 : index
    %c0_28 = arith.constant 0 : index
    %c0_29 = arith.constant 0 : index
    %28 = vector.load %arg7[%c0_27, %c0_28, %c0_29] : memref<1x16x64xbf16, #tpu.memory_space<vmem>>, vector<1x16x64xbf16>
    %29 = vector.shape_cast %28 : vector<1x16x64xbf16> to vector<16x64xbf16>
    %c512 = arith.constant 512 : index
    %c0_30 = arith.constant 0 : index
    %30 = vector.load %arg10[%c512, %c0_30] : memref<1600x256xbf16, #tpu.memory_space<vmem>>, vector<64x256xbf16>
    %cst_31 = arith.constant dense<0.000000e+00> : vector<16x256xf32>
    %31 = tpu.matmul %29, %30, %cst_31 {dimension_numbers = #tpu.dot_dimension_numbers<[1], [0], [0], [1], [0, 0, 1, 1], [], []>} : vector<16x64xbf16>, vector<64x256xbf16>, vector<16x256xf32> -> vector<16x256xf32>
    %32 = arith.addf %27, %31 : vector<16x256xf32>
    %c0_32 = arith.constant 0 : index
    %c0_33 = arith.constant 0 : index
    %c0_34 = arith.constant 0 : index
    %33 = vector.load %arg8[%c0_32, %c0_33, %c0_34] : memref<1x16x1024xbf16, #tpu.memory_space<vmem>>, vector<1x16x1024xbf16>
    %34 = vector.shape_cast %33 : vector<1x16x1024xbf16> to vector<16x1024xbf16>
    %c576 = arith.constant 576 : index
    %c0_35 = arith.constant 0 : index
    %35 = vector.load %arg10[%c576, %c0_35] : memref<1600x256xbf16, #tpu.memory_space<vmem>>, vector<1024x256xbf16>
    %cst_36 = arith.constant dense<0.000000e+00> : vector<16x256xf32>
    %36 = tpu.matmul %34, %35, %cst_36 {dimension_numbers = #tpu.dot_dimension_numbers<[1], [0], [0], [1], [0, 0, 1, 1], [], []>} : vector<16x1024xbf16>, vector<1024x256xbf16>, vector<16x256xf32> -> vector<16x256xf32>
    %37 = arith.addf %32, %36 : vector<16x256xf32>
    %cst_37 = arith.constant 0.000000e+00 : f32
    %38 = vector.broadcast %cst_37 : f32 to vector<16x256xf32>
    %39 = arith.maximumf %37, %38 : vector<16x256xf32>
    %40 = arith.truncf %39 : vector<16x256xf32> to vector<16x256xbf16>
    %c0_38 = arith.constant 0 : index
    %c0_39 = arith.constant 0 : index
    %41 = vector.load %arg11[%c0_38, %c0_39] : memref<256x256xbf16, #tpu.memory_space<vmem>>, vector<256x256xbf16>
    %cst_40 = arith.constant dense<0.000000e+00> : vector<16x256xf32>
    %42 = tpu.matmul %40, %41, %cst_40 {dimension_numbers = #tpu.dot_dimension_numbers<[1], [0], [0], [1], [0, 0, 1, 1], [], []>} : vector<16x256xbf16>, vector<256x256xbf16>, vector<16x256xf32> -> vector<16x256xf32>
    %c0_41 = arith.constant 0 : index
    %c0_42 = arith.constant 0 : index
    %43 = vector.load %arg12[%c0_41, %c0_42] : memref<1x256xf32, #tpu.memory_space<vmem>>, vector<1x256xf32>
    %44 = vector.broadcast %43 : vector<1x256xf32> to vector<16x256xf32>
    %45 = arith.addf %42, %44 : vector<16x256xf32>
    %cst_43 = arith.constant 0.000000e+00 : f32
    %46 = vector.broadcast %cst_43 : f32 to vector<16x256xf32>
    %47 = arith.maximumf %45, %46 : vector<16x256xf32>
    %48 = arith.truncf %47 : vector<16x256xf32> to vector<16x256xbf16>
    %c0_44 = arith.constant 0 : index
    %c0_45 = arith.constant 0 : index
    %49 = vector.load %arg13[%c0_44, %c0_45] : memref<256x128xbf16, #tpu.memory_space<vmem>>, vector<256x128xbf16>
    %cst_46 = arith.constant dense<0.000000e+00> : vector<16x128xf32>
    %50 = tpu.matmul %48, %49, %cst_46 {dimension_numbers = #tpu.dot_dimension_numbers<[1], [0], [0], [1], [0, 0, 1, 1], [], []>} : vector<16x256xbf16>, vector<256x128xbf16>, vector<16x128xf32> -> vector<16x128xf32>
    %c0_47 = arith.constant 0 : index
    %c0_48 = arith.constant 0 : index
    %51 = vector.load %arg14[%c0_47, %c0_48] : memref<1x128xf32, #tpu.memory_space<vmem>>, vector<1x128xf32>
    %52 = vector.broadcast %51 : vector<1x128xf32> to vector<16x128xf32>
    %53 = arith.addf %50, %52 : vector<16x128xf32>
    %c0_49 = arith.constant 0 : index
    %c0_50 = arith.constant 0 : index
    %c0_51 = arith.constant 0 : index
    %54 = vector.load %arg15[%c0_49, %c0_50, %c0_51] : memref<1x16x128xf32, #tpu.memory_space<vmem>>, vector<1x16x128xf32>
    %55 = vector.shape_cast %54 : vector<1x16x128xf32> to vector<16x128xf32>
    %56 = vector.shape_cast %53 : vector<16x128xf32> to vector<1x16x128xf32>
    tpu.vector_store %arg15[%c0_49, %c0_50, %c0_51], %56 {strides = array<i32>} : memref<1x16x128xf32, #tpu.memory_space<vmem>>, vector<1x16x128xf32>,
    return
  }
  func.func @transform_0(%arg0: i32, %arg1: i32) -> (i32, i32, i32) {
    %c0_i32 = arith.constant 0 : i32
    %c0_i32_0 = arith.constant 0 : i32
    return %arg0, %arg1, %c0_i32 : i32, i32, i32
  }
  func.func @transform_1(%arg0: i32, %arg1: i32) -> (i32, i32, i32) {
    %c0_i32 = arith.constant 0 : i32
    %c0_i32_0 = arith.constant 0 : i32
    return %arg0, %arg1, %c0_i32 : i32, i32, i32
  }
  func.func @transform_2(%arg0: i32, %arg1: i32) -> (i32, i32, i32) {
    %c0_i32 = arith.constant 0 : i32
    %c0_i32_0 = arith.constant 0 : i32
    return %arg0, %arg1, %c0_i32 : i32, i32, i32
  }
  func.func @transform_3(%arg0: i32, %arg1: i32) -> (i32, i32, i32) {
    %c0_i32 = arith.constant 0 : i32
    %c0_i32_0 = arith.constant 0 : i32
    return %arg0, %arg1, %c0_i32 : i32, i32, i32
  }
  func.func @transform_4(%arg0: i32, %arg1: i32) -> (i32, i32, i32) {
    %c0_i32 = arith.constant 0 : i32
    %c0_i32_0 = arith.constant 0 : i32
    return %arg0, %arg1, %c0_i32 : i32, i32, i32
  }
  func.func @transform_5(%arg0: i32, %arg1: i32) -> (i32, i32, i32) {
    %c0_i32 = arith.constant 0 : i32
    %c0_i32_0 = arith.constant 0 : i32
    return %arg0, %arg1, %c0_i32 : i32, i32, i32
  }
  func.func @transform_6(%arg0: i32, %arg1: i32) -> (i32, i32, i32) {
    %c0_i32 = arith.constant 0 : i32
    %c0_i32_0 = arith.constant 0 : i32
    return %arg0, %arg1, %c0_i32 : i32, i32, i32
  }
  func.func @transform_7(%arg0: i32, %arg1: i32) -> (i32, i32, i32) {
    %c0_i32 = arith.constant 0 : i32
    %c0_i32_0 = arith.constant 0 : i32
    %c0_i32_1 = arith.constant 0 : i32
    return %arg0, %c0_i32, %c0_i32_0 : i32, i32, i32
  }
  func.func @transform_8(%arg0: i32, %arg1: i32) -> (i32, i32) {
    %c0_i32 = arith.constant 0 : i32
    %c0_i32_0 = arith.constant 0 : i32
    %c0_i32_1 = arith.constant 0 : i32
    return %c0_i32, %c0_i32_0 : i32, i32
  }
  func.func @transform_9(%arg0: i32, %arg1: i32) -> (i32, i32) {
    %c0_i32 = arith.constant 0 : i32
    %c0_i32_0 = arith.constant 0 : i32
    %c0_i32_1 = arith.constant 0 : i32
    return %c0_i32, %c0_i32_0 : i32, i32
  }
  func.func @transform_10(%arg0: i32, %arg1: i32) -> (i32, i32) {
    %c0_i32 = arith.constant 0 : i32
    %c0_i32_0 = arith.constant 0 : i32
    %c0_i32_1 = arith.constant 0 : i32
    return %c0_i32, %c0_i32_0 : i32, i32
  }
  func.func @transform_11(%arg0: i32, %arg1: i32) -> (i32, i32) {
    %c0_i32 = arith.constant 0 : i32
    %c0_i32_0 = arith.constant 0 : i32
    %c0_i32_1 = arith.constant 0 : i32
    return %c0_i32, %c0_i32_0 : i32, i32
  }
  func.func @transform_12(%arg0: i32, %arg1: i32) -> (i32, i32) {
    %c0_i32 = arith.constant 0 : i32
    %c0_i32_0 = arith.constant 0 : i32
    %c0_i32_1 = arith.constant 0 : i32
    return %c0_i32, %c0_i32_0 : i32, i32
  }
  func.func @transform_13(%arg0: i32, %arg1: i32) -> (i32, i32, i32) {
    %c0_i32 = arith.constant 0 : i32
    %c0_i32_0 = arith.constant 0 : i32
    return %arg0, %arg1, %c0_i32 : i32, i32, i32
  }
}

</mosaic_0001>

<bundles_post_ra>
// kernel: dgcnn_seg_forward.14
= control target key start
LH: loop header
LB: loop body
LE: loop exit
PB: predicated region body
PF: predicated region fallthrough
CT: control target
= control target key end

     0   :  { %s665_s9 = smov 0   ;;  %s667_s10 = smov 0   ;;  %s819_s0 = inlined_call_operand.vmem [shape: f32[2,16,5], index: 0, kind: input, shape index: {}]   ;;  %s820_s1 = inlined_call_operand.vmem [shape: f32[2,5,16], index: 1, kind: input, shape index: {}]   ;;  %s821_s2 = inlined_call_operand.vmem [shape: s32[2,16,8], index: 2, kind: output, shape index: {}]  }
   0x1   :  { %s669_s11 = smov 0  }
   0x2 LB: > { %s24_s12 = sadd.s32 1, %s644_s10  ;;  %p577_p0 = scmp.ge.s32.totalorder %s648_s11, 1  ;;  %s648_s11 = sphi %s669_s11, %s12_s11   ;;  %s644_s10 = sphi %s667_s10, %s823_s10   ;;  %s640_s9 = sphi %s665_s9, %s822_s9  }
   0x3   : > { %p26_p1 = scmp.ge.s32.totalorder %s24_s12, 2  ;;  %p142_p2 = scmp.lt.s32.totalorder %s648_s11, 3 }
   0x5   : > { %s825_s12 = smov (%p26_p1, %s24_s12), 0  ;;  %p143_p3 = pnand %p577_p0, %p142_p2 }
   0x6   : > { %p177_p4 = scmp.lt.s32.totalorder (!%p143_p3), %s640_s9, 1  ;;  %vm210_vm0 = vcmask (!%p143_p3), 1044480   ;;  %vm203_vm1 = vcmask (!%p143_p3), 39936   ;;  %vm292_vm2 = vcmask (!%p143_p3), 130048   ;;  %v289_v7 = vlaneseq (!%p143_p3) }
   0x7   : > { %146 = sbr.rel (%p143_p3) target bundleno = 2561 (0xa01), region = 28 }
   0x8   : > { %v290_v8 = vand.u32 (!%p143_p3), 127, %v289_v7 }
   0xa   : > { %v699_v9 = vcvt.s32.f32 (!%p143_p3), %v290_v8 }
   0xe   : > { %s827_s9 = smov (!%p177_p4, %s640_s9), 1 }
   0xf   : > { %s580_s13 = sshll.u32 %s827_s9, 3  ;;  %s588_s14 = sshll.u32 %s827_s9, 4 }
  0x10   : > { %s189_s17 = scalar_lea.vmem %s820_s1, %s580_s13  ;;  %s184_s20 = scalar_lea.vmem %s819_s0, %s588_s14 }
  0x11   : > { %v202_v0 = vld [vmem:[%s189_s17] sm:$0x1f]  ;;  %v201_v2 = vld [vmem:[%s184_s20 + $0x8] sm:$0xff]  ;;  %s198_s23 = scalar_lea.vmem %s821_s2, %s588_s14 }
  0x12   : > { %v200_v1 = vld [vmem:[%s184_s20] sm:$0xff]  ;;  %593 = vmatprep.subr.msk.mxu0 %vm210_vm0, %v202_v0 }
  0x13   : > { %595 = vmatprep.mubr.msk.f32.mxu0 %vm203_vm1, %v200_v1  ;;  %594 = vmatpush3.msk.msra.mxu0 %vm210_vm0, %v202_v0 }
  0x14   : > { %596 = vmatmul.mubr.msk.f32.vlgmr.msra.gmra.mrb[0].mxu0 %vm203_vm1, %v201_v2 }
  0xe7   : > { %v597_v3 = vpop.f32.mrb[0].mxu0 }
  0xe8   : > { %v280_v4 = vpop.f32.mrb[1].mxu0  ;;  %v296_v6 = vsel %vm292_vm2, %v597_v3, inf }
  0xe9   : > { %v293_v5 = vsel %vm292_vm2, %v280_v4, inf }
  0xea   : > { %294 = vmin.xlane.f32.xlu0 %v293_v5 }
  0xee   : > { %297 = vmin.xlane.f32.xlu0 %v296_v6 }
 0x177   : > { %v295_v10 = vpop.xlane.xlu0 %294 }
 0x178   : > { %vm299_vm3 = vcmp.eq.f32.partialorder %v280_v4, %v295_v10 }
 0x179   : > { %v301_v11 = vsel %vm299_vm3, %v699_v9, 16.0 }
 0x17a   : > { %v303_v12 = vsel %vm292_vm2, %v301_v11, inf }
 0x17b   : > { %304 = vmin.xlane.f32.xlu1 %v303_v12  ;;  %v298_v13 = vpop.xlane.xlu0 %297 }
 0x17c   : > { %vm300_vm4 = vcmp.eq.f32.partialorder %v597_v3, %v298_v13 }
 0x17d   : > { %v302_v14 = vsel %vm300_vm4, %v699_v9, 16.0 }
 0x17e   : > { %v306_v15 = vsel %vm292_vm2, %v302_v14, inf }
 0x17f   : > { %307 = vmin.xlane.f32.xlu1 %v306_v15 }
 0x208   : > { %v705_v16 = vpop.xlane.xlu1 %304 }
 0x209   : > { %vm309_vm5 = vcmp.eq.f32.partialorder %v699_v9, %v705_v16 }
 0x20a   : > { %v311_v17 = vsel %vm309_vm5, inf, %v280_v4 }
 0x20b   : > { %v313_v18 = vsel %vm292_vm2, %v311_v17, inf }
 0x20c   : > { %314 = vmin.xlane.f32.xlu0 %v313_v18  ;;  %v710_v19 = vpop.xlane.xlu1 %307 }
 0x20d   : > { %vm310_vm6 = vcmp.eq.f32.partialorder %v699_v9, %v710_v19 }
 0x20e   : > { %v312_v20 = vsel %vm310_vm6, inf, %v597_v3 }
 0x20f   : > { %v316_v21 = vsel %vm292_vm2, %v312_v20, inf }
 0x210   : > { %317 = vmin.xlane.f32.xlu1 %v316_v21 }
 0x299   : > { %v315_v22 = vpop.xlane.xlu0 %314 }
 0x29a   : > { %vm319_vm7 = vcmp.eq.f32.partialorder %v311_v17, %v315_v22 }
 0x29b   : > { %v321_v23 = vsel %vm319_vm7, %v699_v9, 16.0 }
 0x29c   : > { %v323_v24 = vsel %vm292_vm2, %v321_v23, inf }
 0x29d   : > { %v318_v25 = vpop.xlane.xlu1 %317  ;;  %324 = vmin.xlane.f32.xlu0 %v323_v24 }
 0x29e   : > { %vm320_vm8 = vcmp.eq.f32.partialorder %v312_v20, %v318_v25 }
 0x29f   : > { %v322_v26 = vsel %vm320_vm8, %v699_v9, 16.0 }
 0x2a0   : > { %v326_v27 = vsel %vm292_vm2, %v322_v26, inf }
 0x2a1   : > { %327 = vmin.xlane.f32.xlu1 %v326_v27 }
 0x32a   : > { %v719_v28 = vpop.xlane.xlu0 %324 }
 0x32b   : > { %vm329_vm9 = vcmp.eq.f32.partialorder %v699_v9, %v719_v28 }
 0x32c   : > { %v331_v29 = vsel %vm329_vm9, inf, %v311_v17 }
 0x32d   : > { %v333_v30 = vsel %vm292_vm2, %v331_v29, inf }
 0x32e   : > { %v724_v31 = vpop.xlane.xlu1 %327  ;;  %334 = vmin.xlane.f32.xlu0 %v333_v30 }
 0x32f   : > { %vm330_vm10 = vcmp.eq.f32.partialorder %v699_v9, %v724_v31 }
 0x330   : > { %v332_v32 = vsel %vm330_vm10, inf, %v312_v20 }
 0x331   : > { %v336_v33 = vsel %vm292_vm2, %v332_v32, inf }
 0x332   : > { %337 = vmin.xlane.f32.xlu1 %v336_v33 }
 0x3bb   : > { %v335_v34 = vpop.xlane.xlu0 %334 }
 0x3bc   : > { %vm339_vm11 = vcmp.eq.f32.partialorder %v331_v29, %v335_v34 }
 0x3bd   : > { %v341_v35 = vsel %vm339_vm11, %v699_v9, 16.0 }
 0x3be   : > { %v343_v36 = vsel %vm292_vm2, %v341_v35, inf }
 0x3bf   : > { %v338_v37 = vpop.xlane.xlu1 %337  ;;  %344 = vmin.xlane.f32.xlu0 %v343_v36 }
 0x3c0   : > { %vm340_vm12 = vcmp.eq.f32.partialorder %v332_v32, %v338_v37 }
 0x3c1   : > { %v342_v38 = vsel %vm340_vm12, %v699_v9, 16.0 }
 0x3c2   : > { %v346_v39 = vsel %vm292_vm2, %v342_v38, inf }
 0x3c3   : > { %347 = vmin.xlane.f32.xlu1 %v346_v39 }
 0x44c   : > { %v733_v40 = vpop.xlane.xlu0 %344 }
 0x44d   : > { %vm349_vm13 = vcmp.eq.f32.partialorder %v699_v9, %v733_v40 }
 0x44e   : > { %v351_v41 = vsel %vm349_vm13, inf, %v331_v29 }
 0x44f   : > { %v353_v42 = vsel %vm292_vm2, %v351_v41, inf }
 0x450   : > { %v738_v43 = vpop.xlane.xlu1 %347  ;;  %354 = vmin.xlane.f32.xlu0 %v353_v42 }
 0x451   : > { %vm350_vm14 = vcmp.eq.f32.partialorder %v699_v9, %v738_v43 }
 0x452   : > { %v352_v44 = vsel %vm350_vm14, inf, %v332_v32 }
 0x453   : > { %v356_v45 = vsel %vm292_vm2, %v352_v44, inf }
 0x454   : > { %357 = vmin.xlane.f32.xlu1 %v356_v45 }
 0x4dd   : > { %v355_v46 = vpop.xlane.xlu0 %354 }
 0x4de   : > { %vm359_vm15 = vcmp.eq.f32.partialorder %v351_v41, %v355_v46 }
 0x4df   : > { %v361_v47 = vsel %vm359_vm15, %v699_v9, 16.0 }
 0x4e0   : > { %v363_v48 = vsel %vm292_vm2, %v361_v47, inf }
 0x4e1   : > { %v358_v49 = vpop.xlane.xlu1 %357  ;;  %364 = vmin.xlane.f32.xlu0 %v363_v48 }
 0x4e2   : > { %vm360_vm0 = vcmp.eq.f32.partialorder %v352_v44, %v358_v49 }
 0x4e3   : > { %v362_v50 = vsel %vm360_vm0, %v699_v9, 16.0 }
 0x4e4   : > { %v366_v51 = vsel %vm292_vm2, %v362_v50, inf }
 0x4e5   : > { %367 = vmin.xlane.f32.xlu1 %v366_v51 }
 0x56e   : > { %v747_v52 = vpop.xlane.xlu0 %364 }
 0x56f   : > { %vm369_vm3 = vcmp.eq.f32.partialorder %v699_v9, %v747_v52 }
 0x570   : > { %v371_v53 = vsel %vm369_vm3, inf, %v351_v41 }
 0x571   : > { %v373_v54 = vsel %vm292_vm2, %v371_v53, inf }
 0x572   : > { %v752_v55 = vpop.xlane.xlu1 %367  ;;  %374 = vmin.xlane.f32.xlu0 %v373_v54 }
 0x573   : > { %vm370_vm4 = vcmp.eq.f32.partialorder %v699_v9, %v752_v55 }
 0x574   : > { %v372_v56 = vsel %vm370_vm4, inf, %v352_v44 }
 0x575   : > { %v376_v57 = vsel %vm292_vm2, %v372_v56, inf }
 0x576   : > { %377 = vmin.xlane.f32.xlu1 %v376_v57 }
 0x5ff   : > { %v375_v58 = vpop.xlane.xlu0 %374 }
 0x600   : > { %vm379_vm5 = vcmp.eq.f32.partialorder %v371_v53, %v375_v58 }
 0x601   : > { %v381_v59 = vsel %vm379_vm5, %v699_v9, 16.0  ;;  %vm449_vm5 = vcmask 7168  }
 0x602   : > { %v383_v60 = vsel %vm292_vm2, %v381_v59, inf  ;;  %v450_v42 = vsel %vm449_vm5, %v705_v16, %v719_v28 }
 0x603   : > { %v378_v61 = vpop.xlane.xlu1 %377  ;;  %384 = vmin.xlane.f32.xlu0 %v383_v60 }
 0x604   : > { %vm380_vm6 = vcmp.eq.f32.partialorder %v372_v56, %v378_v61 }
 0x605   : > { %v382_v62 = vsel %vm380_vm6, %v699_v9, 16.0  ;;  %vm452_vm6 = vcmask 15360  }
 0x606   : > { %v386_v63 = vsel %vm292_vm2, %v382_v62, inf  ;;  %v453_v44 = vsel %vm452_vm6, %v450_v42, %v733_v40 }
 0x607   : > { %387 = vmin.xlane.f32.xlu1 %v386_v63 }
 0x690   : > { %v761_v0 = vpop.xlane.xlu0 %384 }
 0x691   : > { %vm389_vm7 = vcmp.eq.f32.partialorder %v699_v9, %v761_v0 }
 0x692   : > { %v391_v1 = vsel %vm389_vm7, inf, %v371_v53  ;;  %vm455_vm7 = vcmask 23552  }
 0x693   : > { %v393_v2 = vsel %vm292_vm2, %v391_v1, inf  ;;  %v456_v45 = vsel %vm455_vm7, %v453_v44, %v747_v52 }
 0x694   : > { %v766_v3 = vpop.xlane.xlu1 %387  ;;  %394 = vmin.xlane.f32.xlu0 %v393_v2 }
 0x695   : > { %vm390_vm8 = vcmp.eq.f32.partialorder %v699_v9, %v766_v3 }
 0x696   : > { %v392_v4 = vsel %vm390_vm8, inf, %v372_v56  ;;  %vm458_vm8 = vcmask 31744  }
 0x697   : > { %v396_v5 = vsel %vm292_vm2, %v392_v4, inf  ;;  %v459_v46 = vsel %vm458_vm8, %v456_v45, %v761_v0 }
 0x698   : > { %397 = vmin.xlane.f32.xlu1 %v396_v5 }
 0x721   : > { %v395_v6 = vpop.xlane.xlu0 %394 }
 0x722   : > { %vm399_vm9 = vcmp.eq.f32.partialorder %v391_v1, %v395_v6 }
 0x723   : > { %v401_v7 = vsel %vm399_vm9, %v699_v9, 16.0  ;;  %vm463_vm9 = vcmask 48128  }
 0x724   : > { %v403_v8 = vsel %vm292_vm2, %v401_v7, inf }
 0x725   : > { %v398_v10 = vpop.xlane.xlu1 %397  ;;  %404 = vmin.xlane.f32.xlu0 %v403_v8 }
 0x726   : > { %vm400_vm10 = vcmp.eq.f32.partialorder %v392_v4, %v398_v10 }
 0x727   : > { %v402_v11 = vsel %vm400_vm10, %v699_v9, 16.0  ;;  %vm466_vm10 = vcmask 56320  }
 0x728   : > { %v406_v12 = vsel %vm292_vm2, %v402_v11, inf }
 0x729   : > { %407 = vmin.xlane.f32.xlu1 %v406_v12 }
 0x7b2   : > { %v405_v13 = vpop.xlane.xlu0 %404 }
 0x7b3   : > { %vm409_vm11 = vcmp.eq.f32.partialorder %v699_v9, %v405_v13  ;;  %v461_v47 = vsel %vm203_vm1, %v459_v46, %v405_v13 }
 0x7b4   : > { %v411_v14 = vsel %vm409_vm11, inf, %v391_v1 }
 0x7b5   : > { %v413_v15 = vsel %vm292_vm2, %v411_v14, inf }
 0x7b6   : > { %v408_v17 = vpop.xlane.xlu1 %407  ;;  %414 = vmin.xlane.f32.xlu0 %v413_v15 }
 0x7b7   : > { %vm410_vm12 = vcmp.eq.f32.partialorder %v699_v9, %v408_v17 }
 0x7b8   : > { %v412_v18 = vsel %vm410_vm12, inf, %v392_v4 }
 0x7b9   : > { %v416_v20 = vsel %vm292_vm2, %v412_v18, inf }
 0x7ba   : > { %417 = vmin.xlane.f32.xlu1 %v416_v20 }
 0x843   : > { %v415_v21 = vpop.xlane.xlu0 %414 }
 0x844   : > { %vm419_vm13 = vcmp.eq.f32.partialorder %v411_v14, %v415_v21 }
 0x845   : > { %v421_v22 = vsel %vm419_vm13, %v699_v9, 16.0 }
 0x846   : > { %v423_v23 = vsel %vm292_vm2, %v421_v22, inf }
 0x847   : > { %v418_v24 = vpop.xlane.xlu1 %417  ;;  %424 = vmin.xlane.f32.xlu0 %v423_v23 }
 0x848   : > { %vm420_vm14 = vcmp.eq.f32.partialorder %v412_v18, %v418_v24 }
 0x849   : > { %v422_v25 = vsel %vm420_vm14, %v699_v9, 16.0 }
 0x84a   : > { %v426_v26 = vsel %vm292_vm2, %v422_v25, inf }
 0x84b   : > { %427 = vmin.xlane.f32.xlu1 %v426_v26 }
 0x8d4   : > { %v425_v27 = vpop.xlane.xlu0 %424 }
 0x8d5   : > { %vm429_vm15 = vcmp.eq.f32.partialorder %v699_v9, %v425_v27  ;;  %v464_v49 = vsel %vm463_vm9, %v461_v47, %v425_v27 }
 0x8d6   : > { %v431_v29 = vsel %vm429_vm15, inf, %v411_v14 }
 0x8d7   : > { %v433_v30 = vsel %vm292_vm2, %v431_v29, inf }
 0x8d8   : > { %v428_v32 = vpop.xlane.xlu1 %427  ;;  %434 = vmin.xlane.f32.xlu0 %v433_v30 }
 0x8d9   : > { %vm430_vm0 = vcmp.eq.f32.partialorder %v699_v9, %v428_v32 }
 0x8da   : > { %v432_v33 = vsel %vm430_vm0, inf, %v412_v18 }
 0x8db   : > { %v436_v34 = vsel %vm292_vm2, %v432_v33, inf }
 0x8dc   : > { %437 = vmin.xlane.f32.xlu1 %v436_v34 }
 0x965   : > { %v435_v35 = vpop.xlane.xlu0 %434 }
 0x966   : > { %vm439_vm3 = vcmp.eq.f32.partialorder %v431_v29, %v435_v35 }
 0x967   : > { %v441_v36 = vsel %vm439_vm3, %v699_v9, 16.0 }
 0x968   : > { %v443_v37 = vsel %vm292_vm2, %v441_v36, inf }
 0x969   : > { %v438_v38 = vpop.xlane.xlu1 %437  ;;  %444 = vmin.xlane.f32.xlu0 %v443_v37 }
 0x96a   : > { %vm440_vm4 = vcmp.eq.f32.partialorder %v432_v33, %v438_v38 }
 0x96b   : > { %v442_v39 = vsel %vm440_vm4, %v699_v9, 16.0  ;;  %v451_v9 = vsel %vm449_vm5, %v710_v19, %v724_v31 }
 0x96c   : > { %v446_v41 = vsel %vm292_vm2, %v442_v39, inf  ;;  %v454_v48 = vsel %vm452_vm6, %v451_v9, %v738_v43  ;;  %vm471_vm2 = vcmask 64512  }
 0x96d   : > { %447 = vmin.xlane.f32.xlu1 %v446_v41  ;;  %v457_v16 = vsel %vm455_vm7, %v454_v48, %v752_v55 }
 0x96e   : > { %v460_v40 = vsel %vm458_vm8, %v457_v16, %v766_v3 }
 0x96f   : > { %v462_v19 = vsel %vm203_vm1, %v460_v40, %v408_v17 }
 0x970   : > { %v465_v31 = vsel %vm463_vm9, %v462_v19, %v428_v32 }
 0x9f6   : > { %v445_v50 = vpop.xlane.xlu0 %444 }
 0x9f7   : > { %v467_v28 = vsel %vm466_vm10, %v464_v49, %v445_v50 }
 0x9f8   : > { %v598_v51 = vtrunc.f32 %v467_v28 }
 0x9fa   : > { %v599_v52 = vcvt.f32.s32 %v598_v51  ;;  %v448_v43 = vpop.xlane.xlu1 %447 }
 0x9fb   : > { %v468_v53 = vsel %vm466_vm10, %v465_v31, %v448_v43 }
 0x9fc   : > { %472 = vst.msk [vmem:[%s198_s23] sm:$0xff] %vm471_vm2, %v599_v52  ;;  %v600_v54 = vtrunc.f32 %v468_v53 }
 0x9fe   : > { %v601_v55 = vcvt.f32.s32 %v600_v54 }
 0xa00   : > { %473 = vst.msk [vmem:[%s198_s23 + $0x8] sm:$0xff] %vm471_vm2, %v601_v55 }
 0xa01 PF: > { %s12_s11 = sadd.s32 1, %s648_s11   ;;  %s822_s9 = smov %s644_s10 }
 0xa02   : > { %p9_p5 = scmp.ge.s32.totalorder %s12_s11, 4   ;;  %s823_s10 = smov %s825_s12 }
 0xa04   :  { %11 = sbr.rel (!%p9_p5) target bundleno = 2 (0x2), region = 61 }

// kernel: dgcnn_seg_forward.15
= control target key start
LH: loop header
LB: loop body
LE: loop exit
PB: predicated region body
PF: predicated region fallthrough
CT: control target
= control target key end

     0   :  { %12 = vsyncpa [#allocation3], 0  ;;  %s1748_s0 = inlined_call_operand.vmem [shape: bf16[2,16,3], index: 0, kind: input, shape index: {}]   ;;  %s1749_s1 = inlined_call_operand.vmem [shape: bf16[2,8,16,3], index: 1, kind: input, shape index: {}]   ;;  %s1750_s2 = inlined_call_operand.hbm [shape: bf16[3,64], index: 2, kind: input, shape index: {}]   ;;  %s1751_s3 = inlined_call_operand.hbm [shape: bf16[3,64], index: 3, kind: input, shape index: {}]   ;;  %s1752_s4 = inlined_call_operand.hbm [shape: f32[1,64], index: 4, kind: input, shape index: {}]   ;;  %s1753_s5 = inlined_call_operand.hbm [shape: bf16[64,128], index: 5, kind: input, shape index: {}]   ;;  %s1754_s6 = inlined_call_operand.hbm [shape: f32[1,128], index: 6, kind: input, shape index: {}]   ;;  %s1755_s7 = inlined_call_operand.vmem [shape: bf16[2,16,128], index: 7, kind: output, shape index: {}]  }
   0x1   :  { %13 = vsyncpa [#allocation5], 0 }
   0x2   :  { %14 = vsyncpa [#allocation8], 0  ;;  %s1545_s24 = smov 0   ;;  %s1547_s25 = smov 0  }
   0x3   :  { %s1549_s26 = smov 0  }
   0x4 LB: > { %s1495_s27 = smov [#allocation4]   ;;  %s1080_s29 = sadd.s32 4294967295, %s1493_s26   ;;  %s1493_s26 = sphi %s1549_s26, %s20_s26   ;;  %s1489_s25 = sphi %s1547_s25, %s1766_s25   ;;  %s1485_s24 = sphi %s1545_s24, %s1765_s24  }
   0x5   : > { %s250_s28 = sshll.u32 %s1495_s27, 4  ;;  %p1082_p0 = scmp.ge.s32.totalorder %s1493_s26, 1  ;;  %s251_s28 = int_to_ptr.vmem [resolvable:$true] %s250_s28 }
   0x6   : > { %p226_p1 = scmp.lt.s32.totalorder %s1493_s26, 3  ;;  %p1563_p2 = scmp.eq.s32.totalorder %s1080_s29, 0 }
   0x7   : > { %s1496_s9 = smov [#allocation7]   ;;  %s32_s12 = sadd.s32 1, %s1489_s25 }
   0x8   : > { %s1759_s30 = scalar_select %p1563_p2, 1, 0 }
   0x9   : > { %p1567_p3 = pnand %p1082_p0, %p226_p1  ;;  %s271_s10 = sshll.u32 %s1496_s9, 4  ;;  %s1573_s10 = int_to_ptr.vmem [resolvable:$true] %s271_s10 }
   0xa   : > { %s1319_s15 = scalar_lea.hbm %s1751_s3, 32 }
   0xb   : > { %s1760_s8 = scalar_select %p1567_p3, 1, 0 }
   0xc   : > { %p1246_p4 = pneg %p1567_p3  ;;  %p1320_p6 = scmp.ne.s32.totalorder %s1751_s3, %s1319_s15 }
   0xd   : > { %p1326_p10 = scmp.lt.u32.totalorder %s1319_s15, %s1751_s3 }
   0xe   : > { %p1577_p5 = pnand %p1563_p2, %p1246_p4 }
  0x10   : > { %p1590_p7 = pneg %p1577_p5 }
  0x12   : > { %p1322_p8 = pnand %p1590_p7, %p1320_p6 }
  0x14   : > { %p1323_p9 = pneg %p1322_p8 }
  0x16   : > { %p1328_p11 = pnand %p1326_p10, %p1323_p9 }
  0x18   : > { %1331 = shalt.err (!%p1328_p11)
}
  0x19   : > { %s1332_s21 = scalar_lea.vmem %s251_s28, 32  ;;  %p1340_p1 = scmp.lt.s32.totalorder %s251_s28, %s251_s28 }
  0x1a   : > { %p1333_p12 = scmp.ne.s32.totalorder %s251_s28, %s1332_s21  ;;  %p1341_p4 = scmp.lt.s32.totalorder %s1332_s21, %s1332_s21 }
  0x1c   : > { %p1335_p13 = pnand %p1333_p12, %p1590_p7  ;;  %p1342_p2 = por %p1341_p4, %p1340_p1 }
  0x1e   : > { %p1336_p0 = pneg %p1335_p13 }
  0x20   : > { %p1343_p3 = pnand %p1342_p2, %p1336_p0 }
  0x22   : > { %1346 = shalt.err (!%p1343_p3)
}
  0x23   : > { %1252 = dma.hbm_to_vmem [thread:$0]  (!%p1577_p5), %s1751_s3, 32, %s251_s28, [#allocation5]  }
  0x24   : > { %s1347_s9 = scalar_lea.hbm %s1753_s5, 512 }
  0x25   : > { %p1348_p6 = scmp.ne.s32.totalorder %s1753_s5, %s1347_s9  ;;  %p1354_p2 = scmp.lt.u32.totalorder %s1347_s9, %s1753_s5 }
  0x27   : > { %p1350_p8 = pnand %p1348_p6, %p1590_p7 }
  0x29   : > { %p1351_p9 = pneg %p1350_p8 }
  0x2b   : > { %p1356_p3 = pnand %p1354_p2, %p1351_p9 }
  0x2d   : > { %1359 = shalt.err (!%p1356_p3)
}
  0x2e   : > { %s1360_s28 = scalar_lea.vmem %s1573_s10, 512  ;;  %p1368_p13 = scmp.lt.s32.totalorder %s1573_s10, %s1573_s10 }
  0x2f   : > { %p1361_p10 = scmp.ne.s32.totalorder %s1573_s10, %s1360_s28  ;;  %p1369_p0 = scmp.lt.s32.totalorder %s1360_s28, %s1360_s28 }
  0x31   : > { %p1363_p11 = pnand %p1361_p10, %p1590_p7  ;;  %p1370_p1 = por %p1369_p0, %p1368_p13 }
  0x33   : > { %p1364_p12 = pneg %p1363_p11 }
  0x35   : > { %p1371_p4 = pnand %p1370_p1, %p1364_p12 }
  0x37   : > { %1374 = shalt.err (!%p1371_p4)
}
  0x38   : > { %s1497_s17 = smov 64   ;;  %s1498_s19 = smov 4  }
  0x39   : > { %1258 = dma.hbm_to_vmem [thread:$0]  (!%p1577_p5), %s1753_s5, 512, %s1573_s10, [#allocation8], %s1497_s17, %s1497_s17, %s1498_s19  }
  0x3a   : > { %p34_p6 = scmp.ge.s32.totalorder %s32_s12, 2  ;;  %s1499_s22 = smov [#allocation2]  }
  0x3b   : > { %s239_s23 = sshll.u32 %s1499_s22, 4  ;;  %s1500_s27 = smov [#allocation6]   ;;  %s240_s23 = int_to_ptr.vmem [resolvable:$true] %s239_s23 }
  0x3c   : > { %s1768_s12 = smov (%p34_p6, %s32_s12), 0  ;;  %s261_s29 = sshll.u32 %s1500_s27, 4  ;;  %s262_s29 = int_to_ptr.vmem [resolvable:$true] %s261_s29 }
  0x3d   : > { %s1375_s14 = scalar_lea.hbm %s1750_s2, 32 }
  0x3e   : > { %p1376_p8 = scmp.ne.s32.totalorder %s1750_s2, %s1375_s14  ;;  %p1382_p3 = scmp.lt.u32.totalorder %s1375_s14, %s1750_s2 }
  0x40   : > { %p1378_p9 = pnand %p1376_p8, %p1590_p7 }
  0x42   : > { %p1379_p2 = pneg %p1378_p9 }
  0x44   : > { %p1384_p10 = pnand %p1382_p3, %p1379_p2 }
  0x46   : > { %1387 = shalt.err (!%p1384_p10)
}
  0x47   : > { %s1388_s17 = scalar_lea.vmem %s240_s23, 32  ;;  %p1396_p0 = scmp.lt.s32.totalorder %s240_s23, %s240_s23 }
  0x48   : > { %p1389_p11 = scmp.ne.s32.totalorder %s240_s23, %s1388_s17  ;;  %p1397_p1 = scmp.lt.s32.totalorder %s1388_s17, %s1388_s17 }
  0x4a   : > { %p1391_p12 = pnand %p1389_p11, %p1590_p7  ;;  %p1398_p4 = por %p1397_p1, %p1396_p0 }
  0x4c   : > { %p1392_p13 = pneg %p1391_p12 }
  0x4e   : > { %p1399_p6 = pnand %p1398_p4, %p1392_p13 }
  0x50   : > { %1402 = shalt.err (!%p1399_p6)
}
  0x51   : > { %1249 = dma.hbm_to_vmem [thread:$0]  (!%p1577_p5), %s1750_s2, 32, %s240_s23, [#allocation3]  }
  0x52   : > { %s1403_s27 = scalar_lea.hbm %s1752_s4, 16 }
  0x53   : > { %p1404_p8 = scmp.ne.s32.totalorder %s1752_s4, %s1403_s27  ;;  %p1410_p3 = scmp.lt.u32.totalorder %s1403_s27, %s1752_s4 }
  0x55   : > { %p1406_p9 = pnand %p1404_p8, %p1590_p7 }
  0x57   : > { %p1407_p2 = pneg %p1406_p9 }
  0x59   : > { %p1412_p10 = pnand %p1410_p3, %p1407_p2 }
  0x5b   : > { %1415 = shalt.err (!%p1412_p10)
}
  0x5c   : > { %s1416_s16 = scalar_lea.vmem %s262_s29, 16  ;;  %s1423_s23 = scalar_lea.vmem %s262_s29, 32 }
  0x5d   : > { %p1417_p11 = scmp.ne.s32.totalorder %s262_s29, %s1416_s16  ;;  %p1424_p0 = scmp.lt.s32.totalorder %s262_s29, %s262_s29 }
  0x5e   : > { %p1425_p1 = scmp.lt.s32.totalorder %s1423_s23, %s1416_s16 }
  0x5f   : > { %p1419_p12 = pnand %p1417_p11, %p1590_p7 }
  0x60   : > { %p1426_p4 = por %p1425_p1, %p1424_p0 }
  0x61   : > { %p1420_p13 = pneg %p1419_p12 }
  0x63   : > { %p1427_p6 = pnand %p1426_p4, %p1420_p13 }
  0x65   : > { %1430 = shalt.err (!%p1427_p6)
}
  0x66   : > { %1255 = dma.hbm_to_vmem [thread:$0]  (!%p1577_p5), %s1752_s4, 16, %s262_s29, [#allocation5]  }
  0x67   : > { %s1501_s17 = smov [#allocation9]   ;;  %s1431_s22 = scalar_lea.hbm %s1754_s6, 16 }
  0x68   : > { %s285_s19 = sshll.u32 %s1501_s17, 4  ;;  %p1432_p8 = scmp.ne.s32.totalorder %s1754_s6, %s1431_s22  ;;  %s286_s19 = int_to_ptr.vmem [resolvable:$true] %s285_s19 }
  0x69   : > { %p1438_p3 = scmp.lt.u32.totalorder %s1431_s22, %s1754_s6 }
  0x6a   : > { %p1434_p9 = pnand %p1432_p8, %p1590_p7 }
  0x6c   : > { %p1435_p2 = pneg %p1434_p9 }
  0x6e   : > { %p1440_p10 = pnand %p1438_p3, %p1435_p2 }
  0x70   : > { %1443 = shalt.err (!%p1440_p10)
}
  0x71   : > { %s1444_s29 = scalar_lea.vmem %s286_s19, 16  ;;  %s1451_s15 = scalar_lea.vmem %s286_s19, 32 }
  0x72   : > { %p1445_p11 = scmp.ne.s32.totalorder %s286_s19, %s1444_s29  ;;  %p1452_p0 = scmp.lt.s32.totalorder %s286_s19, %s286_s19 }
  0x73   : > { %p1453_p1 = scmp.lt.s32.totalorder %s1451_s15, %s1444_s29 }
  0x74   : > { %p1447_p12 = pnand %p1445_p11, %p1590_p7 }
  0x75   : > { %p1454_p4 = por %p1453_p1, %p1452_p0 }
  0x76   : > { %p1448_p13 = pneg %p1447_p12 }
  0x78   : > { %p1455_p6 = pnand %p1454_p4, %p1448_p13 }
  0x7a   : > { %1458 = shalt.err (!%p1455_p6)
}
  0x7b   : > { %1261 = dma.hbm_to_vmem [thread:$0]  (!%p1577_p5), %s1754_s6, 16, %s286_s19, [#allocation8]  }
  0x7c   : > { %p1763_p8 = scmp.ne.s32.totalorder %s1760_s8, 0 }
  0x7d   : > { %p1764_p9 = scmp.ne.s32.totalorder (!%p1763_p8), %s1759_s30, 0 }
  0x7e   : > { %324 = sbr.rel (%p1763_p8) target bundleno = 620 (0x26c), region = 48 }
  0x85   : > { %1472 = dma.done.wait (%p1764_p9), [#allocation3], 32  }
  0x86   : > { %1474 = vsyncadd (%p1764_p9), [#allocation3], 4294967264 }
  0x87   : > { %1476 = dma.done.wait (%p1764_p9), [#allocation5], 48  }
  0x88   : > { %1478 = vsyncadd (%p1764_p9), [#allocation5], 4294967248 }
  0x89   : > { %1480 = dma.done.wait (%p1764_p9), [#allocation8], 528  }
  0x8a   : > { %1482 = vsyncadd (%p1764_p9), [#allocation8], 4294966768  ;;  %vm440_vm0 = vcmask 1040384   ;;  %v1502_v0 = vmov 0.0   ;;  %p390_p5 = scmp.lt.s32.totalorder %s1485_s24, 1  ;;  %vm441_vm1 = vcmask 1041408  }
  0x8b   : > { %1170 = vmatprep.subr.bf16.mxu0 %v1502_v0  ;;  %v1503_v1 = vmov 65535   ;;  %vm1504_vm2 = vmmov 0   ;;  %v423_v4 = vld [vmem:[#allocation4] sm:$0x3]  ;;  %v422_v5 = vld [vmem:[#allocation2] sm:$0x3] }
  0x8c   : > { %v442_v2 = vsel %vm440_vm0, 4294967295, %v1503_v1  ;;  %1172 = vmatprep.mubr.msk.bf16.mxu0 %vm1504_vm2, %v1502_v0  ;;  %s1770_s24 = smov (!%p390_p5, %s1485_s24), 1  ;;  %vm436_vm3 = vcmask 23552   ;;  %v1315_v14 = vld [vmem:[#allocation7] sm:$0xff]   ;;  %v1316_v18 = vld [vmem:[#allocation7 + $0x8] sm:$0xff]   ;;  %v1317_v19 = vld [vmem:[#allocation7 + $0x10] sm:$0xff]  }
  0x8d   : > { %v443_v3 = vsel %vm441_vm1, %v442_v2, 0  ;;  %s1137_s8 = sshll.u32 %s1770_s24, 3  ;;  %s1138_s30 = sshll.u32 %s1770_s24, 6  ;;  %v1318_v20 = vld [vmem:[#allocation7 + $0x18] sm:$0xff]   ;;  %vm741_vm4 = vcmask 523264  }
  0x8e   : > { %s397_s10 = scalar_lea.vmem %s1748_s0, %s1137_s8  ;;  %s407_s19 = scalar_lea.vmem %s1749_s1, %s1138_s30  ;;  %v445_v6 = vand.u32 %v443_v3, %v423_v4  ;;  %v569_v7 = vand.u32 %v443_v3, %v422_v5  ;;  %v1101_v21 = vld [vmem:[#allocation6] ss:$0 sm:$0xff] }
  0x8f   : > { %v1306_v8 = vld [vmem:[%s397_s10] sm:$0xff]   ;;  %v1308_v10 = vld [vmem:[%s407_s19 + $0x8] sm:$0xff]   ;;  %v1309_v11 = vld [vmem:[%s407_s19 + $0x10] sm:$0xff]   ;;  %s417_s22 = scalar_lea.vmem %s1755_s7, %s1137_s8 }
  0x90   : > { %v1307_v9 = vld [vmem:[%s407_s19] sm:$0xff]   ;;  %1171 = vmatpush3.bf16.msra.mxu0 %v445_v6  ;;  %1176 = vmatprep.subr.bf16.mxu1 %v569_v7  ;;  %v1310_v12 = vld [vmem:[%s407_s19 + $0x18] sm:$0xff]   ;;  %v1312_v15 = vld [vmem:[%s407_s19 + $0x28] sm:$0xff]  }
  0x91   : > { %1177 = vmatpush3.bf16.msra.mxu1 %v569_v7  ;;  %1178 = vmatprep.mubr.msk.bf16.mxu1 %vm436_vm3, %v1307_v9  ;;  %v1311_v13 = vld [vmem:[%s407_s19 + $0x20] sm:$0xff]   ;;  %v1313_v16 = vld [vmem:[%s407_s19 + $0x30] sm:$0xff]   ;;  %v1314_v17 = vld [vmem:[%s407_s19 + $0x38] sm:$0xff]  }
  0x92   : > { %1194 = vmatprep.subr.bf16.mxu0 %v1315_v14  ;;  %1218 = vmatprep.subr.bf16.mxu1 %v1315_v14 }
  0x93   : > { %1173 = vmatmul.mubr.msk.bf16.vlgmr.msra.gmra.mrb[0].mxu0 %vm436_vm3, %v1306_v8 }
  0x94   : > { %1179 = vmatmul.mubr.msk.bf16.vlgmr.msra.gmra.mrb[0].mxu1 %vm436_vm3, %v1308_v10  ;;  %1195 = vmatpush3.bf16.msra.mxu0 %v1315_v14 }
  0x95   : > { %1182 = vmatprep.mubr.msk.bf16.mxu1 %vm436_vm3, %v1309_v11  ;;  %1222 = vmatpush3.bf16.msra.mxu1 %v1315_v14 }
  0x96   : > { %1196 = vmatprep.subr.bf16.mxu0 %v1316_v18  ;;  %1219 = vmatprep.subr.bf16.mxu1 %v1316_v18 }
  0x98   : > { %1197 = vmatpush3.bf16.msra.mxu0 %v1316_v18 }
  0x99   : > { %1223 = vmatpush3.bf16.msra.mxu1 %v1316_v18  ;;  %1198 = vmatprep.subr.bf16.mxu0 %v1317_v19 }
  0x9a   : > { %1220 = vmatprep.subr.bf16.mxu1 %v1317_v19 }
  0x9c   : > { %1183 = vmatmul.mubr.msk.bf16.gmra.mrb[4].mxu1 %vm436_vm3, %v1310_v12  ;;  %1199 = vmatpush3.bf16.msra.mxu0 %v1317_v19 }
  0x9d   : > { %1186 = vmatprep.mubr.msk.bf16.mxu1 %vm436_vm3, %v1311_v13  ;;  %1224 = vmatpush3.bf16.msra.mxu1 %v1317_v19 }
  0x9e   : > { %1200 = vmatprep.subr.bf16.mxu0 %v1318_v20  ;;  %1221 = vmatprep.subr.bf16.mxu1 %v1318_v20 }
  0xa0   : > { %1201 = vmatpush3.bf16.msra.mxu0 %v1318_v20 }
  0xa1   : > { %1225 = vmatpush3.bf16.msra.mxu1 %v1318_v20 }
  0xa4   : > { %1187 = vmatmul.mubr.msk.bf16.gmra.mrb[8].mxu1 %vm436_vm3, %v1312_v15 }
  0xa5   : > { %1190 = vmatprep.mubr.msk.bf16.mxu1 %vm436_vm3, %v1313_v16 }
  0xac   : > { %1191 = vmatmul.mubr.msk.bf16.gmra.mrb[12].mxu1 %vm436_vm3, %v1314_v17 }
 0x166   : > { %v481_v22 = vpop.f32.mrb[0].mxu0 }
 0x167   : > { %v482_v23 = vadd.f32 %v1101_v21, %v481_v22  ;;  %v1174_v24 = vpop.f32.mrb[1].mxu0  ;;  %v1180_v25 = vpop.f32.mrb[0].mxu1 }
 0x168   : > { %v484_v26 = vpop.f32.mrb[2].mxu0  ;;  %v605_v27 = vpop.f32.mrb[1].mxu1  ;;  %v1132_v24 = vld [vmem:[#allocation9] ss:$0 sm:$0xff] }
 0x169   : > { %v670_v28 = vadd.f32 %v1180_v25, %v482_v23  ;;  %v485_v29 = vadd.f32 %v1101_v21, %v484_v26  ;;  %v668_v30 = vadd.f32 %v605_v27, %v482_v23  ;;  %v1181_v31 = vpop.f32.mrb[2].mxu1  ;;  %v1175_v32 = vpop.f32.mrb[3].mxu0 }
 0x16a   : > { %v608_v33 = vpop.f32.mrb[3].mxu1 }
 0x16b   : > { %v671_v34 = vadd.f32 %v1181_v31, %v485_v29  ;;  %v669_v35 = vadd.f32 %v608_v33, %v485_v29  ;;  %v686_v36 = vmax.f32 %v670_v28, 0.0  ;;  %v684_v37 = vmax.f32 %v668_v30, 0.0 }
 0x16d   : > { %v687_v38 = vmax.f32 %v671_v34, 0.0  ;;  %v685_v39 = vmax.f32 %v669_v35, 0.0 }
 0x16f   : > { %v710_v40 = vpack.c.bf16 %v687_v38, %v686_v36  ;;  %v709_v41 = vpack.c.bf16 %v685_v39, %v684_v37  ;;  %v1184_v42 = vpop.f32.mrb[4].mxu1 }
 0x170   : > { %v674_v43 = vadd.f32 %v1184_v42, %v482_v23  ;;  %v621_v44 = vpop.f32.mrb[5].mxu1 }
 0x171   : > { %v672_v45 = vadd.f32 %v621_v44, %v482_v23  ;;  %v1185_v46 = vpop.f32.mrb[6].mxu1  ;;  %1202 = vmatprep.mubr.msk.bf16.mxu0 %vm741_vm4, %v709_v41 }
 0x172   : > { %v675_v47 = vadd.f32 %v1185_v46, %v485_v29  ;;  %v624_v48 = vpop.f32.mrb[7].mxu1  ;;  %1203 = vmatmul.mubr.msk.bf16.vlgmr.msra.gmra.mrb[4].mxu0 %vm741_vm4, %v710_v40  ;;  %v690_v50 = vmax.f32 %v674_v43, 0.0 }
 0x173   : > { %v673_v49 = vadd.f32 %v624_v48, %v485_v29  ;;  %v688_v52 = vmax.f32 %v672_v45, 0.0 }
 0x174   : > { %v691_v51 = vmax.f32 %v675_v47, 0.0 }
 0x175   : > { %v689_v53 = vmax.f32 %v673_v49, 0.0 }
 0x176   : > { %v712_v54 = vpack.c.bf16 %v691_v51, %v690_v50 }
 0x177   : > { %v711_v55 = vpack.c.bf16 %v689_v53, %v688_v52  ;;  %v1188_v56 = vpop.f32.mrb[8].mxu1 }
 0x178   : > { %v678_v57 = vadd.f32 %v1188_v56, %v482_v23  ;;  %v637_v58 = vpop.f32.mrb[9].mxu1 }
 0x179   : > { %v676_v59 = vadd.f32 %v637_v58, %v482_v23  ;;  %v1189_v60 = vpop.f32.mrb[10].mxu1  ;;  %1206 = vmatprep.mubr.msk.bf16.mxu0 %vm741_vm4, %v711_v55 }
 0x17a   : > { %v679_v61 = vadd.f32 %v1189_v60, %v485_v29  ;;  %v640_v62 = vpop.f32.mrb[11].mxu1  ;;  %1207 = vmatmul.mubr.msk.bf16.gmra.mrb[8].mxu0 %vm741_vm4, %v712_v54  ;;  %v694_v0 = vmax.f32 %v678_v57, 0.0 }
 0x17b   : > { %v677_v63 = vadd.f32 %v640_v62, %v485_v29  ;;  %v692_v2 = vmax.f32 %v676_v59, 0.0 }
 0x17c   : > { %v695_v1 = vmax.f32 %v679_v61, 0.0 }
 0x17d   : > { %v693_v3 = vmax.f32 %v677_v63, 0.0 }
 0x17e   : > { %v714_v4 = vpack.c.bf16 %v695_v1, %v694_v0 }
 0x17f   : > { %v713_v5 = vpack.c.bf16 %v693_v3, %v692_v2  ;;  %v1192_v6 = vpop.f32.mrb[12].mxu1 }
 0x180   : > { %v682_v7 = vadd.f32 %v1192_v6, %v482_v23  ;;  %v653_v8 = vpop.f32.mrb[13].mxu1 }
 0x181   : > { %v680_v9 = vadd.f32 %v653_v8, %v482_v23  ;;  %v1193_v10 = vpop.f32.mrb[14].mxu1  ;;  %1210 = vmatprep.mubr.msk.bf16.mxu0 %vm741_vm4, %v713_v5 }
 0x182   : > { %v683_v11 = vadd.f32 %v1193_v10, %v485_v29  ;;  %v656_v12 = vpop.f32.mrb[15].mxu1  ;;  %1211 = vmatmul.mubr.msk.bf16.gmra.mrb[12].mxu0 %vm741_vm4, %v714_v4  ;;  %v698_v14 = vmax.f32 %v682_v7, 0.0 }
 0x183   : > { %v681_v13 = vadd.f32 %v656_v12, %v485_v29  ;;  %v696_v16 = vmax.f32 %v680_v9, 0.0 }
 0x184   : > { %v699_v15 = vmax.f32 %v683_v11, 0.0 }
 0x185   : > { %v697_v17 = vmax.f32 %v681_v13, 0.0 }
 0x186   : > { %v716_v18 = vpack.c.bf16 %v699_v15, %v698_v14 }
 0x187   : > { %v715_v19 = vpack.c.bf16 %v697_v17, %v696_v16 }
 0x189   : > { %1214 = vmatprep.mubr.msk.bf16.mxu1 %vm741_vm4, %v715_v19 }
 0x18a   : > { %1215 = vmatmul.mubr.msk.bf16.vlgmr.msra.gmra.mrb[16].mxu1 %vm741_vm4, %v716_v18 }
 0x245   : > { %v1204_v20 = vpop.f32.mrb[4].mxu0 }
 0x246   : > { %v800_v21 = vpop.f32.mrb[5].mxu0  ;;  %v871_v25 = vadd.f32 %v1204_v20, %v1132_v24 }
 0x247   : > { %v1205_v22 = vpop.f32.mrb[6].mxu0  ;;  %v869_v26 = vadd.f32 %v1132_v24, %v800_v21 }
 0x248   : > { %v803_v23 = vpop.f32.mrb[7].mxu0  ;;  %v872_v28 = vadd.f32 %v1205_v22, %v1132_v24  ;;  %v887_v34 = vmax.f32 %v871_v25, 0.0 }
 0x249   : > { %v870_v31 = vadd.f32 %v1132_v24, %v803_v23  ;;  %v885_v38 = vmax.f32 %v869_v26, 0.0 }
 0x24a   : > { %v888_v41 = vmax.f32 %v872_v28, 0.0 }
 0x24b   : > { %v886_v44 = vmax.f32 %v870_v31, 0.0 }
 0x24d   : > { %v1208_v27 = vpop.f32.mrb[8].mxu0 }
 0x24e   : > { %v875_v29 = vadd.f32 %v1208_v27, %v1132_v24  ;;  %v816_v30 = vpop.f32.mrb[9].mxu0 }
 0x24f   : > { %v873_v32 = vadd.f32 %v1132_v24, %v816_v30  ;;  %v1209_v33 = vpop.f32.mrb[10].mxu0 }
 0x250   : > { %v891_v35 = vmax.f32 %v875_v29, 0.0  ;;  %v876_v36 = vadd.f32 %v1209_v33, %v1132_v24  ;;  %v819_v37 = vpop.f32.mrb[11].mxu0 }
 0x251   : > { %v889_v39 = vmax.f32 %v873_v32, 0.0  ;;  %v874_v40 = vadd.f32 %v1132_v24, %v819_v37 }
 0x252   : > { %v902_v42 = vmax.f32 %v887_v34, %v891_v35  ;;  %v892_v43 = vmax.f32 %v876_v36, 0.0 }
 0x253   : > { %v901_v45 = vmax.f32 %v885_v38, %v889_v39  ;;  %v890_v46 = vmax.f32 %v874_v40, 0.0 }
 0x254   : > { %v909_v47 = vmax.f32 %v888_v41, %v892_v43 }
 0x255   : > { %v908_v48 = vmax.f32 %v886_v44, %v890_v46  ;;  %v1212_v49 = vpop.f32.mrb[12].mxu0 }
 0x256   : > { %v879_v50 = vadd.f32 %v1212_v49, %v1132_v24  ;;  %v832_v51 = vpop.f32.mrb[13].mxu0 }
 0x257   : > { %v877_v52 = vadd.f32 %v1132_v24, %v832_v51  ;;  %v1213_v53 = vpop.f32.mrb[14].mxu0 }
 0x258   : > { %v895_v54 = vmax.f32 %v879_v50, 0.0  ;;  %v880_v55 = vadd.f32 %v1213_v53, %v1132_v24  ;;  %v835_v56 = vpop.f32.mrb[15].mxu0 }
 0x259   : > { %v893_v57 = vmax.f32 %v877_v52, 0.0  ;;  %v878_v58 = vadd.f32 %v1132_v24, %v835_v56 }
 0x25a   : > { %v904_v59 = vmax.f32 %v902_v42, %v895_v54  ;;  %v896_v60 = vmax.f32 %v880_v55, 0.0 }
 0x25b   : > { %v903_v61 = vmax.f32 %v901_v45, %v893_v57  ;;  %v894_v62 = vmax.f32 %v878_v58, 0.0 }
 0x25c   : > { %v911_v63 = vmax.f32 %v909_v47, %v896_v60 }
 0x25d   : > { %v910_v0 = vmax.f32 %v908_v48, %v894_v62  ;;  %v1216_v1 = vpop.f32.mrb[16].mxu1 }
 0x25e   : > { %v883_v2 = vadd.f32 %v1216_v1, %v1132_v24  ;;  %v848_v3 = vpop.f32.mrb[17].mxu1 }
 0x25f   : > { %v881_v4 = vadd.f32 %v1132_v24, %v848_v3  ;;  %v1217_v5 = vpop.f32.mrb[18].mxu1 }
 0x260   : > { %v899_v6 = vmax.f32 %v883_v2, 0.0  ;;  %v884_v7 = vadd.f32 %v1217_v5, %v1132_v24  ;;  %v851_v8 = vpop.f32.mrb[19].mxu1 }
 0x261   : > { %v897_v9 = vmax.f32 %v881_v4, 0.0  ;;  %v882_v10 = vadd.f32 %v1132_v24, %v851_v8 }
 0x262   : > { %v906_v11 = vmax.f32 %v904_v59, %v899_v6  ;;  %v900_v12 = vmax.f32 %v884_v7, 0.0 }
 0x263   : > { %v905_v13 = vmax.f32 %v903_v61, %v897_v9  ;;  %v898_v14 = vmax.f32 %v882_v10, 0.0 }
 0x264   : > { %v913_v15 = vmax.f32 %v911_v63, %v900_v12 }
 0x265   : > { %v907_v16 = vmax.f32 %v905_v13, %v906_v11  ;;  %v912_v17 = vmax.f32 %v910_v0, %v898_v14 }
 0x267   : > { %v914_v18 = vmax.f32 %v912_v17, %v913_v15 }
 0x269   : > { %v1145_v19 = vpack.c.bf16 %v914_v18, %v907_v16 }
 0x26b   : > { %1146 = vst [vmem:[%s417_s22] sm:$0xff] %v1145_v19  }
 0x26c PF: > { %s20_s26 = sadd.s32 1, %s1493_s26   ;;  %s1765_s24 = smov %s1489_s25 }
 0x26d   : > { %p17_p7 = scmp.ge.s32.totalorder %s20_s26, 4   ;;  %s1766_s25 = smov %s1768_s12 }
 0x26f   :  { %19 = sbr.rel (!%p17_p7) target bundleno = 4 (0x4), region = 102 }
 0x276   :  { %955 = vsyncpa [#allocation3], 1 }
 0x277   :  { %957 = vsyncpa [#allocation3 + $0x1], 1 }
 0x278   :  { %958 = vsyncpa [#allocation5], 1 }
 0x279   :  { %959 = vsyncpa [#allocation8], 1 }

// kernel: dgcnn_seg_forward.16
= control target key start
LH: loop header
LB: loop body
LE: loop exit
PB: predicated region body
PF: predicated region fallthrough
CT: control target
= control target key end

     0   :  { %8 = vsyncpa [#allocation3], 0  ;;  %s1478_s0 = inlined_call_operand.vmem [shape: bf16[2,16,128], index: 0, kind: input, shape index: {}]   ;;  %s1479_s1 = inlined_call_operand.hbm [shape: bf16[128,1024], index: 1, kind: input, shape index: {}]   ;;  %s1480_s2 = inlined_call_operand.hbm [shape: f32[1,1024], index: 2, kind: input, shape index: {}]   ;;  %s1481_s3 = inlined_call_operand.vmem [shape: f32[2,1,1024], index: 3, kind: output, shape index: {}]  }
   0x1   :  { %9 = vsyncpa [#allocation5], 0  ;;  %s1305_s12 = smov 0   ;;  %s1307_s13 = smov 0  }
   0x2   :  { %s1309_s14 = smov 0  }
   0x3 LB: > { %s1060_s15 = sadd.s32 4294967295, %s1277_s14   ;;  %s27_s16 = sadd.s32 1, %s1273_s13  ;;  %s1277_s14 = sphi %s1309_s14, %s15_s14   ;;  %s1273_s13 = sphi %s1307_s13, %s1491_s13   ;;  %s1269_s12 = sphi %s1305_s12, %s1490_s12  }
   0x4   : > { %p29_p0 = scmp.ge.s32.totalorder %s27_s16, 2  ;;  %p1062_p1 = scmp.ge.s32.totalorder %s1277_s14, 1 }
   0x5   : > { %p128_p2 = scmp.lt.s32.totalorder %s1277_s14, 3  ;;  %p1330_p4 = scmp.eq.s32.totalorder %s1060_s15, 0 }
   0x6   : > { %s1493_s16 = smov (%p29_p0, %s27_s16), 0  ;;  %s1279_s19 = smov [#allocation2]  }
   0x7   : > { %p1326_p3 = pnand %p1062_p1, %p128_p2  ;;  %s140_s20 = sshll.u32 %s1279_s19, 4  ;;  %s141_s20 = int_to_ptr.vmem [resolvable:$true] %s140_s20 }
   0x8   : > { %s1486_s18 = scalar_select %p1330_p4, 1, 0 }
   0x9   : > { %s1485_s17 = scalar_select %p1326_p3, 1, 0 }
   0xa   : > { %p1148_p5 = pneg %p1326_p3  ;;  %s1280_s22 = smov [#allocation4]  }
   0xb   : > { %s154_s23 = sshll.u32 %s1280_s22, 4  ;;  %s1191_s26 = scalar_lea.hbm %s1479_s1, 8192  ;;  %s1342_s23 = int_to_ptr.vmem [resolvable:$true] %s154_s23 }
   0xc   : > { %p1338_p6 = pnand %p1330_p4, %p1148_p5  ;;  %p1192_p7 = scmp.ne.s32.totalorder %s1479_s1, %s1191_s26 }
   0xd   : > { %p1198_p11 = scmp.lt.u32.totalorder %s1191_s26, %s1479_s1 }
   0xe   : > { %p1193_p8 = pneg %p1338_p6 }
  0x10   : > { %p1194_p9 = pnand %p1193_p8, %p1192_p7 }
  0x12   : > { %p1195_p10 = pneg %p1194_p9 }
  0x14   : > { %p1200_p12 = pnand %p1198_p11, %p1195_p10 }
  0x16   : > { %1203 = shalt.err (!%p1200_p12)
}
  0x17   : > { %s1204_s4 = scalar_lea.vmem %s141_s20, 8192  ;;  %p1212_p2 = scmp.lt.s32.totalorder %s141_s20, %s141_s20 }
  0x18   : > { %p1205_p13 = scmp.ne.s32.totalorder %s141_s20, %s1204_s4  ;;  %p1213_p5 = scmp.lt.s32.totalorder %s1204_s4, %s1204_s4 }
  0x1a   : > { %p1207_p0 = pnand %p1205_p13, %p1193_p8  ;;  %p1214_p4 = por %p1213_p5, %p1212_p2 }
  0x1c   : > { %p1208_p1 = pneg %p1207_p0 }
  0x1e   : > { %p1215_p3 = pnand %p1214_p4, %p1208_p1 }
  0x20   : > { %1218 = shalt.err (!%p1215_p3)
}
  0x21   : > { %s1281_s5 = smov 512   ;;  %s1282_s6 = smov 32  }
  0x22   : > { %1151 = dma.hbm_to_vmem [thread:$0]  (!%p1338_p6), %s1479_s1, 8192, %s141_s20, [#allocation3], %s1281_s5, %s1281_s5, %s1282_s6  }
  0x23   : > { %s1219_s11 = scalar_lea.hbm %s1480_s2, 128 }
  0x24   : > { %p1220_p7 = scmp.ne.s32.totalorder %s1480_s2, %s1219_s11  ;;  %p1226_p9 = scmp.lt.u32.totalorder %s1219_s11, %s1480_s2 }
  0x26   : > { %p1222_p3 = pnand %p1220_p7, %p1193_p8 }
  0x28   : > { %p1223_p4 = pneg %p1222_p3 }
  0x2a   : > { %p1228_p10 = pnand %p1226_p9, %p1223_p4 }
  0x2c   : > { %1231 = shalt.err (!%p1228_p10)
}
  0x2d   : > { %s1232_s20 = scalar_lea.vmem %s1342_s23, 128  ;;  %p1240_p0 = scmp.lt.s32.totalorder %s1342_s23, %s1342_s23 }
  0x2e   : > { %p1233_p11 = scmp.ne.s32.totalorder %s1342_s23, %s1232_s20  ;;  %p1241_p1 = scmp.lt.s32.totalorder %s1232_s20, %s1232_s20 }
  0x30   : > { %p1235_p12 = pnand %p1233_p11, %p1193_p8  ;;  %p1242_p2 = por %p1241_p1, %p1240_p0 }
  0x32   : > { %p1236_p13 = pneg %p1235_p12 }
  0x34   : > { %p1243_p5 = pnand %p1242_p2, %p1236_p13 }
  0x36   : > { %1246 = shalt.err (!%p1243_p5)
}
  0x37   : > { %1154 = dma.hbm_to_vmem [thread:$0]  (!%p1338_p6), %s1480_s2, 128, %s1342_s23, [#allocation5]  }
  0x38   : > { %p1488_p7 = scmp.ne.s32.totalorder %s1485_s17, 0 }
  0x39   : > { %p1489_p3 = scmp.ne.s32.totalorder (!%p1488_p7), %s1486_s18, 0 }
  0x3a   : > { %180 = sbr.rel (%p1488_p7) target bundleno = 380 (0x17c), region = 32 }
  0x41   : > { %1260 = dma.done.wait (%p1489_p3), [#allocation3], 8192  }
  0x42   : > { %1262 = vsyncadd (%p1489_p3), [#allocation3], 4294959104 }
  0x43   : > { %1264 = dma.done.wait (%p1489_p3), [#allocation5], 128  }
  0x44   : > { %1266 = vsyncadd (%p1489_p3), [#allocation5], 4294967168  ;;  %v1283_v0 = vmov 0   ;;  %p212_p6 = scmp.lt.s32.totalorder %s1269_s12, 1  ;;  %v233_v1 = vld [vmem:[#allocation2] sm:$0xff]  ;;  %v234_v3 = vld [vmem:[#allocation2 + $0x8] sm:$0xff] }
  0x45   : > { %697 = vmatprep.mubr.bf16.mxu0 %v1283_v0  ;;  %740 = vmatprep.mubr.bf16.mxu1 %v1283_v0  ;;  %v237_v2 = vld [vmem:[#allocation2 + $0x20] sm:$0xff]  ;;  %v238_v5 = vld [vmem:[#allocation2 + $0x28] sm:$0xff]  ;;  %v235_v63 = vld [vmem:[#allocation2 + $0x10] sm:$0xff] }
  0x46   : > { %v1074_v4 = vcombine.high %v233_v1, %v237_v2  ;;  %v1073_v6 = vcombine.low %v233_v1, %v237_v2  ;;  %v241_v7 = vld [vmem:[#allocation2 + $0x40] sm:$0xff]  ;;  %v1076_v9 = vcombine.high %v234_v3, %v238_v5  ;;  %v1075_v10 = vcombine.low %v234_v3, %v238_v5  ;;  %v242_v12 = vld [vmem:[#allocation2 + $0x48] sm:$0xff]  ;;  %s1495_s12 = smov (!%p212_p6, %s1269_s12), 1  ;;  %v239_v1 = vld [vmem:[#allocation2 + $0x30] sm:$0xff] }
  0x47   : > { %v245_v8 = vld [vmem:[#allocation2 + $0x60] sm:$0xff]  ;;  %v246_v13 = vld [vmem:[#allocation2 + $0x68] sm:$0xff]  ;;  %s1139_s17 = sshll.u32 %s1495_s12, 3  ;;  %v236_v2 = vld [vmem:[#allocation2 + $0x18] sm:$0xff] }
  0x48   : > { %v1082_v11 = vcombine.high %v241_v7, %v245_v8  ;;  %v249_v14 = vld [vmem:[#allocation2 + $0x80] sm:$0xff]  ;;  %665 = vmatprep.subr.bf16.mxu0 %v1074_v4  ;;  %v1084_v15 = vcombine.high %v242_v12, %v246_v13  ;;  %v250_v17 = vld [vmem:[#allocation2 + $0x88] sm:$0xff]  ;;  %708 = vmatprep.subr.bf16.mxu1 %v1076_v9  ;;  %v1081_v19 = vcombine.low %v241_v7, %v245_v8  ;;  %s1415_s23 = scalar_lea.vmem %s1478_s0, %s1139_s17  ;;  %v240_v3 = vld [vmem:[#allocation2 + $0x38] sm:$0xff]  ;;  %s224_s29 = scalar_lea.vmem %s1481_s3, %s1139_s17 }
  0x49   : > { %v253_v16 = vld [vmem:[#allocation2 + $0xa0] sm:$0xff]  ;;  %v254_v18 = vld [vmem:[#allocation2 + $0xa8] sm:$0xff]  ;;  %666 = vmatpush1.bf16.msra.mxu0 %v1073_v6  ;;  %709 = vmatpush1.bf16.msra.mxu1 %v1075_v10  ;;  %v1083_v20 = vcombine.low %v242_v12, %v246_v13  ;;  %v1078_v6 = vcombine.high %v235_v63, %v239_v1  ;;  %v1080_v7 = vcombine.high %v236_v2, %v240_v3  ;;  %v243_v8 = vld [vmem:[#allocation2 + $0x50] sm:$0xff] }
  0x4a   : > { %667 = vmatprep.subr.bf16.mxu0 %v1082_v11  ;;  %v1090_v21 = vcombine.high %v249_v14, %v253_v16  ;;  %710 = vmatprep.subr.bf16.mxu1 %v1084_v15  ;;  %v1092_v22 = vcombine.high %v250_v17, %v254_v18  ;;  %v257_v23 = vld [vmem:[#allocation2 + $0xc0] sm:$0xff]  ;;  %v258_v25 = vld [vmem:[#allocation2 + $0xc8] sm:$0xff]  ;;  %v1089_v27 = vcombine.low %v249_v14, %v253_v16  ;;  %v247_v9 = vld [vmem:[#allocation2 + $0x70] sm:$0xff] }
  0x4b   : > { %v261_v24 = vld [vmem:[#allocation2 + $0xe0] sm:$0xff]  ;;  %v262_v26 = vld [vmem:[#allocation2 + $0xe8] sm:$0xff]  ;;  %v1091_v28 = vcombine.low %v250_v17, %v254_v18  ;;  %v244_v11 = vld [vmem:[#allocation2 + $0x58] sm:$0xff]  ;;  %v1077_v13 = vcombine.low %v235_v63, %v239_v1  ;;  %v1079_v14 = vcombine.low %v236_v2, %v240_v3  ;;  %v1086_v15 = vcombine.high %v243_v8, %v247_v9 }
  0x4c   : > { %v1098_v29 = vcombine.high %v257_v23, %v261_v24  ;;  %v1100_v30 = vcombine.high %v258_v25, %v262_v26  ;;  %v265_v31 = vld [vmem:[#allocation2 + $0x100] sm:$0xff]  ;;  %v266_v33 = vld [vmem:[#allocation2 + $0x108] sm:$0xff]  ;;  %v1097_v35 = vcombine.low %v257_v23, %v261_v24  ;;  %v1099_v36 = vcombine.low %v258_v25, %v262_v26  ;;  %v248_v12 = vld [vmem:[#allocation2 + $0x78] sm:$0xff] }
  0x4d   : > { %668 = vmatpush1.bf16.msra.mxu0 %v1081_v19  ;;  %711 = vmatpush1.bf16.msra.mxu1 %v1083_v20  ;;  %v269_v32 = vld [vmem:[#allocation2 + $0x120] sm:$0xff]  ;;  %v270_v34 = vld [vmem:[#allocation2 + $0x128] sm:$0xff]  ;;  %v1088_v16 = vcombine.high %v244_v11, %v248_v12  ;;  %v251_v17 = vld [vmem:[#allocation2 + $0x90] sm:$0xff]  ;;  %v299_v3 = vlaneseq }
  0x4e   : > { %669 = vmatprep.subr.bf16.mxu0 %v1090_v21  ;;  %712 = vmatprep.subr.bf16.mxu1 %v1092_v22  ;;  %v1106_v37 = vcombine.high %v265_v31, %v269_v32  ;;  %v1108_v38 = vcombine.high %v266_v33, %v270_v34  ;;  %v273_v39 = vld [vmem:[#allocation2 + $0x140] sm:$0xff]  ;;  %v274_v41 = vld [vmem:[#allocation2 + $0x148] sm:$0xff]  ;;  %v1105_v43 = vcombine.low %v265_v31, %v269_v32  ;;  %v255_v18 = vld [vmem:[#allocation2 + $0xb0] sm:$0xff] }
  0x4f   : > { %v277_v40 = vld [vmem:[#allocation2 + $0x160] sm:$0xff]  ;;  %v278_v42 = vld [vmem:[#allocation2 + $0x168] sm:$0xff]  ;;  %v1107_v44 = vcombine.low %v266_v33, %v270_v34  ;;  %v252_v19 = vld [vmem:[#allocation2 + $0x98] sm:$0xff]  ;;  %v1085_v21 = vcombine.low %v243_v8, %v247_v9  ;;  %v1087_v22 = vcombine.low %v244_v11, %v248_v12  ;;  %v1094_v23 = vcombine.high %v251_v17, %v255_v18 }
  0x50   : > { %v1114_v45 = vcombine.high %v273_v39, %v277_v40  ;;  %v1116_v46 = vcombine.high %v274_v41, %v278_v42  ;;  %v281_v47 = vld [vmem:[#allocation2 + $0x180] sm:$0xff]  ;;  %v282_v49 = vld [vmem:[#allocation2 + $0x188] sm:$0xff]  ;;  %v1113_v51 = vcombine.low %v273_v39, %v277_v40  ;;  %v1115_v52 = vcombine.low %v274_v41, %v278_v42  ;;  %v256_v20 = vld [vmem:[#allocation2 + $0xb8] sm:$0xff] }
  0x51   : > { %670 = vmatpush1.bf16.msra.mxu0 %v1089_v27  ;;  %713 = vmatpush1.bf16.msra.mxu1 %v1091_v28  ;;  %v285_v48 = vld [vmem:[#allocation2 + $0x1a0] sm:$0xff]  ;;  %v286_v50 = vld [vmem:[#allocation2 + $0x1a8] sm:$0xff]  ;;  %v1096_v24 = vcombine.high %v252_v19, %v256_v20  ;;  %v259_v25 = vld [vmem:[#allocation2 + $0xd0] sm:$0xff] }
  0x52   : > { %671 = vmatprep.subr.bf16.mxu0 %v1098_v29  ;;  %714 = vmatprep.subr.bf16.mxu1 %v1100_v30  ;;  %v1122_v53 = vcombine.high %v281_v47, %v285_v48  ;;  %v1124_v54 = vcombine.high %v282_v49, %v286_v50  ;;  %v289_v55 = vld [vmem:[#allocation2 + $0x1c0] sm:$0xff]  ;;  %v290_v57 = vld [vmem:[#allocation2 + $0x1c8] sm:$0xff]  ;;  %v1121_v59 = vcombine.low %v281_v47, %v285_v48  ;;  %v263_v26 = vld [vmem:[#allocation2 + $0xf0] sm:$0xff] }
  0x53   : > { %v293_v56 = vld [vmem:[#allocation2 + $0x1e0] sm:$0xff]  ;;  %v294_v58 = vld [vmem:[#allocation2 + $0x1e8] sm:$0xff]  ;;  %v1123_v60 = vcombine.low %v282_v49, %v286_v50  ;;  %v260_v27 = vld [vmem:[#allocation2 + $0xd8] sm:$0xff]  ;;  %v1093_v29 = vcombine.low %v251_v17, %v255_v18  ;;  %v1095_v30 = vcombine.low %v252_v19, %v256_v20  ;;  %v1102_v31 = vcombine.high %v259_v25, %v263_v26 }
  0x54   : > { %v1130_v61 = vcombine.high %v289_v55, %v293_v56  ;;  %v1132_v62 = vcombine.high %v290_v57, %v294_v58  ;;  %v1129_v4 = vcombine.low %v289_v55, %v293_v56  ;;  %v1131_v5 = vcombine.low %v290_v57, %v294_v58  ;;  %v1418_v10 = vld [vmem:[%s1415_s23] sm:$0xff]   ;;  %v264_v28 = vld [vmem:[#allocation2 + $0xf8] sm:$0xff]  ;;  %v267_v33 = vld [vmem:[#allocation2 + $0x110] sm:$0xff] }
  0x55   : > { %672 = vmatpush1.bf16.msra.mxu0 %v1097_v35  ;;  %715 = vmatpush1.bf16.msra.mxu1 %v1099_v36  ;;  %v1104_v32 = vcombine.high %v260_v27, %v264_v28  ;;  %v271_v34 = vld [vmem:[#allocation2 + $0x130] sm:$0xff]  ;;  %v268_v35 = vld [vmem:[#allocation2 + $0x118] sm:$0xff] }
  0x56   : > { %673 = vmatprep.subr.bf16.mxu0 %v1106_v37  ;;  %716 = vmatprep.subr.bf16.mxu1 %v1108_v38  ;;  %v272_v36 = vld [vmem:[#allocation2 + $0x138] sm:$0xff]  ;;  %v1101_v37 = vcombine.low %v259_v25, %v263_v26  ;;  %v1103_v38 = vcombine.low %v260_v27, %v264_v28  ;;  %v1110_v39 = vcombine.high %v267_v33, %v271_v34  ;;  %v275_v40 = vld [vmem:[#allocation2 + $0x150] sm:$0xff] }
  0x57   : > { %v279_v41 = vld [vmem:[#allocation2 + $0x170] sm:$0xff]  ;;  %v276_v42 = vld [vmem:[#allocation2 + $0x158] sm:$0xff] }
  0x58   : > { %v283_v48 = vld [vmem:[#allocation2 + $0x190] sm:$0xff]  ;;  %v284_v50 = vld [vmem:[#allocation2 + $0x198] sm:$0xff] }
  0x59   : > { %674 = vmatpush1.bf16.msra.mxu0 %v1105_v43  ;;  %717 = vmatpush1.bf16.msra.mxu1 %v1107_v44  ;;  %v280_v43 = vld [vmem:[#allocation2 + $0x178] sm:$0xff]  ;;  %v1109_v44 = vcombine.low %v267_v33, %v271_v34  ;;  %v287_v49 = vld [vmem:[#allocation2 + $0x1b0] sm:$0xff] }
  0x5a   : > { %675 = vmatprep.subr.bf16.mxu0 %v1114_v45  ;;  %718 = vmatprep.subr.bf16.mxu1 %v1116_v46  ;;  %v1111_v45 = vcombine.low %v268_v35, %v272_v36  ;;  %v1118_v46 = vcombine.high %v275_v40, %v279_v41  ;;  %v1120_v47 = vcombine.high %v276_v42, %v280_v43  ;;  %v291_v56 = vld [vmem:[#allocation2 + $0x1d0] sm:$0xff]  ;;  %v292_v58 = vld [vmem:[#allocation2 + $0x1d8] sm:$0xff] }
  0x5b   : > { %v295_v57 = vld [vmem:[#allocation2 + $0x1f0] sm:$0xff] }
  0x5c   : > { %v1133_v1 = vcombine.low %v291_v56, %v295_v57 }
  0x5d   : > { %676 = vmatpush1.bf16.msra.mxu0 %v1113_v51  ;;  %719 = vmatpush1.bf16.msra.mxu1 %v1115_v52  ;;  %v288_v51 = vld [vmem:[#allocation2 + $0x1b8] sm:$0xff]  ;;  %v1117_v52 = vcombine.low %v275_v40, %v279_v41 }
  0x5e   : > { %677 = vmatprep.subr.bf16.mxu0 %v1122_v53  ;;  %720 = vmatprep.subr.bf16.mxu1 %v1124_v54  ;;  %v1119_v53 = vcombine.low %v276_v42, %v280_v43  ;;  %v1126_v54 = vcombine.high %v283_v48, %v287_v49  ;;  %v1128_v55 = vcombine.high %v284_v50, %v288_v51 }
  0x61   : > { %678 = vmatpush1.bf16.msra.mxu0 %v1121_v59  ;;  %721 = vmatpush1.bf16.msra.mxu1 %v1123_v60  ;;  %v296_v59 = vld [vmem:[#allocation2 + $0x1f8] sm:$0xff]  ;;  %v1125_v60 = vcombine.low %v283_v48, %v287_v49  ;;  %v1284_v48 = vmov 1966171168  }
  0x62   : > { %679 = vmatprep.subr.bf16.mxu0 %v1130_v61  ;;  %722 = vmatprep.subr.bf16.mxu1 %v1132_v62  ;;  %v1127_v61 = vcombine.low %v284_v50, %v288_v51  ;;  %v1134_v62 = vcombine.high %v291_v56, %v295_v57  ;;  %v1136_v63 = vcombine.high %v292_v58, %v296_v59  ;;  %v923_v49 = vunpack.c.l.s4 %v1284_v48 }
  0x63   : > { %v1135_v2 = vcombine.low %v292_v58, %v296_v59 }
  0x64   : > { %v924_v58 = vunpack.c.0.s8 %v923_v49 }
  0x65   : > { %680 = vmatpush1.bf16.msra.mxu0 %v1129_v4  ;;  %723 = vmatpush1.bf16.msra.mxu1 %v1131_v5  ;;  %v1426_v4 = vshrl.u32 %v299_v3, 7 }
  0x66   : > { %751 = vmatprep.subr.bf16.mxu0 %v1078_v6  ;;  %794 = vmatprep.subr.bf16.mxu1 %v1080_v7  ;;  %v1429_v6 = vld [vmem:[#allocation4] sm:$0xff] }
  0x67   : > { %v301_v5 = vsub.s32 0, %v1426_v4  ;;  %v309_v7 = vsub.s32 2, %v1426_v4  ;;  %v305_v8 = vsub.s32 1, %v1426_v4  ;;  %v313_v9 = vsub.s32 3, %v1426_v4 }
  0x68   : > { %698 = vmatmul.mubr.bf16.vlgmr.msra.gmra.mrb[0].mxu0 %v1418_v10  ;;  %741 = vmatmul.mubr.bf16.vlgmr.msra.gmra.mrb[0].mxu1 %v1418_v10 }
  0x69   : > { %752 = vmatpush1.bf16.msra.mxu0 %v1077_v13  ;;  %795 = vmatpush1.bf16.msra.mxu1 %v1079_v14  ;;  %v302_v11 = vrot.slane %v1429_v6, %v301_v5  ;;  %v310_v12 = vrot.slane %v1429_v6, %v309_v7  ;;  %v306_v13 = vrot.slane %v1429_v6, %v305_v8 }
  0x6a   : > { %753 = vmatprep.subr.bf16.mxu0 %v1086_v15  ;;  %796 = vmatprep.subr.bf16.mxu1 %v1088_v16  ;;  %v1439_v5 = vsub.s32 %v924_v58, %v1426_v4 }
  0x6b   : > { %783 = vmatprep.mubr.bf16.mxu0 %v1283_v0  ;;  %826 = vmatprep.mubr.bf16.mxu1 %v1283_v0  ;;  %v1112_v0 = vcombine.high %v268_v35, %v272_v36 }
  0x6d   : > { %754 = vmatpush1.bf16.msra.mxu0 %v1085_v21  ;;  %797 = vmatpush1.bf16.msra.mxu1 %v1087_v22 }
  0x6e   : > { %755 = vmatprep.subr.bf16.mxu0 %v1094_v23  ;;  %798 = vmatprep.subr.bf16.mxu1 %v1096_v24 }
  0x71   : > { %756 = vmatpush1.bf16.msra.mxu0 %v1093_v29  ;;  %799 = vmatpush1.bf16.msra.mxu1 %v1095_v30 }
  0x72   : > { %757 = vmatprep.subr.bf16.mxu0 %v1102_v31  ;;  %800 = vmatprep.subr.bf16.mxu1 %v1104_v32 }
  0x75   : > { %758 = vmatpush1.bf16.msra.mxu0 %v1101_v37  ;;  %801 = vmatpush1.bf16.msra.mxu1 %v1103_v38 }
  0x76   : > { %759 = vmatprep.subr.bf16.mxu0 %v1110_v39  ;;  %802 = vmatprep.subr.bf16.mxu1 %v1112_v0 }
  0x79   : > { %760 = vmatpush1.bf16.msra.mxu0 %v1109_v44  ;;  %803 = vmatpush1.bf16.msra.mxu1 %v1111_v45 }
  0x7a   : > { %761 = vmatprep.subr.bf16.mxu0 %v1118_v46  ;;  %804 = vmatprep.subr.bf16.mxu1 %v1120_v47 }
  0x7d   : > { %762 = vmatpush1.bf16.msra.mxu0 %v1117_v52  ;;  %805 = vmatpush1.bf16.msra.mxu1 %v1119_v53 }
  0x7e   : > { %763 = vmatprep.subr.bf16.mxu0 %v1126_v54  ;;  %806 = vmatprep.subr.bf16.mxu1 %v1128_v55 }
  0x81   : > { %764 = vmatpush1.bf16.msra.mxu0 %v1125_v60  ;;  %807 = vmatpush1.bf16.msra.mxu1 %v1127_v61 }
  0x82   : > { %765 = vmatprep.subr.bf16.mxu0 %v1134_v62  ;;  %808 = vmatprep.subr.bf16.mxu1 %v1136_v63 }
  0x85   : > { %766 = vmatpush1.bf16.msra.mxu0 %v1133_v1  ;;  %809 = vmatpush1.bf16.msra.mxu1 %v1135_v2 }
  0x88   : > { %784 = vmatmul.mubr.bf16.vlgmr.msra.gmra.mrb[4].mxu0 %v1418_v10  ;;  %827 = vmatmul.mubr.bf16.vlgmr.msra.gmra.mrb[4].mxu1 %v1418_v10  ;;  %v314_v10 = vrot.slane %v1429_v6, %v313_v9 }
 0x13b   : > { %v699_v14 = vpop.f32.mrb[0].mxu0  ;;  %v742_v16 = vpop.f32.mrb[0].mxu1 }
 0x13c   : > { %v700_v15 = vadd.f32 %v699_v14, %v302_v11  ;;  %v701_v17 = vpop.f32.mrb[1].mxu0  ;;  %v743_v18 = vadd.f32 %v742_v16, %v310_v12  ;;  %v744_v20 = vpop.f32.mrb[1].mxu1  ;;  %v321_v14 = vsub.s32 5, %v1426_v4  ;;  %v329_v16 = vsub.s32 7, %v1426_v4 }
 0x13d   : > { %v702_v19 = vadd.f32 %v701_v17, %v306_v13  ;;  %v703_v21 = vpop.f32.mrb[2].mxu0  ;;  %v745_v23 = vadd.f32 %v744_v20, %v314_v10  ;;  %v746_v25 = vpop.f32.mrb[2].mxu1 }
 0x13e   : > { %v837_v22 = vmax.f32 %v700_v15, 0.0  ;;  %v704_v24 = vadd.f32 %v703_v21, %v302_v11  ;;  %v705_v26 = vpop.f32.mrb[3].mxu0  ;;  %v839_v27 = vmax.f32 %v743_v18, 0.0  ;;  %v747_v28 = vadd.f32 %v746_v25, %v310_v12  ;;  %v748_v30 = vpop.f32.mrb[3].mxu1 }
 0x13f   : > { %v706_v29 = vadd.f32 %v705_v26, %v306_v13  ;;  %v749_v32 = vadd.f32 %v748_v30, %v314_v10  ;;  %v838_v33 = vmax.f32 %v702_v19, 0.0  ;;  %v840_v36 = vmax.f32 %v745_v23, 0.0 }
 0x140   : > { %v845_v31 = vmax.f32 %v704_v24, 0.0  ;;  %v847_v34 = vmax.f32 %v747_v28, 0.0  ;;  %v317_v13 = vsub.s32 4, %v1426_v4  ;;  %v325_v10 = vsub.s32 6, %v1426_v4 }
 0x141   : > { %v846_v35 = vmax.f32 %v706_v29, 0.0  ;;  %v848_v38 = vmax.f32 %v749_v32, 0.0  ;;  %v322_v19 = vrot.slane %v1429_v6, %v321_v14  ;;  %v330_v20 = vrot.slane %v1429_v6, %v329_v16 }
 0x142   : > { %v854_v37 = vmax.f32 %v837_v22, %v845_v31  ;;  %v868_v39 = vmax.f32 %v839_v27, %v847_v34  ;;  %v318_v17 = vrot.slane %v1429_v6, %v317_v13  ;;  %v326_v18 = vrot.slane %v1429_v6, %v325_v10 }
 0x143   : > { %v861_v0 = vmax.f32 %v838_v33, %v846_v35  ;;  %v875_v41 = vmax.f32 %v840_v36, %v848_v38 }
 0x144   : > { %v855_v40 = vrot.slane %v854_v37, 4  ;;  %v869_v42 = vrot.slane %v868_v39, 4 }
 0x145   : > { %v862_v43 = vrot.slane %v861_v0, 4  ;;  %v876_v45 = vrot.slane %v875_v41, 4 }
 0x146   : > { %v856_v44 = vmax.f32 %v854_v37, %v855_v40  ;;  %v870_v46 = vmax.f32 %v868_v39, %v869_v42 }
 0x147   : > { %v863_v47 = vmax.f32 %v861_v0, %v862_v43  ;;  %v877_v51 = vmax.f32 %v875_v41, %v876_v45 }
 0x148   : > { %v857_v50 = vrot.slane %v856_v44, 2  ;;  %v871_v52 = vrot.slane %v870_v46, 2 }
 0x149   : > { %v864_v53 = vrot.slane %v863_v47, 2  ;;  %v878_v55 = vrot.slane %v877_v51, 2 }
 0x14a   : > { %v858_v54 = vmax.f32 %v856_v44, %v857_v50  ;;  %v872_v56 = vmax.f32 %v870_v46, %v871_v52 }
 0x14b   : > { %v865_v57 = vmax.f32 %v863_v47, %v864_v53  ;;  %v879_v60 = vmax.f32 %v877_v51, %v878_v55 }
 0x14c   : > { %v859_v59 = vrot.slane %v858_v54, 1  ;;  %v873_v61 = vrot.slane %v872_v56, 1 }
 0x14d   : > { %v866_v62 = vrot.slane %v865_v57, 1  ;;  %v880_v1 = vrot.slane %v879_v60, 1 }
 0x14e   : > { %v860_v63 = vmax.f32 %v858_v54, %v859_v59  ;;  %v874_v2 = vmax.f32 %v872_v56, %v873_v61 }
 0x14f   : > { %v867_v3 = vmax.f32 %v865_v57, %v866_v62  ;;  %v881_v7 = vmax.f32 %v879_v60, %v880_v1 }
 0x151   : > { %v918_v8 = vcombine.low %v860_v63, %v867_v3  ;;  %v919_v9 = vcombine.low %v874_v2, %v881_v7 }
 0x153   : > { %v1442_v11 = vrot.slane %v918_v8, %v1439_v5  ;;  %v1445_v12 = vrot.slane %v919_v9, %v1439_v5 }
 0x155   : > { %v950_v15 = vcombine.low %v1442_v11, %v1445_v12 }
 0x15b   : > { %v785_v21 = vpop.f32.mrb[4].mxu0  ;;  %v828_v23 = vpop.f32.mrb[4].mxu1 }
 0x15c   : > { %v786_v22 = vadd.f32 %v785_v21, %v318_v17  ;;  %v787_v24 = vpop.f32.mrb[5].mxu0  ;;  %v829_v25 = vadd.f32 %v828_v23, %v326_v18  ;;  %v830_v27 = vpop.f32.mrb[5].mxu1 }
 0x15d   : > { %v788_v26 = vadd.f32 %v787_v24, %v322_v19  ;;  %v789_v28 = vpop.f32.mrb[6].mxu0  ;;  %v831_v29 = vadd.f32 %v830_v27, %v330_v20  ;;  %v832_v31 = vpop.f32.mrb[6].mxu1 }
 0x15e   : > { %v790_v30 = vadd.f32 %v789_v28, %v318_v17  ;;  %v791_v4 = vpop.f32.mrb[7].mxu0  ;;  %v833_v32 = vadd.f32 %v832_v31, %v326_v18  ;;  %v834_v34 = vpop.f32.mrb[7].mxu1  ;;  %v841_v35 = vmax.f32 %v786_v22, 0.0  ;;  %v843_v38 = vmax.f32 %v829_v25, 0.0 }
 0x15f   : > { %v792_v33 = vadd.f32 %v791_v4, %v322_v19  ;;  %v835_v37 = vadd.f32 %v834_v34, %v330_v20  ;;  %v842_v6 = vmax.f32 %v788_v26, 0.0  ;;  %v844_v40 = vmax.f32 %v831_v29, 0.0 }
 0x160   : > { %v849_v36 = vmax.f32 %v790_v30, 0.0  ;;  %v851_v39 = vmax.f32 %v833_v32, 0.0  ;;  %v958_v18 = vrot.slane %v950_v15, %v1439_v5 }
 0x161   : > { %v850_v0 = vmax.f32 %v792_v33, 0.0  ;;  %v852_v42 = vmax.f32 %v835_v37, 0.0 }
 0x162   : > { %v882_v41 = vmax.f32 %v841_v35, %v849_v36  ;;  %v896_v43 = vmax.f32 %v843_v38, %v851_v39 }
 0x163   : > { %v889_v44 = vmax.f32 %v842_v6, %v850_v0  ;;  %v903_v46 = vmax.f32 %v844_v40, %v852_v42 }
 0x164   : > { %v883_v45 = vrot.slane %v882_v41, 4  ;;  %v897_v47 = vrot.slane %v896_v43, 4 }
 0x165   : > { %v890_v48 = vrot.slane %v889_v44, 4  ;;  %v904_v50 = vrot.slane %v903_v46, 4 }
 0x166   : > { %v884_v49 = vmax.f32 %v882_v41, %v883_v45  ;;  %v898_v51 = vmax.f32 %v896_v43, %v897_v47 }
 0x167   : > { %v891_v52 = vmax.f32 %v889_v44, %v890_v48  ;;  %v905_v54 = vmax.f32 %v903_v46, %v904_v50 }
 0x168   : > { %v885_v53 = vrot.slane %v884_v49, 2  ;;  %v899_v55 = vrot.slane %v898_v51, 2 }
 0x169   : > { %v892_v56 = vrot.slane %v891_v52, 2  ;;  %v906_v58 = vrot.slane %v905_v54, 2 }
 0x16a   : > { %v886_v57 = vmax.f32 %v884_v49, %v885_v53  ;;  %v900_v59 = vmax.f32 %v898_v51, %v899_v55 }
 0x16b   : > { %v893_v60 = vmax.f32 %v891_v52, %v892_v56  ;;  %v907_v62 = vmax.f32 %v905_v54, %v906_v58 }
 0x16c   : > { %v887_v61 = vrot.slane %v886_v57, 1  ;;  %v901_v63 = vrot.slane %v900_v59, 1 }
 0x16d   : > { %v894_v1 = vrot.slane %v893_v60, 1  ;;  %v908_v3 = vrot.slane %v907_v62, 1 }
 0x16e   : > { %v888_v2 = vmax.f32 %v886_v57, %v887_v61  ;;  %v902_v7 = vmax.f32 %v900_v59, %v901_v63 }
 0x16f   : > { %v895_v8 = vmax.f32 %v893_v60, %v894_v1  ;;  %v909_v9 = vmax.f32 %v907_v62, %v908_v3 }
 0x171   : > { %v920_v13 = vcombine.low %v888_v2, %v895_v8  ;;  %v921_v10 = vcombine.low %v902_v7, %v909_v9 }
 0x173   : > { %v942_v14 = vrot.slane %v920_v13, %v1439_v5  ;;  %v949_v16 = vrot.slane %v921_v10, %v1439_v5 }
 0x175   : > { %v951_v17 = vcombine.low %v942_v14, %v949_v16 }
 0x177   : > { %v965_v19 = vrot.slane %v951_v17, %v1439_v5 }
 0x179   : > { %v966_v20 = vcombine.low %v958_v18, %v965_v19 }
 0x17b   : > { %969 = vst [vmem:[%s224_s29] sm:$0xff] %v966_v20 }
 0x17c PF: > { %s15_s14 = sadd.s32 1, %s1277_s14   ;;  %s1490_s12 = smov %s1273_s13 }
 0x17d   : > { %p12_p8 = scmp.ge.s32.totalorder %s15_s14, 4   ;;  %s1491_s13 = smov %s1493_s16 }
 0x17f   :  { %14 = sbr.rel (!%p12_p8) target bundleno = 3 (0x3), region = 75 }
 0x186   :  { %989 = vsyncpa [#allocation3], 1 }
 0x187   :  { %991 = vsyncpa [#allocation3 + $0x1], 1 }
 0x188   :  { %992 = vsyncpa [#allocation5], 1 }

// kernel: dgcnn_seg_forward.19
= control target key start
LH: loop header
LB: loop body
LE: loop exit
PB: predicated region body
PF: predicated region fallthrough
CT: control target
= control target key end

     0   :  { %vm171_vm0 = vcmask 519168   ;;  %s304_s1 = inlined_call_operand.vmem [shape: bf16[128,64], index: 1, kind: input, shape index: {}]   ;;  %s305_s0 = inlined_call_operand.vmem [shape: bf16[32,128], index: 0, kind: input, shape index: {}]   ;;  %s306_s2 = inlined_call_operand.vmem [shape: f32[1,64], index: 2, kind: input, shape index: {}]   ;;  %s307_s3 = inlined_call_operand.vmem [shape: bf16[32,64], index: 3, kind: output, shape index: {}]  }
   0x1   :  { %v229_v0 = vld [vmem:[%s304_s1] sm:$0xff]   ;;  %v230_v1 = vld [vmem:[%s304_s1 + $0x8] sm:$0xff]   ;;  %v231_v2 = vld [vmem:[%s304_s1 + $0x10] sm:$0xff]  }
   0x2   :  { %209 = vmatprep.subr.bf16.mxu0 %v229_v0  ;;  %v232_v3 = vld [vmem:[%s304_s1 + $0x18] sm:$0xff]   ;;  %v237_v4 = vld [vmem:[%s305_s0] sm:$0xff]   ;;  %v234_v6 = vld [vmem:[%s304_s1 + $0x28] sm:$0xff]  }
   0x3   :  { %210 = vmatpush3.bf16.msra.mxu0 %v229_v0  ;;  %225 = vmatprep.mubr.bf16.mxu0 %v237_v4  ;;  %v233_v5 = vld [vmem:[%s304_s1 + $0x20] sm:$0xff]   ;;  %v235_v7 = vld [vmem:[%s304_s1 + $0x30] sm:$0xff]   ;;  %v236_v8 = vld [vmem:[%s304_s1 + $0x38] sm:$0xff]  }
   0x4   :  { %211 = vmatprep.subr.bf16.mxu0 %v230_v1  ;;  %v238_v9 = vld [vmem:[%s305_s0 + $0x8] sm:$0xff]   ;;  %v180_v10 = vld [vmem:[%s306_s2] ss:$0 sm:$0xff] }
   0x7   :  { %212 = vmatpush3.bf16.msra.mxu0 %v230_v1 }
   0x8   :  { %213 = vmatprep.subr.bf16.mxu0 %v231_v2 }
   0xb   :  { %214 = vmatpush3.bf16.msra.mxu0 %v231_v2 }
   0xc   :  { %215 = vmatprep.subr.bf16.mxu0 %v232_v3 }
   0xf   :  { %216 = vmatpush3.bf16.msra.mxu0 %v232_v3 }
  0x10   :  { %217 = vmatprep.subr.bf16.mxu0 %v233_v5 }
  0x13   :  { %218 = vmatpush3.bf16.msra.mxu0 %v233_v5 }
  0x14   :  { %219 = vmatprep.subr.bf16.mxu0 %v234_v6 }
  0x17   :  { %220 = vmatpush3.bf16.msra.mxu0 %v234_v6 }
  0x18   :  { %221 = vmatprep.subr.bf16.mxu0 %v235_v7 }
  0x1b   :  { %222 = vmatpush3.bf16.msra.mxu0 %v235_v7 }
  0x1c   :  { %223 = vmatprep.subr.bf16.mxu0 %v236_v8 }
  0x1f   :  { %224 = vmatpush3.bf16.msra.mxu0 %v236_v8 }
  0x22   :  { %226 = vmatmul.mubr.bf16.vlgmr.msra.gmra.mrb[0].mxu0 %v238_v9 }
  0xf5   :  { %v227_v11 = vpop.f32.mrb[0].mxu0 }
  0xf6   :  { %v145_v12 = vadd.f32 %v227_v11, %v180_v10  ;;  %v136_v13 = vpop.f32.mrb[1].mxu0 }
  0xf7   :  { %v137_v14 = vadd.f32 %v180_v10, %v136_v13  ;;  %v228_v15 = vpop.f32.mrb[2].mxu0 }
  0xf8   :  { %v153_v16 = vmax.f32 %v145_v12, 0.0  ;;  %v148_v17 = vadd.f32 %v228_v15, %v180_v10  ;;  %v139_v18 = vpop.f32.mrb[3].mxu0 }
  0xf9   :  { %v151_v19 = vmax.f32 %v137_v14, 0.0  ;;  %v140_v20 = vadd.f32 %v180_v10, %v139_v18 }
  0xfa   :  { %v197_v21 = vpack.c.bf16 %v153_v16, %v153_v16  ;;  %v154_v22 = vmax.f32 %v148_v17, 0.0 }
  0xfb   :  { %v195_v23 = vpack.c.bf16 %v151_v19, %v151_v19  ;;  %v152_v24 = vmax.f32 %v140_v20, 0.0 }
  0xfc   :  { %174 = vst.msk [vmem:[%s307_s3 + $0x8] sm:$0xf] %vm171_vm0, %v197_v21  ;;  %v198_v25 = vpack.c.bf16 %v154_v22, %v154_v22 }
  0xfd   :  { %172 = vst.msk [vmem:[%s307_s3] sm:$0xf] %vm171_vm0, %v195_v23  ;;  %v196_v26 = vpack.c.bf16 %v152_v24, %v152_v24 }
  0xfe   :  { %175 = vst.msk [vmem:[%s307_s3 + $0xc] sm:$0xf] %vm171_vm0, %v198_v25 }
  0xff   :  { %173 = vst.msk [vmem:[%s307_s3 + $0x4] sm:$0xf] %vm171_vm0, %v196_v26 }

// kernel: dgcnn_seg_forward.18
= control target key start
LH: loop header
LB: loop body
LE: loop exit
PB: predicated region body
PF: predicated region fallthrough
CT: control target
= control target key end

     0   :  { %s1273_s24 = smov 0   ;;  %s1275_s25 = smov 0   ;;  %s1410_s0 = inlined_call_operand.vmem [shape: bf16[2,16,3], index: 0, kind: input, shape index: {}]   ;;  %s1411_s1 = inlined_call_operand.vmem [shape: bf16[2,8,16,3], index: 1, kind: input, shape index: {}]   ;;  %s1412_s2 = inlined_call_operand.vmem [shape: bf16[3,64], index: 2, kind: input, shape index: {}]   ;;  %s1413_s3 = inlined_call_operand.vmem [shape: bf16[3,64], index: 3, kind: input, shape index: {}]   ;;  %s1414_s4 = inlined_call_operand.vmem [shape: f32[1,64], index: 4, kind: input, shape index: {}]   ;;  %s1415_s5 = inlined_call_operand.vmem [shape: bf16[64,64], index: 5, kind: input, shape index: {}]   ;;  %s1416_s6 = inlined_call_operand.vmem [shape: f32[1,64], index: 6, kind: input, shape index: {}]   ;;  %s1417_s7 = inlined_call_operand.vmem [shape: bf16[2,16,128], index: 7, kind: output, shape index: {}]  }
   0x1   :  { %s1277_s26 = smov 0  }
   0x2 LB: > { %s29_s27 = sadd.s32 1, %s1223_s25  ;;  %p1027_p0 = scmp.ge.s32.totalorder %s1227_s26, 1  ;;  %s1227_s26 = sphi %s1277_s26, %s17_s26   ;;  %s1223_s25 = sphi %s1275_s25, %s1419_s25   ;;  %s1219_s24 = sphi %s1273_s24, %s1418_s24  }
   0x3   : > { %p31_p1 = scmp.ge.s32.totalorder %s29_s27, 2  ;;  %p275_p2 = scmp.lt.s32.totalorder %s1227_s26, 3 }
   0x5   : > { %s1421_s27 = smov (%p31_p1, %s29_s27), 0  ;;  %p276_p3 = pnand %p1027_p0, %p275_p2 }
   0x6   : > { %v358_v0 = vld [vmem:[%s1413_s3] sm:$0x3] (!%p276_p3)  ;;  %vm375_vm0 = vcmask (!%p276_p3), 1040384   ;;  %vm376_vm1 = vcmask (!%p276_p3), 1041408   ;;  %v1229_v1 = vmov (!%p276_p3), 0.0   ;;  %v1230_v2 = vmov (!%p276_p3), 65535  }
   0x7   : > { %279 = sbr.rel (%p276_p3) target bundleno = 615 (0x267), region = 48  ;;  %1103 = vmatprep.subr.bf16.mxu0 (!%p276_p3), %v1229_v1  ;;  %v377_v3 = vsel (!%p276_p3), %vm375_vm0, 4294967295, %v1230_v2  ;;  %v357_v4 = vld [vmem:[%s1412_s2] sm:$0x3] (!%p276_p3)  ;;  %p325_p4 = scmp.lt.s32.totalorder (!%p276_p3), %s1219_s24, 1  ;;  %vm1231_vm2 = vmmov (!%p276_p3), 0  }
   0x8   : > { %v378_v5 = vsel (!%p276_p3), %vm376_vm1, %v377_v3, 0  ;;  %1105 = vmatprep.mubr.msk.bf16.mxu0 (!%p276_p3), %vm1231_vm2, %v1229_v1  ;;  %v1201_v6 = vld [vmem:[%s1415_s5] sm:$0xff] (!%p276_p3)   ;;  %vm371_vm3 = vcmask (!%p276_p3), 23552   ;;  %v1202_v18 = vld [vmem:[%s1415_s5 + $0x8] sm:$0xff] (!%p276_p3)   ;;  %v1203_v19 = vld [vmem:[%s1415_s5 + $0x10] sm:$0xff] (!%p276_p3)   ;;  %vm676_vm4 = vcmask (!%p276_p3), 523264  }
   0x9   : > { %v380_v7 = vand.u32 (!%p276_p3), %v378_v5, %v358_v0  ;;  %v504_v8 = vand.u32 (!%p276_p3), %v378_v5, %v357_v4  ;;  %v1204_v20 = vld [vmem:[%s1415_s5 + $0x18] sm:$0xff] (!%p276_p3)   ;;  %v1034_v21 = vld [vmem:[%s1414_s4] ss:$0 sm:$0xff] (!%p276_p3)  ;;  %s1232_s10 = smov (!%p276_p3), 64  }
   0xb   : > { %1104 = vmatpush3.bf16.msra.mxu0 (!%p276_p3), %v380_v7  ;;  %1109 = vmatprep.subr.bf16.mxu1 (!%p276_p3), %v504_v8 }
   0xc   : > { %1110 = vmatpush3.bf16.msra.mxu1 (!%p276_p3), %v504_v8  ;;  %1127 = vmatprep.subr.bf16.mxu0 (!%p276_p3), %v1201_v6 }
   0xd   : > { %1151 = vmatprep.subr.bf16.mxu1 (!%p276_p3), %v1201_v6 }
   0xe   : > { %s1423_s24 = smov (!%p325_p4, %s1219_s24), 1 }
   0xf   : > { %s1070_s11 = sshll.u32 %s1423_s24, 3  ;;  %s1071_s12 = sshll.u32 %s1423_s24, 6 }
  0x10   : > { %s332_s15 = scalar_lea.vmem %s1410_s0, %s1070_s11  ;;  %s342_s18 = scalar_lea.vmem %s1411_s1, %s1071_s12 }
  0x11   : > { %v1192_v9 = vld [vmem:[%s332_s15] sm:$0xff]   ;;  %v1194_v11 = vld [vmem:[%s342_s18 + $0x8] sm:$0xff]   ;;  %v1195_v12 = vld [vmem:[%s342_s18 + $0x10] sm:$0xff]   ;;  %s352_s14 = scalar_lea.vmem %s1417_s7, %s1070_s11 }
  0x12   : > { %v1193_v10 = vld [vmem:[%s342_s18] sm:$0xff]   ;;  %1106 = vmatmul.mubr.msk.bf16.vlgmr.msra.gmra.mrb[0].mxu0 %vm371_vm3, %v1192_v9  ;;  %v1196_v13 = vld [vmem:[%s342_s18 + $0x18] sm:$0xff]   ;;  %v1198_v15 = vld [vmem:[%s342_s18 + $0x28] sm:$0xff]  }
  0x13   : > { %1111 = vmatprep.mubr.msk.bf16.mxu1 %vm371_vm3, %v1193_v10  ;;  %1128 = vmatpush3.bf16.msra.mxu0 %v1201_v6  ;;  %v1197_v14 = vld [vmem:[%s342_s18 + $0x20] sm:$0xff]   ;;  %v1199_v16 = vld [vmem:[%s342_s18 + $0x30] sm:$0xff]   ;;  %v1200_v17 = vld [vmem:[%s342_s18 + $0x38] sm:$0xff]  }
  0x14   : > { %1112 = vmatmul.mubr.msk.bf16.vlgmr.msra.gmra.mrb[0].mxu1 %vm371_vm3, %v1194_v11  ;;  %1129 = vmatprep.subr.bf16.mxu0 %v1202_v18 }
  0x15   : > { %1115 = vmatprep.mubr.msk.bf16.mxu1 %vm371_vm3, %v1195_v12  ;;  %1155 = vmatpush3.bf16.msra.mxu1 %v1201_v6 }
  0x16   : > { %1152 = vmatprep.subr.bf16.mxu1 %v1202_v18 }
  0x17   : > { %1130 = vmatpush3.bf16.msra.mxu0 %v1202_v18 }
  0x18   : > { %1131 = vmatprep.subr.bf16.mxu0 %v1203_v19 }
  0x19   : > { %1156 = vmatpush3.bf16.msra.mxu1 %v1202_v18 }
  0x1a   : > { %1153 = vmatprep.subr.bf16.mxu1 %v1203_v19 }
  0x1b   : > { %1132 = vmatpush3.bf16.msra.mxu0 %v1203_v19 }
  0x1c   : > { %1116 = vmatmul.mubr.msk.bf16.gmra.mrb[4].mxu1 %vm371_vm3, %v1196_v13  ;;  %1133 = vmatprep.subr.bf16.mxu0 %v1204_v20 }
  0x1d   : > { %1119 = vmatprep.mubr.msk.bf16.mxu1 %vm371_vm3, %v1197_v14  ;;  %1157 = vmatpush3.bf16.msra.mxu1 %v1203_v19 }
  0x1e   : > { %1154 = vmatprep.subr.bf16.mxu1 %v1204_v20 }
  0x1f   : > { %1134 = vmatpush3.bf16.msra.mxu0 %v1204_v20 }
  0x21   : > { %1158 = vmatpush3.bf16.msra.mxu1 %v1204_v20  ;;  %v1344_v20 = vld [vmem:[%s1416_s6] ss:$0 sm:$0xff] }
  0x24   : > { %1120 = vmatmul.mubr.msk.bf16.gmra.mrb[8].mxu1 %vm371_vm3, %v1198_v15 }
  0x25   : > { %1123 = vmatprep.mubr.msk.bf16.mxu1 %vm371_vm3, %v1199_v16 }
  0x2c   : > { %1124 = vmatmul.mubr.msk.bf16.gmra.mrb[12].mxu1 %vm371_vm3, %v1200_v17 }
  0xe5   : > { %v416_v22 = vpop.f32.mrb[0].mxu0 }
  0xe6   : > { %v417_v23 = vadd.f32 %v1034_v21, %v416_v22  ;;  %v1107_v24 = vpop.f32.mrb[1].mxu0 }
  0xe7   : > { %v1113_v25 = vpop.f32.mrb[0].mxu1  ;;  %v419_v26 = vpop.f32.mrb[2].mxu0 }
  0xe8   : > { %v605_v27 = vadd.f32 %v1113_v25, %v417_v23  ;;  %v420_v28 = vadd.f32 %v1034_v21, %v419_v26  ;;  %v540_v29 = vpop.f32.mrb[1].mxu1  ;;  %v1108_v30 = vpop.f32.mrb[3].mxu0 }
  0xe9   : > { %v603_v31 = vadd.f32 %v540_v29, %v417_v23  ;;  %v1114_v32 = vpop.f32.mrb[2].mxu1 }
  0xea   : > { %v606_v33 = vadd.f32 %v1114_v32, %v420_v28  ;;  %v543_v34 = vpop.f32.mrb[3].mxu1  ;;  %v621_v36 = vmax.f32 %v605_v27, 0.0 }
  0xeb   : > { %v604_v35 = vadd.f32 %v543_v34, %v420_v28  ;;  %v619_v38 = vmax.f32 %v603_v31, 0.0 }
  0xec   : > { %v622_v37 = vmax.f32 %v606_v33, 0.0 }
  0xed   : > { %v620_v39 = vmax.f32 %v604_v35, 0.0 }
  0xee   : > { %v645_v40 = vpack.c.bf16 %v622_v37, %v621_v36 }
  0xef   : > { %v644_v41 = vpack.c.bf16 %v620_v39, %v619_v38  ;;  %v1117_v42 = vpop.f32.mrb[4].mxu1 }
  0xf0   : > { %v609_v43 = vadd.f32 %v1117_v42, %v417_v23  ;;  %v556_v44 = vpop.f32.mrb[5].mxu1 }
  0xf1   : > { %v607_v45 = vadd.f32 %v556_v44, %v417_v23  ;;  %v1118_v46 = vpop.f32.mrb[6].mxu1  ;;  %1135 = vmatprep.mubr.msk.bf16.mxu0 %vm676_vm4, %v644_v41 }
  0xf2   : > { %v610_v47 = vadd.f32 %v1118_v46, %v420_v28  ;;  %v559_v48 = vpop.f32.mrb[7].mxu1  ;;  %1136 = vmatmul.mubr.msk.bf16.vlgmr.msra.gmra.mrb[4].mxu0 %vm676_vm4, %v645_v40  ;;  %v625_v50 = vmax.f32 %v609_v43, 0.0 }
  0xf3   : > { %v608_v49 = vadd.f32 %v559_v48, %v420_v28  ;;  %v623_v52 = vmax.f32 %v607_v45, 0.0 }
  0xf4   : > { %v626_v51 = vmax.f32 %v610_v47, 0.0 }
  0xf5   : > { %v624_v53 = vmax.f32 %v608_v49, 0.0 }
  0xf6   : > { %v647_v54 = vpack.c.bf16 %v626_v51, %v625_v50 }
  0xf7   : > { %v646_v55 = vpack.c.bf16 %v624_v53, %v623_v52  ;;  %v1121_v56 = vpop.f32.mrb[8].mxu1 }
  0xf8   : > { %v613_v57 = vadd.f32 %v1121_v56, %v417_v23  ;;  %v572_v58 = vpop.f32.mrb[9].mxu1 }
  0xf9   : > { %v611_v59 = vadd.f32 %v572_v58, %v417_v23  ;;  %v1122_v60 = vpop.f32.mrb[10].mxu1  ;;  %1139 = vmatprep.mubr.msk.bf16.mxu0 %vm676_vm4, %v646_v55 }
  0xfa   : > { %v614_v61 = vadd.f32 %v1122_v60, %v420_v28  ;;  %v575_v62 = vpop.f32.mrb[11].mxu1  ;;  %1140 = vmatmul.mubr.msk.bf16.gmra.mrb[8].mxu0 %vm676_vm4, %v647_v54  ;;  %v629_v0 = vmax.f32 %v613_v57, 0.0 }
  0xfb   : > { %v612_v63 = vadd.f32 %v575_v62, %v420_v28  ;;  %v627_v2 = vmax.f32 %v611_v59, 0.0 }
  0xfc   : > { %v630_v1 = vmax.f32 %v614_v61, 0.0 }
  0xfd   : > { %v628_v3 = vmax.f32 %v612_v63, 0.0 }
  0xfe   : > { %v649_v4 = vpack.c.bf16 %v630_v1, %v629_v0 }
  0xff   : > { %v648_v5 = vpack.c.bf16 %v628_v3, %v627_v2  ;;  %v1125_v6 = vpop.f32.mrb[12].mxu1 }
 0x100   : > { %v617_v7 = vadd.f32 %v1125_v6, %v417_v23  ;;  %v588_v8 = vpop.f32.mrb[13].mxu1 }
 0x101   : > { %v615_v9 = vadd.f32 %v588_v8, %v417_v23  ;;  %v1126_v10 = vpop.f32.mrb[14].mxu1  ;;  %1143 = vmatprep.mubr.msk.bf16.mxu0 %vm676_vm4, %v648_v5 }
 0x102   : > { %v618_v11 = vadd.f32 %v1126_v10, %v420_v28  ;;  %v591_v12 = vpop.f32.mrb[15].mxu1  ;;  %1144 = vmatmul.mubr.msk.bf16.gmra.mrb[12].mxu0 %vm676_vm4, %v649_v4  ;;  %v633_v14 = vmax.f32 %v617_v7, 0.0 }
 0x103   : > { %v616_v13 = vadd.f32 %v591_v12, %v420_v28  ;;  %v631_v16 = vmax.f32 %v615_v9, 0.0 }
 0x104   : > { %v634_v15 = vmax.f32 %v618_v11, 0.0 }
 0x105   : > { %v632_v17 = vmax.f32 %v616_v13, 0.0 }
 0x106   : > { %v651_v18 = vpack.c.bf16 %v634_v15, %v633_v14 }
 0x107   : > { %v650_v19 = vpack.c.bf16 %v632_v17, %v631_v16 }
 0x109   : > { %1147 = vmatprep.mubr.msk.bf16.mxu1 %vm676_vm4, %v650_v19 }
 0x10a   : > { %1148 = vmatmul.mubr.msk.bf16.vlgmr.msra.gmra.mrb[16].mxu1 %vm676_vm4, %v651_v18 }
 0x1c5   : > { %v1137_v21 = vpop.f32.mrb[4].mxu0 }
 0x1c6   : > { %v806_v22 = vadd.f32 %v1137_v21, %v1344_v20  ;;  %v735_v23 = vpop.f32.mrb[5].mxu0 }
 0x1c7   : > { %v804_v24 = vadd.f32 %v1344_v20, %v735_v23  ;;  %v1138_v25 = vpop.f32.mrb[6].mxu0 }
 0x1c8   : > { %v822_v26 = vmax.f32 %v806_v22, 0.0  ;;  %v807_v27 = vadd.f32 %v1138_v25, %v1344_v20  ;;  %v738_v28 = vpop.f32.mrb[7].mxu0 }
 0x1c9   : > { %v820_v29 = vmax.f32 %v804_v24, 0.0  ;;  %v805_v30 = vadd.f32 %v1344_v20, %v738_v28 }
 0x1ca   : > { %v867_v31 = vsel %vm676_vm4, %v822_v26, 0.0  ;;  %v823_v32 = vmax.f32 %v807_v27, 0.0  ;;  %v837_v47 = vsel %vm676_vm4, %v822_v26, -inf }
 0x1cb   : > { %v866_v33 = vsel %vm676_vm4, %v820_v29, 0.0  ;;  %v821_v34 = vmax.f32 %v805_v30, 0.0  ;;  %v836_v50 = vsel %vm676_vm4, %v820_v29, -inf }
 0x1cc   : > { %v868_v35 = vadd.f32 %v867_v31, %v866_v33  ;;  %v882_v36 = vsel %vm676_vm4, %v823_v32, 0.0  ;;  %v852_v51 = vsel %vm676_vm4, %v823_v32, -inf }
 0x1cd   : > { %v881_v37 = vsel %vm676_vm4, %v821_v34, 0.0  ;;  %v1141_v38 = vpop.f32.mrb[8].mxu0  ;;  %v851_v58 = vsel %vm676_vm4, %v821_v34, -inf }
 0x1ce   : > { %v883_v39 = vadd.f32 %v882_v36, %v881_v37  ;;  %v810_v40 = vadd.f32 %v1141_v38, %v1344_v20  ;;  %v751_v41 = vpop.f32.mrb[9].mxu0 }
 0x1cf   : > { %v808_v42 = vadd.f32 %v1344_v20, %v751_v41  ;;  %v1142_v43 = vpop.f32.mrb[10].mxu0 }
 0x1d0   : > { %v826_v44 = vmax.f32 %v810_v40, 0.0  ;;  %v811_v45 = vadd.f32 %v1142_v43, %v1344_v20  ;;  %v754_v46 = vpop.f32.mrb[11].mxu0 }
 0x1d1   : > { %v824_v48 = vmax.f32 %v808_v42, 0.0  ;;  %v809_v49 = vadd.f32 %v1344_v20, %v754_v46 }
 0x1d2   : > { %v840_v52 = vsel %vm676_vm4, %v826_v44, -inf  ;;  %v827_v53 = vmax.f32 %v811_v45, 0.0  ;;  %v871_v62 = vsel %vm676_vm4, %v826_v44, 0.0 }
 0x1d3   : > { %v841_v54 = vmax.f32 %v837_v47, %v840_v52  ;;  %v838_v55 = vsel %vm676_vm4, %v824_v48, -inf  ;;  %v869_v56 = vsel %vm676_vm4, %v824_v48, 0.0  ;;  %v825_v57 = vmax.f32 %v809_v49, 0.0 }
 0x1d4   : > { %v839_v59 = vmax.f32 %v836_v50, %v838_v55  ;;  %v870_v60 = vadd.f32 %v869_v56, %v868_v35  ;;  %v855_v61 = vsel %vm676_vm4, %v827_v53, -inf  ;;  %v886_v8 = vsel %vm676_vm4, %v827_v53, 0.0 }
 0x1d5   : > { %v856_v63 = vmax.f32 %v852_v51, %v855_v61  ;;  %v853_v0 = vsel %vm676_vm4, %v825_v57, -inf  ;;  %v884_v1 = vsel %vm676_vm4, %v825_v57, 0.0  ;;  %v1145_v2 = vpop.f32.mrb[12].mxu0 }
 0x1d6   : > { %v854_v3 = vmax.f32 %v851_v58, %v853_v0  ;;  %v885_v4 = vadd.f32 %v884_v1, %v883_v39  ;;  %v814_v5 = vadd.f32 %v1145_v2, %v1344_v20  ;;  %v767_v6 = vpop.f32.mrb[13].mxu0  ;;  %v872_v7 = vadd.f32 %v871_v62, %v870_v60 }
 0x1d7   : > { %v812_v9 = vadd.f32 %v1344_v20, %v767_v6  ;;  %v1146_v10 = vpop.f32.mrb[14].mxu0 }
 0x1d8   : > { %v830_v11 = vmax.f32 %v814_v5, 0.0  ;;  %v815_v12 = vadd.f32 %v1146_v10, %v1344_v20  ;;  %v770_v13 = vpop.f32.mrb[15].mxu0  ;;  %v887_v14 = vadd.f32 %v886_v8, %v885_v4 }
 0x1d9   : > { %v828_v15 = vmax.f32 %v812_v9, 0.0  ;;  %v813_v16 = vadd.f32 %v1344_v20, %v770_v13 }
 0x1da   : > { %v844_v17 = vsel %vm676_vm4, %v830_v11, -inf  ;;  %v831_v18 = vmax.f32 %v815_v12, 0.0  ;;  %v875_v27 = vsel %vm676_vm4, %v830_v11, 0.0 }
 0x1db   : > { %v845_v19 = vmax.f32 %v841_v54, %v844_v17  ;;  %v842_v21 = vsel %vm676_vm4, %v828_v15, -inf  ;;  %v873_v22 = vsel %vm676_vm4, %v828_v15, 0.0  ;;  %v829_v23 = vmax.f32 %v813_v16, 0.0 }
 0x1dc   : > { %v843_v24 = vmax.f32 %v839_v59, %v842_v21  ;;  %v874_v25 = vadd.f32 %v873_v22, %v872_v7  ;;  %v859_v26 = vsel %vm676_vm4, %v831_v18, -inf  ;;  %v890_v37 = vsel %vm676_vm4, %v831_v18, 0.0 }
 0x1dd   : > { %v860_v28 = vmax.f32 %v856_v63, %v859_v26  ;;  %v857_v29 = vsel %vm676_vm4, %v829_v23, -inf  ;;  %v888_v30 = vsel %vm676_vm4, %v829_v23, 0.0  ;;  %v1149_v31 = vpop.f32.mrb[16].mxu1 }
 0x1de   : > { %v858_v32 = vmax.f32 %v854_v3, %v857_v29  ;;  %v889_v33 = vadd.f32 %v888_v30, %v887_v14  ;;  %v818_v34 = vadd.f32 %v1149_v31, %v1344_v20  ;;  %v783_v35 = vpop.f32.mrb[17].mxu1  ;;  %v876_v36 = vadd.f32 %v875_v27, %v874_v25 }
 0x1df   : > { %v816_v38 = vadd.f32 %v1344_v20, %v783_v35  ;;  %v1150_v39 = vpop.f32.mrb[18].mxu1 }
 0x1e0   : > { %v834_v40 = vmax.f32 %v818_v34, 0.0  ;;  %v819_v41 = vadd.f32 %v1150_v39, %v1344_v20  ;;  %v786_v42 = vpop.f32.mrb[19].mxu1  ;;  %v891_v43 = vadd.f32 %v890_v37, %v889_v33 }
 0x1e1   : > { %v832_v44 = vmax.f32 %v816_v38, 0.0  ;;  %v817_v45 = vadd.f32 %v1344_v20, %v786_v42 }
 0x1e2   : > { %v848_v46 = vsel %vm676_vm4, %v834_v40, -inf  ;;  %v835_v47 = vmax.f32 %v819_v41, 0.0  ;;  %v879_v55 = vsel %vm676_vm4, %v834_v40, 0.0 }
 0x1e3   : > { %v849_v48 = vmax.f32 %v845_v19, %v848_v46  ;;  %v846_v49 = vsel %vm676_vm4, %v832_v44, -inf  ;;  %v877_v50 = vsel %vm676_vm4, %v832_v44, 0.0  ;;  %v833_v51 = vmax.f32 %v817_v45, 0.0 }
 0x1e4   : > { %v847_v52 = vmax.f32 %v843_v24, %v846_v49  ;;  %v878_v53 = vadd.f32 %v877_v50, %v876_v36  ;;  %v863_v54 = vsel %vm676_vm4, %v835_v47, -inf  ;;  %v894_v62 = vsel %vm676_vm4, %v835_v47, 0.0 }
 0x1e5   : > { %v864_v56 = vmax.f32 %v860_v28, %v863_v54  ;;  %v861_v57 = vsel %vm676_vm4, %v833_v51, -inf  ;;  %v892_v20 = vsel %vm676_vm4, %v833_v51, 0.0 }
 0x1e6   : > { %v850_v58 = vmax.f32 %v847_v52, %v849_v48  ;;  %v862_v59 = vmax.f32 %v858_v32, %v861_v57  ;;  %v893_v60 = vadd.f32 %v892_v20, %v891_v43  ;;  %v880_v61 = vadd.f32 %v879_v55, %v878_v53 }
 0x1e8   : > { %v865_v63 = vmax.f32 %v862_v59, %v864_v56  ;;  %v895_v0 = vadd.f32 %v894_v62, %v893_v60  ;;  %v896_v1 = vmul.f32 0.125, %v880_v61 }
 0x1ea   : > { %v897_v2 = vmul.f32 0.125, %v895_v0 }
 0x1ec   : > { %v1187_v3 = vpack.i.bf16 %v897_v2, %v896_v1 }
 0x1ee   : > { %1188 = vrot.lane.b32.xlu0 %v1187_v3, %s1232_s10 }
 0x260   : > { %v1189_v4 = vpop.permute.xlu0 %1188 }
 0x261   : > { %v1191_v5 = vunpack.i.h.bf16 %v1189_v4  ;;  %v1190_v6 = vunpack.i.l.bf16 %v1189_v4 }
 0x263   : > { %v906_v7 = vsel %vm676_vm4, %v850_v58, %v1190_v6  ;;  %v907_v8 = vsel %vm676_vm4, %v865_v63, %v1191_v5 }
 0x264   : > { %v1078_v9 = vpack.c.bf16 %v907_v8, %v906_v7 }
 0x266   : > { %1079 = vst [vmem:[%s352_s14] sm:$0xff] %v1078_v9  }
 0x267 PF: > { %s17_s26 = sadd.s32 1, %s1227_s26   ;;  %s1418_s24 = smov %s1223_s25 }
 0x268   : > { %p14_p5 = scmp.ge.s32.totalorder %s17_s26, 4   ;;  %s1419_s25 = smov %s1421_s27 }
 0x26a   :  { %16 = sbr.rel (!%p14_p5) target bundleno = 2 (0x2), region = 81 }

// kernel: dgcnn_seg_forward.20
= control target key start
LH: loop header
LB: loop body
LE: loop exit
PB: predicated region body
PF: predicated region fallthrough
CT: control target
= control target key end

     0   :  { %s718_s9 = smov 0   ;;  %s720_s10 = smov 0   ;;  %s870_s0 = inlined_call_operand.vmem [shape: f32[2,16,66], index: 0, kind: input, shape index: {}]   ;;  %s871_s1 = inlined_call_operand.vmem [shape: f32[2,66,16], index: 1, kind: input, shape index: {}]   ;;  %s872_s2 = inlined_call_operand.vmem [shape: s32[2,16,8], index: 2, kind: output, shape index: {}]  }
   0x1   :  { %s722_s11 = smov 0  }
   0x2 LB: > { %s24_s12 = sadd.s32 1, %s697_s10  ;;  %p589_p0 = scmp.ge.s32.totalorder %s701_s11, 1  ;;  %s701_s11 = sphi %s722_s11, %s12_s11   ;;  %s697_s10 = sphi %s720_s10, %s874_s10   ;;  %s693_s9 = sphi %s718_s9, %s873_s9  }
   0x3   : > { %p26_p1 = scmp.ge.s32.totalorder %s24_s12, 2  ;;  %p143_p2 = scmp.lt.s32.totalorder %s701_s11, 3 }
   0x5   : > { %s876_s12 = smov (%p26_p1, %s24_s12), 0  ;;  %p144_p3 = pnand %p589_p0, %p143_p2 }
   0x6   : > { %p179_p4 = scmp.lt.s32.totalorder (!%p144_p3), %s693_s9, 1  ;;  %vm214_vm0 = vcmask (!%p144_p3), 539648   ;;  %vm221_vm1 = vcmask (!%p144_p3), 1041408   ;;  %vm303_vm2 = vcmask (!%p144_p3), 130048   ;;  %v300_v19 = vlaneseq (!%p144_p3) }
   0x7   : > { %147 = sbr.rel (%p144_p3) target bundleno = 2580 (0xa14), region = 28 }
   0x8   : > { %v301_v20 = vand.u32 (!%p144_p3), 127, %v300_v19 }
   0xa   : > { %v752_v21 = vcvt.s32.f32 (!%p144_p3), %v301_v20 }
   0xe   : > { %s878_s9 = smov (!%p179_p4, %s693_s9), 1 }
   0xf   : > { %s650_s13 = smul.u32 72, %s878_s9  ;;  %s600_s14 = sshll.u32 %s878_s9, 4 }
  0x10   : > { %s186_s17 = scalar_lea.vmem %s870_s0, %s600_s14  ;;  %s201_s23 = scalar_lea.vmem %s872_s2, %s600_s14 }
  0x11   : > { %s192_s20 = scalar_lea.vmem %s871_s1, %s650_s13  ;;  %v203_v0 = vld [vmem:[%s186_s17] sm:$0xff]  ;;  %v204_v14 = vld [vmem:[%s186_s17 + $0x8] sm:$0xff] }
  0x12   : > { %v205_v1 = vld [vmem:[%s192_s20] sm:$0xff]  ;;  %v206_v2 = vld [vmem:[%s192_s20 + $0x8] sm:$0xff]  ;;  %v207_v3 = vld [vmem:[%s192_s20 + $0x10] sm:$0xff]  ;;  %631 = vmatprep.mubr.msk.f32.mxu0 %vm214_vm0, %v203_v0 }
  0x13   : > { %v634_v4 = vpack.c.bf16 %v206_v2, %v205_v1  ;;  %v208_v5 = vld [vmem:[%s192_s20 + $0x18] sm:$0xff]  ;;  %v209_v7 = vld [vmem:[%s192_s20 + $0x20] sm:$0xff]  ;;  %v210_v8 = vld [vmem:[%s192_s20 + $0x28] sm:$0xff] }
  0x14   : > { %v638_v6 = vpack.c.bf16 %v208_v5, %v207_v3  ;;  %v642_v9 = vpack.c.bf16 %v210_v8, %v209_v7  ;;  %v211_v10 = vld [vmem:[%s192_s20 + $0x30] sm:$0xff]  ;;  %v212_v11 = vld [vmem:[%s192_s20 + $0x38] sm:$0xff]  ;;  %v213_v13 = vld [vmem:[%s192_s20 + $0x40] sm:$0x3] }
  0x15   : > { %635 = vmatprep.subr.bf16.mxu0 %v634_v4  ;;  %v646_v12 = vpack.c.bf16 %v212_v11, %v211_v10 }
  0x16   : > { %637 = vmatpush3.bf16.msra.mxu0 %v634_v4 }
  0x17   : > { %639 = vmatprep.subr.bf16.mxu0 %v638_v6 }
  0x1a   : > { %641 = vmatpush3.bf16.msra.mxu0 %v638_v6 }
  0x1b   : > { %643 = vmatprep.subr.bf16.mxu0 %v642_v9 }
  0x1e   : > { %645 = vmatpush3.bf16.msra.mxu0 %v642_v9 }
  0x1f   : > { %647 = vmatprep.subr.bf16.mxu0 %v646_v12 }
  0x22   : > { %649 = vmatpush3.bf16.msra.mxu0 %v646_v12 }
  0x23   : > { %629 = vmatprep.subr.msk.mxu0 %vm221_vm1, %v213_v13 }
  0x26   : > { %630 = vmatpush3.msk.msra.mxu0 %vm221_vm1, %v213_v13 }
  0x27   : > { %632 = vmatmul.mubr.msk.f32.vlgmr.msra.gmra.mrb[0].mxu0 %vm214_vm0, %v204_v14 }
  0xfa   : > { %v633_v15 = vpop.f32.mrb[0].mxu0 }
  0xfb   : > { %v291_v16 = vpop.f32.mrb[1].mxu0  ;;  %v307_v18 = vsel %vm303_vm2, %v633_v15, inf }
  0xfc   : > { %v304_v17 = vsel %vm303_vm2, %v291_v16, inf }
  0xfd   : > { %305 = vmin.xlane.f32.xlu0 %v304_v17 }
 0x101   : > { %308 = vmin.xlane.f32.xlu0 %v307_v18 }
 0x18a   : > { %v306_v22 = vpop.xlane.xlu0 %305 }
 0x18b   : > { %vm310_vm3 = vcmp.eq.f32.partialorder %v291_v16, %v306_v22 }
 0x18c   : > { %v312_v23 = vsel %vm310_vm3, %v752_v21, 16.0 }
 0x18d   : > { %v314_v24 = vsel %vm303_vm2, %v312_v23, inf }
 0x18e   : > { %315 = vmin.xlane.f32.xlu1 %v314_v24  ;;  %v309_v25 = vpop.xlane.xlu0 %308 }
 0x18f   : > { %vm311_vm4 = vcmp.eq.f32.partialorder %v633_v15, %v309_v25 }
 0x190   : > { %v313_v26 = vsel %vm311_vm4, %v752_v21, 16.0 }
 0x191   : > { %v317_v27 = vsel %vm303_vm2, %v313_v26, inf }
 0x192   : > { %318 = vmin.xlane.f32.xlu1 %v317_v27 }
 0x21b   : > { %v758_v28 = vpop.xlane.xlu1 %315 }
 0x21c   : > { %vm320_vm5 = vcmp.eq.f32.partialorder %v752_v21, %v758_v28 }
 0x21d   : > { %v322_v29 = vsel %vm320_vm5, inf, %v291_v16 }
 0x21e   : > { %v324_v30 = vsel %vm303_vm2, %v322_v29, inf }
 0x21f   : > { %325 = vmin.xlane.f32.xlu0 %v324_v30  ;;  %v763_v31 = vpop.xlane.xlu1 %318 }
 0x220   : > { %vm321_vm6 = vcmp.eq.f32.partialorder %v752_v21, %v763_v31 }
 0x221   : > { %v323_v32 = vsel %vm321_vm6, inf, %v633_v15 }
 0x222   : > { %v327_v33 = vsel %vm303_vm2, %v323_v32, inf }
 0x223   : > { %328 = vmin.xlane.f32.xlu1 %v327_v33 }
 0x2ac   : > { %v326_v34 = vpop.xlane.xlu0 %325 }
 0x2ad   : > { %vm330_vm7 = vcmp.eq.f32.partialorder %v322_v29, %v326_v34 }
 0x2ae   : > { %v332_v35 = vsel %vm330_vm7, %v752_v21, 16.0 }
 0x2af   : > { %v334_v36 = vsel %vm303_vm2, %v332_v35, inf }
 0x2b0   : > { %v329_v37 = vpop.xlane.xlu1 %328  ;;  %335 = vmin.xlane.f32.xlu0 %v334_v36 }
 0x2b1   : > { %vm331_vm8 = vcmp.eq.f32.partialorder %v323_v32, %v329_v37 }
 0x2b2   : > { %v333_v38 = vsel %vm331_vm8, %v752_v21, 16.0 }
 0x2b3   : > { %v337_v39 = vsel %vm303_vm2, %v333_v38, inf }
 0x2b4   : > { %338 = vmin.xlane.f32.xlu1 %v337_v39 }
 0x33d   : > { %v772_v40 = vpop.xlane.xlu0 %335 }
 0x33e   : > { %vm340_vm9 = vcmp.eq.f32.partialorder %v752_v21, %v772_v40 }
 0x33f   : > { %v342_v41 = vsel %vm340_vm9, inf, %v322_v29 }
 0x340   : > { %v344_v42 = vsel %vm303_vm2, %v342_v41, inf }
 0x341   : > { %v777_v43 = vpop.xlane.xlu1 %338  ;;  %345 = vmin.xlane.f32.xlu0 %v344_v42 }
 0x342   : > { %vm341_vm10 = vcmp.eq.f32.partialorder %v752_v21, %v777_v43 }
 0x343   : > { %v343_v44 = vsel %vm341_vm10, inf, %v323_v32 }
 0x344   : > { %v347_v45 = vsel %vm303_vm2, %v343_v44, inf }
 0x345   : > { %348 = vmin.xlane.f32.xlu1 %v347_v45 }
 0x3ce   : > { %v346_v46 = vpop.xlane.xlu0 %345 }
 0x3cf   : > { %vm350_vm11 = vcmp.eq.f32.partialorder %v342_v41, %v346_v46 }
 0x3d0   : > { %v352_v47 = vsel %vm350_vm11, %v752_v21, 16.0 }
 0x3d1   : > { %v354_v48 = vsel %vm303_vm2, %v352_v47, inf }
 0x3d2   : > { %v349_v49 = vpop.xlane.xlu1 %348  ;;  %355 = vmin.xlane.f32.xlu0 %v354_v48 }
 0x3d3   : > { %vm351_vm12 = vcmp.eq.f32.partialorder %v343_v44, %v349_v49 }
 0x3d4   : > { %v353_v50 = vsel %vm351_vm12, %v752_v21, 16.0 }
 0x3d5   : > { %v357_v51 = vsel %vm303_vm2, %v353_v50, inf }
 0x3d6   : > { %358 = vmin.xlane.f32.xlu1 %v357_v51 }
 0x45f   : > { %v786_v52 = vpop.xlane.xlu0 %355 }
 0x460   : > { %vm360_vm13 = vcmp.eq.f32.partialorder %v752_v21, %v786_v52 }
 0x461   : > { %v362_v53 = vsel %vm360_vm13, inf, %v342_v41 }
 0x462   : > { %v364_v54 = vsel %vm303_vm2, %v362_v53, inf }
 0x463   : > { %v791_v55 = vpop.xlane.xlu1 %358  ;;  %365 = vmin.xlane.f32.xlu0 %v364_v54 }
 0x464   : > { %vm361_vm14 = vcmp.eq.f32.partialorder %v752_v21, %v791_v55 }
 0x465   : > { %v363_v56 = vsel %vm361_vm14, inf, %v343_v44 }
 0x466   : > { %v367_v57 = vsel %vm303_vm2, %v363_v56, inf }
 0x467   : > { %368 = vmin.xlane.f32.xlu1 %v367_v57 }
 0x4f0   : > { %v366_v58 = vpop.xlane.xlu0 %365 }
 0x4f1   : > { %vm370_vm15 = vcmp.eq.f32.partialorder %v362_v53, %v366_v58 }
 0x4f2   : > { %v372_v59 = vsel %vm370_vm15, %v752_v21, 16.0 }
 0x4f3   : > { %v374_v60 = vsel %vm303_vm2, %v372_v59, inf }
 0x4f4   : > { %v369_v61 = vpop.xlane.xlu1 %368  ;;  %375 = vmin.xlane.f32.xlu0 %v374_v60 }
 0x4f5   : > { %vm371_vm0 = vcmp.eq.f32.partialorder %v363_v56, %v369_v61 }
 0x4f6   : > { %v373_v62 = vsel %vm371_vm0, %v752_v21, 16.0 }
 0x4f7   : > { %v377_v63 = vsel %vm303_vm2, %v373_v62, inf }
 0x4f8   : > { %378 = vmin.xlane.f32.xlu1 %v377_v63 }
 0x581   : > { %v800_v0 = vpop.xlane.xlu0 %375 }
 0x582   : > { %vm380_vm1 = vcmp.eq.f32.partialorder %v752_v21, %v800_v0 }
 0x583   : > { %v382_v1 = vsel %vm380_vm1, inf, %v362_v53 }
 0x584   : > { %v384_v2 = vsel %vm303_vm2, %v382_v1, inf }
 0x585   : > { %v805_v3 = vpop.xlane.xlu1 %378  ;;  %385 = vmin.xlane.f32.xlu0 %v384_v2 }
 0x586   : > { %vm381_vm3 = vcmp.eq.f32.partialorder %v752_v21, %v805_v3 }
 0x587   : > { %v383_v4 = vsel %vm381_vm3, inf, %v363_v56  ;;  %vm460_vm3 = vcmask 7168  }
 0x588   : > { %v387_v5 = vsel %vm303_vm2, %v383_v4, inf  ;;  %v461_v54 = vsel %vm460_vm3, %v758_v28, %v772_v40 }
 0x589   : > { %388 = vmin.xlane.f32.xlu1 %v387_v5 }
 0x612   : > { %v386_v6 = vpop.xlane.xlu0 %385 }
 0x613   : > { %vm390_vm4 = vcmp.eq.f32.partialorder %v382_v1, %v386_v6 }
 0x614   : > { %v392_v7 = vsel %vm390_vm4, %v752_v21, 16.0  ;;  %vm463_vm4 = vcmask 15360  }
 0x615   : > { %v394_v8 = vsel %vm303_vm2, %v392_v7, inf  ;;  %v464_v56 = vsel %vm463_vm4, %v461_v54, %v786_v52 }
 0x616   : > { %v389_v9 = vpop.xlane.xlu1 %388  ;;  %395 = vmin.xlane.f32.xlu0 %v394_v8 }
 0x617   : > { %vm391_vm5 = vcmp.eq.f32.partialorder %v383_v4, %v389_v9 }
 0x618   : > { %v393_v10 = vsel %vm391_vm5, %v752_v21, 16.0  ;;  %vm466_vm5 = vcmask 23552  }
 0x619   : > { %v397_v11 = vsel %vm303_vm2, %v393_v10, inf  ;;  %v467_v57 = vsel %vm466_vm5, %v464_v56, %v800_v0 }
 0x61a   : > { %398 = vmin.xlane.f32.xlu1 %v397_v11 }
 0x6a3   : > { %v814_v12 = vpop.xlane.xlu0 %395 }
 0x6a4   : > { %vm400_vm6 = vcmp.eq.f32.partialorder %v752_v21, %v814_v12 }
 0x6a5   : > { %v402_v13 = vsel %vm400_vm6, inf, %v382_v1  ;;  %vm469_vm6 = vcmask 31744  }
 0x6a6   : > { %v404_v14 = vsel %vm303_vm2, %v402_v13, inf  ;;  %v470_v58 = vsel %vm469_vm6, %v467_v57, %v814_v12 }
 0x6a7   : > { %v819_v15 = vpop.xlane.xlu1 %398  ;;  %405 = vmin.xlane.f32.xlu0 %v404_v14 }
 0x6a8   : > { %vm401_vm7 = vcmp.eq.f32.partialorder %v752_v21, %v819_v15 }
 0x6a9   : > { %v403_v16 = vsel %vm401_vm7, inf, %v383_v4  ;;  %vm472_vm7 = vcmask 39936  }
 0x6aa   : > { %v407_v17 = vsel %vm303_vm2, %v403_v16, inf }
 0x6ab   : > { %408 = vmin.xlane.f32.xlu1 %v407_v17 }
 0x734   : > { %v406_v18 = vpop.xlane.xlu0 %405 }
 0x735   : > { %vm410_vm8 = vcmp.eq.f32.partialorder %v402_v13, %v406_v18 }
 0x736   : > { %v412_v19 = vsel %vm410_vm8, %v752_v21, 16.0  ;;  %vm475_vm8 = vcmask 48128  }
 0x737   : > { %v414_v20 = vsel %vm303_vm2, %v412_v19, inf }
 0x738   : > { %v409_v22 = vpop.xlane.xlu1 %408  ;;  %415 = vmin.xlane.f32.xlu0 %v414_v20 }
 0x739   : > { %vm411_vm9 = vcmp.eq.f32.partialorder %v403_v16, %v409_v22 }
 0x73a   : > { %v413_v23 = vsel %vm411_vm9, %v752_v21, 16.0  ;;  %vm478_vm9 = vcmask 56320  }
 0x73b   : > { %v417_v24 = vsel %vm303_vm2, %v413_v23, inf }
 0x73c   : > { %418 = vmin.xlane.f32.xlu1 %v417_v24 }
 0x7c5   : > { %v416_v25 = vpop.xlane.xlu0 %415 }
 0x7c6   : > { %vm420_vm10 = vcmp.eq.f32.partialorder %v752_v21, %v416_v25  ;;  %v473_v59 = vsel %vm472_vm7, %v470_v58, %v416_v25 }
 0x7c7   : > { %v422_v26 = vsel %vm420_vm10, inf, %v402_v13 }
 0x7c8   : > { %v424_v27 = vsel %vm303_vm2, %v422_v26, inf }
 0x7c9   : > { %v419_v29 = vpop.xlane.xlu1 %418  ;;  %425 = vmin.xlane.f32.xlu0 %v424_v27 }
 0x7ca   : > { %vm421_vm11 = vcmp.eq.f32.partialorder %v752_v21, %v419_v29 }
 0x7cb   : > { %v423_v30 = vsel %vm421_vm11, inf, %v403_v16 }
 0x7cc   : > { %v427_v32 = vsel %vm303_vm2, %v423_v30, inf }
 0x7cd   : > { %428 = vmin.xlane.f32.xlu1 %v427_v32 }
 0x856   : > { %v426_v33 = vpop.xlane.xlu0 %425 }
 0x857   : > { %vm430_vm12 = vcmp.eq.f32.partialorder %v422_v26, %v426_v33 }
 0x858   : > { %v432_v34 = vsel %vm430_vm12, %v752_v21, 16.0 }
 0x859   : > { %v434_v35 = vsel %vm303_vm2, %v432_v34, inf }
 0x85a   : > { %v429_v36 = vpop.xlane.xlu1 %428  ;;  %435 = vmin.xlane.f32.xlu0 %v434_v35 }
 0x85b   : > { %vm431_vm13 = vcmp.eq.f32.partialorder %v423_v30, %v429_v36 }
 0x85c   : > { %v433_v37 = vsel %vm431_vm13, %v752_v21, 16.0 }
 0x85d   : > { %v437_v38 = vsel %vm303_vm2, %v433_v37, inf }
 0x85e   : > { %438 = vmin.xlane.f32.xlu1 %v437_v38 }
 0x8e7   : > { %v436_v39 = vpop.xlane.xlu0 %435 }
 0x8e8   : > { %vm440_vm14 = vcmp.eq.f32.partialorder %v752_v21, %v436_v39  ;;  %v476_v61 = vsel %vm475_vm8, %v473_v59, %v436_v39 }
 0x8e9   : > { %v442_v41 = vsel %vm440_vm14, inf, %v422_v26 }
 0x8ea   : > { %v444_v42 = vsel %vm303_vm2, %v442_v41, inf }
 0x8eb   : > { %v439_v44 = vpop.xlane.xlu1 %438  ;;  %445 = vmin.xlane.f32.xlu0 %v444_v42 }
 0x8ec   : > { %vm441_vm15 = vcmp.eq.f32.partialorder %v752_v21, %v439_v44 }
 0x8ed   : > { %v443_v45 = vsel %vm441_vm15, inf, %v423_v30 }
 0x8ee   : > { %v447_v46 = vsel %vm303_vm2, %v443_v45, inf }
 0x8ef   : > { %448 = vmin.xlane.f32.xlu1 %v447_v46 }
 0x978   : > { %v446_v47 = vpop.xlane.xlu0 %445 }
 0x979   : > { %vm450_vm0 = vcmp.eq.f32.partialorder %v442_v41, %v446_v47 }
 0x97a   : > { %v452_v48 = vsel %vm450_vm0, %v752_v21, 16.0 }
 0x97b   : > { %v454_v49 = vsel %vm303_vm2, %v452_v48, inf }
 0x97c   : > { %v449_v50 = vpop.xlane.xlu1 %448  ;;  %455 = vmin.xlane.f32.xlu0 %v454_v49 }
 0x97d   : > { %vm451_vm1 = vcmp.eq.f32.partialorder %v443_v45, %v449_v50 }
 0x97e   : > { %v453_v51 = vsel %vm451_vm1, %v752_v21, 16.0  ;;  %v462_v21 = vsel %vm460_vm3, %v763_v31, %v777_v43 }
 0x97f   : > { %v457_v53 = vsel %vm303_vm2, %v453_v51, inf  ;;  %v465_v60 = vsel %vm463_vm4, %v462_v21, %v791_v55  ;;  %vm483_vm2 = vcmask 64512  }
 0x980   : > { %458 = vmin.xlane.f32.xlu1 %v457_v53  ;;  %v468_v28 = vsel %vm466_vm5, %v465_v60, %v805_v3 }
 0x981   : > { %v471_v52 = vsel %vm469_vm6, %v468_v28, %v819_v15 }
 0x982   : > { %v474_v0 = vsel %vm472_vm7, %v471_v52, %v419_v29 }
 0x983   : > { %v477_v31 = vsel %vm475_vm8, %v474_v0, %v439_v44 }
 0xa09   : > { %v456_v62 = vpop.xlane.xlu0 %455 }
 0xa0a   : > { %v479_v40 = vsel %vm478_vm9, %v476_v61, %v456_v62 }
 0xa0b   : > { %v651_v63 = vtrunc.f32 %v479_v40 }
 0xa0d   : > { %v652_v43 = vcvt.f32.s32 %v651_v63  ;;  %v459_v1 = vpop.xlane.xlu1 %458 }
 0xa0e   : > { %v480_v55 = vsel %vm478_vm9, %v477_v31, %v459_v1 }
 0xa0f   : > { %484 = vst.msk [vmem:[%s201_s23] sm:$0xff] %vm483_vm2, %v652_v43  ;;  %v653_v2 = vtrunc.f32 %v480_v55 }
 0xa11   : > { %v654_v3 = vcvt.f32.s32 %v653_v2 }
 0xa13   : > { %485 = vst.msk [vmem:[%s201_s23 + $0x8] sm:$0xff] %vm483_vm2, %v654_v3 }
 0xa14 PF: > { %s12_s11 = sadd.s32 1, %s701_s11   ;;  %s873_s9 = smov %s697_s10 }
 0xa15   : > { %p9_p5 = scmp.ge.s32.totalorder %s12_s11, 4   ;;  %s874_s10 = smov %s876_s12 }
 0xa17   :  { %11 = sbr.rel (!%p9_p5) target bundleno = 2 (0x2), region = 61 }

// kernel: dgcnn_seg_forward.21
= control target key start
LH: loop header
LB: loop body
LE: loop exit
PB: predicated region body
PF: predicated region fallthrough
CT: control target
= control target key end

     0   :  { %s1039_s18 = smov 0   ;;  %s1041_s19 = smov 0   ;;  %s1204_s0 = inlined_call_operand.vmem [shape: bf16[2,16,64], index: 0, kind: input, shape index: {}]   ;;  %s1205_s1 = inlined_call_operand.vmem [shape: bf16[2,8,16,64], index: 1, kind: input, shape index: {}]   ;;  %s1206_s2 = inlined_call_operand.vmem [shape: bf16[64,64], index: 2, kind: input, shape index: {}]   ;;  %s1207_s3 = inlined_call_operand.vmem [shape: bf16[64,64], index: 3, kind: input, shape index: {}]   ;;  %s1208_s4 = inlined_call_operand.vmem [shape: f32[1,64], index: 4, kind: input, shape index: {}]   ;;  %s1209_s5 = inlined_call_operand.vmem [shape: bf16[2,16,128], index: 5, kind: output, shape index: {}]  }
   0x1   :  { %s1043_s20 = smov 0  }
   0x2 LB: > { %s27_s21 = sadd.s32 1, %s1000_s19  ;;  %p824_p0 = scmp.ge.s32.totalorder %s1004_s20, 1  ;;  %s1004_s20 = sphi %s1043_s20, %s15_s20   ;;  %s1000_s19 = sphi %s1041_s19, %s1211_s19   ;;  %s996_s18 = sphi %s1039_s18, %s1210_s18  }
   0x3   : > { %p29_p1 = scmp.ge.s32.totalorder %s27_s21, 2  ;;  %p225_p2 = scmp.lt.s32.totalorder %s1004_s20, 3 }
   0x5   : > { %s1213_s21 = smov (%p29_p1, %s27_s21), 0  ;;  %p226_p3 = pnand %p824_p0, %p225_p2 }
   0x6   : > { %v965_v0 = vld [vmem:[%s1207_s3] sm:$0xff] (!%p226_p3)   ;;  %v1006_v1 = vmov (!%p226_p3), 0.0   ;;  %v967_v3 = vld [vmem:[%s1207_s3 + $0x8] sm:$0xff] (!%p226_p3)   ;;  %vm1007_vm0 = vmmov (!%p226_p3), 0   ;;  %p271_p4 = scmp.lt.s32.totalorder (!%p226_p3), %s996_s18, 1  ;;  %v970_v5 = vld [vmem:[%s1206_s2 + $0x10] sm:$0xff] (!%p226_p3)  }
   0x7   : > { %229 = sbr.rel (%p226_p3) target bundleno = 401 (0x191), region = 40  ;;  %889 = vmatprep.subr.bf16.mxu0 (!%p226_p3), %v1006_v1  ;;  %v966_v2 = vld [vmem:[%s1206_s2] sm:$0xff] (!%p226_p3)   ;;  %897 = vmatprep.mubr.msk.bf16.mxu0 (!%p226_p3), %vm1007_vm0, %v1006_v1  ;;  %v968_v4 = vld [vmem:[%s1206_s2 + $0x8] sm:$0xff] (!%p226_p3)   ;;  %v969_v6 = vld [vmem:[%s1207_s3 + $0x10] sm:$0xff] (!%p226_p3)   ;;  %vm355_vm1 = vcmask (!%p226_p3), 523264   ;;  %s1008_s27 = smov (!%p226_p3), 64  }
   0x8   : > { %890 = vmatpush3.bf16.msra.mxu0 (!%p226_p3), %v965_v0  ;;  %925 = vmatprep.subr.bf16.mxu1 (!%p226_p3), %v966_v2  ;;  %v972_v7 = vld [vmem:[%s1206_s2 + $0x18] sm:$0xff] (!%p226_p3)   ;;  %v831_v18 = vld [vmem:[%s1208_s4] ss:$0 sm:$0xff] (!%p226_p3) }
   0x9   : > { %891 = vmatprep.subr.bf16.mxu0 (!%p226_p3), %v1006_v1  ;;  %929 = vmatpush3.bf16.msra.mxu1 (!%p226_p3), %v966_v2  ;;  %v971_v9 = vld [vmem:[%s1207_s3 + $0x18] sm:$0xff] (!%p226_p3)  }
   0xa   : > { %926 = vmatprep.subr.bf16.mxu1 (!%p226_p3), %v968_v4 }
   0xc   : > { %892 = vmatpush3.bf16.msra.mxu0 (!%p226_p3), %v967_v3 }
   0xd   : > { %893 = vmatprep.subr.bf16.mxu0 (!%p226_p3), %v1006_v1  ;;  %930 = vmatpush3.bf16.msra.mxu1 (!%p226_p3), %v968_v4 }
   0xe   : > { %s1215_s18 = smov (!%p271_p4, %s996_s18), 1  ;;  %927 = vmatprep.subr.bf16.mxu1 %v970_v5 }
   0xf   : > { %s862_s9 = sshll.u32 %s1215_s18, 3  ;;  %s863_s13 = sshll.u32 %s1215_s18, 6 }
  0x10   : > { %s278_s12 = scalar_lea.vmem %s1204_s0, %s862_s9  ;;  %s1090_s22 = scalar_lea.vmem %s1205_s1, %s863_s13  ;;  %894 = vmatpush3.bf16.msra.mxu0 %v969_v6 }
  0x11   : > { %v974_v8 = vld [vmem:[%s1090_s22 + $0x10] sm:$0xff]   ;;  %895 = vmatprep.subr.bf16.mxu0 %v1006_v1  ;;  %931 = vmatpush3.bf16.msra.mxu1 %v970_v5  ;;  %v973_v10 = vld [vmem:[%s278_s12] sm:$0xff]   ;;  %v975_v12 = vld [vmem:[%s1090_s22 + $0x18] sm:$0xff]   ;;  %s298_s30 = scalar_lea.vmem %s1209_s5, %s862_s9 }
  0x12   : > { %913 = vmatprep.mubr.msk.bf16.mxu1 %vm355_vm1, %v974_v8  ;;  %928 = vmatprep.subr.bf16.mxu1 %v972_v7  ;;  %v978_v11 = vld [vmem:[%s1090_s22] sm:$0xff]   ;;  %v977_v14 = vld [vmem:[%s1090_s22 + $0x28] sm:$0xff]   ;;  %v980_v15 = vld [vmem:[%s1090_s22 + $0x30] sm:$0xff]  }
  0x13   : > { %v976_v13 = vld [vmem:[%s1090_s22 + $0x20] sm:$0xff]   ;;  %v979_v16 = vld [vmem:[%s1090_s22 + $0x8] sm:$0xff]   ;;  %v981_v17 = vld [vmem:[%s1090_s22 + $0x38] sm:$0xff]  }
  0x14   : > { %896 = vmatpush3.bf16.msra.mxu0 %v971_v9 }
  0x15   : > { %901 = vmatprep.subr.bf16.mxu0 %v966_v2  ;;  %932 = vmatpush3.bf16.msra.mxu1 %v972_v7 }
  0x17   : > { %898 = vmatmul.mubr.msk.bf16.vlgmr.msra.gmra.mrb[0].mxu0 %vm355_vm1, %v973_v10 }
  0x18   : > { %902 = vmatpush3.bf16.msra.mxu0 %v966_v2  ;;  %909 = vmatprep.mubr.msk.bf16.mxu0 %vm355_vm1, %v978_v11 }
  0x19   : > { %914 = vmatmul.mubr.msk.bf16.vlgmr.msra.gmra.mrb[0].mxu1 %vm355_vm1, %v975_v12  ;;  %903 = vmatprep.subr.bf16.mxu0 %v968_v4 }
  0x1a   : > { %917 = vmatprep.mubr.msk.bf16.mxu1 %vm355_vm1, %v976_v13 }
  0x1c   : > { %904 = vmatpush3.bf16.msra.mxu0 %v968_v4 }
  0x1d   : > { %905 = vmatprep.subr.bf16.mxu0 %v970_v5 }
  0x20   : > { %906 = vmatpush3.bf16.msra.mxu0 %v970_v5 }
  0x21   : > { %918 = vmatmul.mubr.msk.bf16.gmra.mrb[4].mxu1 %vm355_vm1, %v977_v14  ;;  %907 = vmatprep.subr.bf16.mxu0 %v972_v7 }
  0x22   : > { %921 = vmatprep.mubr.msk.bf16.mxu1 %vm355_vm1, %v980_v15 }
  0x24   : > { %908 = vmatpush3.bf16.msra.mxu0 %v972_v7 }
  0x27   : > { %910 = vmatmul.mubr.msk.bf16.vlgmr.msra.gmra.mrb[4].mxu0 %vm355_vm1, %v979_v16 }
  0x29   : > { %922 = vmatmul.mubr.msk.bf16.gmra.mrb[8].mxu1 %vm355_vm1, %v981_v17 }
  0xea   : > { %v393_v19 = vpop.f32.mrb[0].mxu0 }
  0xeb   : > { %v394_v20 = vadd.f32 %v831_v18, %v393_v19  ;;  %v899_v21 = vpop.f32.mrb[1].mxu0 }
  0xec   : > { %v915_v22 = vpop.f32.mrb[0].mxu1  ;;  %v396_v23 = vpop.f32.mrb[2].mxu0 }
  0xed   : > { %v607_v24 = vadd.f32 %v915_v22, %v394_v20  ;;  %v1115_v25 = vadd.f32 %v831_v18, %v396_v23  ;;  %v554_v26 = vpop.f32.mrb[1].mxu1  ;;  %v900_v27 = vpop.f32.mrb[3].mxu0 }
  0xee   : > { %v605_v28 = vadd.f32 %v554_v26, %v394_v20  ;;  %v916_v29 = vpop.f32.mrb[2].mxu1 }
  0xef   : > { %v1118_v30 = vadd.f32 %v916_v29, %v1115_v25  ;;  %v557_v31 = vpop.f32.mrb[3].mxu1  ;;  %v623_v36 = vmax.f32 %v607_v24, 0.0 }
  0xf0   : > { %v1121_v32 = vadd.f32 %v557_v31, %v1115_v25  ;;  %v621_v39 = vmax.f32 %v605_v28, 0.0 }
  0xf1   : > { %v624_v42 = vmax.f32 %v1118_v30, 0.0  ;;  %v637_v46 = vsel %vm355_vm1, %v623_v36, -inf  ;;  %v668_v49 = vsel %vm355_vm1, %v623_v36, 0.0 }
  0xf2   : > { %v622_v43 = vmax.f32 %v1121_v32, 0.0  ;;  %v635_v50 = vsel %vm355_vm1, %v621_v39, -inf  ;;  %v666_v51 = vsel %vm355_vm1, %v621_v39, 0.0 }
  0xf3   : > { %v652_v54 = vsel %vm355_vm1, %v624_v42, -inf }
  0xf4   : > { %v919_v33 = vpop.f32.mrb[4].mxu1  ;;  %v650_v55 = vsel %vm355_vm1, %v622_v43, -inf }
  0xf5   : > { %v1123_v34 = vadd.f32 %v919_v33, %v394_v20  ;;  %v570_v35 = vpop.f32.mrb[5].mxu1 }
  0xf6   : > { %v609_v37 = vadd.f32 %v570_v35, %v394_v20  ;;  %v920_v38 = vpop.f32.mrb[6].mxu1 }
  0xf7   : > { %v1126_v40 = vadd.f32 %v920_v38, %v1115_v25  ;;  %v573_v41 = vpop.f32.mrb[7].mxu1  ;;  %v627_v44 = vmax.f32 %v1123_v34, 0.0 }
  0xf8   : > { %v1132_v45 = vadd.f32 %v573_v41, %v1115_v25  ;;  %v625_v47 = vmax.f32 %v609_v37, 0.0 }
  0xf9   : > { %v641_v56 = vsel %vm355_vm1, %v627_v44, -inf  ;;  %v628_v60 = vmax.f32 %v1126_v40, 0.0 }
  0xfa   : > { %v911_v48 = vpop.f32.mrb[4].mxu0  ;;  %v639_v2 = vsel %vm355_vm1, %v625_v47, -inf  ;;  %v626_v17 = vmax.f32 %v1132_v45, 0.0  ;;  %v670_v36 = vsel %vm355_vm1, %v625_v47, 0.0 }
  0xfb   : > { %v603_v52 = vadd.f32 %v911_v48, %v394_v20  ;;  %v538_v53 = vpop.f32.mrb[5].mxu0  ;;  %v656_v16 = vsel %vm355_vm1, %v628_v60, -inf  ;;  %v687_v30 = vsel %vm355_vm1, %v628_v60, 0.0 }
  0xfc   : > { %v601_v57 = vadd.f32 %v538_v53, %v394_v20  ;;  %v923_v58 = vpop.f32.mrb[8].mxu1  ;;  %v912_v59 = vpop.f32.mrb[6].mxu0  ;;  %v654_v47 = vsel %vm355_vm1, %v626_v17, -inf }
  0xfd   : > { %v619_v61 = vmax.f32 %v603_v52, 0.0  ;;  %v615_v62 = vadd.f32 %v923_v58, %v394_v20  ;;  %v604_v63 = vadd.f32 %v912_v59, %v1115_v25  ;;  %v586_v0 = vpop.f32.mrb[9].mxu1  ;;  %v541_v1 = vpop.f32.mrb[7].mxu0 }
  0xfe   : > { %v617_v3 = vmax.f32 %v601_v57, 0.0  ;;  %v613_v4 = vadd.f32 %v586_v0, %v394_v20  ;;  %v602_v5 = vadd.f32 %v541_v1, %v1115_v25  ;;  %v924_v6 = vpop.f32.mrb[10].mxu1 }
  0xff   : > { %v634_v7 = vsel %vm355_vm1, %v619_v61, -inf  ;;  %v664_v8 = vsel %vm355_vm1, %v619_v61, 0.0  ;;  %v631_v9 = vmax.f32 %v615_v62, 0.0  ;;  %v620_v10 = vmax.f32 %v604_v63, 0.0  ;;  %v589_v11 = vpop.f32.mrb[11].mxu1 }
 0x100   : > { %v638_v12 = vmax.f32 %v634_v7, %v637_v46  ;;  %v633_v13 = vsel %vm355_vm1, %v617_v3, -inf  ;;  %v663_v14 = vsel %vm355_vm1, %v617_v3, 0.0  ;;  %v629_v15 = vmax.f32 %v613_v4, 0.0 }
 0x101   : > { %v636_v18 = vmax.f32 %v633_v13, %v635_v50  ;;  %v665_v19 = vadd.f32 %v664_v8, %v663_v14  ;;  %v645_v21 = vsel %vm355_vm1, %v631_v9, -inf  ;;  %v649_v22 = vsel %vm355_vm1, %v620_v10, -inf }
 0x102   : > { %v642_v20 = vmax.f32 %v638_v12, %v641_v56  ;;  %v679_v23 = vsel %vm355_vm1, %v620_v10, 0.0  ;;  %v653_v26 = vmax.f32 %v649_v22, %v652_v54  ;;  %v643_v28 = vsel %vm355_vm1, %v629_v15, -inf }
 0x103   : > { %v667_v24 = vadd.f32 %v666_v51, %v665_v19  ;;  %v640_v27 = vmax.f32 %v636_v18, %v639_v2  ;;  %v618_v31 = vmax.f32 %v602_v5, 0.0  ;;  %v616_v33 = vadd.f32 %v924_v6, %v1115_v25 }
 0x104   : > { %v646_v29 = vmax.f32 %v642_v20, %v645_v21  ;;  %v614_v35 = vadd.f32 %v589_v11, %v1115_v25  ;;  %v657_v39 = vmax.f32 %v653_v26, %v656_v16  ;;  %v681_v54 = vsel %vm355_vm1, %v622_v43, 0.0 }
 0x105   : > { %v669_v37 = vadd.f32 %v668_v49, %v667_v24  ;;  %v644_v38 = vmax.f32 %v640_v27, %v643_v28  ;;  %v648_v41 = vsel %vm355_vm1, %v618_v31, -inf  ;;  %v678_v45 = vsel %vm355_vm1, %v618_v31, 0.0 }
 0x106   : > { %v632_v46 = vmax.f32 %v616_v33, 0.0  ;;  %v630_v48 = vmax.f32 %v614_v35, 0.0  ;;  %v651_v52 = vmax.f32 %v648_v41, %v650_v55  ;;  %v680_v53 = vadd.f32 %v679_v23, %v678_v45 }
 0x107   : > { %v647_v50 = vmax.f32 %v644_v38, %v646_v29  ;;  %v671_v51 = vadd.f32 %v670_v36, %v669_v37  ;;  %v672_v25 = vsel %vm355_vm1, %v627_v44, 0.0  ;;  %v683_v55 = vsel %vm355_vm1, %v624_v42, 0.0 }
 0x108   : > { %v660_v49 = vsel %vm355_vm1, %v632_v46, -inf  ;;  %v682_v57 = vadd.f32 %v681_v54, %v680_v53  ;;  %v655_v59 = vmax.f32 %v651_v52, %v654_v47  ;;  %v674_v32 = vsel %vm355_vm1, %v629_v15, 0.0 }
 0x109   : > { %v673_v56 = vadd.f32 %v672_v25, %v671_v51  ;;  %v661_v58 = vmax.f32 %v657_v39, %v660_v49  ;;  %v658_v43 = vsel %vm355_vm1, %v630_v48, -inf  ;;  %v685_v44 = vsel %vm355_vm1, %v626_v17, 0.0 }
 0x10a   : > { %v684_v34 = vadd.f32 %v683_v55, %v682_v57  ;;  %v659_v62 = vmax.f32 %v655_v59, %v658_v43  ;;  %v676_v63 = vsel %vm355_vm1, %v631_v9, 0.0  ;;  %v689_v3 = vsel %vm355_vm1, %v630_v48, 0.0 }
 0x10b   : > { %v675_v61 = vadd.f32 %v674_v32, %v673_v56  ;;  %v691_v5 = vsel %vm355_vm1, %v632_v46, 0.0 }
 0x10c   : > { %v662_v0 = vmax.f32 %v659_v62, %v661_v58  ;;  %v686_v1 = vadd.f32 %v685_v44, %v684_v34 }
 0x10d   : > { %v677_v2 = vadd.f32 %v676_v63, %v675_v61 }
 0x10e   : > { %v688_v42 = vadd.f32 %v687_v30, %v686_v1 }
 0x10f   : > { %v693_v7 = vmul.f32 0.125, %v677_v2 }
 0x110   : > { %v690_v4 = vadd.f32 %v689_v3, %v688_v42 }
 0x112   : > { %v692_v6 = vadd.f32 %v691_v5, %v690_v4 }
 0x114   : > { %v694_v8 = vmul.f32 0.125, %v692_v6 }
 0x116   : > { %v960_v10 = vpack.i.bf16 %v694_v8, %v693_v7 }
 0x118   : > { %961 = vrot.lane.b32.xlu0 %v960_v10, %s1008_s27 }
 0x18a   : > { %v962_v9 = vpop.permute.xlu0 %961 }
 0x18b   : > { %v964_v11 = vunpack.i.h.bf16 %v962_v9  ;;  %v963_v12 = vunpack.i.l.bf16 %v962_v9 }
 0x18d   : > { %v703_v40 = vsel %vm355_vm1, %v647_v50, %v963_v12  ;;  %v704_v60 = vsel %vm355_vm1, %v662_v0, %v964_v11 }
 0x18e   : > { %v870_v13 = vpack.c.bf16 %v704_v60, %v703_v40 }
 0x190   : > { %871 = vst [vmem:[%s298_s30] sm:$0xff] %v870_v13  }
 0x191 PF: > { %s15_s20 = sadd.s32 1, %s1004_s20   ;;  %s1210_s18 = smov %s1000_s19 }
 0x192   : > { %p12_p5 = scmp.ge.s32.totalorder %s15_s20, 4   ;;  %s1211_s19 = smov %s1213_s21 }
 0x194   :  { %14 = sbr.rel (!%p12_p5) target bundleno = 2 (0x2), region = 73 }

// kernel: dgcnn_seg_forward.26
= control target key start
LH: loop header
LB: loop body
LE: loop exit
PB: predicated region body
PF: predicated region fallthrough
CT: control target
= control target key end

     0   :  { %s2198_s21 = smov 0   ;;  %s2200_s22 = smov 0   ;;  %s2627_s0 = inlined_call_operand.vmem [shape: bf16[2,16,64], index: 0, kind: input, shape index: {}]   ;;  %s2628_s1 = inlined_call_operand.vmem [shape: bf16[2,16,64], index: 1, kind: input, shape index: {}]   ;;  %s2629_s2 = inlined_call_operand.vmem [shape: bf16[2,16,64], index: 2, kind: input, shape index: {}]   ;;  %s2630_s3 = inlined_call_operand.vmem [shape: bf16[192,1024], index: 3, kind: input, shape index: {}]   ;;  %s2631_s4 = inlined_call_operand.vmem [shape: f32[1,1024], index: 4, kind: input, shape index: {}]   ;;  %s2632_s5 = inlined_call_operand.vmem [shape: bf16[2,16,1024], index: 5, kind: output, shape index: {0}]   ;;  %s2633_s6 = inlined_call_operand.vmem [shape: f32[2,1,1024], index: 6, kind: output, shape index: {1}]  }
   0x1   :  { %s2202_s23 = smov 0  }
   0x2 LB: > { %s29_s24 = sadd.s32 1, %s2155_s22  ;;  %p1932_p0 = scmp.ge.s32.totalorder %s2159_s23, 1  ;;  %s2159_s23 = sphi %s2202_s23, %s17_s23   ;;  %s2155_s22 = sphi %s2200_s22, %s2635_s22   ;;  %s2151_s21 = sphi %s2198_s21, %s2634_s21  }
   0x3   : > { %p31_p1 = scmp.ge.s32.totalorder %s29_s24, 2  ;;  %p270_p2 = scmp.lt.s32.totalorder %s2159_s23, 3 }
   0x5   : > { %s2637_s24 = smov (%p31_p1, %s29_s24), 0  ;;  %p271_p3 = pnand %p1932_p0, %p270_p2 }
   0x6   : > { %v418_v0 = vld [vmem:[%s2630_s3 + $0x100] sm:$0xff] (!%p271_p3)  ;;  %v419_v2 = vld [vmem:[%s2630_s3 + $0x108] sm:$0xff] (!%p271_p3)  ;;  %p332_p4 = scmp.lt.s32.totalorder (!%p271_p3), %s2151_s21, 1  ;;  %v2161_v8 = vmov (!%p271_p3), 0   ;;  %v420_v31 = vld [vmem:[%s2630_s3 + $0x110] sm:$0xff] (!%p271_p3)  ;;  %vm615_vm0 = vcmask (!%p271_p3), 523264  }
   0x7   : > { %274 = sbr.rel (%p271_p3) target bundleno = 352 (0x160), region = 40  ;;  %v422_v1 = vld [vmem:[%s2630_s3 + $0x120] sm:$0xff] (!%p271_p3)  ;;  %v423_v4 = vld [vmem:[%s2630_s3 + $0x128] sm:$0xff] (!%p271_p3)  ;;  %651 = vmatprep.mubr.bf16.mxu0 (!%p271_p3), %v2161_v8  ;;  %694 = vmatprep.mubr.bf16.mxu1 (!%p271_p3), %v2161_v8  ;;  %v424_v32 = vld [vmem:[%s2630_s3 + $0x130] sm:$0xff] (!%p271_p3) }
   0x8   : > { %v1944_v3 = vcombine.high (!%p271_p3), %v418_v0, %v422_v1  ;;  %v1943_v5 = vcombine.low (!%p271_p3), %v418_v0, %v422_v1  ;;  %v426_v6 = vld [vmem:[%s2630_s3 + $0x140] sm:$0xff] (!%p271_p3)  ;;  %v1946_v9 = vcombine.high (!%p271_p3), %v419_v2, %v423_v4  ;;  %v1945_v10 = vcombine.low (!%p271_p3), %v419_v2, %v423_v4  ;;  %v427_v12 = vld [vmem:[%s2630_s3 + $0x148] sm:$0xff] (!%p271_p3)  ;;  %v421_v33 = vld [vmem:[%s2630_s3 + $0x118] sm:$0xff] (!%p271_p3) }
   0x9   : > { %v430_v7 = vld [vmem:[%s2630_s3 + $0x160] sm:$0xff] (!%p271_p3)  ;;  %v431_v13 = vld [vmem:[%s2630_s3 + $0x168] sm:$0xff] (!%p271_p3)  ;;  %v425_v34 = vld [vmem:[%s2630_s3 + $0x138] sm:$0xff] (!%p271_p3)  ;;  %v1948_v37 = vcombine.high (!%p271_p3), %v420_v31, %v424_v32  ;;  %v1947_v44 = vcombine.low (!%p271_p3), %v420_v31, %v424_v32 }
   0xa   : > { %v1952_v11 = vcombine.high (!%p271_p3), %v426_v6, %v430_v7  ;;  %v434_v14 = vld [vmem:[%s2630_s3 + $0x180] sm:$0xff] (!%p271_p3)  ;;  %619 = vmatprep.subr.bf16.mxu0 (!%p271_p3), %v1944_v3  ;;  %v1954_v15 = vcombine.high (!%p271_p3), %v427_v12, %v431_v13  ;;  %v435_v17 = vld [vmem:[%s2630_s3 + $0x188] sm:$0xff] (!%p271_p3)  ;;  %662 = vmatprep.subr.bf16.mxu1 (!%p271_p3), %v1946_v9  ;;  %v1951_v19 = vcombine.low (!%p271_p3), %v426_v6, %v430_v7  ;;  %v428_v39 = vld [vmem:[%s2630_s3 + $0x150] sm:$0xff] (!%p271_p3) }
   0xb   : > { %v438_v16 = vld [vmem:[%s2630_s3 + $0x1a0] sm:$0xff] (!%p271_p3)  ;;  %v439_v18 = vld [vmem:[%s2630_s3 + $0x1a8] sm:$0xff] (!%p271_p3)  ;;  %620 = vmatpush1.bf16.msra.mxu0 (!%p271_p3), %v1943_v5  ;;  %663 = vmatpush1.bf16.msra.mxu1 (!%p271_p3), %v1945_v10  ;;  %v1953_v20 = vcombine.low (!%p271_p3), %v427_v12, %v431_v13  ;;  %v1950_v38 = vcombine.high (!%p271_p3), %v421_v33, %v425_v34  ;;  %v432_v40 = vld [vmem:[%s2630_s3 + $0x170] sm:$0xff] (!%p271_p3)  ;;  %v1949_v45 = vcombine.low (!%p271_p3), %v421_v33, %v425_v34 }
   0xc   : > { %621 = vmatprep.subr.bf16.mxu0 (!%p271_p3), %v1952_v11  ;;  %v1960_v21 = vcombine.high (!%p271_p3), %v434_v14, %v438_v16  ;;  %664 = vmatprep.subr.bf16.mxu1 (!%p271_p3), %v1954_v15  ;;  %v1962_v22 = vcombine.high (!%p271_p3), %v435_v17, %v439_v18  ;;  %v442_v23 = vld [vmem:[%s2630_s3 + $0x1c0] sm:$0xff] (!%p271_p3)  ;;  %v443_v25 = vld [vmem:[%s2630_s3 + $0x1c8] sm:$0xff] (!%p271_p3)  ;;  %v1959_v27 = vcombine.low (!%p271_p3), %v434_v14, %v438_v16  ;;  %v429_v42 = vld [vmem:[%s2630_s3 + $0x158] sm:$0xff] (!%p271_p3) }
   0xd   : > { %v446_v24 = vld [vmem:[%s2630_s3 + $0x1e0] sm:$0xff] (!%p271_p3)  ;;  %v447_v26 = vld [vmem:[%s2630_s3 + $0x1e8] sm:$0xff] (!%p271_p3)  ;;  %v1961_v28 = vcombine.low (!%p271_p3), %v435_v17, %v439_v18  ;;  %v433_v43 = vld [vmem:[%s2630_s3 + $0x178] sm:$0xff] (!%p271_p3)  ;;  %v1956_v46 = vcombine.high (!%p271_p3), %v428_v39, %v432_v40  ;;  %v1955_v52 = vcombine.low (!%p271_p3), %v428_v39, %v432_v40 }
   0xe   : > { %s2639_s21 = smov (!%p332_p4, %s2151_s21), 1  ;;  %v1968_v29 = vcombine.high %v442_v23, %v446_v24  ;;  %v1970_v30 = vcombine.high %v443_v25, %v447_v26  ;;  %v1967_v35 = vcombine.low %v442_v23, %v446_v24  ;;  %v1969_v36 = vcombine.low %v443_v25, %v447_v26  ;;  %v436_v47 = vld [vmem:[%s2630_s3 + $0x190] sm:$0xff]  ;;  %v437_v50 = vld [vmem:[%s2630_s3 + $0x198] sm:$0xff]  ;;  %v384_v0 = vld [vmem:[%s2630_s3] sm:$0xff] }
   0xf   : > { %s2258_s29 = sshll.u32 %s2639_s21, 3  ;;  %622 = vmatpush1.bf16.msra.mxu0 %v1951_v19  ;;  %665 = vmatpush1.bf16.msra.mxu1 %v1953_v20  ;;  %v1958_v48 = vcombine.high %v429_v42, %v433_v43  ;;  %v440_v49 = vld [vmem:[%s2630_s3 + $0x1b0] sm:$0xff]  ;;  %v441_v51 = vld [vmem:[%s2630_s3 + $0x1b8] sm:$0xff]  ;;  %v1957_v53 = vcombine.low %v429_v42, %v433_v43  ;;  %v388_v1 = vld [vmem:[%s2630_s3 + $0x20] sm:$0xff]  ;;  %s2066_s9 = sshll.u32 %s2639_s21, 6 }
  0x10   : > { %s349_s8 = scalar_lea.vmem %s2628_s1, %s2258_s29  ;;  %623 = vmatprep.subr.bf16.mxu0 %v1960_v21  ;;  %666 = vmatprep.subr.bf16.mxu1 %v1962_v22  ;;  %s339_s18 = scalar_lea.vmem %s2627_s0, %s2258_s29  ;;  %v1964_v54 = vcombine.high %v436_v47, %v440_v49  ;;  %v1966_v55 = vcombine.high %v437_v50, %v441_v51  ;;  %v444_v56 = vld [vmem:[%s2630_s3 + $0x1d0] sm:$0xff]  ;;  %v445_v58 = vld [vmem:[%s2630_s3 + $0x1d8] sm:$0xff]  ;;  %v1963_v60 = vcombine.low %v436_v47, %v440_v49  ;;  %v385_v2 = vld [vmem:[%s2630_s3 + $0x8] sm:$0xff] }
  0x11   : > { %v2294_v41 = vld [vmem:[%s349_s8] sm:$0xff]   ;;  %v448_v57 = vld [vmem:[%s2630_s3 + $0x1f0] sm:$0xff]  ;;  %v449_v59 = vld [vmem:[%s2630_s3 + $0x1f8] sm:$0xff]  ;;  %v1965_v61 = vcombine.low %v437_v50, %v441_v51  ;;  %s359_s30 = scalar_lea.vmem %s2629_s2, %s2258_s29  ;;  %v1981_v6 = vcombine.high %v384_v0, %v388_v1  ;;  %v1980_v13 = vcombine.low %v384_v0, %v388_v1  ;;  %s375_s13 = scalar_lea.vmem %s2633_s6, %s2258_s29 }
  0x12   : > { %v1972_v62 = vcombine.high %v444_v56, %v448_v57  ;;  %v1974_v63 = vcombine.high %v445_v58, %v449_v59  ;;  %v389_v3 = vld [vmem:[%s2630_s3 + $0x28] sm:$0xff]  ;;  %v1971_v4 = vcombine.low %v444_v56, %v448_v57  ;;  %v1973_v5 = vcombine.low %v445_v58, %v449_v59  ;;  %v392_v9 = vld [vmem:[%s2630_s3 + $0x40] sm:$0xff]  ;;  %v386_v33 = vld [vmem:[%s2630_s3 + $0x10] sm:$0xff] }
  0x13   : > { %624 = vmatpush1.bf16.msra.mxu0 %v1959_v27  ;;  %667 = vmatpush1.bf16.msra.mxu1 %v1961_v28  ;;  %v1983_v7 = vcombine.high %v385_v2, %v389_v3  ;;  %v396_v10 = vld [vmem:[%s2630_s3 + $0x60] sm:$0xff]  ;;  %v393_v11 = vld [vmem:[%s2630_s3 + $0x48] sm:$0xff]  ;;  %v1982_v14 = vcombine.low %v385_v2, %v389_v3  ;;  %v390_v34 = vld [vmem:[%s2630_s3 + $0x30] sm:$0xff] }
  0x14   : > { %625 = vmatprep.subr.bf16.mxu0 %v1968_v29  ;;  %668 = vmatprep.subr.bf16.mxu1 %v1970_v30  ;;  %v397_v12 = vld [vmem:[%s2630_s3 + $0x68] sm:$0xff]  ;;  %v1989_v15 = vcombine.high %v392_v9, %v396_v10  ;;  %v400_v17 = vld [vmem:[%s2630_s3 + $0x80] sm:$0xff]  ;;  %v1988_v21 = vcombine.low %v392_v9, %v396_v10  ;;  %v1985_v39 = vcombine.high %v386_v33, %v390_v34  ;;  %v398_v42 = vld [vmem:[%s2630_s3 + $0x70] sm:$0xff] }
  0x15   : > { %v1991_v16 = vcombine.high %v393_v11, %v397_v12  ;;  %v404_v18 = vld [vmem:[%s2630_s3 + $0xa0] sm:$0xff]  ;;  %v401_v19 = vld [vmem:[%s2630_s3 + $0x88] sm:$0xff]  ;;  %v1990_v22 = vcombine.low %v393_v11, %v397_v12  ;;  %v402_v50 = vld [vmem:[%s2630_s3 + $0x90] sm:$0xff] }
  0x16   : > { %v405_v20 = vld [vmem:[%s2630_s3 + $0xa8] sm:$0xff]  ;;  %v1997_v23 = vcombine.high %v400_v17, %v404_v18  ;;  %v408_v25 = vld [vmem:[%s2630_s3 + $0xc0] sm:$0xff]  ;;  %v1996_v29 = vcombine.low %v400_v17, %v404_v18  ;;  %v406_v51 = vld [vmem:[%s2630_s3 + $0xb0] sm:$0xff] }
  0x17   : > { %626 = vmatpush1.bf16.msra.mxu0 %v1967_v35  ;;  %669 = vmatpush1.bf16.msra.mxu1 %v1969_v36  ;;  %v1999_v24 = vcombine.high %v401_v19, %v405_v20  ;;  %v412_v26 = vld [vmem:[%s2630_s3 + $0xe0] sm:$0xff]  ;;  %v409_v27 = vld [vmem:[%s2630_s3 + $0xc8] sm:$0xff]  ;;  %v1998_v30 = vcombine.low %v401_v19, %v405_v20  ;;  %v387_v35 = vld [vmem:[%s2630_s3 + $0x18] sm:$0xff]  ;;  %v2001_v56 = vcombine.high %v402_v50, %v406_v51 }
  0x18   : > { %705 = vmatprep.subr.bf16.mxu0 %v1948_v37  ;;  %748 = vmatprep.subr.bf16.mxu1 %v1950_v38  ;;  %v413_v28 = vld [vmem:[%s2630_s3 + $0xe8] sm:$0xff]  ;;  %v2005_v31 = vcombine.high %v408_v25, %v412_v26  ;;  %v391_v36 = vld [vmem:[%s2630_s3 + $0x38] sm:$0xff]  ;;  %v2004_v37 = vcombine.low %v408_v25, %v412_v26  ;;  %v2417_v43 = vld [vmem:[%s339_s18] sm:$0xff]  }
  0x19   : > { %v2007_v32 = vcombine.high %v409_v27, %v413_v28  ;;  %v2006_v38 = vcombine.low %v409_v27, %v413_v28  ;;  %v1987_v40 = vcombine.high %v387_v35, %v391_v36  ;;  %v1986_v47 = vcombine.low %v387_v35, %v391_v36  ;;  %v410_v58 = vld [vmem:[%s2630_s3 + $0xd0] sm:$0xff]  ;;  %v1133_v2 = vld [vmem:[%s2630_s3 + $0x200] sm:$0xff] }
  0x1a   : > { %1975 = vmatmul.mubr.msk.bf16.vlgmr.msra.gmra.mrb[0].mxu0 %vm615_vm0, %v2294_v41  ;;  %1976 = vmatmul.mubr.msk.bf16.vlgmr.msra.gmra.mrb[0].mxu1 %vm615_vm0, %v2294_v41  ;;  %v414_v59 = vld [vmem:[%s2630_s3 + $0xf0] sm:$0xff]  ;;  %v1137_v3 = vld [vmem:[%s2630_s3 + $0x220] sm:$0xff] }
  0x1b   : > { %706 = vmatpush1.bf16.msra.mxu0 %v1947_v44  ;;  %749 = vmatpush1.bf16.msra.mxu1 %v1949_v45  ;;  %v395_v44 = vld [vmem:[%s2630_s3 + $0x58] sm:$0xff]  ;;  %v2009_v0 = vcombine.high %v410_v58, %v414_v59  ;;  %v2018_v9 = vcombine.high %v1133_v2, %v1137_v3  ;;  %v1141_v11 = vld [vmem:[%s2630_s3 + $0x240] sm:$0xff]  ;;  %v1135_v35 = vld [vmem:[%s2630_s3 + $0x210] sm:$0xff] }
  0x1c   : > { %707 = vmatprep.subr.bf16.mxu0 %v1956_v46  ;;  %750 = vmatprep.subr.bf16.mxu1 %v1958_v48  ;;  %v399_v45 = vld [vmem:[%s2630_s3 + $0x78] sm:$0xff]  ;;  %v1984_v46 = vcombine.low %v386_v33, %v390_v34  ;;  %v1145_v12 = vld [vmem:[%s2630_s3 + $0x260] sm:$0xff]  ;;  %v1139_v36 = vld [vmem:[%s2630_s3 + $0x230] sm:$0xff] }
  0x1d   : > { %737 = vmatprep.mubr.bf16.mxu0 %v2161_v8  ;;  %780 = vmatprep.mubr.bf16.mxu1 %v2161_v8  ;;  %v1995_v49 = vcombine.high %v395_v44, %v399_v45  ;;  %v2026_v17 = vcombine.high %v1141_v11, %v1145_v12  ;;  %v1149_v19 = vld [vmem:[%s2630_s3 + $0x280] sm:$0xff] }
  0x1e   : > { %v1153_v20 = vld [vmem:[%s2630_s3 + $0x2a0] sm:$0xff] }
  0x1f   : > { %708 = vmatpush1.bf16.msra.mxu0 %v1955_v52  ;;  %751 = vmatpush1.bf16.msra.mxu1 %v1957_v53  ;;  %v403_v52 = vld [vmem:[%s2630_s3 + $0x98] sm:$0xff]  ;;  %v2034_v25 = vcombine.high %v1149_v19, %v1153_v20  ;;  %v1157_v27 = vld [vmem:[%s2630_s3 + $0x2c0] sm:$0xff] }
  0x20   : > { %709 = vmatprep.subr.bf16.mxu0 %v1964_v54  ;;  %752 = vmatprep.subr.bf16.mxu1 %v1966_v55  ;;  %v407_v53 = vld [vmem:[%s2630_s3 + $0xb8] sm:$0xff]  ;;  %v1994_v55 = vcombine.low %v395_v44, %v399_v45  ;;  %v1161_v28 = vld [vmem:[%s2630_s3 + $0x2e0] sm:$0xff]  ;;  %v1147_v44 = vld [vmem:[%s2630_s3 + $0x270] sm:$0xff] }
  0x21   : > { %v2003_v57 = vcombine.high %v403_v52, %v407_v53  ;;  %v2042_v33 = vcombine.high %v1157_v27, %v1161_v28  ;;  %v2136_v45 = vld [vmem:[%s359_s30] sm:$0xff]   ;;  %s2587_s30 = scalar_lea.vmem %s2632_s5, %s2066_s9 }
  0x23   : > { %710 = vmatpush1.bf16.msra.mxu0 %v1963_v60  ;;  %753 = vmatpush1.bf16.msra.mxu1 %v1965_v61  ;;  %v411_v60 = vld [vmem:[%s2630_s3 + $0xd8] sm:$0xff] }
  0x24   : > { %711 = vmatprep.subr.bf16.mxu0 %v1972_v62  ;;  %754 = vmatprep.subr.bf16.mxu1 %v1974_v63  ;;  %v415_v61 = vld [vmem:[%s2630_s3 + $0xf8] sm:$0xff]  ;;  %v2000_v62 = vcombine.low %v402_v50, %v406_v51  ;;  %v2002_v63 = vcombine.low %v403_v52, %v407_v53  ;;  %v1151_v52 = vld [vmem:[%s2630_s3 + $0x290] sm:$0xff] }
  0x25   : > { %v2011_v1 = vcombine.high %v411_v60, %v415_v61  ;;  %v1155_v53 = vld [vmem:[%s2630_s3 + $0x2b0] sm:$0xff] }
  0x27   : > { %712 = vmatpush1.bf16.msra.mxu0 %v1971_v4  ;;  %755 = vmatpush1.bf16.msra.mxu1 %v1973_v5  ;;  %v1134_v4 = vld [vmem:[%s2630_s3 + $0x208] sm:$0xff] }
  0x28   : > { %959 = vmatprep.subr.bf16.mxu0 %v1981_v6  ;;  %1002 = vmatprep.subr.bf16.mxu1 %v1983_v7  ;;  %v1138_v5 = vld [vmem:[%s2630_s3 + $0x228] sm:$0xff]  ;;  %v2008_v6 = vcombine.low %v410_v58, %v414_v59  ;;  %v2010_v7 = vcombine.low %v411_v60, %v415_v61  ;;  %v2038_v58 = vcombine.high %v1151_v52, %v1155_v53  ;;  %v1159_v60 = vld [vmem:[%s2630_s3 + $0x2d0] sm:$0xff] }
  0x29   : > { %v2020_v10 = vcombine.high %v1134_v4, %v1138_v5  ;;  %v1163_v61 = vld [vmem:[%s2630_s3 + $0x2f0] sm:$0xff] }
  0x2a   : > { %1977 = vmatmul.mubr.msk.bf16.vlgmr.msra.gmra.mrb[4].mxu0 %vm615_vm0, %v2294_v41  ;;  %1978 = vmatmul.mubr.msk.bf16.vlgmr.msra.gmra.mrb[4].mxu1 %vm615_vm0, %v2294_v41  ;;  %v394_v41 = vld [vmem:[%s2630_s3 + $0x50] sm:$0xff] }
  0x2b   : > { %960 = vmatpush1.bf16.msra.mxu0 %v1980_v13  ;;  %1003 = vmatpush1.bf16.msra.mxu1 %v1982_v14  ;;  %v1993_v48 = vcombine.high %v394_v41, %v398_v42  ;;  %v1992_v54 = vcombine.low %v394_v41, %v398_v42  ;;  %v1142_v13 = vld [vmem:[%s2630_s3 + $0x248] sm:$0xff]  ;;  %v2022_v41 = vcombine.high %v1135_v35, %v1139_v36 }
  0x2c   : > { %961 = vmatprep.subr.bf16.mxu0 %v1989_v15  ;;  %1004 = vmatprep.subr.bf16.mxu1 %v1991_v16  ;;  %v1146_v14 = vld [vmem:[%s2630_s3 + $0x268] sm:$0xff]  ;;  %v2017_v15 = vcombine.low %v1133_v2, %v1137_v3  ;;  %v2019_v16 = vcombine.low %v1134_v4, %v1138_v5  ;;  %v2046_v2 = vcombine.high %v1159_v60, %v1163_v61 }
  0x2d   : > { %991 = vmatprep.mubr.bf16.mxu0 %v2161_v8  ;;  %1034 = vmatprep.mubr.bf16.mxu1 %v2161_v8  ;;  %v2028_v18 = vcombine.high %v1142_v13, %v1146_v14  ;;  %v2045_v4 = vcombine.low %v1159_v60, %v1163_v61 }
  0x2f   : > { %962 = vmatpush1.bf16.msra.mxu0 %v1988_v21  ;;  %1005 = vmatpush1.bf16.msra.mxu1 %v1990_v22  ;;  %v1150_v21 = vld [vmem:[%s2630_s3 + $0x288] sm:$0xff] }
  0x30   : > { %963 = vmatprep.subr.bf16.mxu0 %v1997_v23  ;;  %1006 = vmatprep.subr.bf16.mxu1 %v1999_v24  ;;  %v1154_v22 = vld [vmem:[%s2630_s3 + $0x2a8] sm:$0xff]  ;;  %v2025_v23 = vcombine.low %v1141_v11, %v1145_v12  ;;  %v2027_v24 = vcombine.low %v1142_v13, %v1146_v14 }
  0x31   : > { %v2036_v26 = vcombine.high %v1150_v21, %v1154_v22 }
  0x33   : > { %964 = vmatpush1.bf16.msra.mxu0 %v1996_v29  ;;  %1007 = vmatpush1.bf16.msra.mxu1 %v1998_v30  ;;  %v1158_v29 = vld [vmem:[%s2630_s3 + $0x2c8] sm:$0xff] }
  0x34   : > { %965 = vmatprep.subr.bf16.mxu0 %v2005_v31  ;;  %1008 = vmatprep.subr.bf16.mxu1 %v2007_v32  ;;  %v1162_v30 = vld [vmem:[%s2630_s3 + $0x2e8] sm:$0xff]  ;;  %v2033_v31 = vcombine.low %v1149_v19, %v1153_v20  ;;  %v2035_v32 = vcombine.low %v1150_v21, %v1154_v22 }
  0x35   : > { %v2044_v34 = vcombine.high %v1158_v29, %v1162_v30 }
  0x37   : > { %966 = vmatpush1.bf16.msra.mxu0 %v2004_v37  ;;  %1009 = vmatpush1.bf16.msra.mxu1 %v2006_v38  ;;  %v1136_v37 = vld [vmem:[%s2630_s3 + $0x218] sm:$0xff] }
  0x38   : > { %1045 = vmatprep.subr.bf16.mxu0 %v1985_v39  ;;  %1088 = vmatprep.subr.bf16.mxu1 %v1987_v40  ;;  %v1140_v38 = vld [vmem:[%s2630_s3 + $0x238] sm:$0xff]  ;;  %v2041_v39 = vcombine.low %v1157_v27, %v1161_v28  ;;  %v2043_v40 = vcombine.low %v1158_v29, %v1162_v30 }
  0x39   : > { %v2024_v42 = vcombine.high %v1136_v37, %v1140_v38 }
  0x3a   : > { %2012 = vmatmul.mubr.msk.bf16.vlgmr.msra.gmra.mrb[0].mxu0 %vm615_vm0, %v2417_v43  ;;  %2013 = vmatmul.mubr.msk.bf16.vlgmr.msra.gmra.mrb[0].mxu1 %vm615_vm0, %v2417_v43 }
  0x3b   : > { %1046 = vmatpush1.bf16.msra.mxu0 %v1984_v46  ;;  %1089 = vmatpush1.bf16.msra.mxu1 %v1986_v47  ;;  %v1144_v46 = vld [vmem:[%s2630_s3 + $0x258] sm:$0xff] }
  0x3c   : > { %1047 = vmatprep.subr.bf16.mxu0 %v1993_v48  ;;  %1090 = vmatprep.subr.bf16.mxu1 %v1995_v49  ;;  %v1148_v47 = vld [vmem:[%s2630_s3 + $0x278] sm:$0xff]  ;;  %v2021_v48 = vcombine.low %v1135_v35, %v1139_v36  ;;  %v2023_v49 = vcombine.low %v1136_v37, %v1140_v38 }
  0x3d   : > { %1077 = vmatprep.mubr.bf16.mxu0 %v2161_v8  ;;  %1120 = vmatprep.mubr.bf16.mxu1 %v2161_v8  ;;  %v2032_v51 = vcombine.high %v1144_v46, %v1148_v47 }
  0x3f   : > { %1048 = vmatpush1.bf16.msra.mxu0 %v1992_v54  ;;  %1091 = vmatpush1.bf16.msra.mxu1 %v1994_v55  ;;  %v1152_v54 = vld [vmem:[%s2630_s3 + $0x298] sm:$0xff] }
  0x40   : > { %1049 = vmatprep.subr.bf16.mxu0 %v2001_v56  ;;  %1092 = vmatprep.subr.bf16.mxu1 %v2003_v57  ;;  %v1156_v55 = vld [vmem:[%s2630_s3 + $0x2b8] sm:$0xff]  ;;  %v2031_v57 = vcombine.low %v1144_v46, %v1148_v47 }
  0x41   : > { %v2040_v59 = vcombine.high %v1152_v54, %v1156_v55 }
  0x43   : > { %1050 = vmatpush1.bf16.msra.mxu0 %v2000_v62  ;;  %1093 = vmatpush1.bf16.msra.mxu1 %v2002_v63  ;;  %v1160_v62 = vld [vmem:[%s2630_s3 + $0x2d8] sm:$0xff] }
  0x44   : > { %1051 = vmatprep.subr.bf16.mxu0 %v2009_v0  ;;  %1094 = vmatprep.subr.bf16.mxu1 %v2011_v1  ;;  %v1164_v63 = vld [vmem:[%s2630_s3 + $0x2f8] sm:$0xff]  ;;  %v2037_v0 = vcombine.low %v1151_v52, %v1155_v53  ;;  %v2039_v1 = vcombine.low %v1152_v54, %v1156_v55 }
  0x45   : > { %v2048_v3 = vcombine.high %v1160_v62, %v1164_v63  ;;  %v2047_v5 = vcombine.low %v1160_v62, %v1164_v63 }
  0x47   : > { %1052 = vmatpush1.bf16.msra.mxu0 %v2008_v6  ;;  %1095 = vmatpush1.bf16.msra.mxu1 %v2010_v7 }
  0x48   : > { %1333 = vmatprep.subr.bf16.mxu0 %v2018_v9  ;;  %1376 = vmatprep.subr.bf16.mxu1 %v2020_v10  ;;  %v2574_v9 = vld [vmem:[%s2631_s4] sm:$0xff] }
  0x4a   : > { %2014 = vmatmul.mubr.msk.bf16.vlgmr.msra.gmra.mrb[4].mxu0 %vm615_vm0, %v2417_v43  ;;  %2015 = vmatmul.mubr.msk.bf16.vlgmr.msra.gmra.mrb[4].mxu1 %vm615_vm0, %v2417_v43  ;;  %v1143_v43 = vld [vmem:[%s2630_s3 + $0x250] sm:$0xff] }
  0x4b   : > { %1334 = vmatpush1.bf16.msra.mxu0 %v2017_v15  ;;  %1377 = vmatpush1.bf16.msra.mxu1 %v2019_v16  ;;  %v2030_v50 = vcombine.high %v1143_v43, %v1147_v44  ;;  %v2029_v56 = vcombine.low %v1143_v43, %v1147_v44 }
  0x4c   : > { %1335 = vmatprep.subr.bf16.mxu0 %v2026_v17  ;;  %1378 = vmatprep.subr.bf16.mxu1 %v2028_v18 }
  0x4d   : > { %1365 = vmatprep.mubr.bf16.mxu0 %v2161_v8  ;;  %1408 = vmatprep.mubr.bf16.mxu1 %v2161_v8 }
  0x4f   : > { %1336 = vmatpush1.bf16.msra.mxu0 %v2025_v23  ;;  %1379 = vmatpush1.bf16.msra.mxu1 %v2027_v24 }
  0x50   : > { %1337 = vmatprep.subr.bf16.mxu0 %v2034_v25  ;;  %1380 = vmatprep.subr.bf16.mxu1 %v2036_v26 }
  0x53   : > { %1338 = vmatpush1.bf16.msra.mxu0 %v2033_v31  ;;  %1381 = vmatpush1.bf16.msra.mxu1 %v2035_v32 }
  0x54   : > { %1339 = vmatprep.subr.bf16.mxu0 %v2042_v33  ;;  %1382 = vmatprep.subr.bf16.mxu1 %v2044_v34 }
  0x57   : > { %1340 = vmatpush1.bf16.msra.mxu0 %v2041_v39  ;;  %1383 = vmatpush1.bf16.msra.mxu1 %v2043_v40 }
  0x58   : > { %1419 = vmatprep.subr.bf16.mxu0 %v2022_v41  ;;  %1462 = vmatprep.subr.bf16.mxu1 %v2024_v42 }
  0x5a   : > { %2049 = vmatmul.mubr.msk.bf16.vlgmr.msra.gmra.mrb[0].mxu0 %vm615_vm0, %v2136_v45  ;;  %2050 = vmatmul.mubr.msk.bf16.vlgmr.msra.gmra.mrb[0].mxu1 %vm615_vm0, %v2136_v45 }
  0x5b   : > { %1420 = vmatpush1.bf16.msra.mxu0 %v2021_v48  ;;  %1463 = vmatpush1.bf16.msra.mxu1 %v2023_v49  ;;  %v2162_v49 = vmov 1966171168  }
  0x5c   : > { %1421 = vmatprep.subr.bf16.mxu0 %v2030_v50  ;;  %1464 = vmatprep.subr.bf16.mxu1 %v2032_v51  ;;  %v1721_v50 = vunpack.c.l.s4 %v2162_v49 }
  0x5d   : > { %1451 = vmatprep.mubr.bf16.mxu0 %v2161_v8  ;;  %1494 = vmatprep.mubr.bf16.mxu1 %v2161_v8  ;;  %v1523_v8 = vlaneseq }
  0x5e   : > { %v1722_v63 = vunpack.c.0.s8 %v1721_v50 }
  0x5f   : > { %1422 = vmatpush1.bf16.msra.mxu0 %v2029_v56  ;;  %1465 = vmatpush1.bf16.msra.mxu1 %v2031_v57  ;;  %v2568_v6 = vshrl.u32 %v1523_v8, 7 }
  0x60   : > { %1423 = vmatprep.subr.bf16.mxu0 %v2038_v58  ;;  %1466 = vmatprep.subr.bf16.mxu1 %v2040_v59 }
  0x61   : > { %v1525_v7 = vsub.s32 0, %v2568_v6  ;;  %v1533_v10 = vsub.s32 2, %v2568_v6  ;;  %v1529_v11 = vsub.s32 1, %v2568_v6  ;;  %v1537_v12 = vsub.s32 3, %v2568_v6 }
  0x62   : > { %v1541_v47 = vsub.s32 4, %v2568_v6  ;;  %v1549_v55 = vsub.s32 6, %v2568_v6  ;;  %v1545_v56 = vsub.s32 5, %v2568_v6  ;;  %v1553_v59 = vsub.s32 7, %v2568_v6 }
  0x63   : > { %1424 = vmatpush1.bf16.msra.mxu0 %v2037_v0  ;;  %1467 = vmatpush1.bf16.msra.mxu1 %v2039_v1  ;;  %v1526_v13 = vrot.slane %v2574_v9, %v1525_v7  ;;  %v1534_v14 = vrot.slane %v2574_v9, %v1533_v10  ;;  %v1530_v15 = vrot.slane %v2574_v9, %v1529_v11 }
  0x64   : > { %1425 = vmatprep.subr.bf16.mxu0 %v2046_v2  ;;  %1468 = vmatprep.subr.bf16.mxu1 %v2048_v3  ;;  %v1538_v16 = vrot.slane %v2574_v9, %v1537_v12  ;;  %v1542_v1 = vrot.slane %v2574_v9, %v1541_v47  ;;  %v1554_v10 = vrot.slane %v2574_v9, %v1553_v59 }
  0x67   : > { %1426 = vmatpush1.bf16.msra.mxu0 %v2045_v4  ;;  %1469 = vmatpush1.bf16.msra.mxu1 %v2047_v5  ;;  %v1550_v4 = vrot.slane %v2574_v9, %v1549_v55  ;;  %v1546_v5 = vrot.slane %v2574_v9, %v1545_v56 }
  0x6a   : > { %2051 = vmatmul.mubr.msk.bf16.vlgmr.msra.gmra.mrb[4].mxu0 %vm615_vm0, %v2136_v45  ;;  %2052 = vmatmul.mubr.msk.bf16.vlgmr.msra.gmra.mrb[4].mxu1 %vm615_vm0, %v2136_v45 }
 0x12d   : > { %v1367_v17 = vpop.f32.mrb[0].mxu0  ;;  %v1410_v19 = vpop.f32.mrb[0].mxu1 }
 0x12e   : > { %v1563_v18 = vadd.f32 %v1526_v13, %v1367_v17  ;;  %v1369_v20 = vpop.f32.mrb[1].mxu0  ;;  %v1565_v21 = vadd.f32 %v1534_v14, %v1410_v19  ;;  %v1412_v23 = vpop.f32.mrb[1].mxu1 }
 0x12f   : > { %v1564_v22 = vadd.f32 %v1530_v15, %v1369_v20  ;;  %v1371_v24 = vpop.f32.mrb[2].mxu0  ;;  %v1566_v26 = vadd.f32 %v1538_v16, %v1412_v23  ;;  %v1414_v28 = vpop.f32.mrb[2].mxu1 }
 0x130   : > { %v1579_v25 = vmax.f32 %v1563_v18, 0.0  ;;  %v1571_v27 = vadd.f32 %v1526_v13, %v1371_v24  ;;  %v1373_v29 = vpop.f32.mrb[3].mxu0  ;;  %v1581_v30 = vmax.f32 %v1565_v21, 0.0  ;;  %v1573_v32 = vadd.f32 %v1534_v14, %v1414_v28  ;;  %v1416_v34 = vpop.f32.mrb[3].mxu1 }
 0x131   : > { %v1580_v31 = vmax.f32 %v1564_v22, 0.0  ;;  %v1572_v33 = vadd.f32 %v1530_v15, %v1373_v29  ;;  %v1582_v35 = vmax.f32 %v1566_v26, 0.0  ;;  %v1574_v37 = vadd.f32 %v1538_v16, %v1416_v34 }
 0x132   : > { %v1587_v36 = vmax.f32 %v1571_v27, 0.0  ;;  %v1589_v39 = vmax.f32 %v1573_v32, 0.0  ;;  %v2602_v15 = vsub.s32 %v1722_v63, %v2568_v6 }
 0x133   : > { %v2067_v38 = vpack.c.bf16 %v1580_v31, %v1579_v25  ;;  %v1588_v40 = vmax.f32 %v1572_v33, 0.0  ;;  %v2068_v41 = vpack.c.bf16 %v1582_v35, %v1581_v30  ;;  %v1590_v43 = vmax.f32 %v1574_v37, 0.0 }
 0x134   : > { %v1652_v42 = vmax.f32 %v1579_v25, %v1587_v36  ;;  %v1666_v44 = vmax.f32 %v1581_v30, %v1589_v39 }
 0x135   : > { %1643 = vst [vmem:[%s2587_s30] sm:$0xff] %v2067_v38  ;;  %v2071_v45 = vpack.c.bf16 %v1588_v40, %v1587_v36  ;;  %v1659_v46 = vmax.f32 %v1580_v31, %v1588_v40  ;;  %1644 = vst [vmem:[%s2587_s30 + $0x8] sm:$0xff] %v2068_v41  ;;  %v2072_v51 = vpack.c.bf16 %v1590_v43, %v1589_v39 }
 0x136   : > { %v1653_v48 = vrot.slane %v1652_v42, 4  ;;  %v1673_v52 = vmax.f32 %v1582_v35, %v1590_v43  ;;  %v1667_v53 = vrot.slane %v1666_v44, 4 }
 0x137   : > { %1647 = vst [vmem:[%s2587_s30 + $0x20] sm:$0xff] %v2071_v45  ;;  %v1660_v54 = vrot.slane %v1659_v46, 4  ;;  %1648 = vst [vmem:[%s2587_s30 + $0x28] sm:$0xff] %v2072_v51 }
 0x138   : > { %v1654_v57 = vmax.f32 %v1652_v42, %v1653_v48  ;;  %v1674_v58 = vrot.slane %v1673_v52, 4  ;;  %v1668_v60 = vmax.f32 %v1666_v44, %v1667_v53 }
 0x139   : > { %v1661_v61 = vmax.f32 %v1659_v46, %v1660_v54 }
 0x13a   : > { %v1655_v62 = vrot.slane %v1654_v57, 2  ;;  %v1675_v0 = vmax.f32 %v1673_v52, %v1674_v58  ;;  %v1669_v2 = vrot.slane %v1668_v60, 2 }
 0x13b   : > { %v1662_v3 = vrot.slane %v1661_v61, 2 }
 0x13c   : > { %v1656_v8 = vmax.f32 %v1654_v57, %v1655_v62  ;;  %v1676_v7 = vrot.slane %v1675_v0, 2  ;;  %v1670_v11 = vmax.f32 %v1668_v60, %v1669_v2 }
 0x13d   : > { %v1663_v12 = vmax.f32 %v1661_v61, %v1662_v3  ;;  %v1453_v13 = vpop.f32.mrb[4].mxu0  ;;  %v1496_v18 = vpop.f32.mrb[4].mxu1 }
 0x13e   : > { %v1657_v14 = vrot.slane %v1656_v8, 1  ;;  %v1677_v16 = vmax.f32 %v1675_v0, %v1676_v7  ;;  %v1567_v17 = vadd.f32 %v1542_v1, %v1453_v13  ;;  %v1455_v19 = vpop.f32.mrb[5].mxu0  ;;  %v1671_v20 = vrot.slane %v1670_v11, 1  ;;  %v1498_v24 = vpop.f32.mrb[5].mxu1 }
 0x13f   : > { %v1664_v21 = vrot.slane %v1663_v12, 1  ;;  %v1569_v22 = vadd.f32 %v1550_v4, %v1496_v18  ;;  %v1568_v23 = vadd.f32 %v1546_v5, %v1455_v19  ;;  %v1457_v25 = vpop.f32.mrb[6].mxu0  ;;  %v1570_v28 = vadd.f32 %v1554_v10, %v1498_v24  ;;  %v1500_v29 = vpop.f32.mrb[6].mxu1 }
 0x140   : > { %v1658_v26 = vmax.f32 %v1656_v8, %v1657_v14  ;;  %v1678_v27 = vrot.slane %v1677_v16, 1  ;;  %v1583_v9 = vmax.f32 %v1567_v17, 0.0  ;;  %v1459_v30 = vpop.f32.mrb[7].mxu0  ;;  %v1672_v31 = vmax.f32 %v1670_v11, %v1671_v20  ;;  %v1502_v34 = vpop.f32.mrb[7].mxu1 }
 0x141   : > { %v1665_v32 = vmax.f32 %v1663_v12, %v1664_v21  ;;  %v1585_v6 = vmax.f32 %v1569_v22, 0.0  ;;  %v1584_v33 = vmax.f32 %v1568_v23, 0.0  ;;  %v1586_v36 = vmax.f32 %v1570_v28, 0.0 }
 0x142   : > { %v1679_v35 = vmax.f32 %v1677_v16, %v1678_v27  ;;  %v1575_v37 = vadd.f32 %v1542_v1, %v1457_v25  ;;  %v1577_v38 = vadd.f32 %v1550_v4, %v1500_v29  ;;  %v1576_v41 = vadd.f32 %v1546_v5, %v1459_v30 }
 0x143   : > { %v1716_v39 = vcombine.low %v1658_v26, %v1665_v32  ;;  %v2069_v40 = vpack.c.bf16 %v1584_v33, %v1583_v9  ;;  %v1578_v42 = vadd.f32 %v1554_v10, %v1502_v34  ;;  %v2070_v44 = vpack.c.bf16 %v1586_v36, %v1585_v6 }
 0x144   : > { %v1717_v43 = vcombine.low %v1672_v31, %v1679_v35  ;;  %v1591_v45 = vmax.f32 %v1575_v37, 0.0  ;;  %v1593_v46 = vmax.f32 %v1577_v38, 0.0  ;;  %v1592_v48 = vmax.f32 %v1576_v41, 0.0 }
 0x145   : > { %v1726_v47 = vrot.slane %v1716_v39, %v2602_v15  ;;  %1645 = vst [vmem:[%s2587_s30 + $0x10] sm:$0xff] %v2069_v40  ;;  %v1594_v49 = vmax.f32 %v1578_v42, 0.0  ;;  %1646 = vst [vmem:[%s2587_s30 + $0x18] sm:$0xff] %v2070_v44 }
 0x146   : > { %v1733_v50 = vrot.slane %v1717_v43, %v2602_v15  ;;  %v1680_v51 = vmax.f32 %v1583_v9, %v1591_v45  ;;  %v1694_v52 = vmax.f32 %v1585_v6, %v1593_v46  ;;  %v2073_v53 = vpack.c.bf16 %v1592_v48, %v1591_v45 }
 0x147   : > { %v1687_v54 = vmax.f32 %v1584_v33, %v1592_v48  ;;  %v2074_v55 = vpack.c.bf16 %v1594_v49, %v1593_v46  ;;  %v1701_v56 = vmax.f32 %v1586_v36, %v1594_v49 }
 0x148   : > { %v1748_v57 = vcombine.low %v1726_v47, %v1733_v50  ;;  %v1681_v58 = vrot.slane %v1680_v51, 4  ;;  %v1695_v59 = vrot.slane %v1694_v52, 4  ;;  %1649 = vst [vmem:[%s2587_s30 + $0x30] sm:$0xff] %v2073_v53 }
 0x149   : > { %v1688_v60 = vrot.slane %v1687_v54, 4  ;;  %1650 = vst [vmem:[%s2587_s30 + $0x38] sm:$0xff] %v2074_v55  ;;  %v1702_v61 = vrot.slane %v1701_v56, 4 }
 0x14a   : > { %v1682_v62 = vmax.f32 %v1680_v51, %v1681_v58  ;;  %v1696_v63 = vmax.f32 %v1694_v52, %v1695_v59  ;;  %v1756_v26 = vrot.slane %v1748_v57, %v2602_v15 }
 0x14b   : > { %v1689_v0 = vmax.f32 %v1687_v54, %v1688_v60  ;;  %v1703_v1 = vmax.f32 %v1701_v56, %v1702_v61 }
 0x14c   : > { %v1683_v2 = vrot.slane %v1682_v62, 2  ;;  %v1697_v3 = vrot.slane %v1696_v63, 2 }
 0x14d   : > { %v1690_v4 = vrot.slane %v1689_v0, 2  ;;  %v1704_v5 = vrot.slane %v1703_v1, 2 }
 0x14e   : > { %v1684_v8 = vmax.f32 %v1682_v62, %v1683_v2  ;;  %v1698_v7 = vmax.f32 %v1696_v63, %v1697_v3 }
 0x14f   : > { %v1691_v10 = vmax.f32 %v1689_v0, %v1690_v4  ;;  %v1705_v11 = vmax.f32 %v1703_v1, %v1704_v5 }
 0x150   : > { %v1685_v12 = vrot.slane %v1684_v8, 1  ;;  %v1699_v13 = vrot.slane %v1698_v7, 1 }
 0x151   : > { %v1692_v14 = vrot.slane %v1691_v10, 1  ;;  %v1706_v16 = vrot.slane %v1705_v11, 1 }
 0x152   : > { %v1686_v17 = vmax.f32 %v1684_v8, %v1685_v12  ;;  %v1700_v18 = vmax.f32 %v1698_v7, %v1699_v13 }
 0x153   : > { %v1693_v19 = vmax.f32 %v1691_v10, %v1692_v14  ;;  %v1707_v20 = vmax.f32 %v1705_v11, %v1706_v16 }
 0x155   : > { %v1718_v21 = vcombine.low %v1686_v17, %v1693_v19  ;;  %v1719_v22 = vcombine.low %v1700_v18, %v1707_v20 }
 0x157   : > { %v1740_v23 = vrot.slane %v1718_v21, %v2602_v15  ;;  %v1747_v24 = vrot.slane %v1719_v22, %v2602_v15 }
 0x159   : > { %v1749_v25 = vcombine.low %v1740_v23, %v1747_v24 }
 0x15b   : > { %v1763_v27 = vrot.slane %v1749_v25, %v2602_v15 }
 0x15d   : > { %v1764_v9 = vcombine.low %v1756_v26, %v1763_v27 }
 0x15f   : > { %1767 = vst [vmem:[%s375_s13] sm:$0xff] %v1764_v9 }
 0x160 PF: > { %s17_s23 = sadd.s32 1, %s2159_s23   ;;  %s2634_s21 = smov %s2155_s22 }
 0x161   : > { %p14_p5 = scmp.ge.s32.totalorder %s17_s23, 4   ;;  %s2635_s22 = smov %s2637_s24 }
 0x163   :  { %16 = sbr.rel (!%p14_p5) target bundleno = 2 (0x2), region = 92 }

// kernel: dgcnn_seg_forward.27
= control target key start
LH: loop header
LB: loop body
LE: loop exit
PB: predicated region body
PF: predicated region fallthrough
CT: control target
= control target key end

     0   :  { %s3987_s25 = smov 0   ;;  %s3989_s26 = smov 0   ;;  %s4895_s0 = inlined_call_operand.vmem [shape: bf16[2,16,128], index: 0, kind: input, shape index: {}]   ;;  %s4896_s1 = inlined_call_operand.vmem [shape: bf16[2,16,64], index: 1, kind: input, shape index: {}]   ;;  %s4897_s2 = inlined_call_operand.vmem [shape: bf16[2,16,128], index: 2, kind: input, shape index: {}]   ;;  %s4898_s3 = inlined_call_operand.vmem [shape: bf16[2,16,64], index: 3, kind: input, shape index: {}]   ;;  %s4899_s4 = inlined_call_operand.vmem [shape: bf16[2,16,128], index: 4, kind: input, shape index: {}]   ;;  %s4900_s5 = inlined_call_operand.vmem [shape: bf16[2,16,64], index: 5, kind: input, shape index: {}]   ;;  %s4901_s6 = inlined_call_operand.vmem [shape: bf16[2,16,1024], index: 6, kind: input, shape index: {}]   ;;  %s4902_s7 = inlined_call_operand.vmem [shape: f32[2,1,256], index: 7, kind: input, shape index: {}]   ;;  %s4903_s8 = inlined_call_operand.vmem [shape: bf16[1600,256], index: 8, kind: input, shape index: {}]   ;;  %s4904_s9 = inlined_call_operand.vmem [shape: bf16[256,256], index: 9, kind: input, shape index: {}]   ;;  %s4905_s10 = inlined_call_operand.vmem [shape: f32[1,256], index: 10, kind: input, shape index: {}]   ;;  %s4906_s11 = inlined_call_operand.vmem [shape: bf16[256,128], index: 11, kind: input, shape index: {}]   ;;  %s4907_s12 = inlined_call_operand.vmem [shape: f32[1,128], index: 12, kind: input, shape index: {}]   ;;  %s4908_s13 = inlined_call_operand.vmem [shape: f32[2,16,128], index: 13, kind: output, shape index: {}]  }
   0x1   :  { %s3991_s27 = smov 0  }
   0x2 LB: > { %s35_s28 = sadd.s32 1, %s3910_s26  ;;  %p3141_p0 = scmp.ge.s32.totalorder %s3914_s27, 1  ;;  %s3914_s27 = sphi %s3991_s27, %s23_s27   ;;  %s3910_s26 = sphi %s3989_s26, %s4911_s26   ;;  %s3906_s25 = sphi %s3987_s25, %s4910_s25  }
   0x3   : > { %p37_p1 = scmp.ge.s32.totalorder %s35_s28, 2  ;;  %p520_p2 = scmp.lt.s32.totalorder %s3914_s27, 3 }
   0x5   : > { %s4913_s28 = smov (%p37_p1, %s35_s28), 0  ;;  %p521_p3 = pnand %p3141_p0, %p520_p2 }
   0x6   : > { %v3522_v0 = vld [vmem:[%s4903_s8 + $0x4] ss:$8 sps:$4 sm:$0xff] (!%p521_p3)   ;;  %v3916_v2 = vmov (!%p521_p3), 0   ;;  %p632_p4 = scmp.lt.s32.totalorder (!%p521_p3), %s3906_s25, 1  ;;  %v3526_v3 = vld [vmem:[%s4903_s8] ss:$8 sps:$4 sm:$0xff] (!%p521_p3)  }
   0x7   : > { %524 = sbr.rel (%p521_p3) target bundleno = 912 (0x390), region = 72  ;;  %v3524_v1 = vld [vmem:[%s4903_s8 + $0x84] ss:$8 sps:$4 sm:$0xff] (!%p521_p3)   ;;  %971 = vmatprep.mubr.bf16.mxu0 (!%p521_p3), %v3916_v2  ;;  %854 = vmatprep.mubr.bf16.mxu1 (!%p521_p3), %v3916_v2  ;;  %v3527_v4 = vld [vmem:[%s4903_s8 + $0x80] ss:$8 sps:$4 sm:$0xff] (!%p521_p3)   ;;  %vm935_vm0 = vcmask (!%p521_p3), 523264  }
   0x8   : > { %822 = vmatprep.subr.bf16.mxu1 (!%p521_p3), %v3522_v0  ;;  %939 = vmatprep.subr.bf16.mxu0 (!%p521_p3), %v3524_v1  ;;  %v3528_v5 = vld [vmem:[%s4903_s8 + $0x14] ss:$8 sps:$4 sm:$0xff] (!%p521_p3)   ;;  %v3532_v7 = vld [vmem:[%s4903_s8 + $0x10] ss:$8 sps:$4 sm:$0xff] (!%p521_p3)   ;;  %v3534_v9 = vld [vmem:[%s4903_s8 + $0x24] ss:$8 sps:$4 sm:$0xff] (!%p521_p3)  }
   0x9   : > { %823 = vmatpush1.bf16.msra.mxu1 (!%p521_p3), %v3526_v3  ;;  %940 = vmatpush1.bf16.msra.mxu0 (!%p521_p3), %v3527_v4  ;;  %v3530_v6 = vld [vmem:[%s4903_s8 + $0x94] ss:$8 sps:$4 sm:$0xff] (!%p521_p3)   ;;  %v3533_v8 = vld [vmem:[%s4903_s8 + $0x90] ss:$8 sps:$4 sm:$0xff] (!%p521_p3)   ;;  %v3536_v10 = vld [vmem:[%s4903_s8 + $0xa4] ss:$8 sps:$4 sm:$0xff] (!%p521_p3)  }
   0xa   : > { %824 = vmatprep.subr.bf16.mxu1 (!%p521_p3), %v3528_v5  ;;  %941 = vmatprep.subr.bf16.mxu0 (!%p521_p3), %v3530_v6  ;;  %v3538_v11 = vld [vmem:[%s4903_s8 + $0x20] ss:$8 sps:$4 sm:$0xff] (!%p521_p3)   ;;  %v3540_v13 = vld [vmem:[%s4903_s8 + $0x34] ss:$8 sps:$4 sm:$0xff] (!%p521_p3)   ;;  %v3544_v15 = vld [vmem:[%s4903_s8 + $0x30] ss:$8 sps:$4 sm:$0xff] (!%p521_p3)  }
   0xb   : > { %v3539_v12 = vld [vmem:[%s4903_s8 + $0xa0] ss:$8 sps:$4 sm:$0xff] (!%p521_p3)   ;;  %v3542_v14 = vld [vmem:[%s4903_s8 + $0xb4] ss:$8 sps:$4 sm:$0xff] (!%p521_p3)   ;;  %v3545_v16 = vld [vmem:[%s4903_s8 + $0xb0] ss:$8 sps:$4 sm:$0xff] (!%p521_p3)  }
   0xc   : > { %v3546_v17 = vld [vmem:[%s4903_s8 + $0x44] ss:$8 sps:$4 sm:$0xff] (!%p521_p3)   ;;  %v3548_v20 = vld [vmem:[%s4903_s8 + $0xc0] ss:$8 sps:$4 sm:$0xff] (!%p521_p3)   ;;  %v3553_v22 = vld [vmem:[%s4903_s8 + $0x54] ss:$8 sps:$4 sm:$0xff] (!%p521_p3)  }
   0xd   : > { %825 = vmatpush1.bf16.msra.mxu1 (!%p521_p3), %v3532_v7  ;;  %942 = vmatpush1.bf16.msra.mxu0 (!%p521_p3), %v3533_v8  ;;  %v3550_v18 = vld [vmem:[%s4903_s8 + $0xc4] ss:$8 sps:$4 sm:$0xff] (!%p521_p3)   ;;  %v3551_v21 = vld [vmem:[%s4903_s8 + $0x40] ss:$8 sps:$4 sm:$0xff] (!%p521_p3)   ;;  %v3557_v23 = vld [vmem:[%s4903_s8 + $0xd4] ss:$8 sps:$4 sm:$0xff] (!%p521_p3)  }
   0xe   : > { %s4915_s25 = smov (!%p632_p4, %s3906_s25), 1  ;;  %826 = vmatprep.subr.bf16.mxu1 %v3534_v9  ;;  %943 = vmatprep.subr.bf16.mxu0 %v3536_v10  ;;  %v3555_v24 = vld [vmem:[%s4903_s8 + $0xd0] ss:$8 sps:$4 sm:$0xff]   ;;  %v3559_v26 = vld [vmem:[%s4903_s8 + $0x64] ss:$8 sps:$4 sm:$0xff]  }
   0xf   : > { %s4052_s14 = sshll.u32 %s4915_s25, 3  ;;  %v3558_v25 = vld [vmem:[%s4903_s8 + $0x50] ss:$8 sps:$4 sm:$0xff]   ;;  %v3563_v27 = vld [vmem:[%s4903_s8 + $0xe4] ss:$8 sps:$4 sm:$0xff]   ;;  %s3433_s22 = sshll.u32 %s4915_s25, 6 }
  0x10   : > { %s649_s23 = scalar_lea.vmem %s4896_s1, %s4052_s14  ;;  %v3561_v28 = vld [vmem:[%s4903_s8 + $0xe0] ss:$8 sps:$4 sm:$0xff]   ;;  %v3565_v30 = vld [vmem:[%s4903_s8 + $0x74] ss:$8 sps:$4 sm:$0xff]   ;;  %s639_s30 = scalar_lea.vmem %s4895_s0, %s4052_s14  ;;  %v3567_v32 = vld [vmem:[%s4903_s8 + $0xf0] ss:$8 sps:$4 sm:$0xff]  }
  0x11   : > { %827 = vmatpush1.bf16.msra.mxu1 %v3538_v11  ;;  %944 = vmatpush1.bf16.msra.mxu0 %v3539_v12  ;;  %v3552_v19 = vld [vmem:[%s649_s23] sm:$0xff]   ;;  %v3569_v31 = vld [vmem:[%s4903_s8 + $0xf4] ss:$8 sps:$4 sm:$0xff]   ;;  %v3570_v33 = vld [vmem:[%s4903_s8 + $0x70] ss:$8 sps:$4 sm:$0xff]   ;;  %s659_s29 = scalar_lea.vmem %s4897_s2, %s4052_s14  ;;  %s669_s21 = scalar_lea.vmem %s4898_s3, %s4052_s14 }
  0x12   : > { %828 = vmatprep.subr.bf16.mxu1 %v3540_v13  ;;  %945 = vmatprep.subr.bf16.mxu0 %v3542_v14  ;;  %v3564_v29 = vld [vmem:[%s4903_s8 + $0x60] ss:$8 sps:$4 sm:$0xff]   ;;  %v3573_v34 = vld [vmem:[%s4903_s8 + $0x104] ss:$8 sps:$4 sm:$0xff]   ;;  %v3580_v39 = vld [vmem:[%s4903_s8 + $0x114] ss:$8 sps:$4 sm:$0xff]   ;;  %s4250_s18 = scalar_lea.vmem %s4901_s6, %s3433_s22  ;;  %s689_s17 = scalar_lea.vmem %s4900_s5, %s4052_s14 }
  0x13   : > { %v3576_v35 = vld [vmem:[%s4903_s8 + $0x244] ss:$8 sps:$4 sm:$0xff]   ;;  %v3571_v37 = vld [vmem:[%s4903_s8 + $0x100] ss:$8 sps:$4 sm:$0xff]   ;;  %v3583_v40 = vld [vmem:[%s4903_s8 + $0x254] ss:$8 sps:$4 sm:$0xff]   ;;  %s4909_s22 = scalar_lea.vmem %s4899_s4, %s4052_s14 }
  0x14   : > { %v3577_v36 = vld [vmem:[%s639_s30] sm:$0xff]   ;;  %v3578_v41 = vld [vmem:[%s4903_s8 + $0x110] ss:$8 sps:$4 sm:$0xff]   ;;  %v3592_v47 = vld [vmem:[%s4903_s8 + $0x134] ss:$8 sps:$4 sm:$0xff]  }
  0x15   : > { %829 = vmatpush1.bf16.msra.mxu1 %v3544_v15  ;;  %946 = vmatpush1.bf16.msra.mxu0 %v3545_v16  ;;  %v3574_v38 = vld [vmem:[%s4903_s8 + $0x240] ss:$8 sps:$4 sm:$0xff]   ;;  %v3581_v42 = vld [vmem:[%s4903_s8 + $0x250] ss:$8 sps:$4 sm:$0xff]   ;;  %v3586_v43 = vld [vmem:[%s4903_s8 + $0x124] ss:$8 sps:$4 sm:$0xff]  }
  0x16   : > { %830 = vmatprep.subr.bf16.mxu1 %v3546_v17  ;;  %1090 = vmatprep.subr.bf16.mxu0 %v3550_v18  ;;  %v3589_v44 = vld [vmem:[%s4903_s8 + $0x264] ss:$8 sps:$4 sm:$0xff]   ;;  %v3584_v45 = vld [vmem:[%s4903_s8 + $0x120] ss:$8 sps:$4 sm:$0xff]   ;;  %v3595_v48 = vld [vmem:[%s4903_s8 + $0x274] ss:$8 sps:$4 sm:$0xff]  }
  0x17   : > { %v3587_v46 = vld [vmem:[%s4903_s8 + $0x260] ss:$8 sps:$4 sm:$0xff]   ;;  %v3590_v49 = vld [vmem:[%s4903_s8 + $0x130] ss:$8 sps:$4 sm:$0xff]   ;;  %v3598_v51 = vld [vmem:[%s4903_s8 + $0x144] ss:$8 sps:$4 sm:$0xff]  }
  0x18   : > { %3185 = vmatmul.mubr.msk.bf16.vlgmr.msra.gmra.mrb[0].mxu0 %vm935_vm0, %v3552_v19  ;;  %v3593_v50 = vld [vmem:[%s4903_s8 + $0x270] ss:$8 sps:$4 sm:$0xff]   ;;  %v3601_v52 = vld [vmem:[%s4903_s8 + $0x284] ss:$8 sps:$4 sm:$0xff]   ;;  %v3596_v53 = vld [vmem:[%s4903_s8 + $0x140] ss:$8 sps:$4 sm:$0xff]  }
  0x19   : > { %831 = vmatpush1.bf16.msra.mxu1 %v3551_v21  ;;  %1091 = vmatpush1.bf16.msra.mxu0 %v3548_v20  ;;  %v3599_v54 = vld [vmem:[%s4903_s8 + $0x280] ss:$8 sps:$4 sm:$0xff]   ;;  %v3605_v56 = vld [vmem:[%s4903_s8 + $0x154] ss:$8 sps:$4 sm:$0xff]   ;;  %v3603_v58 = vld [vmem:[%s4903_s8 + $0x150] ss:$8 sps:$4 sm:$0xff]  }
  0x1a   : > { %832 = vmatprep.subr.bf16.mxu1 %v3553_v22  ;;  %1092 = vmatprep.subr.bf16.mxu0 %v3557_v23  ;;  %v3602_v55 = vld [vmem:[%s659_s29] sm:$0xff]   ;;  %v3608_v57 = vld [vmem:[%s4903_s8 + $0x294] ss:$8 sps:$4 sm:$0xff]   ;;  %v3606_v59 = vld [vmem:[%s4903_s8 + $0x290] ss:$8 sps:$4 sm:$0xff]  }
  0x1b   : > { %1122 = vmatprep.mubr.bf16.mxu0 %v3916_v2  ;;  %v3611_v60 = vld [vmem:[%s4903_s8 + $0x164] ss:$8 sps:$4 sm:$0xff]   ;;  %v3609_v62 = vld [vmem:[%s4903_s8 + $0x160] ss:$8 sps:$4 sm:$0xff]   ;;  %v3617_v0 = vld [vmem:[%s4903_s8 + $0x174] ss:$8 sps:$4 sm:$0xff]  }
  0x1c   : > { %v3614_v61 = vld [vmem:[%s4903_s8 + $0x2a4] ss:$8 sps:$4 sm:$0xff]   ;;  %v3612_v63 = vld [vmem:[%s4903_s8 + $0x2a0] ss:$8 sps:$4 sm:$0xff]   ;;  %v3620_v1 = vld [vmem:[%s4903_s8 + $0x2b4] ss:$8 sps:$4 sm:$0xff]  }
  0x1d   : > { %833 = vmatpush1.bf16.msra.mxu1 %v3558_v25  ;;  %1093 = vmatpush1.bf16.msra.mxu0 %v3555_v24  ;;  %v3615_v3 = vld [vmem:[%s4903_s8 + $0x170] ss:$8 sps:$4 sm:$0xff]   ;;  %v3623_v5 = vld [vmem:[%s4903_s8 + $0x184] ss:$8 sps:$4 sm:$0xff]   ;;  %v3621_v7 = vld [vmem:[%s4903_s8 + $0x180] ss:$8 sps:$4 sm:$0xff]  }
  0x1e   : > { %834 = vmatprep.subr.bf16.mxu1 %v3559_v26  ;;  %1094 = vmatprep.subr.bf16.mxu0 %v3563_v27  ;;  %v3618_v4 = vld [vmem:[%s4903_s8 + $0x2b0] ss:$8 sps:$4 sm:$0xff]   ;;  %v3626_v6 = vld [vmem:[%s4903_s8 + $0x2c4] ss:$8 sps:$4 sm:$0xff]   ;;  %v3624_v8 = vld [vmem:[%s4903_s8 + $0x2c0] ss:$8 sps:$4 sm:$0xff]  }
  0x1f   : > { %v3627_v9 = vld [vmem:[%s669_s21] sm:$0xff]   ;;  %v3630_v10 = vld [vmem:[%s4903_s8 + $0x194] ss:$8 sps:$4 sm:$0xff]   ;;  %v3628_v12 = vld [vmem:[%s4903_s8 + $0x190] ss:$8 sps:$4 sm:$0xff]   ;;  %s3156_s21 = sshll.u32 %s4915_s25, 1 }
  0x20   : > { %v3633_v11 = vld [vmem:[%s4903_s8 + $0x2d4] ss:$8 sps:$4 sm:$0xff]   ;;  %v3631_v13 = vld [vmem:[%s4903_s8 + $0x2d0] ss:$8 sps:$4 sm:$0xff]   ;;  %v3636_v14 = vld [vmem:[%s4903_s8 + $0x1a4] ss:$8 sps:$4 sm:$0xff]  }
  0x21   : > { %835 = vmatpush1.bf16.msra.mxu1 %v3564_v29  ;;  %1095 = vmatpush1.bf16.msra.mxu0 %v3561_v28  ;;  %v3639_v15 = vld [vmem:[%s4903_s8 + $0x2e4] ss:$8 sps:$4 sm:$0xff]   ;;  %v3634_v19 = vld [vmem:[%s4903_s8 + $0x1a0] ss:$8 sps:$4 sm:$0xff]   ;;  %v3642_v21 = vld [vmem:[%s4903_s8 + $0x1b4] ss:$8 sps:$4 sm:$0xff]  }
  0x22   : > { %836 = vmatprep.subr.bf16.mxu1 %v3565_v30  ;;  %1096 = vmatprep.subr.bf16.mxu0 %v3569_v31  ;;  %v4266_v16 = vld [vmem:[%s4250_s18] sm:$0xff]  ;;  %v3645_v22 = vld [vmem:[%s4903_s8 + $0x2f4] ss:$8 sps:$4 sm:$0xff]   ;;  %v3640_v23 = vld [vmem:[%s4903_s8 + $0x1b0] ss:$8 sps:$4 sm:$0xff]  }
  0x23   : > { %v4269_v17 = vld [vmem:[%s4250_s18 + $0x20] sm:$0xff]  ;;  %v3643_v24 = vld [vmem:[%s4903_s8 + $0x2f0] ss:$8 sps:$4 sm:$0xff]   ;;  %v3654_v29 = vld [vmem:[%s4903_s8 + $0x1d4] ss:$8 sps:$4 sm:$0xff]  }
  0x24   : > { %v3241_v18 = vcombine.high %v4266_v16, %v4269_v17  ;;  %v3637_v20 = vld [vmem:[%s4903_s8 + $0x2e0] ss:$8 sps:$4 sm:$0xff]   ;;  %v3648_v25 = vld [vmem:[%s4903_s8 + $0x1c4] ss:$8 sps:$4 sm:$0xff]   ;;  %v3657_v30 = vld [vmem:[%s4903_s8 + $0x314] ss:$8 sps:$4 sm:$0xff]  }
  0x25   : > { %837 = vmatpush1.bf16.msra.mxu1 %v3570_v33  ;;  %1097 = vmatpush1.bf16.msra.mxu0 %v3567_v32  ;;  %v3651_v26 = vld [vmem:[%s4903_s8 + $0x304] ss:$8 sps:$4 sm:$0xff]   ;;  %v3646_v27 = vld [vmem:[%s4903_s8 + $0x1c0] ss:$8 sps:$4 sm:$0xff]   ;;  %v3652_v31 = vld [vmem:[%s4903_s8 + $0x1d0] ss:$8 sps:$4 sm:$0xff]  }
  0x26   : > { %1098 = vmatprep.subr.bf16.mxu0 %v3573_v34  ;;  %2314 = vmatprep.subr.bf16.mxu1 %v3576_v35  ;;  %v3649_v28 = vld [vmem:[%s4903_s8 + $0x300] ss:$8 sps:$4 sm:$0xff]   ;;  %v3655_v32 = vld [vmem:[%s4903_s8 + $0x310] ss:$8 sps:$4 sm:$0xff]   ;;  %v3660_v33 = vld [vmem:[%s4903_s8 + $0x1e4] ss:$8 sps:$4 sm:$0xff]  }
  0x27   : > { %v3663_v34 = vld [vmem:[%s4903_s8 + $0x324] ss:$8 sps:$4 sm:$0xff]   ;;  %v3658_v35 = vld [vmem:[%s4903_s8 + $0x1e0] ss:$8 sps:$4 sm:$0xff]  }
  0x28   : > { %855 = vmatmul.mubr.bf16.vlgmr.msra.gmra.mrb[0].mxu1 %v3577_v36  ;;  %v3661_v36 = vld [vmem:[%s4903_s8 + $0x320] ss:$8 sps:$4 sm:$0xff]  }
  0x29   : > { %1099 = vmatpush1.bf16.msra.mxu0 %v3571_v37  ;;  %2315 = vmatpush1.bf16.msra.mxu1 %v3574_v38  ;;  %v3666_v37 = vld [vmem:[%s4903_s8 + $0x1f4] ss:$8 sps:$4 sm:$0xff]  }
  0x2a   : > { %1100 = vmatprep.subr.bf16.mxu0 %v3580_v39  ;;  %2316 = vmatprep.subr.bf16.mxu1 %v3583_v40  ;;  %v3669_v38 = vld [vmem:[%s4903_s8 + $0x334] ss:$8 sps:$4 sm:$0xff]   ;;  %v3664_v39 = vld [vmem:[%s4903_s8 + $0x1f0] ss:$8 sps:$4 sm:$0xff]  }
  0x2b   : > { %2346 = vmatprep.mubr.bf16.mxu1 %v3241_v18  ;;  %v3667_v40 = vld [vmem:[%s4903_s8 + $0x330] ss:$8 sps:$4 sm:$0xff]   ;;  %v3722_v18 = vld [vmem:[%s4903_s8 + $0x3c4] ss:$8 sps:$4 sm:$0xff]  }
  0x2d   : > { %1101 = vmatpush1.bf16.msra.mxu0 %v3578_v41  ;;  %2317 = vmatpush1.bf16.msra.mxu1 %v3581_v42  ;;  %v3672_v41 = vld [vmem:[%s4903_s8 + $0x204] ss:$8 sps:$4 sm:$0xff]  }
  0x2e   : > { %1102 = vmatprep.subr.bf16.mxu0 %v3586_v43  ;;  %2318 = vmatprep.subr.bf16.mxu1 %v3589_v44  ;;  %v3675_v42 = vld [vmem:[%s4903_s8 + $0x344] ss:$8 sps:$4 sm:$0xff]   ;;  %v3670_v43 = vld [vmem:[%s4903_s8 + $0x200] ss:$8 sps:$4 sm:$0xff]   ;;  %v3240_v44 = vcombine.low %v4266_v16, %v4269_v17  ;;  %v3714_v16 = vld [vmem:[%s4903_s8 + $0x3b0] ss:$8 sps:$4 sm:$0xff]  }
  0x2f   : > { %v3717_v17 = vld [vmem:[%s4903_s8 + $0x470] ss:$8 sps:$4 sm:$0xff]  }
  0x31   : > { %1103 = vmatpush1.bf16.msra.mxu0 %v3584_v45  ;;  %2319 = vmatpush1.bf16.msra.mxu1 %v3587_v46  ;;  %v3673_v45 = vld [vmem:[%s4903_s8 + $0x340] ss:$8 sps:$4 sm:$0xff]  }
  0x32   : > { %1104 = vmatprep.subr.bf16.mxu0 %v3592_v47  ;;  %2320 = vmatprep.subr.bf16.mxu1 %v3595_v48  ;;  %v3676_v46 = vld [vmem:[%s4909_s22] sm:$0xff]   ;;  %v3679_v47 = vld [vmem:[%s4903_s8 + $0x214] ss:$8 sps:$4 sm:$0xff]  }
  0x33   : > { %v3682_v48 = vld [vmem:[%s4903_s8 + $0x354] ss:$8 sps:$4 sm:$0xff]  }
  0x35   : > { %1105 = vmatpush1.bf16.msra.mxu0 %v3590_v49  ;;  %2321 = vmatpush1.bf16.msra.mxu1 %v3593_v50  ;;  %v3677_v49 = vld [vmem:[%s4903_s8 + $0x210] ss:$8 sps:$4 sm:$0xff]  }
  0x36   : > { %1195 = vmatprep.subr.bf16.mxu0 %v3598_v51  ;;  %2322 = vmatprep.subr.bf16.mxu1 %v3601_v52  ;;  %v3680_v50 = vld [vmem:[%s4903_s8 + $0x350] ss:$8 sps:$4 sm:$0xff]   ;;  %v3685_v51 = vld [vmem:[%s4903_s8 + $0x224] ss:$8 sps:$4 sm:$0xff]  }
  0x37   : > { %v3688_v52 = vld [vmem:[%s4903_s8 + $0x364] ss:$8 sps:$4 sm:$0xff]  }
  0x38   : > { %1123 = vmatmul.mubr.bf16.vlgmr.msra.gmra.mrb[0].mxu0 %v3602_v55  ;;  %v3691_v55 = vld [vmem:[%s4903_s8 + $0x234] ss:$8 sps:$4 sm:$0xff]  }
  0x39   : > { %1196 = vmatpush1.bf16.msra.mxu0 %v3596_v53  ;;  %2323 = vmatpush1.bf16.msra.mxu1 %v3599_v54  ;;  %v3683_v53 = vld [vmem:[%s4903_s8 + $0x220] ss:$8 sps:$4 sm:$0xff]  }
  0x3a   : > { %1197 = vmatprep.subr.bf16.mxu0 %v3605_v56  ;;  %2324 = vmatprep.subr.bf16.mxu1 %v3608_v57  ;;  %v3686_v54 = vld [vmem:[%s4903_s8 + $0x360] ss:$8 sps:$4 sm:$0xff]   ;;  %v3689_v56 = vld [vmem:[%s4903_s8 + $0x230] ss:$8 sps:$4 sm:$0xff]  }
  0x3b   : > { %1227 = vmatprep.mubr.bf16.mxu0 %v3916_v2  ;;  %v3692_v57 = vld [vmem:[%s4903_s8 + $0x370] ss:$8 sps:$4 sm:$0xff]  }
  0x3d   : > { %1198 = vmatpush1.bf16.msra.mxu0 %v3603_v58  ;;  %2325 = vmatpush1.bf16.msra.mxu1 %v3606_v59  ;;  %v3698_v58 = vld [vmem:[%s4903_s8 + $0x384] ss:$8 sps:$4 sm:$0xff]  }
  0x3e   : > { %1199 = vmatprep.subr.bf16.mxu0 %v3611_v60  ;;  %2326 = vmatprep.subr.bf16.mxu1 %v3614_v61  ;;  %v3701_v59 = vld [vmem:[%s4903_s8 + $0x444] ss:$8 sps:$4 sm:$0xff]   ;;  %v3696_v61 = vld [vmem:[%s4903_s8 + $0x380] ss:$8 sps:$4 sm:$0xff]  }
  0x3f   : > { %v3695_v60 = vld [vmem:[%s689_s17] sm:$0xff]   ;;  %s3434_s17 = sshll.u32 %s4915_s25, 4 }
  0x40   : > { %s714_s29 = scalar_lea.vmem %s4908_s13, %s3434_s17 }
  0x41   : > { %1200 = vmatpush1.bf16.msra.mxu0 %v3609_v62  ;;  %2327 = vmatpush1.bf16.msra.mxu1 %v3612_v63  ;;  %v3699_v62 = vld [vmem:[%s4903_s8 + $0x440] ss:$8 sps:$4 sm:$0xff]   ;;  %v3704_v63 = vld [vmem:[%s4903_s8 + $0x394] ss:$8 sps:$4 sm:$0xff]  }
  0x42   : > { %1201 = vmatprep.subr.bf16.mxu0 %v3617_v0  ;;  %2328 = vmatprep.subr.bf16.mxu1 %v3620_v1  ;;  %v3707_v0 = vld [vmem:[%s4903_s8 + $0x454] ss:$8 sps:$4 sm:$0xff]   ;;  %v4428_v1 = vld [vmem:[%s4250_s18 + $0x8] sm:$0xff] }
  0x45   : > { %1202 = vmatpush1.bf16.msra.mxu0 %v3615_v3  ;;  %2329 = vmatpush1.bf16.msra.mxu1 %v3618_v4  ;;  %v4431_v3 = vld [vmem:[%s4250_s18 + $0x28] sm:$0xff] }
  0x46   : > { %1346 = vmatprep.subr.bf16.mxu0 %v3623_v5  ;;  %2330 = vmatprep.subr.bf16.mxu1 %v3626_v6  ;;  %v3243_v4 = vcombine.high %v4428_v1, %v4431_v3  ;;  %v3702_v5 = vld [vmem:[%s4903_s8 + $0x390] ss:$8 sps:$4 sm:$0xff]  }
  0x47   : > { %v3705_v6 = vld [vmem:[%s4903_s8 + $0x450] ss:$8 sps:$4 sm:$0xff]  }
  0x48   : > { %3212 = vmatmul.mubr.msk.bf16.vlgmr.msra.gmra.mrb[0].mxu0 %vm935_vm0, %v3627_v9  ;;  %v3708_v9 = vld [vmem:[%s4903_s8 + $0x3a0] ss:$8 sps:$4 sm:$0xff]  }
  0x49   : > { %1347 = vmatpush1.bf16.msra.mxu0 %v3621_v7  ;;  %2331 = vmatpush1.bf16.msra.mxu1 %v3624_v8  ;;  %v3710_v7 = vld [vmem:[%s4903_s8 + $0x3a4] ss:$8 sps:$4 sm:$0xff]  }
  0x4a   : > { %1348 = vmatprep.subr.bf16.mxu0 %v3630_v10  ;;  %2332 = vmatprep.subr.bf16.mxu1 %v3633_v11  ;;  %v3713_v8 = vld [vmem:[%s4903_s8 + $0x464] ss:$8 sps:$4 sm:$0xff]   ;;  %v3711_v10 = vld [vmem:[%s4903_s8 + $0x460] ss:$8 sps:$4 sm:$0xff]   ;;  %v4455_v11 = vld [vmem:[%s4250_s18 + $0x10] sm:$0xff] }
  0x4b   : > { %1378 = vmatprep.mubr.bf16.mxu0 %v3916_v2 }
  0x4d   : > { %1349 = vmatpush1.bf16.msra.mxu0 %v3628_v12  ;;  %2333 = vmatpush1.bf16.msra.mxu1 %v3631_v13  ;;  %v4458_v12 = vld [vmem:[%s4250_s18 + $0x30] sm:$0xff] }
  0x4e   : > { %1350 = vmatprep.subr.bf16.mxu0 %v3636_v14  ;;  %2334 = vmatprep.subr.bf16.mxu1 %v3639_v15  ;;  %v3716_v13 = vld [vmem:[%s4903_s8 + $0x3b4] ss:$8 sps:$4 sm:$0xff]   ;;  %v3245_v14 = vcombine.high %v4455_v11, %v4458_v12 }
  0x4f   : > { %v3719_v15 = vld [vmem:[%s4903_s8 + $0x474] ss:$8 sps:$4 sm:$0xff]  }
  0x51   : > { %1351 = vmatpush1.bf16.msra.mxu0 %v3634_v19  ;;  %2335 = vmatpush1.bf16.msra.mxu1 %v3637_v20  ;;  %v3725_v19 = vld [vmem:[%s4903_s8 + $0x484] ss:$8 sps:$4 sm:$0xff]   ;;  %v3720_v20 = vld [vmem:[%s4903_s8 + $0x3c0] ss:$8 sps:$4 sm:$0xff]  }
  0x52   : > { %1352 = vmatprep.subr.bf16.mxu0 %v3642_v21  ;;  %2336 = vmatprep.subr.bf16.mxu1 %v3645_v22  ;;  %v3723_v21 = vld [vmem:[%s4903_s8 + $0x480] ss:$8 sps:$4 sm:$0xff]   ;;  %v3728_v22 = vld [vmem:[%s4903_s8 + $0x3d4] ss:$8 sps:$4 sm:$0xff]  }
  0x55   : > { %1353 = vmatpush1.bf16.msra.mxu0 %v3640_v23  ;;  %2337 = vmatpush1.bf16.msra.mxu1 %v3643_v24  ;;  %v3731_v23 = vld [vmem:[%s4903_s8 + $0x494] ss:$8 sps:$4 sm:$0xff]   ;;  %v3726_v24 = vld [vmem:[%s4903_s8 + $0x3d0] ss:$8 sps:$4 sm:$0xff]  }
  0x56   : > { %1354 = vmatprep.subr.bf16.mxu0 %v3648_v25  ;;  %2338 = vmatprep.subr.bf16.mxu1 %v3651_v26  ;;  %v3729_v25 = vld [vmem:[%s4903_s8 + $0x490] ss:$8 sps:$4 sm:$0xff]   ;;  %v3734_v26 = vld [vmem:[%s4903_s8 + $0x3e4] ss:$8 sps:$4 sm:$0xff]  }
  0x59   : > { %1355 = vmatpush1.bf16.msra.mxu0 %v3646_v27  ;;  %2339 = vmatpush1.bf16.msra.mxu1 %v3649_v28  ;;  %v3737_v27 = vld [vmem:[%s4903_s8 + $0x4a4] ss:$8 sps:$4 sm:$0xff]   ;;  %v3732_v28 = vld [vmem:[%s4903_s8 + $0x3e0] ss:$8 sps:$4 sm:$0xff]  }
  0x5a   : > { %1356 = vmatprep.subr.bf16.mxu0 %v3654_v29  ;;  %2340 = vmatprep.subr.bf16.mxu1 %v3657_v30  ;;  %v3735_v29 = vld [vmem:[%s4903_s8 + $0x4a0] ss:$8 sps:$4 sm:$0xff]   ;;  %v3740_v30 = vld [vmem:[%s4903_s8 + $0x3f4] ss:$8 sps:$4 sm:$0xff]  }
  0x5d   : > { %1357 = vmatpush1.bf16.msra.mxu0 %v3652_v31  ;;  %2341 = vmatpush1.bf16.msra.mxu1 %v3655_v32  ;;  %v3743_v31 = vld [vmem:[%s4903_s8 + $0x4b4] ss:$8 sps:$4 sm:$0xff]   ;;  %v3738_v32 = vld [vmem:[%s4903_s8 + $0x3f0] ss:$8 sps:$4 sm:$0xff]  }
  0x5e   : > { %1358 = vmatprep.subr.bf16.mxu0 %v3660_v33  ;;  %2342 = vmatprep.subr.bf16.mxu1 %v3663_v34  ;;  %v3741_v33 = vld [vmem:[%s4903_s8 + $0x4b0] ss:$8 sps:$4 sm:$0xff]   ;;  %v3746_v34 = vld [vmem:[%s4903_s8 + $0x404] ss:$8 sps:$4 sm:$0xff]  }
  0x61   : > { %1359 = vmatpush1.bf16.msra.mxu0 %v3658_v35  ;;  %2343 = vmatpush1.bf16.msra.mxu1 %v3661_v36  ;;  %v3749_v35 = vld [vmem:[%s4903_s8 + $0x4c4] ss:$8 sps:$4 sm:$0xff]   ;;  %v3744_v36 = vld [vmem:[%s4903_s8 + $0x400] ss:$8 sps:$4 sm:$0xff]  }
  0x62   : > { %1360 = vmatprep.subr.bf16.mxu0 %v3666_v37  ;;  %2344 = vmatprep.subr.bf16.mxu1 %v3669_v38  ;;  %v3747_v37 = vld [vmem:[%s4903_s8 + $0x4c0] ss:$8 sps:$4 sm:$0xff]   ;;  %v3752_v38 = vld [vmem:[%s4903_s8 + $0x414] ss:$8 sps:$4 sm:$0xff]  }
  0x65   : > { %1361 = vmatpush1.bf16.msra.mxu0 %v3664_v39  ;;  %2345 = vmatpush1.bf16.msra.mxu1 %v3667_v40  ;;  %v3755_v39 = vld [vmem:[%s4903_s8 + $0x4d4] ss:$8 sps:$4 sm:$0xff]   ;;  %v3750_v40 = vld [vmem:[%s4903_s8 + $0x410] ss:$8 sps:$4 sm:$0xff]  }
  0x66   : > { %1451 = vmatprep.subr.bf16.mxu0 %v3672_v41  ;;  %2357 = vmatprep.subr.bf16.mxu1 %v3675_v42  ;;  %v3753_v41 = vld [vmem:[%s4903_s8 + $0x4d0] ss:$8 sps:$4 sm:$0xff]   ;;  %v3758_v42 = vld [vmem:[%s4903_s8 + $0x424] ss:$8 sps:$4 sm:$0xff]  }
  0x68   : > { %1379 = vmatmul.mubr.bf16.vlgmr.msra.gmra.mrb[0].mxu0 %v3676_v46  ;;  %2347 = vmatmul.mubr.bf16.vlgmr.msra.gmra.mrb[4].mxu1 %v3240_v44  ;;  %v3756_v44 = vld [vmem:[%s4903_s8 + $0x420] ss:$8 sps:$4 sm:$0xff]   ;;  %v3764_v46 = vld [vmem:[%s4903_s8 + $0x434] ss:$8 sps:$4 sm:$0xff]  }
  0x69   : > { %1452 = vmatpush1.bf16.msra.mxu0 %v3670_v43  ;;  %2358 = vmatpush1.bf16.msra.mxu1 %v3673_v45  ;;  %v3761_v43 = vld [vmem:[%s4903_s8 + $0x4e4] ss:$8 sps:$4 sm:$0xff]   ;;  %v3759_v45 = vld [vmem:[%s4903_s8 + $0x4e0] ss:$8 sps:$4 sm:$0xff]  }
  0x6a   : > { %1453 = vmatprep.subr.bf16.mxu0 %v3679_v47  ;;  %2359 = vmatprep.subr.bf16.mxu1 %v3682_v48  ;;  %v3767_v47 = vld [vmem:[%s4903_s8 + $0x4f4] ss:$8 sps:$4 sm:$0xff]   ;;  %v3762_v48 = vld [vmem:[%s4903_s8 + $0x430] ss:$8 sps:$4 sm:$0xff]  }
  0x6b   : > { %1483 = vmatprep.mubr.bf16.mxu0 %v3916_v2  ;;  %v3694_v2 = vld [vmem:[%s4903_s8 + $0x374] ss:$8 sps:$4 sm:$0xff]   ;;  %2389 = vmatprep.mubr.bf16.mxu1 %v3243_v4  ;;  %v3786_v4 = vld [vmem:[%s4903_s8 + $0x560] ss:$8 sps:$4 sm:$0xff]  }
  0x6d   : > { %1454 = vmatpush1.bf16.msra.mxu0 %v3677_v49  ;;  %2360 = vmatpush1.bf16.msra.mxu1 %v3680_v50  ;;  %v3765_v49 = vld [vmem:[%s4903_s8 + $0x4f0] ss:$8 sps:$4 sm:$0xff]   ;;  %v3770_v50 = vld [vmem:[%s4903_s8 + $0x504] ss:$8 sps:$4 sm:$0xff]  }
  0x6e   : > { %1455 = vmatprep.subr.bf16.mxu0 %v3685_v51  ;;  %2361 = vmatprep.subr.bf16.mxu1 %v3688_v52  ;;  %v3768_v51 = vld [vmem:[%s4903_s8 + $0x500] ss:$8 sps:$4 sm:$0xff]   ;;  %v3242_v52 = vcombine.low %v4428_v1, %v4431_v3  ;;  %v3783_v1 = vld [vmem:[%s4903_s8 + $0x550] ss:$8 sps:$4 sm:$0xff]   ;;  %v3788_v3 = vld [vmem:[%s4903_s8 + $0x564] ss:$8 sps:$4 sm:$0xff]  }
  0x71   : > { %1456 = vmatpush1.bf16.msra.mxu0 %v3683_v53  ;;  %2362 = vmatpush1.bf16.msra.mxu1 %v3686_v54  ;;  %v3773_v53 = vld [vmem:[%s4903_s8 + $0x514] ss:$8 sps:$4 sm:$0xff]   ;;  %v3771_v54 = vld [vmem:[%s4903_s8 + $0x510] ss:$8 sps:$4 sm:$0xff]  }
  0x72   : > { %1457 = vmatprep.subr.bf16.mxu0 %v3691_v55  ;;  %2363 = vmatprep.subr.bf16.mxu1 %v3694_v2  ;;  %v3776_v55 = vld [vmem:[%s4903_s8 + $0x524] ss:$8 sps:$4 sm:$0xff]   ;;  %v3774_v2 = vld [vmem:[%s4903_s8 + $0x520] ss:$8 sps:$4 sm:$0xff]  }
  0x75   : > { %1458 = vmatpush1.bf16.msra.mxu0 %v3689_v56  ;;  %2364 = vmatpush1.bf16.msra.mxu1 %v3692_v57  ;;  %v3779_v56 = vld [vmem:[%s4903_s8 + $0x534] ss:$8 sps:$4 sm:$0xff]   ;;  %v3777_v57 = vld [vmem:[%s4903_s8 + $0x530] ss:$8 sps:$4 sm:$0xff]  }
  0x76   : > { %2365 = vmatprep.subr.bf16.mxu1 %v3698_v58  ;;  %2400 = vmatprep.subr.bf16.mxu0 %v3701_v59  ;;  %v3782_v58 = vld [vmem:[%s4903_s8 + $0x544] ss:$8 sps:$4 sm:$0xff]   ;;  %v4600_v59 = vld [vmem:[%s4250_s18 + $0x18] sm:$0xff] }
  0x78   : > { %3239 = vmatmul.mubr.msk.bf16.vlgmr.msra.gmra.mrb[0].mxu0 %vm935_vm0, %v3695_v60  ;;  %v4603_v60 = vld [vmem:[%s4250_s18 + $0x38] sm:$0xff]  ;;  %s705_s18 = scalar_lea.vmem %s4902_s7, %s3156_s21 }
  0x79   : > { %2366 = vmatpush1.bf16.msra.mxu1 %v3696_v61  ;;  %2401 = vmatpush1.bf16.msra.mxu0 %v3699_v62  ;;  %v3244_v61 = vcombine.low %v4455_v11, %v4458_v12  ;;  %v3780_v62 = vld [vmem:[%s4903_s8 + $0x540] ss:$8 sps:$4 sm:$0xff]   ;;  %v3800_v11 = vld [vmem:[%s4903_s8 + $0x5a4] ss:$8 sps:$4 sm:$0xff]  }
  0x7a   : > { %2367 = vmatprep.subr.bf16.mxu1 %v3704_v63  ;;  %2402 = vmatprep.subr.bf16.mxu0 %v3707_v0  ;;  %v3247_v63 = vcombine.high %v4600_v59, %v4603_v60  ;;  %v3785_v0 = vld [vmem:[%s4903_s8 + $0x554] ss:$8 sps:$4 sm:$0xff]   ;;  %v3798_v12 = vld [vmem:[%s4903_s8 + $0x5a0] ss:$8 sps:$4 sm:$0xff]  }
  0x7b   : > { %2432 = vmatprep.mubr.bf16.mxu0 %v3245_v14  ;;  %v3801_v14 = vld [vmem:[%s4903_s8 + $0x5b0] ss:$8 sps:$4 sm:$0xff]  }
  0x7d   : > { %2368 = vmatpush1.bf16.msra.mxu1 %v3702_v5  ;;  %2403 = vmatpush1.bf16.msra.mxu0 %v3705_v6  ;;  %v3791_v5 = vld [vmem:[%s4903_s8 + $0x574] ss:$8 sps:$4 sm:$0xff]   ;;  %v3789_v6 = vld [vmem:[%s4903_s8 + $0x570] ss:$8 sps:$4 sm:$0xff]  }
  0x7e   : > { %2369 = vmatprep.subr.bf16.mxu1 %v3710_v7  ;;  %2404 = vmatprep.subr.bf16.mxu0 %v3713_v8  ;;  %v3794_v7 = vld [vmem:[%s4903_s8 + $0x584] ss:$8 sps:$4 sm:$0xff]   ;;  %v3792_v8 = vld [vmem:[%s4903_s8 + $0x580] ss:$8 sps:$4 sm:$0xff]  }
  0x81   : > { %2370 = vmatpush1.bf16.msra.mxu1 %v3708_v9  ;;  %2405 = vmatpush1.bf16.msra.mxu0 %v3711_v10  ;;  %v3797_v9 = vld [vmem:[%s4903_s8 + $0x594] ss:$8 sps:$4 sm:$0xff]   ;;  %v3795_v10 = vld [vmem:[%s4903_s8 + $0x590] ss:$8 sps:$4 sm:$0xff]  }
  0x82   : > { %2371 = vmatprep.subr.bf16.mxu1 %v3716_v13  ;;  %2406 = vmatprep.subr.bf16.mxu0 %v3719_v15  ;;  %v3803_v13 = vld [vmem:[%s4903_s8 + $0x5b4] ss:$8 sps:$4 sm:$0xff]   ;;  %v3806_v15 = vld [vmem:[%s4903_s8 + $0x5c4] ss:$8 sps:$4 sm:$0xff]  }
  0x85   : > { %2372 = vmatpush1.bf16.msra.mxu1 %v3714_v16  ;;  %2407 = vmatpush1.bf16.msra.mxu0 %v3717_v17  ;;  %v3804_v16 = vld [vmem:[%s4903_s8 + $0x5c0] ss:$8 sps:$4 sm:$0xff]   ;;  %v3809_v17 = vld [vmem:[%s4903_s8 + $0x5d4] ss:$8 sps:$4 sm:$0xff]  }
  0x86   : > { %2373 = vmatprep.subr.bf16.mxu1 %v3722_v18  ;;  %2408 = vmatprep.subr.bf16.mxu0 %v3725_v19  ;;  %v3807_v18 = vld [vmem:[%s4903_s8 + $0x5d0] ss:$8 sps:$4 sm:$0xff]   ;;  %v3812_v19 = vld [vmem:[%s4903_s8 + $0x5e4] ss:$8 sps:$4 sm:$0xff]  }
  0x89   : > { %2374 = vmatpush1.bf16.msra.mxu1 %v3720_v20  ;;  %2409 = vmatpush1.bf16.msra.mxu0 %v3723_v21  ;;  %v3810_v20 = vld [vmem:[%s4903_s8 + $0x5e0] ss:$8 sps:$4 sm:$0xff]   ;;  %v3815_v21 = vld [vmem:[%s4903_s8 + $0x5f4] ss:$8 sps:$4 sm:$0xff]  }
  0x8a   : > { %2375 = vmatprep.subr.bf16.mxu1 %v3728_v22  ;;  %2410 = vmatprep.subr.bf16.mxu0 %v3731_v23  ;;  %v3813_v22 = vld [vmem:[%s4903_s8 + $0x5f0] ss:$8 sps:$4 sm:$0xff]   ;;  %v3818_v23 = vld [vmem:[%s4903_s8 + $0x604] ss:$8 sps:$4 sm:$0xff]  }
  0x8d   : > { %2376 = vmatpush1.bf16.msra.mxu1 %v3726_v24  ;;  %2411 = vmatpush1.bf16.msra.mxu0 %v3729_v25  ;;  %v3816_v24 = vld [vmem:[%s4903_s8 + $0x600] ss:$8 sps:$4 sm:$0xff]   ;;  %v3821_v25 = vld [vmem:[%s4903_s8 + $0x614] ss:$8 sps:$4 sm:$0xff]  }
  0x8e   : > { %2377 = vmatprep.subr.bf16.mxu1 %v3734_v26  ;;  %2412 = vmatprep.subr.bf16.mxu0 %v3737_v27  ;;  %v3819_v26 = vld [vmem:[%s4903_s8 + $0x610] ss:$8 sps:$4 sm:$0xff]   ;;  %v3824_v27 = vld [vmem:[%s4903_s8 + $0x624] ss:$8 sps:$4 sm:$0xff]  }
  0x91   : > { %2378 = vmatpush1.bf16.msra.mxu1 %v3732_v28  ;;  %2413 = vmatpush1.bf16.msra.mxu0 %v3735_v29  ;;  %v3822_v28 = vld [vmem:[%s4903_s8 + $0x620] ss:$8 sps:$4 sm:$0xff]   ;;  %v3827_v29 = vld [vmem:[%s4903_s8 + $0x634] ss:$8 sps:$4 sm:$0xff]  }
  0x92   : > { %2379 = vmatprep.subr.bf16.mxu1 %v3740_v30  ;;  %2414 = vmatprep.subr.bf16.mxu0 %v3743_v31  ;;  %v3825_v30 = vld [vmem:[%s4903_s8 + $0x630] ss:$8 sps:$4 sm:$0xff]   ;;  %v3246_v31 = vcombine.low %v4600_v59, %v4603_v60  ;;  %v3866_v59 = vld [vmem:[%s4904_s9 + $0xc4] ss:$8 sps:$4 sm:$0xff]   ;;  %v3864_v60 = vld [vmem:[%s4904_s9 + $0xc0] ss:$8 sps:$4 sm:$0xff]  }
  0x95   : > { %2380 = vmatpush1.bf16.msra.mxu1 %v3738_v32  ;;  %2415 = vmatpush1.bf16.msra.mxu0 %v3741_v33 }
  0x96   : > { %2381 = vmatprep.subr.bf16.mxu1 %v3746_v34  ;;  %2416 = vmatprep.subr.bf16.mxu0 %v3749_v35 }
  0x99   : > { %2382 = vmatpush1.bf16.msra.mxu1 %v3744_v36  ;;  %2417 = vmatpush1.bf16.msra.mxu0 %v3747_v37  ;;  %v3828_v36 = vld [vmem:[%s4904_s9] ss:$8 sps:$4 sm:$0xff]   ;;  %v3830_v37 = vld [vmem:[%s4904_s9 + $0x4] ss:$8 sps:$4 sm:$0xff]  }
  0x9a   : > { %2383 = vmatprep.subr.bf16.mxu1 %v3752_v38  ;;  %2418 = vmatprep.subr.bf16.mxu0 %v3755_v39  ;;  %v3833_v38 = vld [vmem:[%s4904_s9 + $0x14] ss:$8 sps:$4 sm:$0xff]   ;;  %v3831_v39 = vld [vmem:[%s4904_s9 + $0x10] ss:$8 sps:$4 sm:$0xff]  }
  0x9d   : > { %2384 = vmatpush1.bf16.msra.mxu1 %v3750_v40  ;;  %2419 = vmatpush1.bf16.msra.mxu0 %v3753_v41  ;;  %v3836_v40 = vld [vmem:[%s4904_s9 + $0x24] ss:$8 sps:$4 sm:$0xff]   ;;  %v3834_v41 = vld [vmem:[%s4904_s9 + $0x20] ss:$8 sps:$4 sm:$0xff]  }
  0x9e   : > { %2385 = vmatprep.subr.bf16.mxu1 %v3758_v42  ;;  %2420 = vmatprep.subr.bf16.mxu0 %v3761_v43  ;;  %v3839_v42 = vld [vmem:[%s4904_s9 + $0x34] ss:$8 sps:$4 sm:$0xff]   ;;  %v3837_v43 = vld [vmem:[%s4904_s9 + $0x30] ss:$8 sps:$4 sm:$0xff]  }
  0xa1   : > { %2386 = vmatpush1.bf16.msra.mxu1 %v3756_v44  ;;  %2421 = vmatpush1.bf16.msra.mxu0 %v3759_v45  ;;  %v3842_v44 = vld [vmem:[%s4904_s9 + $0x44] ss:$8 sps:$4 sm:$0xff]   ;;  %v3840_v45 = vld [vmem:[%s4904_s9 + $0x40] ss:$8 sps:$4 sm:$0xff]  }
  0xa2   : > { %2387 = vmatprep.subr.bf16.mxu1 %v3764_v46  ;;  %2422 = vmatprep.subr.bf16.mxu0 %v3767_v47  ;;  %v3845_v46 = vld [vmem:[%s4904_s9 + $0x54] ss:$8 sps:$4 sm:$0xff]   ;;  %v3843_v47 = vld [vmem:[%s4904_s9 + $0x50] ss:$8 sps:$4 sm:$0xff]  }
  0xa5   : > { %2388 = vmatpush1.bf16.msra.mxu1 %v3762_v48  ;;  %2423 = vmatpush1.bf16.msra.mxu0 %v3765_v49  ;;  %v3848_v48 = vld [vmem:[%s4904_s9 + $0x64] ss:$8 sps:$4 sm:$0xff]   ;;  %v3846_v49 = vld [vmem:[%s4904_s9 + $0x60] ss:$8 sps:$4 sm:$0xff]  }
  0xa6   : > { %2424 = vmatprep.subr.bf16.mxu0 %v3770_v50  ;;  %2700 = vmatprep.subr.bf16.mxu1 %v3830_v37  ;;  %v3851_v50 = vld [vmem:[%s4904_s9 + $0x74] ss:$8 sps:$4 sm:$0xff]  }
  0xa8   : > { %2390 = vmatmul.mubr.bf16.vlgmr.msra.gmra.mrb[4].mxu1 %v3242_v52  ;;  %v3854_v52 = vld [vmem:[%s4904_s9 + $0x84] ss:$8 sps:$4 sm:$0xff]  }
  0xa9   : > { %2425 = vmatpush1.bf16.msra.mxu0 %v3768_v51  ;;  %2701 = vmatpush1.bf16.msra.mxu1 %v3828_v36  ;;  %v3849_v51 = vld [vmem:[%s4904_s9 + $0x70] ss:$8 sps:$4 sm:$0xff]  }
  0xaa   : > { %2426 = vmatprep.subr.bf16.mxu0 %v3773_v53  ;;  %2702 = vmatprep.subr.bf16.mxu1 %v3833_v38  ;;  %v3852_v53 = vld [vmem:[%s4904_s9 + $0x80] ss:$8 sps:$4 sm:$0xff]  }
  0xad   : > { %2427 = vmatpush1.bf16.msra.mxu0 %v3771_v54  ;;  %2703 = vmatpush1.bf16.msra.mxu1 %v3831_v39  ;;  %v3857_v54 = vld [vmem:[%s4904_s9 + $0x94] ss:$8 sps:$4 sm:$0xff]  }
  0xae   : > { %2428 = vmatprep.subr.bf16.mxu0 %v3776_v55  ;;  %2704 = vmatprep.subr.bf16.mxu1 %v3836_v40  ;;  %v3855_v55 = vld [vmem:[%s4904_s9 + $0x90] ss:$8 sps:$4 sm:$0xff]  }
  0xb1   : > { %2429 = vmatpush1.bf16.msra.mxu0 %v3774_v2  ;;  %2705 = vmatpush1.bf16.msra.mxu1 %v3834_v41  ;;  %v3860_v2 = vld [vmem:[%s4904_s9 + $0xa4] ss:$8 sps:$4 sm:$0xff]  }
  0xb2   : > { %2430 = vmatprep.subr.bf16.mxu0 %v3779_v56  ;;  %2706 = vmatprep.subr.bf16.mxu1 %v3839_v42  ;;  %v3858_v56 = vld [vmem:[%s4904_s9 + $0xa0] ss:$8 sps:$4 sm:$0xff]  }
  0xb5   : > { %2431 = vmatpush1.bf16.msra.mxu0 %v3777_v57  ;;  %2707 = vmatpush1.bf16.msra.mxu1 %v3837_v43  ;;  %v3863_v57 = vld [vmem:[%s4904_s9 + $0xb4] ss:$8 sps:$4 sm:$0xff]  }
  0xb6   : > { %2443 = vmatprep.subr.bf16.mxu0 %v3782_v58  ;;  %2708 = vmatprep.subr.bf16.mxu1 %v3842_v44  ;;  %v3861_v58 = vld [vmem:[%s4904_s9 + $0xb0] ss:$8 sps:$4 sm:$0xff]  }
  0xb8   : > { %2433 = vmatmul.mubr.bf16.vlgmr.msra.gmra.mrb[4].mxu0 %v3244_v61  ;;  %v3869_v61 = vld [vmem:[%s4904_s9 + $0xd4] ss:$8 sps:$4 sm:$0xff]  }
  0xb9   : > { %2444 = vmatpush1.bf16.msra.mxu0 %v3780_v62  ;;  %2475 = vmatprep.mubr.bf16.mxu0 %v3247_v63  ;;  %v3867_v62 = vld [vmem:[%s4904_s9 + $0xd0] ss:$8 sps:$4 sm:$0xff]   ;;  %v866_v63 = vlaneseq }
  0xba   : > { %2445 = vmatprep.subr.bf16.mxu0 %v3785_v0  ;;  %2709 = vmatpush1.bf16.msra.mxu1 %v3840_v45 }
  0xbb   : > { %2710 = vmatprep.subr.bf16.mxu1 %v3845_v46  ;;  %v4797_v0 = vshrl.u32 %v866_v63, 7  ;;  %v3877_v46 = vld [vmem:[%s4906_s11] sm:$0xff]  }
  0xbd   : > { %2446 = vmatpush1.bf16.msra.mxu0 %v3783_v1  ;;  %v868_v1 = vsub.s32 0, %v4797_v0 }
  0xbe   : > { %2447 = vmatprep.subr.bf16.mxu0 %v3788_v3  ;;  %2711 = vmatpush1.bf16.msra.mxu1 %v3843_v47  ;;  %v717_v3 = vld [vmem:[%s705_s18] sm:$0x3]  ;;  %v3878_v47 = vld [vmem:[%s4906_s11 + $0x48] sm:$0xff]  }
  0xbf   : > { %2712 = vmatprep.subr.bf16.mxu1 %v3848_v48  ;;  %v3879_v48 = vld [vmem:[%s4906_s11 + $0x8] sm:$0xff]  }
  0xc1   : > { %2448 = vmatpush1.bf16.msra.mxu0 %v3786_v4  ;;  %v872_v4 = vsub.s32 1, %v4797_v0  ;;  %v3408_v0 = vld [vmem:[%s4907_s12] ss:$0 sm:$0xff] }
  0xc2   : > { %2449 = vmatprep.subr.bf16.mxu0 %v3791_v5  ;;  %2713 = vmatpush1.bf16.msra.mxu1 %v3846_v49  ;;  %v869_v5 = vrot.slane %v717_v3, %v868_v1  ;;  %v3880_v49 = vld [vmem:[%s4906_s11 + $0x50] sm:$0xff]  }
  0xc3   : > { %2714 = vmatprep.subr.bf16.mxu1 %v3851_v50  ;;  %v3881_v50 = vld [vmem:[%s4906_s11 + $0x10] sm:$0xff]  }
  0xc5   : > { %2450 = vmatpush1.bf16.msra.mxu0 %v3789_v6  ;;  %v873_v6 = vrot.slane %v717_v3, %v872_v4 }
  0xc6   : > { %2451 = vmatprep.subr.bf16.mxu0 %v3794_v7  ;;  %2715 = vmatpush1.bf16.msra.mxu1 %v3849_v51  ;;  %v3882_v51 = vld [vmem:[%s4906_s11 + $0x58] sm:$0xff]  }
  0xc7   : > { %2716 = vmatprep.subr.bf16.mxu1 %v3854_v52  ;;  %v3883_v52 = vld [vmem:[%s4906_s11 + $0x18] sm:$0xff]  }
  0xc9   : > { %2452 = vmatpush1.bf16.msra.mxu0 %v3792_v8 }
  0xca   : > { %2453 = vmatprep.subr.bf16.mxu0 %v3797_v9  ;;  %2717 = vmatpush1.bf16.msra.mxu1 %v3852_v53  ;;  %v3884_v53 = vld [vmem:[%s4906_s11 + $0x60] sm:$0xff]  }
  0xcb   : > { %2718 = vmatprep.subr.bf16.mxu1 %v3857_v54  ;;  %v3885_v54 = vld [vmem:[%s4906_s11 + $0x20] sm:$0xff]  }
  0xcd   : > { %2454 = vmatpush1.bf16.msra.mxu0 %v3795_v10 }
  0xce   : > { %2455 = vmatprep.subr.bf16.mxu0 %v3800_v11  ;;  %2719 = vmatpush1.bf16.msra.mxu1 %v3855_v55  ;;  %v3886_v55 = vld [vmem:[%s4906_s11 + $0x68] sm:$0xff]  }
  0xcf   : > { %2720 = vmatprep.subr.bf16.mxu1 %v3860_v2  ;;  %v3887_v2 = vld [vmem:[%s4906_s11 + $0x28] sm:$0xff]  }
  0xd1   : > { %2456 = vmatpush1.bf16.msra.mxu0 %v3798_v12 }
  0xd2   : > { %2457 = vmatprep.subr.bf16.mxu0 %v3803_v13  ;;  %2721 = vmatpush1.bf16.msra.mxu1 %v3858_v56  ;;  %v3872_v13 = vld [vmem:[%s4904_s9 + $0xe4] ss:$8 sps:$4 sm:$0xff]   ;;  %v3888_v56 = vld [vmem:[%s4906_s11 + $0x70] sm:$0xff]  }
  0xd3   : > { %2722 = vmatprep.subr.bf16.mxu1 %v3863_v57  ;;  %v3889_v57 = vld [vmem:[%s4906_s11 + $0x30] sm:$0xff]  }
  0xd5   : > { %2458 = vmatpush1.bf16.msra.mxu0 %v3801_v14 }
  0xd6   : > { %2459 = vmatprep.subr.bf16.mxu0 %v3806_v15  ;;  %2723 = vmatpush1.bf16.msra.mxu1 %v3861_v58  ;;  %v3890_v58 = vld [vmem:[%s4906_s11 + $0x78] sm:$0xff]  }
  0xd7   : > { %2724 = vmatprep.subr.bf16.mxu1 %v3866_v59  ;;  %v3891_v59 = vld [vmem:[%s4906_s11 + $0x38] sm:$0xff]  }
  0xd9   : > { %2460 = vmatpush1.bf16.msra.mxu0 %v3804_v16 }
  0xda   : > { %2461 = vmatprep.subr.bf16.mxu0 %v3809_v17  ;;  %2725 = vmatpush1.bf16.msra.mxu1 %v3864_v60  ;;  %v3870_v17 = vld [vmem:[%s4904_s9 + $0xe0] ss:$8 sps:$4 sm:$0xff]  }
  0xdb   : > { %2726 = vmatprep.subr.bf16.mxu1 %v3869_v61  ;;  %v2528_v60 = vld [vmem:[%s4905_s10] sm:$0x3] }
  0xdc   : > { %v2533_v61 = vrot.slane %v2528_v60, %v868_v1 }
  0xdd   : > { %2462 = vmatpush1.bf16.msra.mxu0 %v3807_v18 }
  0xde   : > { %2463 = vmatprep.subr.bf16.mxu0 %v3812_v19  ;;  %2727 = vmatpush1.bf16.msra.mxu1 %v3867_v62  ;;  %v2537_v62 = vrot.slane %v2528_v60, %v872_v4 }
  0xdf   : > { %2728 = vmatprep.subr.bf16.mxu1 %v3872_v13 }
  0xe1   : > { %2464 = vmatpush1.bf16.msra.mxu0 %v3810_v20 }
  0xe2   : > { %2465 = vmatprep.subr.bf16.mxu0 %v3815_v21  ;;  %2729 = vmatpush1.bf16.msra.mxu1 %v3870_v17  ;;  %v3875_v21 = vld [vmem:[%s4904_s9 + $0xf4] ss:$8 sps:$4 sm:$0xff]  }
  0xe3   : > { %2730 = vmatprep.subr.bf16.mxu1 %v3875_v21 }
  0xe5   : > { %2466 = vmatpush1.bf16.msra.mxu0 %v3813_v22  ;;  %v3873_v22 = vld [vmem:[%s4904_s9 + $0xf0] ss:$8 sps:$4 sm:$0xff]  }
  0xe6   : > { %2467 = vmatprep.subr.bf16.mxu0 %v3818_v23  ;;  %2731 = vmatpush1.bf16.msra.mxu1 %v3873_v22  ;;  %v3876_v23 = vld [vmem:[%s4906_s11 + $0x40] sm:$0xff]  }
  0xe7   : > { %3435 = vmatprep.subr.bf16.mxu1 %v3876_v23 }
  0xe9   : > { %2468 = vmatpush1.bf16.msra.mxu0 %v3816_v24 }
  0xea   : > { %2469 = vmatprep.subr.bf16.mxu0 %v3821_v25 }
  0xed   : > { %2470 = vmatpush1.bf16.msra.mxu0 %v3819_v26 }
  0xee   : > { %2471 = vmatprep.subr.bf16.mxu0 %v3824_v27 }
  0xf1   : > { %2472 = vmatpush1.bf16.msra.mxu0 %v3822_v28 }
  0xf2   : > { %2473 = vmatprep.subr.bf16.mxu0 %v3827_v29 }
  0xf5   : > { %2474 = vmatpush1.bf16.msra.mxu0 %v3825_v30 }
  0xf8   : > { %2476 = vmatmul.mubr.bf16.vlgmr.msra.gmra.mrb[4].mxu0 %v3246_v31 }
  0xfb   : > { %v4704_v32 = vpop.f32.mrb[0].mxu1 }
  0xfc   : > { %v4706_v33 = vpop.f32.mrb[1].mxu1  ;;  %v876_v7 = vadd.f32 %v869_v5, %v4704_v32 }
  0xfd   : > { %v4708_v34 = vpop.f32.mrb[2].mxu1  ;;  %v877_v8 = vadd.f32 %v873_v6, %v4706_v33 }
  0xfe   : > { %v4710_v35 = vpop.f32.mrb[3].mxu1  ;;  %v878_v9 = vadd.f32 %v869_v5, %v4708_v34 }
  0xff   : > { %v879_v14 = vadd.f32 %v873_v6, %v4710_v35 }
 0x14b   : > { %v1485_v10 = vpop.f32.mrb[0].mxu0 }
 0x14c   : > { %v3458_v11 = vadd.f32 %v1485_v10, %v876_v7  ;;  %v1487_v12 = vpop.f32.mrb[1].mxu0 }
 0x14d   : > { %v3462_v15 = vadd.f32 %v1487_v12, %v877_v8  ;;  %v1489_v16 = vpop.f32.mrb[2].mxu0 }
 0x14e   : > { %v3466_v18 = vadd.f32 %v1489_v16, %v878_v9  ;;  %v1491_v19 = vpop.f32.mrb[3].mxu0 }
 0x14f   : > { %v3470_v20 = vadd.f32 %v1491_v19, %v879_v14 }
 0x17b   : > { %v2391_v24 = vpop.f32.mrb[4].mxu1 }
 0x17c   : > { %v3459_v25 = vadd.f32 %v3458_v11, %v2391_v24  ;;  %v2393_v26 = vpop.f32.mrb[5].mxu1 }
 0x17d   : > { %v3463_v27 = vadd.f32 %v3462_v15, %v2393_v26  ;;  %v2395_v28 = vpop.f32.mrb[6].mxu1 }
 0x17e   : > { %v3467_v29 = vadd.f32 %v3466_v18, %v2395_v28  ;;  %v2397_v30 = vpop.f32.mrb[7].mxu1 }
 0x17f   : > { %v3471_v31 = vadd.f32 %v3470_v20, %v2397_v30 }
 0x1cb   : > { %v2477_v32 = vpop.f32.mrb[4].mxu0 }
 0x1cc   : > { %v3460_v33 = vadd.f32 %v3459_v25, %v2477_v32  ;;  %v2479_v34 = vpop.f32.mrb[5].mxu0 }
 0x1cd   : > { %v3464_v35 = vadd.f32 %v3463_v27, %v2479_v34  ;;  %v2481_v36 = vpop.f32.mrb[6].mxu0 }
 0x1ce   : > { %v3468_v37 = vadd.f32 %v3467_v29, %v2481_v36  ;;  %v2483_v38 = vpop.f32.mrb[7].mxu0  ;;  %v2490_v40 = vmax.f32 %v3460_v33, 0.0 }
 0x1cf   : > { %v3472_v39 = vadd.f32 %v3471_v31, %v2483_v38  ;;  %v2491_v42 = vmax.f32 %v3464_v35, 0.0 }
 0x1d0   : > { %v2492_v41 = vmax.f32 %v3468_v37, 0.0 }
 0x1d1   : > { %v2493_v43 = vmax.f32 %v3472_v39, 0.0 }
 0x1d2   : > { %v2494_v44 = vpack.c.bf16 %v2492_v41, %v2490_v40 }
 0x1d3   : > { %v2495_v45 = vpack.c.bf16 %v2493_v43, %v2491_v42 }
 0x1d5   : > { %2732 = vmatprep.mubr.bf16.mxu1 %v2495_v45 }
 0x1d6   : > { %2733 = vmatmul.mubr.bf16.vlgmr.msra.gmra.mrb[8].mxu1 %v2494_v44 }
 0x1d7   : > { %3436 = vmatpush3.bf16.msra.mxu1 %v3877_v46 }
 0x1d8   : > { %3437 = vmatprep.subr.bf16.mxu1 %v3878_v47 }
 0x1db   : > { %3438 = vmatpush3.bf16.msra.mxu1 %v3879_v48 }
 0x1dc   : > { %3439 = vmatprep.subr.bf16.mxu1 %v3880_v49 }
 0x1df   : > { %3440 = vmatpush3.bf16.msra.mxu1 %v3881_v50 }
 0x1e0   : > { %3441 = vmatprep.subr.bf16.mxu1 %v3882_v51 }
 0x1e3   : > { %3442 = vmatpush3.bf16.msra.mxu1 %v3883_v52 }
 0x1e4   : > { %3443 = vmatprep.subr.bf16.mxu1 %v3884_v53 }
 0x1e7   : > { %3444 = vmatpush3.bf16.msra.mxu1 %v3885_v54 }
 0x1e8   : > { %3445 = vmatprep.subr.bf16.mxu1 %v3886_v55 }
 0x1eb   : > { %3446 = vmatpush3.bf16.msra.mxu1 %v3887_v2 }
 0x1ec   : > { %3447 = vmatprep.subr.bf16.mxu1 %v3888_v56 }
 0x1ef   : > { %3448 = vmatpush3.bf16.msra.mxu1 %v3889_v57 }
 0x1f0   : > { %3449 = vmatprep.subr.bf16.mxu1 %v3890_v58 }
 0x1f3   : > { %3450 = vmatpush3.bf16.msra.mxu1 %v3891_v59 }
 0x2a9   : > { %v2734_v63 = vpop.f32.mrb[8].mxu1 }
 0x2aa   : > { %v2735_v3 = vadd.f32 %v2734_v63, %v2533_v61  ;;  %v2736_v5 = vpop.f32.mrb[9].mxu1 }
 0x2ab   : > { %v2737_v6 = vadd.f32 %v2736_v5, %v2537_v62  ;;  %v2738_v7 = vpop.f32.mrb[10].mxu1 }
 0x2ac   : > { %v2739_v8 = vadd.f32 %v2738_v7, %v2533_v61  ;;  %v2740_v9 = vpop.f32.mrb[11].mxu1  ;;  %v2743_v11 = vmax.f32 %v2735_v3, 0.0 }
 0x2ad   : > { %v2741_v10 = vadd.f32 %v2740_v9, %v2537_v62  ;;  %v2744_v13 = vmax.f32 %v2737_v6, 0.0 }
 0x2ae   : > { %v2745_v12 = vmax.f32 %v2739_v8, 0.0 }
 0x2af   : > { %v2746_v14 = vmax.f32 %v2741_v10, 0.0 }
 0x2b0   : > { %v2747_v15 = vpack.c.bf16 %v2745_v12, %v2743_v11 }
 0x2b1   : > { %v2748_v16 = vpack.c.bf16 %v2746_v14, %v2744_v13 }
 0x2b3   : > { %2916 = vmatprep.mubr.bf16.mxu1 %v2748_v16 }
 0x2b4   : > { %2917 = vmatmul.mubr.bf16.vlgmr.msra.gmra.mrb[12].mxu1 %v2747_v15 }
 0x387   : > { %v3451_v1 = vpop.f32.mrb[12].mxu1 }
 0x388   : > { %v3452_v4 = vpop.f32.mrb[13].mxu1 }
 0x389   : > { %v3453_v17 = vadd.f32 %v3452_v4, %v3451_v1  ;;  %v3454_v18 = vpop.f32.mrb[14].mxu1 }
 0x38a   : > { %v3455_v19 = vpop.f32.mrb[15].mxu1 }
 0x38b   : > { %v2919_v20 = vadd.f32 %v3453_v17, %v3408_v0  ;;  %v3456_v21 = vadd.f32 %v3455_v19, %v3454_v18 }
 0x38d   : > { %2925 = vst [vmem:[%s714_s29] sm:$0xff] %v2919_v20  ;;  %v2922_v22 = vadd.f32 %v3456_v21, %v3408_v0 }
 0x38f   : > { %2926 = vst [vmem:[%s714_s29 + $0x8] sm:$0xff] %v2922_v22 }
 0x390 PF: > { %s23_s27 = sadd.s32 1, %s3914_s27   ;;  %s4910_s25 = smov %s3910_s26 }
 0x391   : > { %p20_p5 = scmp.ge.s32.totalorder %s23_s27, 4   ;;  %s4911_s26 = smov %s4913_s28 }
 0x393   :  { %22 = sbr.rel (!%p20_p5) target bundleno = 2 (0x2), region = 123 }

</bundles_post_ra>
